<compile_context>
chip_gen: v7x
topology: tpu7x:2x2x1
jax: 0.10.0
libtpu: 0.0.40
codegen_flags: <defaults>
</compile_context>

<pallas_src>
import functools
import math

import jax
import jax.numpy as jnp
from jax.experimental import pallas as pl
from jax.experimental.pallas import tpu as pltpu

_HALO_PROWS = 4  # halo size of the 3x3 kernel, in plane-rows (multiple of 4)


def _round_up(x, m):
    return (x + m - 1) // m * m


def _vmem_limit_bytes():
    """3/4 of physical VMEM (v5e/v6e: 96 MiB, v7x: 48 MiB), with a fallback."""
    try:
        cap = int(pltpu.get_tpu_info().vmem_capacity_bytes)
        return min(cap * 3 // 4, 100 * 1024 * 1024)
    except Exception:
        return 48 * 1024 * 1024


_VMEM_LIMIT = _vmem_limit_bytes()


# ---------------------------------------------------------------------------
# Pallas kernels
# ---------------------------------------------------------------------------

def _matmul_bias_act_kernel(x_ref, w_ref, b_ref, o_ref, *, act):
    """Fused 1x1 Conv + folded BN (+ SiLU): (TM,Cin)@(Cin,Cout) + bias."""
    y = jnp.dot(x_ref[...], w_ref[...], preferred_element_type=jnp.float32)
    y = y + b_ref[...]
    if act == "silu":
        y = y * jax.nn.sigmoid(y)
    o_ref[...] = y.astype(o_ref.dtype)


def _matmul_bias_add_relu_kernel(x_ref, w_ref, b_ref, r_ref, o_ref):
    """Fused cv3 + residual + ReLU: relu((TM,Cin)@(Cin,Cout) + bias + res)."""
    y = jnp.dot(x_ref[...], w_ref[...], preferred_element_type=jnp.float32)
    y = y + b_ref[...] + r_ref[...].astype(jnp.float32)
    o_ref[...] = jnp.maximum(y, 0.0).astype(o_ref.dtype)


def _conv3x3_kernel(xc_ref, xh_ref, w_ref, b_ref, o_ref, win_ref,
                    *, taps, tm, halo):
    """Row-tiled 3x3 conv (+ folded BN + SiLU) over phase planes.

    xc_ref : (1, P, tm, Cin)   current tile of flattened plane rows
    xh_ref : (1, P, halo, Cin) halo rows immediately following the tile
    w_ref  : (9, Cin, Cout)    per-tap weights (BN-folded)
    b_ref  : (1, Cout) f32
    o_ref  : (1, tm, Cout)     lane-dense output tile
    win_ref: (P, tm+halo, Cin) VMEM scratch (tile ++ halo working window)
    taps   : static tuple of (plane_index, flattened_offset) per 3x3 tap
    """
    # Assemble the contiguous working window (one small VMEM copy per tile).
    win_ref[:, pl.ds(0, tm), :] = xc_ref[0]
    win_ref[:, pl.ds(tm, halo), :] = xh_ref[0]

    acc = None
    for t, (p, off) in enumerate(taps):
        patch = win_ref[p, pl.ds(off, tm), :]           # (tm, Cin), native dtype
        c = jnp.dot(patch, w_ref[t], preferred_element_type=jnp.float32)
        acc = c if acc is None else acc + c
    y = acc + b_ref[...]
    y = y * jax.nn.sigmoid(y)                           # SiLU
    o_ref[0] = y.astype(o_ref.dtype)


# ---------------------------------------------------------------------------
# pallas_call wrappers
# ---------------------------------------------------------------------------

def _conv1x1_bn_act(x, w_mat, bias, act=None, residual=None, tile_m=512):
    """Fused 1x1 conv + folded BN + activation on NHWC input.

    If `residual` is given, computes relu(conv(x) + bias + residual) instead
    (the ResNetBlock epilogue). No wrapper-side padding: ragged tail tiles are
    handled by Pallas block masking."""
    B, H, W, Cin = x.shape
    Cout = w_mat.shape[1]
    M = B * H * W
    tm = min(tile_m, _round_up(M, 8))

    x2 = x.reshape(M, Cin)                              # free reshape (NHWC)
    b2 = bias.reshape(1, Cout).astype(jnp.float32)
    w2 = w_mat.astype(x.dtype)                          # native-dtype MXU feed

    inputs = [x2, w2, b2]
    in_specs = [
        pl.BlockSpec((tm, Cin), lambda i: (i, 0)),
        pl.BlockSpec((Cin, Cout), lambda i: (0, 0)),
        pl.BlockSpec((1, Cout), lambda i: (0, 0)),
    ]
    if residual is None:
        kernel = functools.partial(_matmul_bias_act_kernel, act=act)
    else:
        inputs.append(residual.reshape(M, Cout))
        in_specs.append(pl.BlockSpec((tm, Cout), lambda i: (i, 0)))
        kernel = _matmul_bias_add_relu_kernel

    out = pl.pallas_call(
        kernel,
        out_shape=jax.ShapeDtypeStruct((M, Cout), x.dtype),
        grid=(pl.cdiv(M, tm),),
        in_specs=in_specs,
        out_specs=pl.BlockSpec((tm, Cout), lambda i: (i, 0)),
        compiler_params=pltpu.CompilerParams(
            dimension_semantics=("parallel",),
            vmem_limit_bytes=_VMEM_LIMIT),
    )(*inputs)
    return out.reshape(B, H, W, Cout)


def _conv3x3_bn_silu(x, w9, bias, stride=1, target_rows=512):
    """Fused 3x3 conv (pad=1, stride in {1,2}) + folded BN + SiLU on NHWC.

    The padded input is split into s*s phase planes (for s=1 this is just the
    pad) so the strided conv becomes 9 stride-1 taps at static flattened
    offsets; only the needed outputs are ever computed. Row-tiled over
    grid=(B, row_tiles) with a 4-plane-row halo supplied by a second BlockSpec.
    """
    B, H, W, Cin = x.shape
    Cout = w9.shape[-1]
    s = stride
    assert s in (1, 2), "ResNet uses stride 1 or 2"

    Ho = (H - 1) // s + 1
    Wo = (W - 1) // s + 1
    # Plane geometry: plane[a,b][r,c] = padded[s*r+a, s*c+b].
    wq_raw = (s * (Wo - 1) + 3 + s - 1) // s
    Wq = _round_up(wq_raw, 8)                 # lane pitch, multiple of 8
    tr = max(4, (target_rows // Wq) // 4 * 4) # output plane-rows per tile
    tr = min(tr, _round_up(Ho, 4))
    rt = (Ho + tr - 1) // tr                  # number of row tiles
    Hq = rt * tr + _HALO_PROWS                # plane rows (incl. halo padding)
    Hp, Wp = s * Hq, s * Wq
    P = s * s

    # Single wrapper-side pad + phase split (for s=1 this is just the pad).
    xp = jnp.pad(x, ((0, 0), (1, Hp - 1 - H), (1, Wp - 1 - W), (0, 0)))
    xp = xp.reshape(B, Hq, s, Wq, s, Cin)
    xp = jnp.transpose(xp, (0, 2, 4, 1, 3, 5))          # (B, s, s, Hq, Wq, Cin)
    xflat = xp.reshape(B, P, Hq * Wq, Cin)

    # Static (plane, flattened-offset) per 3x3 tap; tap order matches w9.
    taps = tuple(((dy % s) * s + (dx % s), (dy // s) * Wq + (dx // s))
                 for dy in range(3) for dx in range(3))

    tm = tr * Wq
    halo = _HALO_PROWS * Wq
    b2 = bias.reshape(1, Cout).astype(jnp.float32)
    w9 = w9.astype(x.dtype)                             # native-dtype MXU feed

    kernel = functools.partial(_conv3x3_kernel, taps=taps, tm=tm, halo=halo)
    out = pl.pallas_call(
        kernel,
        out_shape=jax.ShapeDtypeStruct((B, rt * tm, Cout), x.dtype),
        grid=(B, rt),
        in_specs=[
            pl.BlockSpec((1, P, tm, Cin), lambda b, r: (b, 0, r, 0)),
            pl.BlockSpec((1, P, halo, Cin),
                         lambda b, r: (b, 0, (r + 1) * (tr // _HALO_PROWS), 0)),
            pl.BlockSpec((9, Cin, Cout), lambda b, r: (0, 0, 0)),
            pl.BlockSpec((1, Cout), lambda b, r: (0, 0)),
        ],
        out_specs=pl.BlockSpec((1, tm, Cout), lambda b, r: (b, r, 0)),
        scratch_shapes=[pltpu.VMEM((P, tm + halo, Cin), x.dtype)],
        compiler_params=pltpu.CompilerParams(
            dimension_semantics=("parallel", "parallel"),
            vmem_limit_bytes=_VMEM_LIMIT),
    )(xflat, xflat, w9, b2)

    return out.reshape(B, rt * tr, Wq, Cout)[:, :Ho, :Wo, :]


# ---------------------------------------------------------------------------
# Parameter construction / BN folding / model forward
# ---------------------------------------------------------------------------

def _init_conv(key, cin, cout, k):
    w = jax.random.normal(key, (cout, cin, k, k), jnp.float32) / math.sqrt(cin * k * k)
    bn = dict(gamma=jnp.ones((cout,), jnp.float32),
              beta=jnp.zeros((cout,), jnp.float32),
              mean=jnp.zeros((cout,), jnp.float32),
              var=jnp.ones((cout,), jnp.float32),
              eps=1e-5)
    return dict(w=w, bn=bn)


def _init_resnet_block(key, c1, c2, s, e):
    c3 = e * c2
    ks = jax.random.split(key, 4)
    p = dict(cv1=_init_conv(ks[0], c1, c2, 1),
             cv2=_init_conv(ks[1], c2, c2, 3),
             cv3=_init_conv(ks[2], c2, c3, 1),
             s=s)
    if s != 1 or c1 != c3:
        p["shortcut"] = _init_conv(ks[3], c1, c3, 1)
    return p


def init_resnet_layer(key, c1, c2, s=1, is_first=False, n=1, e=4):
    # TODO(synk): is_first stem (7x7/s2 Conv+BN+SiLU followed by MaxPool2d
    # 3x3/s2) is not implemented as a Pallas kernel; default path is covered.
    assert not is_first
    keys = jax.random.split(key, n)
    blocks = [_init_resnet_block(keys[0], c1, c2, s, e)]
    for i in range(1, n):
        blocks.append(_init_resnet_block(keys[i], e * c2, c2, 1, e))
    return dict(blocks=blocks)


def _bn_scale_bias(bn):
    scale = bn["gamma"] / jnp.sqrt(bn["var"] + bn["eps"])
    return scale, bn["beta"] - bn["mean"] * scale


def _fold_1x1(p):
    scale, bias = _bn_scale_bias(p["bn"])
    w = p["w"][:, :, 0, 0]                     # (Cout, Cin)
    return (w * scale[:, None]).T, bias        # (Cin, Cout), (Cout,)


def _fold_3x3(p):
    scale, bias = _bn_scale_bias(p["bn"])
    w = p["w"] * scale[:, None, None, None]    # (Cout, Cin, 3, 3)
    cout, cin = w.shape[0], w.shape[1]
    w9 = jnp.transpose(w, (2, 3, 1, 0)).reshape(9, cin, cout)
    return w9, bias


def _resnet_block_apply(x, p):
    s = p["s"]
    w1, b1 = _fold_1x1(p["cv1"])
    y = _conv1x1_bn_act(x, w1, b1, act="silu")
    w2, b2 = _fold_3x3(p["cv2"])
    y = _conv3x3_bn_silu(y, w2, b2, stride=s)
    if "shortcut" in p:
        xs = x[:, ::s, ::s, :] if s > 1 else x   # 1x1/s == subsample then 1x1
        wsc, bsc = _fold_1x1(p["shortcut"])
        sc = _conv1x1_bn_act(xs, wsc, bsc, act=None)
    else:
        sc = x
    w3, b3 = _fold_1x1(p["cv3"])
    return _conv1x1_bn_act(y, w3, b3, residual=sc)   # fused +shortcut, ReLU


def resnet_layer_forward(x_nchw, params, compute_dtype=None):
    """x: [B, C1, H, W] -> [B, e*C2, H/s, W/s] (is_first=False path)."""
    dt = compute_dtype if compute_dtype is not None else x_nchw.dtype
    x = jnp.transpose(x_nchw, (0, 2, 3, 1)).astype(dt)   # NCHW -> NHWC (glue)
    for blk in params["blocks"]:
        x = _resnet_block_apply(x, blk)
    return jnp.transpose(x, (0, 3, 1, 2)).astype(x_nchw.dtype)


# ---------------------------------------------------------------------------
# Pure-JAX reference (mirrors the PyTorch module: Conv2d -> BN -> act)
# ---------------------------------------------------------------------------

def _conv_bn_ref(x, p, k, s, act):
    pad = (k - 1) // 2
    w = jnp.transpose(p["w"], (2, 3, 1, 0))          # HWIO
    y = jax.lax.conv_general_dilated(
        x, w, window_strides=(s, s), padding=[(pad, pad), (pad, pad)],
        dimension_numbers=("NHWC", "HWIO", "NHWC"))
    bn = p["bn"]
    y = (y - bn["mean"]) / jnp.sqrt(bn["var"] + bn["eps"]) * bn["gamma"] + bn["beta"]
    if act:
        y = y * jax.nn.sigmoid(y)
    return y


def _resnet_block_ref(x, p):
    s = p["s"]
    y = _conv_bn_ref(x, p["cv1"], 1, 1, True)
    y = _conv_bn_ref(y, p["cv2"], 3, s, True)
    y = _conv_bn_ref(y, p["cv3"], 1, 1, False)
    sc = _conv_bn_ref(x, p["shortcut"], 1, s, False) if "shortcut" in p else x
    return jnp.maximum(y + sc, 0.0)


def _resnet_layer_ref(x_nchw, params):
    x = jnp.transpose(x_nchw, (0, 2, 3, 1))
    for blk in params["blocks"]:
        x = _resnet_block_ref(x, blk)
    return jnp.transpose(x, (0, 3, 1, 2))


# ---------------------------------------------------------------------------

if __name__ == "__main__":
    key = jax.random.PRNGKey(0)
    kx, kp1, kp2 = jax.random.split(key, 3)

    B, C1, H, W = 2, 4, 16, 16
    C2, N, E = 8, 2, 2                                  # c3 = E*C2 = 16

    x = jax.random.normal(kx, (B, C1, H, W), dtype=jnp.float32)

    # --- stride-1 layer (n=2 blocks), f32 compute -------------------------
    params1 = init_resnet_layer(kp1, C1, C2, s=1, is_first=False, n=N, e=E)
    fwd1 = jax.jit(lambda xx: resnet_layer_forward(xx, params1))
    out1 = fwd1(x)
    jax.block_until_ready(out1)
    ref1 = _resnet_layer_ref(x, params1)
    assert out1.shape == (B, E * C2, H, W), out1.shape
    assert jnp.allclose(out1, ref1, atol=1e-3, rtol=1e-3), \
        float(jnp.max(jnp.abs(out1 - ref1)))

    # --- stride-2 first block (downsampling path, phase-plane kernel) -----
    params2 = init_resnet_layer(kp2, C1, C2, s=2, is_first=False, n=N, e=E)
    fwd2 = jax.jit(lambda xx: resnet_layer_forward(xx, params2))
    out2 = fwd2(x)
    jax.block_until_ready(out2)
    ref2 = _resnet_layer_ref(x, params2)
    assert out2.shape == (B, E * C2, H // 2, W // 2), out2.shape
    assert jnp.allclose(out2, ref2, atol=1e-3, rtol=1e-3), \
        float(jnp.max(jnp.abs(out2 - ref2)))

    # --- bf16 activation/weight path (narrow-dtype MXU feed) --------------
    fwd_bf16 = jax.jit(
        lambda xx: resnet_layer_forward(xx, params1, compute_dtype=jnp.bfloat16))
    out_bf16 = fwd_bf16(x)
    jax.block_until_ready(out_bf16)
    assert out_bf16.shape == out1.shape
    assert jnp.allclose(out_bf16.astype(jnp.float32), ref1, atol=0.25, rtol=0.1), \
        float(jnp.max(jnp.abs(out_bf16.astype(jnp.float32) - ref1)))

    print("KERNEL_OK")
</pallas_src>

<mosaic_0001>
module attributes {stable_mosaic.version = 11 : i64} {
  func.func @_matmul_bias_act_kernel(%arg0: i32, %arg1: memref<512x4xf32, #tpu.memory_space<vmem>>, %arg2: memref<4x16xf32, #tpu.memory_space<vmem>>, %arg3: memref<1x16xf32, #tpu.memory_space<vmem>>, %arg4: memref<512x16xf32, #tpu.memory_space<vmem>>) attributes {dimension_semantics = [#tpu.dimension_semantics<parallel>], iteration_bounds = array<i64: 1>, scalar_prefetch = 0 : i64, scratch_operands = 0 : i64, tpu.core_type = #tpu.core_type<tc>, window_params = [{transform_indices = @transform_0, window_bounds = array<i64: 512, 4>}, {pipeline_mode = #tpu.pipeline_mode<synchronous>, transform_indices = @transform_1, window_bounds = array<i64: 4, 16>}, {pipeline_mode = #tpu.pipeline_mode<synchronous>, transform_indices = @transform_2, window_bounds = array<i64: 1, 16>}, {transform_indices = @transform_3, window_bounds = array<i64: 512, 16>}]} {
    %c0 = arith.constant 0 : index
    %c0_0 = arith.constant 0 : index
    %0 = vector.load %arg1[%c0, %c0_0] : memref<512x4xf32, #tpu.memory_space<vmem>>, vector<512x4xf32>
    %c0_1 = arith.constant 0 : index
    %c0_2 = arith.constant 0 : index
    %1 = vector.load %arg2[%c0_1, %c0_2] : memref<4x16xf32, #tpu.memory_space<vmem>>, vector<4x16xf32>
    %cst = arith.constant dense<0.000000e+00> : vector<512x16xf32>
    %2 = tpu.matmul %0, %1, %cst {dimension_numbers = #tpu.dot_dimension_numbers<[1], [0], [0], [1], [0, 0, 1, 1], [], []>} : vector<512x4xf32>, vector<4x16xf32>, vector<512x16xf32> -> vector<512x16xf32>
    %c0_3 = arith.constant 0 : index
    %c0_4 = arith.constant 0 : index
    %3 = vector.load %arg3[%c0_3, %c0_4] : memref<1x16xf32, #tpu.memory_space<vmem>>, vector<1x16xf32>
    %4 = vector.broadcast %3 : vector<1x16xf32> to vector<512x16xf32>
    %5 = arith.addf %2, %4 : vector<512x16xf32>
    %c0_5 = arith.constant 0 : index
    %c0_6 = arith.constant 0 : index
    %6 = vector.load %arg4[%c0_5, %c0_6] : memref<512x16xf32, #tpu.memory_space<vmem>>, vector<512x16xf32>
    tpu.vector_store %arg4[%c0_5, %c0_6], %5 {strides = array<i32>} : memref<512x16xf32, #tpu.memory_space<vmem>>, vector<512x16xf32>,
    return
  }
  func.func @transform_0(%arg0: i32) -> (i32, i32) {
    %c0_i32 = arith.constant 0 : i32
    %c0_i32_0 = arith.constant 0 : i32
    return %arg0, %c0_i32 : i32, i32
  }
  func.func @transform_1(%arg0: i32) -> (i32, i32) {
    %c0_i32 = arith.constant 0 : i32
    %c0_i32_0 = arith.constant 0 : i32
    %c0_i32_1 = arith.constant 0 : i32
    return %c0_i32, %c0_i32_0 : i32, i32
  }
  func.func @transform_2(%arg0: i32) -> (i32, i32) {
    %c0_i32 = arith.constant 0 : i32
    %c0_i32_0 = arith.constant 0 : i32
    %c0_i32_1 = arith.constant 0 : i32
    return %c0_i32, %c0_i32_0 : i32, i32
  }
  func.func @transform_3(%arg0: i32) -> (i32, i32) {
    %c0_i32 = arith.constant 0 : i32
    %c0_i32_0 = arith.constant 0 : i32
    return %arg0, %c0_i32 : i32, i32
  }
}

module attributes {stable_mosaic.version = 11 : i64} {
  func.func @_matmul_bias_act_kernel(%arg0: i32, %arg1: memref<512x4xf32, #tpu.memory_space<vmem>>, %arg2: memref<4x8xf32, #tpu.memory_space<vmem>>, %arg3: memref<1x8xf32, #tpu.memory_space<vmem>>, %arg4: memref<512x8xf32, #tpu.memory_space<vmem>>) attributes {dimension_semantics = [#tpu.dimension_semantics<parallel>], iteration_bounds = array<i64: 1>, scalar_prefetch = 0 : i64, scratch_operands = 0 : i64, tpu.core_type = #tpu.core_type<tc>, window_params = [{transform_indices = @transform_0, window_bounds = array<i64: 512, 4>}, {pipeline_mode = #tpu.pipeline_mode<synchronous>, transform_indices = @transform_1, window_bounds = array<i64: 4, 8>}, {pipeline_mode = #tpu.pipeline_mode<synchronous>, transform_indices = @transform_2, window_bounds = array<i64: 1, 8>}, {transform_indices = @transform_3, window_bounds = array<i64: 512, 8>}]} {
    %c0 = arith.constant 0 : index
    %c0_0 = arith.constant 0 : index
    %0 = vector.load %arg1[%c0, %c0_0] : memref<512x4xf32, #tpu.memory_space<vmem>>, vector<512x4xf32>
    %c0_1 = arith.constant 0 : index
    %c0_2 = arith.constant 0 : index
    %1 = vector.load %arg2[%c0_1, %c0_2] : memref<4x8xf32, #tpu.memory_space<vmem>>, vector<4x8xf32>
    %cst = arith.constant dense<0.000000e+00> : vector<512x8xf32>
    %2 = tpu.matmul %0, %1, %cst {dimension_numbers = #tpu.dot_dimension_numbers<[1], [0], [0], [1], [0, 0, 1, 1], [], []>} : vector<512x4xf32>, vector<4x8xf32>, vector<512x8xf32> -> vector<512x8xf32>
    %c0_3 = arith.constant 0 : index
    %c0_4 = arith.constant 0 : index
    %3 = vector.load %arg3[%c0_3, %c0_4] : memref<1x8xf32, #tpu.memory_space<vmem>>, vector<1x8xf32>
    %4 = vector.broadcast %3 : vector<1x8xf32> to vector<512x8xf32>
    %5 = arith.addf %2, %4 : vector<512x8xf32>
    %6 = arith.negf %5 : vector<512x8xf32>
    %7 = math.exp %6 : vector<512x8xf32>
    %cst_5 = arith.constant 1.000000e+00 : f32
    %8 = vector.broadcast %cst_5 : f32 to vector<512x8xf32>
    %9 = arith.addf %8, %7 : vector<512x8xf32>
    %10 = arith.divf %8, %9 : vector<512x8xf32>
    %11 = arith.mulf %5, %10 : vector<512x8xf32>
    %c0_6 = arith.constant 0 : index
    %c0_7 = arith.constant 0 : index
    %12 = vector.load %arg4[%c0_6, %c0_7] : memref<512x8xf32, #tpu.memory_space<vmem>>, vector<512x8xf32>
    tpu.vector_store %arg4[%c0_6, %c0_7], %11 {strides = array<i32>} : memref<512x8xf32, #tpu.memory_space<vmem>>, vector<512x8xf32>,
    return
  }
  func.func @transform_0(%arg0: i32) -> (i32, i32) {
    %c0_i32 = arith.constant 0 : i32
    %c0_i32_0 = arith.constant 0 : i32
    return %arg0, %c0_i32 : i32, i32
  }
  func.func @transform_1(%arg0: i32) -> (i32, i32) {
    %c0_i32 = arith.constant 0 : i32
    %c0_i32_0 = arith.constant 0 : i32
    %c0_i32_1 = arith.constant 0 : i32
    return %c0_i32, %c0_i32_0 : i32, i32
  }
  func.func @transform_2(%arg0: i32) -> (i32, i32) {
    %c0_i32 = arith.constant 0 : i32
    %c0_i32_0 = arith.constant 0 : i32
    %c0_i32_1 = arith.constant 0 : i32
    return %c0_i32, %c0_i32_0 : i32, i32
  }
  func.func @transform_3(%arg0: i32) -> (i32, i32) {
    %c0_i32 = arith.constant 0 : i32
    %c0_i32_0 = arith.constant 0 : i32
    return %arg0, %c0_i32 : i32, i32
  }
}

module attributes {stable_mosaic.version = 11 : i64} {
  func.func @_conv3x3_kernel(%arg0: i32, %arg1: i32, %arg2: memref<1x1x384x8xf32, #tpu.memory_space<vmem>>, %arg3: memref<1x1x96x8xf32, #tpu.memory_space<vmem>>, %arg4: memref<9x8x8xf32, #tpu.memory_space<vmem>>, %arg5: memref<1x8xf32, #tpu.memory_space<vmem>>, %arg6: memref<1x384x8xf32, #tpu.memory_space<vmem>>, %arg7: memref<1x480x8xf32, #tpu.memory_space<vmem>>) attributes {dimension_semantics = [#tpu.dimension_semantics<parallel>, #tpu.dimension_semantics<parallel>], iteration_bounds = array<i64: 2, 1>, scalar_prefetch = 0 : i64, scratch_operands = 1 : i64, tpu.core_type = #tpu.core_type<tc>, window_params = [{transform_indices = @transform_0, window_bounds = array<i64: 1, 1, 384, 8>}, {transform_indices = @transform_1, window_bounds = array<i64: 1, 1, 96, 8>}, {pipeline_mode = #tpu.pipeline_mode<synchronous>, transform_indices = @transform_2, window_bounds = array<i64: 9, 8, 8>}, {pipeline_mode = #tpu.pipeline_mode<synchronous>, transform_indices = @transform_3, window_bounds = array<i64: 1, 8>}, {transform_indices = @transform_4, window_bounds = array<i64: 1, 384, 8>}]} {
    %c0 = arith.constant 0 : index
    %c0_0 = arith.constant 0 : index
    %c0_1 = arith.constant 0 : index
    %c0_2 = arith.constant 0 : index
    %0 = vector.load %arg2[%c0, %c0_0, %c0_1, %c0_2] : memref<1x1x384x8xf32, #tpu.memory_space<vmem>>, vector<1x1x384x8xf32>
    %1 = vector.shape_cast %0 : vector<1x1x384x8xf32> to vector<1x384x8xf32>
    %c0_3 = arith.constant 0 : index
    %c0_4 = arith.constant 0 : index
    %c0_5 = arith.constant 0 : index
    %2 = vector.load %arg7[%c0_3, %c0_4, %c0_5] : memref<1x480x8xf32, #tpu.memory_space<vmem>>, vector<1x384x8xf32>
    tpu.vector_store %arg7[%c0_3, %c0_4, %c0_5], %1 {strides = array<i32>} : memref<1x480x8xf32, #tpu.memory_space<vmem>>, vector<1x384x8xf32>,
    %c0_6 = arith.constant 0 : index
    %c0_7 = arith.constant 0 : index
    %c0_8 = arith.constant 0 : index
    %c0_9 = arith.constant 0 : index
    %3 = vector.load %arg3[%c0_6, %c0_7, %c0_8, %c0_9] : memref<1x1x96x8xf32, #tpu.memory_space<vmem>>, vector<1x1x96x8xf32>
    %4 = vector.shape_cast %3 : vector<1x1x96x8xf32> to vector<1x96x8xf32>
    %c0_10 = arith.constant 0 : index
    %c384 = arith.constant 384 : index
    %c0_11 = arith.constant 0 : index
    %5 = vector.load %arg7[%c0_10, %c384, %c0_11] : memref<1x480x8xf32, #tpu.memory_space<vmem>>, vector<1x96x8xf32>
    tpu.vector_store %arg7[%c0_10, %c384, %c0_11], %4 {strides = array<i32>} : memref<1x480x8xf32, #tpu.memory_space<vmem>>, vector<1x96x8xf32>,
    %c0_12 = arith.constant 0 : index
    %c0_13 = arith.constant 0 : index
    %c0_14 = arith.constant 0 : index
    %6 = vector.load %arg7[%c0_12, %c0_13, %c0_14] : memref<1x480x8xf32, #tpu.memory_space<vmem>>, vector<1x384x8xf32>
    %7 = vector.shape_cast %6 : vector<1x384x8xf32> to vector<384x8xf32>
    %c0_15 = arith.constant 0 : index
    %c0_16 = arith.constant 0 : index
    %c0_17 = arith.constant 0 : index
    %8 = vector.load %arg4[%c0_15, %c0_16, %c0_17] : memref<9x8x8xf32, #tpu.memory_space<vmem>>, vector<1x8x8xf32>
    %9 = vector.shape_cast %8 : vector<1x8x8xf32> to vector<8x8xf32>
    %cst = arith.constant dense<0.000000e+00> : vector<384x8xf32>
    %10 = tpu.matmul %7, %9, %cst {dimension_numbers = #tpu.dot_dimension_numbers<[1], [0], [0], [1], [0, 0, 1, 1], [], []>} : vector<384x8xf32>, vector<8x8xf32>, vector<384x8xf32> -> vector<384x8xf32>
    %c0_18 = arith.constant 0 : index
    %c1 = arith.constant 1 : index
    %c0_19 = arith.constant 0 : index
    %11 = vector.load %arg7[%c0_18, %c1, %c0_19] : memref<1x480x8xf32, #tpu.memory_space<vmem>>, vector<1x384x8xf32>
    %12 = vector.shape_cast %11 : vector<1x384x8xf32> to vector<384x8xf32>
    %c1_20 = arith.constant 1 : index
    %c0_21 = arith.constant 0 : index
    %c0_22 = arith.constant 0 : index
    %13 = vector.load %arg4[%c1_20, %c0_21, %c0_22] : memref<9x8x8xf32, #tpu.memory_space<vmem>>, vector<1x8x8xf32>
    %14 = vector.shape_cast %13 : vector<1x8x8xf32> to vector<8x8xf32>
    %cst_23 = arith.constant dense<0.000000e+00> : vector<384x8xf32>
    %15 = tpu.matmul %12, %14, %cst_23 {dimension_numbers = #tpu.dot_dimension_numbers<[1], [0], [0], [1], [0, 0, 1, 1], [], []>} : vector<384x8xf32>, vector<8x8xf32>, vector<384x8xf32> -> vector<384x8xf32>
    %16 = arith.addf %10, %15 : vector<384x8xf32>
    %c0_24 = arith.constant 0 : index
    %c2 = arith.constant 2 : index
    %c0_25 = arith.constant 0 : index
    %17 = vector.load %arg7[%c0_24, %c2, %c0_25] : memref<1x480x8xf32, #tpu.memory_space<vmem>>, vector<1x384x8xf32>
    %18 = vector.shape_cast %17 : vector<1x384x8xf32> to vector<384x8xf32>
    %c2_26 = arith.constant 2 : index
    %c0_27 = arith.constant 0 : index
    %c0_28 = arith.constant 0 : index
    %19 = vector.load %arg4[%c2_26, %c0_27, %c0_28] : memref<9x8x8xf32, #tpu.memory_space<vmem>>, vector<1x8x8xf32>
    %20 = vector.shape_cast %19 : vector<1x8x8xf32> to vector<8x8xf32>
    %cst_29 = arith.constant dense<0.000000e+00> : vector<384x8xf32>
    %21 = tpu.matmul %18, %20, %cst_29 {dimension_numbers = #tpu.dot_dimension_numbers<[1], [0], [0], [1], [0, 0, 1, 1], [], []>} : vector<384x8xf32>, vector<8x8xf32>, vector<384x8xf32> -> vector<384x8xf32>
    %22 = arith.addf %16, %21 : vector<384x8xf32>
    %c0_30 = arith.constant 0 : index
    %c24 = arith.constant 24 : index
    %c0_31 = arith.constant 0 : index
    %23 = vector.load %arg7[%c0_30, %c24, %c0_31] : memref<1x480x8xf32, #tpu.memory_space<vmem>>, vector<1x384x8xf32>
    %24 = vector.shape_cast %23 : vector<1x384x8xf32> to vector<384x8xf32>
    %c3 = arith.constant 3 : index
    %c0_32 = arith.constant 0 : index
    %c0_33 = arith.constant 0 : index
    %25 = vector.load %arg4[%c3, %c0_32, %c0_33] : memref<9x8x8xf32, #tpu.memory_space<vmem>>, vector<1x8x8xf32>
    %26 = vector.shape_cast %25 : vector<1x8x8xf32> to vector<8x8xf32>
    %cst_34 = arith.constant dense<0.000000e+00> : vector<384x8xf32>
    %27 = tpu.matmul %24, %26, %cst_34 {dimension_numbers = #tpu.dot_dimension_numbers<[1], [0], [0], [1], [0, 0, 1, 1], [], []>} : vector<384x8xf32>, vector<8x8xf32>, vector<384x8xf32> -> vector<384x8xf32>
    %28 = arith.addf %22, %27 : vector<384x8xf32>
    %c0_35 = arith.constant 0 : index
    %c25 = arith.constant 25 : index
    %c0_36 = arith.constant 0 : index
    %29 = vector.load %arg7[%c0_35, %c25, %c0_36] : memref<1x480x8xf32, #tpu.memory_space<vmem>>, vector<1x384x8xf32>
    %30 = vector.shape_cast %29 : vector<1x384x8xf32> to vector<384x8xf32>
    %c4 = arith.constant 4 : index
    %c0_37 = arith.constant 0 : index
    %c0_38 = arith.constant 0 : index
    %31 = vector.load %arg4[%c4, %c0_37, %c0_38] : memref<9x8x8xf32, #tpu.memory_space<vmem>>, vector<1x8x8xf32>
    %32 = vector.shape_cast %31 : vector<1x8x8xf32> to vector<8x8xf32>
    %cst_39 = arith.constant dense<0.000000e+00> : vector<384x8xf32>
    %33 = tpu.matmul %30, %32, %cst_39 {dimension_numbers = #tpu.dot_dimension_numbers<[1], [0], [0], [1], [0, 0, 1, 1], [], []>} : vector<384x8xf32>, vector<8x8xf32>, vector<384x8xf32> -> vector<384x8xf32>
    %34 = arith.addf %28, %33 : vector<384x8xf32>
    %c0_40 = arith.constant 0 : index
    %c26 = arith.constant 26 : index
    %c0_41 = arith.constant 0 : index
    %35 = vector.load %arg7[%c0_40, %c26, %c0_41] : memref<1x480x8xf32, #tpu.memory_space<vmem>>, vector<1x384x8xf32>
    %36 = vector.shape_cast %35 : vector<1x384x8xf32> to vector<384x8xf32>
    %c5 = arith.constant 5 : index
    %c0_42 = arith.constant 0 : index
    %c0_43 = arith.constant 0 : index
    %37 = vector.load %arg4[%c5, %c0_42, %c0_43] : memref<9x8x8xf32, #tpu.memory_space<vmem>>, vector<1x8x8xf32>
    %38 = vector.shape_cast %37 : vector<1x8x8xf32> to vector<8x8xf32>
    %cst_44 = arith.constant dense<0.000000e+00> : vector<384x8xf32>
    %39 = tpu.matmul %36, %38, %cst_44 {dimension_numbers = #tpu.dot_dimension_numbers<[1], [0], [0], [1], [0, 0, 1, 1], [], []>} : vector<384x8xf32>, vector<8x8xf32>, vector<384x8xf32> -> vector<384x8xf32>
    %40 = arith.addf %34, %39 : vector<384x8xf32>
    %c0_45 = arith.constant 0 : index
    %c48 = arith.constant 48 : index
    %c0_46 = arith.constant 0 : index
    %41 = vector.load %arg7[%c0_45, %c48, %c0_46] : memref<1x480x8xf32, #tpu.memory_space<vmem>>, vector<1x384x8xf32>
    %42 = vector.shape_cast %41 : vector<1x384x8xf32> to vector<384x8xf32>
    %c6 = arith.constant 6 : index
    %c0_47 = arith.constant 0 : index
    %c0_48 = arith.constant 0 : index
    %43 = vector.load %arg4[%c6, %c0_47, %c0_48] : memref<9x8x8xf32, #tpu.memory_space<vmem>>, vector<1x8x8xf32>
    %44 = vector.shape_cast %43 : vector<1x8x8xf32> to vector<8x8xf32>
    %cst_49 = arith.constant dense<0.000000e+00> : vector<384x8xf32>
    %45 = tpu.matmul %42, %44, %cst_49 {dimension_numbers = #tpu.dot_dimension_numbers<[1], [0], [0], [1], [0, 0, 1, 1], [], []>} : vector<384x8xf32>, vector<8x8xf32>, vector<384x8xf32> -> vector<384x8xf32>
    %46 = arith.addf %40, %45 : vector<384x8xf32>
    %c0_50 = arith.constant 0 : index
    %c49 = arith.constant 49 : index
    %c0_51 = arith.constant 0 : index
    %47 = vector.load %arg7[%c0_50, %c49, %c0_51] : memref<1x480x8xf32, #tpu.memory_space<vmem>>, vector<1x384x8xf32>
    %48 = vector.shape_cast %47 : vector<1x384x8xf32> to vector<384x8xf32>
    %c7 = arith.constant 7 : index
    %c0_52 = arith.constant 0 : index
    %c0_53 = arith.constant 0 : index
    %49 = vector.load %arg4[%c7, %c0_52, %c0_53] : memref<9x8x8xf32, #tpu.memory_space<vmem>>, vector<1x8x8xf32>
    %50 = vector.shape_cast %49 : vector<1x8x8xf32> to vector<8x8xf32>
    %cst_54 = arith.constant dense<0.000000e+00> : vector<384x8xf32>
    %51 = tpu.matmul %48, %50, %cst_54 {dimension_numbers = #tpu.dot_dimension_numbers<[1], [0], [0], [1], [0, 0, 1, 1], [], []>} : vector<384x8xf32>, vector<8x8xf32>, vector<384x8xf32> -> vector<384x8xf32>
    %52 = arith.addf %46, %51 : vector<384x8xf32>
    %c0_55 = arith.constant 0 : index
    %c50 = arith.constant 50 : index
    %c0_56 = arith.constant 0 : index
    %53 = vector.load %arg7[%c0_55, %c50, %c0_56] : memref<1x480x8xf32, #tpu.memory_space<vmem>>, vector<1x384x8xf32>
    %54 = vector.shape_cast %53 : vector<1x384x8xf32> to vector<384x8xf32>
    %c8 = arith.constant 8 : index
    %c0_57 = arith.constant 0 : index
    %c0_58 = arith.constant 0 : index
    %55 = vector.load %arg4[%c8, %c0_57, %c0_58] : memref<9x8x8xf32, #tpu.memory_space<vmem>>, vector<1x8x8xf32>
    %56 = vector.shape_cast %55 : vector<1x8x8xf32> to vector<8x8xf32>
    %cst_59 = arith.constant dense<0.000000e+00> : vector<384x8xf32>
    %57 = tpu.matmul %54, %56, %cst_59 {dimension_numbers = #tpu.dot_dimension_numbers<[1], [0], [0], [1], [0, 0, 1, 1], [], []>} : vector<384x8xf32>, vector<8x8xf32>, vector<384x8xf32> -> vector<384x8xf32>
    %58 = arith.addf %52, %57 : vector<384x8xf32>
    %c0_60 = arith.constant 0 : index
    %c0_61 = arith.constant 0 : index
    %59 = vector.load %arg5[%c0_60, %c0_61] : memref<1x8xf32, #tpu.memory_space<vmem>>, vector<1x8xf32>
    %60 = vector.broadcast %59 : vector<1x8xf32> to vector<384x8xf32>
    %61 = arith.addf %58, %60 : vector<384x8xf32>
    %62 = arith.negf %61 : vector<384x8xf32>
    %63 = math.exp %62 : vector<384x8xf32>
    %cst_62 = arith.constant 1.000000e+00 : f32
    %64 = vector.broadcast %cst_62 : f32 to vector<384x8xf32>
    %65 = arith.addf %64, %63 : vector<384x8xf32>
    %66 = arith.divf %64, %65 : vector<384x8xf32>
    %67 = arith.mulf %61, %66 : vector<384x8xf32>
    %c0_63 = arith.constant 0 : index
    %c0_64 = arith.constant 0 : index
    %c0_65 = arith.constant 0 : index
    %68 = vector.load %arg6[%c0_63, %c0_64, %c0_65] : memref<1x384x8xf32, #tpu.memory_space<vmem>>, vector<1x384x8xf32>
    %69 = vector.shape_cast %68 : vector<1x384x8xf32> to vector<384x8xf32>
    %70 = vector.shape_cast %67 : vector<384x8xf32> to vector<1x384x8xf32>
    tpu.vector_store %arg6[%c0_63, %c0_64, %c0_65], %70 {strides = array<i32>} : memref<1x384x8xf32, #tpu.memory_space<vmem>>, vector<1x384x8xf32>,
    return
  }
  func.func @transform_0(%arg0: i32, %arg1: i32) -> (i32, i32, i32, i32) {
    %c0_i32 = arith.constant 0 : i32
    %c0_i32_0 = arith.constant 0 : i32
    %c0_i32_1 = arith.constant 0 : i32
    return %arg0, %c0_i32, %arg1, %c0_i32_0 : i32, i32, i32, i32
  }
  func.func @transform_1(%arg0: i32, %arg1: i32) -> (i32, i32, i32, i32) {
    %c1_i32 = arith.constant 1 : i32
    %0 = arith.addi %arg1, %c1_i32 : i32
    %c4_i32 = arith.constant 4 : i32
    %1 = arith.muli %0, %c4_i32 : i32
    %c0_i32 = arith.constant 0 : i32
    %c0_i32_0 = arith.constant 0 : i32
    %c0_i32_1 = arith.constant 0 : i32
    return %arg0, %c0_i32, %1, %c0_i32_0 : i32, i32, i32, i32
  }
  func.func @transform_2(%arg0: i32, %arg1: i32) -> (i32, i32, i32) {
    %c0_i32 = arith.constant 0 : i32
    %c0_i32_0 = arith.constant 0 : i32
    %c0_i32_1 = arith.constant 0 : i32
    %c0_i32_2 = arith.constant 0 : i32
    return %c0_i32, %c0_i32_0, %c0_i32_1 : i32, i32, i32
  }
  func.func @transform_3(%arg0: i32, %arg1: i32) -> (i32, i32) {
    %c0_i32 = arith.constant 0 : i32
    %c0_i32_0 = arith.constant 0 : i32
    %c0_i32_1 = arith.constant 0 : i32
    return %c0_i32, %c0_i32_0 : i32, i32
  }
  func.func @transform_4(%arg0: i32, %arg1: i32) -> (i32, i32, i32) {
    %c0_i32 = arith.constant 0 : i32
    %c0_i32_0 = arith.constant 0 : i32
    return %arg0, %arg1, %c0_i32 : i32, i32, i32
  }
}

module attributes {stable_mosaic.version = 11 : i64} {
  func.func @_matmul_bias_add_relu_kernel(%arg0: i32, %arg1: memref<512x8xf32, #tpu.memory_space<vmem>>, %arg2: memref<8x16xf32, #tpu.memory_space<vmem>>, %arg3: memref<1x16xf32, #tpu.memory_space<vmem>>, %arg4: memref<512x16xf32, #tpu.memory_space<vmem>>, %arg5: memref<512x16xf32, #tpu.memory_space<vmem>>) attributes {dimension_semantics = [#tpu.dimension_semantics<parallel>], iteration_bounds = array<i64: 1>, scalar_prefetch = 0 : i64, scratch_operands = 0 : i64, tpu.core_type = #tpu.core_type<tc>, window_params = [{transform_indices = @transform_0, window_bounds = array<i64: 512, 8>}, {pipeline_mode = #tpu.pipeline_mode<synchronous>, transform_indices = @transform_1, window_bounds = array<i64: 8, 16>}, {pipeline_mode = #tpu.pipeline_mode<synchronous>, transform_indices = @transform_2, window_bounds = array<i64: 1, 16>}, {transform_indices = @transform_3, window_bounds = array<i64: 512, 16>}, {transform_indices = @transform_4, window_bounds = array<i64: 512, 16>}]} {
    %c0 = arith.constant 0 : index
    %c0_0 = arith.constant 0 : index
    %0 = vector.load %arg1[%c0, %c0_0] : memref<512x8xf32, #tpu.memory_space<vmem>>, vector<512x8xf32>
    %c0_1 = arith.constant 0 : index
    %c0_2 = arith.constant 0 : index
    %1 = vector.load %arg2[%c0_1, %c0_2] : memref<8x16xf32, #tpu.memory_space<vmem>>, vector<8x16xf32>
    %cst = arith.constant dense<0.000000e+00> : vector<512x16xf32>
    %2 = tpu.matmul %0, %1, %cst {dimension_numbers = #tpu.dot_dimension_numbers<[1], [0], [0], [1], [0, 0, 1, 1], [], []>} : vector<512x8xf32>, vector<8x16xf32>, vector<512x16xf32> -> vector<512x16xf32>
    %c0_3 = arith.constant 0 : index
    %c0_4 = arith.constant 0 : index
    %3 = vector.load %arg3[%c0_3, %c0_4] : memref<1x16xf32, #tpu.memory_space<vmem>>, vector<1x16xf32>
    %4 = vector.broadcast %3 : vector<1x16xf32> to vector<512x16xf32>
    %5 = arith.addf %2, %4 : vector<512x16xf32>
    %c0_5 = arith.constant 0 : index
    %c0_6 = arith.constant 0 : index
    %6 = vector.load %arg4[%c0_5, %c0_6] : memref<512x16xf32, #tpu.memory_space<vmem>>, vector<512x16xf32>
    %7 = arith.addf %5, %6 : vector<512x16xf32>
    %cst_7 = arith.constant 0.000000e+00 : f32
    %8 = vector.broadcast %cst_7 : f32 to vector<512x16xf32>
    %9 = arith.maximumf %7, %8 : vector<512x16xf32>
    %c0_8 = arith.constant 0 : index
    %c0_9 = arith.constant 0 : index
    %10 = vector.load %arg5[%c0_8, %c0_9] : memref<512x16xf32, #tpu.memory_space<vmem>>, vector<512x16xf32>
    tpu.vector_store %arg5[%c0_8, %c0_9], %9 {strides = array<i32>} : memref<512x16xf32, #tpu.memory_space<vmem>>, vector<512x16xf32>,
    return
  }
  func.func @transform_0(%arg0: i32) -> (i32, i32) {
    %c0_i32 = arith.constant 0 : i32
    %c0_i32_0 = arith.constant 0 : i32
    return %arg0, %c0_i32 : i32, i32
  }
  func.func @transform_1(%arg0: i32) -> (i32, i32) {
    %c0_i32 = arith.constant 0 : i32
    %c0_i32_0 = arith.constant 0 : i32
    %c0_i32_1 = arith.constant 0 : i32
    return %c0_i32, %c0_i32_0 : i32, i32
  }
  func.func @transform_2(%arg0: i32) -> (i32, i32) {
    %c0_i32 = arith.constant 0 : i32
    %c0_i32_0 = arith.constant 0 : i32
    %c0_i32_1 = arith.constant 0 : i32
    return %c0_i32, %c0_i32_0 : i32, i32
  }
  func.func @transform_3(%arg0: i32) -> (i32, i32) {
    %c0_i32 = arith.constant 0 : i32
    %c0_i32_0 = arith.constant 0 : i32
    return %arg0, %c0_i32 : i32, i32
  }
  func.func @transform_4(%arg0: i32) -> (i32, i32) {
    %c0_i32 = arith.constant 0 : i32
    %c0_i32_0 = arith.constant 0 : i32
    return %arg0, %c0_i32 : i32, i32
  }
}

module attributes {stable_mosaic.version = 11 : i64} {
  func.func @_matmul_bias_act_kernel(%arg0: i32, %arg1: memref<512x16xf32, #tpu.memory_space<vmem>>, %arg2: memref<16x8xf32, #tpu.memory_space<vmem>>, %arg3: memref<1x8xf32, #tpu.memory_space<vmem>>, %arg4: memref<512x8xf32, #tpu.memory_space<vmem>>) attributes {dimension_semantics = [#tpu.dimension_semantics<parallel>], iteration_bounds = array<i64: 1>, scalar_prefetch = 0 : i64, scratch_operands = 0 : i64, tpu.core_type = #tpu.core_type<tc>, window_params = [{transform_indices = @transform_0, window_bounds = array<i64: 512, 16>}, {pipeline_mode = #tpu.pipeline_mode<synchronous>, transform_indices = @transform_1, window_bounds = array<i64: 16, 8>}, {pipeline_mode = #tpu.pipeline_mode<synchronous>, transform_indices = @transform_2, window_bounds = array<i64: 1, 8>}, {transform_indices = @transform_3, window_bounds = array<i64: 512, 8>}]} {
    %c0 = arith.constant 0 : index
    %c0_0 = arith.constant 0 : index
    %0 = vector.load %arg1[%c0, %c0_0] : memref<512x16xf32, #tpu.memory_space<vmem>>, vector<512x16xf32>
    %c0_1 = arith.constant 0 : index
    %c0_2 = arith.constant 0 : index
    %1 = vector.load %arg2[%c0_1, %c0_2] : memref<16x8xf32, #tpu.memory_space<vmem>>, vector<16x8xf32>
    %cst = arith.constant dense<0.000000e+00> : vector<512x8xf32>
    %2 = tpu.matmul %0, %1, %cst {dimension_numbers = #tpu.dot_dimension_numbers<[1], [0], [0], [1], [0, 0, 1, 1], [], []>} : vector<512x16xf32>, vector<16x8xf32>, vector<512x8xf32> -> vector<512x8xf32>
    %c0_3 = arith.constant 0 : index
    %c0_4 = arith.constant 0 : index
    %3 = vector.load %arg3[%c0_3, %c0_4] : memref<1x8xf32, #tpu.memory_space<vmem>>, vector<1x8xf32>
    %4 = vector.broadcast %3 : vector<1x8xf32> to vector<512x8xf32>
    %5 = arith.addf %2, %4 : vector<512x8xf32>
    %6 = arith.negf %5 : vector<512x8xf32>
    %7 = math.exp %6 : vector<512x8xf32>
    %cst_5 = arith.constant 1.000000e+00 : f32
    %8 = vector.broadcast %cst_5 : f32 to vector<512x8xf32>
    %9 = arith.addf %8, %7 : vector<512x8xf32>
    %10 = arith.divf %8, %9 : vector<512x8xf32>
    %11 = arith.mulf %5, %10 : vector<512x8xf32>
    %c0_6 = arith.constant 0 : index
    %c0_7 = arith.constant 0 : index
    %12 = vector.load %arg4[%c0_6, %c0_7] : memref<512x8xf32, #tpu.memory_space<vmem>>, vector<512x8xf32>
    tpu.vector_store %arg4[%c0_6, %c0_7], %11 {strides = array<i32>} : memref<512x8xf32, #tpu.memory_space<vmem>>, vector<512x8xf32>,
    return
  }
  func.func @transform_0(%arg0: i32) -> (i32, i32) {
    %c0_i32 = arith.constant 0 : i32
    %c0_i32_0 = arith.constant 0 : i32
    return %arg0, %c0_i32 : i32, i32
  }
  func.func @transform_1(%arg0: i32) -> (i32, i32) {
    %c0_i32 = arith.constant 0 : i32
    %c0_i32_0 = arith.constant 0 : i32
    %c0_i32_1 = arith.constant 0 : i32
    return %c0_i32, %c0_i32_0 : i32, i32
  }
  func.func @transform_2(%arg0: i32) -> (i32, i32) {
    %c0_i32 = arith.constant 0 : i32
    %c0_i32_0 = arith.constant 0 : i32
    %c0_i32_1 = arith.constant 0 : i32
    return %c0_i32, %c0_i32_0 : i32, i32
  }
  func.func @transform_3(%arg0: i32) -> (i32, i32) {
    %c0_i32 = arith.constant 0 : i32
    %c0_i32_0 = arith.constant 0 : i32
    return %arg0, %c0_i32 : i32, i32
  }
}

</mosaic_0001>

<bundles_post_ra>
// kernel: _lambda_.7
= control target key start
LH: loop header
LB: loop body
LE: loop exit
PB: predicated region body
PF: predicated region fallthrough
CT: control target
= control target key end

     0   :  { %vm279_vm0 = vcmask 1043456   ;;  %vm86_vm1 = vcmask 31744   ;;  %vm1116_vm2 = vcmask 64512   ;;  %s2659_s1 = inlined_call_operand.vmem [shape: f32[4,8], index: 1, kind: input, shape index: {}]   ;;  %s2660_s0 = inlined_call_operand.vmem [shape: f32[512,4], index: 0, kind: input, shape index: {}]   ;;  %s2661_s2 = inlined_call_operand.vmem [shape: f32[1,8], index: 2, kind: input, shape index: {}]   ;;  %s2662_s3 = inlined_call_operand.vmem [shape: f32[512,8], index: 3, kind: output, shape index: {}]  }
   0x1   :  { %v78_v0 = vld [vmem:[%s2659_s1] sm:$0xf]  ;;  %v15_v3 = vld [vmem:[%s2660_s0 + $0x8] sm:$0xff]  ;;  %v16_v5 = vld [vmem:[%s2660_s0 + $0x10] sm:$0xff] }
   0x2   :  { %v14_v1 = vld [vmem:[%s2660_s0] sm:$0xff]  ;;  %1380 = vmatprep.subr.msk.mxu0 %vm279_vm0, %v78_v0  ;;  %1478 = vmatprep.subr.msk.mxu1 %vm279_vm0, %v78_v0  ;;  %v47_v4 = vld [vmem:[%s2660_s0 + $0x108] sm:$0xff]  ;;  %v48_v6 = vld [vmem:[%s2660_s0 + $0x110] sm:$0xff] }
   0x3   :  { %v46_v2 = vld [vmem:[%s2660_s0 + $0x100] sm:$0xff]  ;;  %1381 = vmatpush3.msk.msra.mxu0 %vm279_vm0, %v78_v0  ;;  %1479 = vmatpush3.msk.msra.mxu1 %vm279_vm0, %v78_v0  ;;  %v17_v7 = vld [vmem:[%s2660_s0 + $0x18] sm:$0xff]  ;;  %v19_v11 = vld [vmem:[%s2660_s0 + $0x28] sm:$0xff] }
   0x4   :  { %1382 = vmatprep.mubr.msk.f32.mxu0 %vm86_vm1, %v14_v1  ;;  %1430 = vmatprep.mubr.msk.f32.mxu1 %vm86_vm1, %v46_v2  ;;  %v49_v8 = vld [vmem:[%s2660_s0 + $0x118] sm:$0xff]  ;;  %v18_v9 = vld [vmem:[%s2660_s0 + $0x20] sm:$0xff]  ;;  %v51_v12 = vld [vmem:[%s2660_s0 + $0x128] sm:$0xff] }
   0x5   :  { %1383 = vmatmul.mubr.msk.f32.vlgmr.msra.gmra.mrb[0].mxu0 %vm86_vm1, %v15_v3  ;;  %1431 = vmatmul.mubr.msk.f32.vlgmr.msra.gmra.mrb[0].mxu1 %vm86_vm1, %v47_v4  ;;  %v50_v10 = vld [vmem:[%s2660_s0 + $0x120] sm:$0xff]  ;;  %v20_v13 = vld [vmem:[%s2660_s0 + $0x30] sm:$0xff]  ;;  %v21_v15 = vld [vmem:[%s2660_s0 + $0x38] sm:$0xff] }
   0x6   :  { %1385 = vmatprep.mubr.msk.f32.mxu0 %vm86_vm1, %v16_v5  ;;  %1433 = vmatprep.mubr.msk.f32.mxu1 %vm86_vm1, %v48_v6  ;;  %v52_v14 = vld [vmem:[%s2660_s0 + $0x130] sm:$0xff]  ;;  %v53_v16 = vld [vmem:[%s2660_s0 + $0x138] sm:$0xff]  ;;  %v22_v17 = vld [vmem:[%s2660_s0 + $0x40] sm:$0xff] }
   0x7   :  { %v54_v18 = vld [vmem:[%s2660_s0 + $0x140] sm:$0xff]  ;;  %v23_v19 = vld [vmem:[%s2660_s0 + $0x48] sm:$0xff]  ;;  %v24_v21 = vld [vmem:[%s2660_s0 + $0x50] sm:$0xff] }
   0x8   :  { %v55_v20 = vld [vmem:[%s2660_s0 + $0x148] sm:$0xff]  ;;  %v56_v22 = vld [vmem:[%s2660_s0 + $0x150] sm:$0xff]  ;;  %v25_v23 = vld [vmem:[%s2660_s0 + $0x58] sm:$0xff] }
   0x9   :  { %1386 = vmatmul.mubr.msk.f32.gmra.mrb[2].mxu0 %vm86_vm1, %v17_v7  ;;  %1434 = vmatmul.mubr.msk.f32.gmra.mrb[2].mxu1 %vm86_vm1, %v49_v8  ;;  %v57_v24 = vld [vmem:[%s2660_s0 + $0x158] sm:$0xff]  ;;  %v26_v25 = vld [vmem:[%s2660_s0 + $0x60] sm:$0xff]  ;;  %v27_v27 = vld [vmem:[%s2660_s0 + $0x68] sm:$0xff] }
   0xa   :  { %1388 = vmatprep.mubr.msk.f32.mxu0 %vm86_vm1, %v18_v9  ;;  %1436 = vmatprep.mubr.msk.f32.mxu1 %vm86_vm1, %v50_v10  ;;  %v58_v26 = vld [vmem:[%s2660_s0 + $0x160] sm:$0xff]  ;;  %v59_v28 = vld [vmem:[%s2660_s0 + $0x168] sm:$0xff]  ;;  %v28_v29 = vld [vmem:[%s2660_s0 + $0x70] sm:$0xff] }
   0xb   :  { %v60_v30 = vld [vmem:[%s2660_s0 + $0x170] sm:$0xff]  ;;  %v29_v31 = vld [vmem:[%s2660_s0 + $0x78] sm:$0xff]  ;;  %v30_v33 = vld [vmem:[%s2660_s0 + $0x80] sm:$0xff] }
   0xc   :  { %v61_v32 = vld [vmem:[%s2660_s0 + $0x178] sm:$0xff]  ;;  %v62_v34 = vld [vmem:[%s2660_s0 + $0x180] sm:$0xff]  ;;  %v31_v35 = vld [vmem:[%s2660_s0 + $0x88] sm:$0xff] }
   0xd   :  { %1389 = vmatmul.mubr.msk.f32.gmra.mrb[4].mxu0 %vm86_vm1, %v19_v11  ;;  %1437 = vmatmul.mubr.msk.f32.gmra.mrb[4].mxu1 %vm86_vm1, %v51_v12  ;;  %v63_v36 = vld [vmem:[%s2660_s0 + $0x188] sm:$0xff]  ;;  %v32_v37 = vld [vmem:[%s2660_s0 + $0x90] sm:$0xff]  ;;  %v33_v39 = vld [vmem:[%s2660_s0 + $0x98] sm:$0xff] }
   0xe   :  { %1391 = vmatprep.mubr.msk.f32.mxu0 %vm86_vm1, %v20_v13  ;;  %1439 = vmatprep.mubr.msk.f32.mxu1 %vm86_vm1, %v52_v14  ;;  %v64_v38 = vld [vmem:[%s2660_s0 + $0x190] sm:$0xff]  ;;  %v65_v40 = vld [vmem:[%s2660_s0 + $0x198] sm:$0xff]  ;;  %v34_v41 = vld [vmem:[%s2660_s0 + $0xa0] sm:$0xff] }
   0xf   :  { %v66_v42 = vld [vmem:[%s2660_s0 + $0x1a0] sm:$0xff]  ;;  %v35_v43 = vld [vmem:[%s2660_s0 + $0xa8] sm:$0xff]  ;;  %v36_v45 = vld [vmem:[%s2660_s0 + $0xb0] sm:$0xff] }
  0x10   :  { %v67_v44 = vld [vmem:[%s2660_s0 + $0x1a8] sm:$0xff]  ;;  %v68_v46 = vld [vmem:[%s2660_s0 + $0x1b0] sm:$0xff]  ;;  %v37_v47 = vld [vmem:[%s2660_s0 + $0xb8] sm:$0xff] }
  0x11   :  { %1392 = vmatmul.mubr.msk.f32.gmra.mrb[6].mxu0 %vm86_vm1, %v21_v15  ;;  %1440 = vmatmul.mubr.msk.f32.gmra.mrb[6].mxu1 %vm86_vm1, %v53_v16  ;;  %v69_v48 = vld [vmem:[%s2660_s0 + $0x1b8] sm:$0xff]  ;;  %v38_v49 = vld [vmem:[%s2660_s0 + $0xc0] sm:$0xff]  ;;  %v39_v51 = vld [vmem:[%s2660_s0 + $0xc8] sm:$0xff] }
  0x12   :  { %1394 = vmatprep.mubr.msk.f32.mxu0 %vm86_vm1, %v22_v17  ;;  %1442 = vmatprep.mubr.msk.f32.mxu1 %vm86_vm1, %v54_v18  ;;  %v70_v50 = vld [vmem:[%s2660_s0 + $0x1c0] sm:$0xff]  ;;  %v71_v52 = vld [vmem:[%s2660_s0 + $0x1c8] sm:$0xff]  ;;  %v40_v53 = vld [vmem:[%s2660_s0 + $0xd0] sm:$0xff] }
  0x13   :  { %v72_v54 = vld [vmem:[%s2660_s0 + $0x1d0] sm:$0xff]  ;;  %v41_v55 = vld [vmem:[%s2660_s0 + $0xd8] sm:$0xff]  ;;  %v42_v57 = vld [vmem:[%s2660_s0 + $0xe0] sm:$0xff] }
  0x14   :  { %v73_v56 = vld [vmem:[%s2660_s0 + $0x1d8] sm:$0xff]  ;;  %v74_v58 = vld [vmem:[%s2660_s0 + $0x1e0] sm:$0xff]  ;;  %v43_v59 = vld [vmem:[%s2660_s0 + $0xe8] sm:$0xff] }
  0x15   :  { %1395 = vmatmul.mubr.msk.f32.gmra.mrb[8].mxu0 %vm86_vm1, %v23_v19  ;;  %1443 = vmatmul.mubr.msk.f32.gmra.mrb[8].mxu1 %vm86_vm1, %v55_v20  ;;  %v75_v60 = vld [vmem:[%s2660_s0 + $0x1e8] sm:$0xff]  ;;  %v44_v61 = vld [vmem:[%s2660_s0 + $0xf0] sm:$0xff]  ;;  %v45_v63 = vld [vmem:[%s2660_s0 + $0xf8] sm:$0xff] }
  0x16   :  { %1397 = vmatprep.mubr.msk.f32.mxu0 %vm86_vm1, %v24_v21  ;;  %1445 = vmatprep.mubr.msk.f32.mxu1 %vm86_vm1, %v56_v22  ;;  %v76_v62 = vld [vmem:[%s2660_s0 + $0x1f0] sm:$0xff]  ;;  %v77_v0 = vld [vmem:[%s2660_s0 + $0x1f8] sm:$0xff]  ;;  %v2018_v1 = vld [vmem:[%s2661_s2] ss:$0 sm:$0xff] }
  0x19   :  { %1398 = vmatmul.mubr.msk.f32.gmra.mrb[10].mxu0 %vm86_vm1, %v25_v23  ;;  %1446 = vmatmul.mubr.msk.f32.gmra.mrb[10].mxu1 %vm86_vm1, %v57_v24 }
  0x1a   :  { %1400 = vmatprep.mubr.msk.f32.mxu0 %vm86_vm1, %v26_v25  ;;  %1448 = vmatprep.mubr.msk.f32.mxu1 %vm86_vm1, %v58_v26 }
  0x1d   :  { %1401 = vmatmul.mubr.msk.f32.gmra.mrb[12].mxu0 %vm86_vm1, %v27_v27  ;;  %1449 = vmatmul.mubr.msk.f32.gmra.mrb[12].mxu1 %vm86_vm1, %v59_v28 }
  0x1e   :  { %1403 = vmatprep.mubr.msk.f32.mxu0 %vm86_vm1, %v28_v29  ;;  %1451 = vmatprep.mubr.msk.f32.mxu1 %vm86_vm1, %v60_v30 }
  0x21   :  { %1404 = vmatmul.mubr.msk.f32.gmra.mrb[14].mxu0 %vm86_vm1, %v29_v31  ;;  %1452 = vmatmul.mubr.msk.f32.gmra.mrb[14].mxu1 %vm86_vm1, %v61_v32 }
  0x22   :  { %1406 = vmatprep.mubr.msk.f32.mxu0 %vm86_vm1, %v30_v33  ;;  %1454 = vmatprep.mubr.msk.f32.mxu1 %vm86_vm1, %v62_v34 }
  0x25   :  { %1407 = vmatmul.mubr.msk.f32.gmra.mrb[16].mxu0 %vm86_vm1, %v31_v35  ;;  %1455 = vmatmul.mubr.msk.f32.gmra.mrb[16].mxu1 %vm86_vm1, %v63_v36 }
  0x26   :  { %1409 = vmatprep.mubr.msk.f32.mxu0 %vm86_vm1, %v32_v37  ;;  %1457 = vmatprep.mubr.msk.f32.mxu1 %vm86_vm1, %v64_v38 }
  0x29   :  { %1410 = vmatmul.mubr.msk.f32.gmra.mrb[18].mxu0 %vm86_vm1, %v33_v39  ;;  %1458 = vmatmul.mubr.msk.f32.gmra.mrb[18].mxu1 %vm86_vm1, %v65_v40 }
  0x2a   :  { %1412 = vmatprep.mubr.msk.f32.mxu0 %vm86_vm1, %v34_v41  ;;  %1460 = vmatprep.mubr.msk.f32.mxu1 %vm86_vm1, %v66_v42 }
  0x2d   :  { %1413 = vmatmul.mubr.msk.f32.gmra.mrb[20].mxu0 %vm86_vm1, %v35_v43  ;;  %1461 = vmatmul.mubr.msk.f32.gmra.mrb[20].mxu1 %vm86_vm1, %v67_v44 }
  0x2e   :  { %1415 = vmatprep.mubr.msk.f32.mxu0 %vm86_vm1, %v36_v45  ;;  %1463 = vmatprep.mubr.msk.f32.mxu1 %vm86_vm1, %v68_v46 }
  0x31   :  { %1416 = vmatmul.mubr.msk.f32.gmra.mrb[22].mxu0 %vm86_vm1, %v37_v47  ;;  %1464 = vmatmul.mubr.msk.f32.gmra.mrb[22].mxu1 %vm86_vm1, %v69_v48 }
  0x32   :  { %1418 = vmatprep.mubr.msk.f32.mxu0 %vm86_vm1, %v38_v49  ;;  %1466 = vmatprep.mubr.msk.f32.mxu1 %vm86_vm1, %v70_v50 }
  0x35   :  { %1419 = vmatmul.mubr.msk.f32.gmra.mrb[24].mxu0 %vm86_vm1, %v39_v51  ;;  %1467 = vmatmul.mubr.msk.f32.gmra.mrb[24].mxu1 %vm86_vm1, %v71_v52 }
  0x36   :  { %1421 = vmatprep.mubr.msk.f32.mxu0 %vm86_vm1, %v40_v53  ;;  %1469 = vmatprep.mubr.msk.f32.mxu1 %vm86_vm1, %v72_v54 }
  0x39   :  { %1422 = vmatmul.mubr.msk.f32.gmra.mrb[26].mxu0 %vm86_vm1, %v41_v55  ;;  %1470 = vmatmul.mubr.msk.f32.gmra.mrb[26].mxu1 %vm86_vm1, %v73_v56 }
  0x3a   :  { %1424 = vmatprep.mubr.msk.f32.mxu0 %vm86_vm1, %v42_v57  ;;  %1472 = vmatprep.mubr.msk.f32.mxu1 %vm86_vm1, %v74_v58 }
  0x3d   :  { %1425 = vmatmul.mubr.msk.f32.gmra.mrb[28].mxu0 %vm86_vm1, %v43_v59  ;;  %1473 = vmatmul.mubr.msk.f32.gmra.mrb[28].mxu1 %vm86_vm1, %v75_v60 }
  0x3e   :  { %1427 = vmatprep.mubr.msk.f32.mxu0 %vm86_vm1, %v44_v61  ;;  %1475 = vmatprep.mubr.msk.f32.mxu1 %vm86_vm1, %v76_v62 }
  0x41   :  { %1428 = vmatmul.mubr.msk.f32.gmra.mrb[30].mxu0 %vm86_vm1, %v45_v63  ;;  %1476 = vmatmul.mubr.msk.f32.gmra.mrb[30].mxu1 %vm86_vm1, %v77_v0 }
  0xd8   :  { %v1384_v2 = vpop.f32.mrb[0].mxu0  ;;  %v1432_v3 = vpop.f32.mrb[0].mxu1 }
  0xd9   :  { %v2021_v4 = vadd.f32 %v1384_v2, %v2018_v1  ;;  %v2024_v5 = vadd.f32 %v1432_v3, %v2018_v1  ;;  %v349_v6 = vpop.f32.mrb[1].mxu0  ;;  %v509_v7 = vpop.f32.mrb[1].mxu1 }
  0xda   :  { %v2027_v8 = vadd.f32 %v2018_v1, %v349_v6  ;;  %v2030_v9 = vadd.f32 %v2018_v1, %v509_v7 }
  0xdb   :  { %v1252_v10 = vmul.f32 -1.442695, %v2021_v4  ;;  %v1284_v11 = vmul.f32 -1.442695, %v2024_v5 }
  0xdc   :  { %v1251_v12 = vmul.f32 -1.442695, %v2027_v8  ;;  %v1283_v13 = vmul.f32 -1.442695, %v2030_v9  ;;  %v1387_v14 = vpop.f32.mrb[2].mxu0  ;;  %v1435_v15 = vpop.f32.mrb[2].mxu1 }
  0xdd   :  { %1480 = vpow2.f32 %v1252_v10  ;;  %v2037_v16 = vadd.f32 %v1387_v14, %v2018_v1  ;;  %v2040_v17 = vadd.f32 %v1435_v15, %v2018_v1  ;;  %v359_v18 = vpop.f32.mrb[3].mxu0  ;;  %v519_v19 = vpop.f32.mrb[3].mxu1 }
  0xde   :  { %1482 = vpow2.f32 %v1284_v11  ;;  %v2043_v20 = vadd.f32 %v2018_v1, %v359_v18  ;;  %v2046_v21 = vadd.f32 %v2018_v1, %v519_v19 }
  0xdf   :  { %1484 = vpow2.f32 %v1251_v12  ;;  %v1254_v22 = vmul.f32 -1.442695, %v2037_v16  ;;  %v1286_v23 = vmul.f32 -1.442695, %v2040_v17 }
  0xe0   :  { %1486 = vpow2.f32 %v1283_v13  ;;  %v1253_v24 = vmul.f32 -1.442695, %v2043_v20  ;;  %v1285_v25 = vmul.f32 -1.442695, %v2046_v21  ;;  %v1390_v26 = vpop.f32.mrb[4].mxu0  ;;  %v1438_v27 = vpop.f32.mrb[4].mxu1 }
  0xe1   :  { %1488 = vpow2.f32 %v1254_v22  ;;  %v2053_v28 = vadd.f32 %v1390_v26, %v2018_v1  ;;  %v2056_v29 = vadd.f32 %v1438_v27, %v2018_v1  ;;  %v369_v30 = vpop.f32.mrb[5].mxu0  ;;  %v529_v31 = vpop.f32.mrb[5].mxu1 }
  0xe2   :  { %1490 = vpow2.f32 %v1286_v23  ;;  %v2059_v32 = vadd.f32 %v2018_v1, %v369_v30  ;;  %v2062_v33 = vadd.f32 %v2018_v1, %v529_v31 }
  0xe3   :  { %1492 = vpow2.f32 %v1253_v24  ;;  %v1256_v34 = vmul.f32 -1.442695, %v2053_v28  ;;  %v1288_v35 = vmul.f32 -1.442695, %v2056_v29 }
  0xe4   :  { %1494 = vpow2.f32 %v1285_v25  ;;  %v1255_v36 = vmul.f32 -1.442695, %v2059_v32  ;;  %v1287_v37 = vmul.f32 -1.442695, %v2062_v33  ;;  %v1393_v38 = vpop.f32.mrb[6].mxu0  ;;  %v1441_v39 = vpop.f32.mrb[6].mxu1 }
  0xe5   :  { %1496 = vpow2.f32 %v1256_v34  ;;  %v2069_v40 = vadd.f32 %v1393_v38, %v2018_v1  ;;  %v379_v41 = vpop.f32.mrb[7].mxu0  ;;  %v539_v42 = vpop.f32.mrb[7].mxu1  ;;  %v2075_v10 = vadd.f32 %v1441_v39, %v2018_v1 }
  0xe6   :  { %1498 = vpow2.f32 %v1288_v35  ;;  %v2078_v13 = vadd.f32 %v2018_v1, %v379_v41  ;;  %v2083_v19 = vadd.f32 %v2018_v1, %v539_v42 }
  0xe7   :  { %v1481_v43 = vpop.eup %1480  ;;  %1500 = vpow2.f32 %v1255_v36  ;;  %v1258_v44 = vmul.f32 -1.442695, %v2069_v40  ;;  %v1290_v34 = vmul.f32 -1.442695, %v2075_v10 }
  0xe8   :  { %v1483_v45 = vpop.eup %1482  ;;  %v861_v46 = vadd.f32 1.0, %v1481_v43  ;;  %1502 = vpow2.f32 %v1287_v37  ;;  %v1396_v47 = vpop.f32.mrb[8].mxu0  ;;  %v1257_v38 = vmul.f32 -1.442695, %v2078_v13 }
  0xe9   :  { %v1485_v48 = vpop.eup %1484  ;;  %v893_v49 = vadd.f32 1.0, %v1483_v45  ;;  %1504 = vpow2.f32 %v1258_v44  ;;  %v1444_v50 = vpop.f32.mrb[8].mxu1  ;;  %v2090_v26 = vadd.f32 %v1396_v47, %v2018_v1  ;;  %v1289_v44 = vmul.f32 -1.442695, %v2083_v19 }
  0xea   :  { %v389_v51 = vpop.f32.mrb[9].mxu0  ;;  %v1487_v52 = vpop.eup %1486  ;;  %1506 = vrcp.f32 %v861_v46  ;;  %v860_v53 = vadd.f32 1.0, %v1485_v48  ;;  %v2096_v35 = vadd.f32 %v1444_v50, %v2018_v1 }
  0xeb   :  { %v549_v54 = vpop.f32.mrb[9].mxu1  ;;  %v1489_v55 = vpop.eup %1488  ;;  %1508 = vrcp.f32 %v893_v49  ;;  %v892_v56 = vadd.f32 1.0, %v1487_v52  ;;  %v2100_v39 = vadd.f32 %v2018_v1, %v389_v51  ;;  %v1260_v50 = vmul.f32 -1.442695, %v2090_v26 }
  0xec   :  { %v1491_v57 = vpop.eup %1490  ;;  %1510 = vrcp.f32 %v860_v53  ;;  %v863_v58 = vadd.f32 1.0, %v1489_v55  ;;  %v1399_v59 = vpop.f32.mrb[10].mxu0  ;;  %v2107_v45 = vadd.f32 %v2018_v1, %v549_v54  ;;  %v1292_v54 = vmul.f32 -1.442695, %v2096_v35 }
  0xed   :  { %v1493_v60 = vpop.eup %1492  ;;  %1512 = vrcp.f32 %v892_v56  ;;  %v895_v61 = vadd.f32 1.0, %v1491_v57  ;;  %v1447_v62 = vpop.f32.mrb[10].mxu1  ;;  %v2116_v51 = vadd.f32 %v1399_v59, %v2018_v1  ;;  %v1259_v57 = vmul.f32 -1.442695, %v2100_v39 }
  0xee   :  { %v399_v63 = vpop.f32.mrb[11].mxu0  ;;  %v1495_v0 = vpop.eup %1494  ;;  %1514 = vrcp.f32 %v863_v58  ;;  %v862_v2 = vadd.f32 1.0, %v1493_v60 }
  0xef   :  { %v2072_v3 = vpop.f32.mrb[11].mxu1  ;;  %v1497_v6 = vpop.eup %1496  ;;  %1516 = vrcp.f32 %v895_v61  ;;  %v894_v7 = vadd.f32 1.0, %v1495_v0  ;;  %v2136_v58 = vadd.f32 %v2018_v1, %v399_v63 }
  0xf0   :  { %v1499_v11 = vpop.eup %1498  ;;  %1518 = vrcp.f32 %v862_v2  ;;  %v865_v12 = vadd.f32 1.0, %v1497_v6  ;;  %v2080_v14 = vpop.f32.mrb[12].mxu0 }
  0xf1   :  { %v1501_v15 = vpop.eup %1500  ;;  %1520 = vrcp.f32 %v894_v7  ;;  %v897_v18 = vadd.f32 1.0, %v1499_v11  ;;  %v2085_v22 = vpop.f32.mrb[12].mxu1  ;;  %v2164_v7 = vadd.f32 %v2080_v14, %v2018_v1 }
  0xf2   :  { %v2087_v23 = vpop.f32.mrb[13].mxu0  ;;  %v1503_v24 = vpop.eup %1502  ;;  %1522 = vrcp.f32 %v865_v12  ;;  %v864_v25 = vadd.f32 1.0, %v1501_v15 }
  0xf3   :  { %v2092_v27 = vpop.f32.mrb[13].mxu1  ;;  %v1505_v30 = vpop.eup %1504  ;;  %1524 = vrcp.f32 %v897_v18  ;;  %v896_v31 = vadd.f32 1.0, %v1503_v24  ;;  %v1261_v18 = vmul.f32 -1.442695, %v2136_v58 }
  0xf4   :  { %v1507_v36 = vpop.eup %1506  ;;  %1526 = vrcp.f32 %v864_v25  ;;  %v867_v37 = vadd.f32 1.0, %v1505_v30  ;;  %v2102_v41 = vpop.f32.mrb[14].mxu0 }
  0xf5   :  { %v1509_v42 = vpop.eup %1508  ;;  %v1053_v43 = vmul.f32 %v1507_v36, %v2021_v4  ;;  %1528 = vrcp.f32 %v896_v31  ;;  %v2109_v46 = vpop.f32.mrb[14].mxu1 }
  0xf6   :  { %v2111_v47 = vpop.f32.mrb[15].mxu0  ;;  %v1511_v48 = vpop.eup %1510  ;;  %v1085_v49 = vmul.f32 %v1509_v42, %v2024_v5  ;;  %1530 = vrcp.f32 %v867_v37  ;;  %v2127_v5 = vadd.f32 %v1447_v62, %v2018_v1  ;;  %v2150_v62 = vadd.f32 %v2018_v1, %v2072_v3 }
  0xf7   :  { %v2118_v4 = vpop.f32.mrb[15].mxu1  ;;  %v1513_v52 = vpop.eup %1512  ;;  %1118 = vst.msk [vmem:[%s2662_s3 + $0x8] sm:$0xff] %vm1116_vm2, %v1053_v43  ;;  %v1052_v53 = vmul.f32 %v1511_v48, %v2027_v8  ;;  %1532 = vpow2.f32 %v1290_v34 }
  0xf8   :  { %v1515_v55 = vpop.eup %1514  ;;  %1150 = vst.msk [vmem:[%s2662_s3 + $0x108] sm:$0xff] %vm1116_vm2, %v1085_v49  ;;  %v1084_v56 = vmul.f32 %v1513_v52, %v2030_v9  ;;  %1534 = vpow2.f32 %v1257_v38  ;;  %v2138_v8 = vpop.f32.mrb[16].mxu0  ;;  %v1291_v9 = vmul.f32 -1.442695, %v2107_v45  ;;  %v1294_v12 = vmul.f32 -1.442695, %v2127_v5 }
  0xf9   :  { %v2140_v59 = vpop.f32.mrb[16].mxu1  ;;  %v1517_v60 = vpop.eup %1516  ;;  %1117 = vst.msk [vmem:[%s2662_s3] sm:$0xff] %vm1116_vm2, %v1052_v53  ;;  %v1055_v61 = vmul.f32 %v1515_v55, %v2037_v16  ;;  %1536 = vpow2.f32 %v1289_v44  ;;  %v1262_v16 = vmul.f32 -1.442695, %v2116_v51  ;;  %v1293_v30 = vmul.f32 -1.442695, %v2150_v62 }
  0xfa   :  { %v2152_v63 = vpop.f32.mrb[17].mxu0  ;;  %v2154_v0 = vpop.f32.mrb[17].mxu1  ;;  %1149 = vst.msk [vmem:[%s2662_s3 + $0x100] sm:$0xff] %vm1116_vm2, %v1084_v56  ;;  %v1087_v6 = vmul.f32 %v1517_v60, %v2040_v17  ;;  %1538 = vpow2.f32 %v1260_v50  ;;  %v2174_v17 = vadd.f32 %v2085_v22, %v2018_v1  ;;  %v2221_v49 = vadd.f32 %v2018_v1, %v2092_v27 }
  0xfb   :  { %v1519_v2 = vpop.eup %1518  ;;  %1120 = vst.msk [vmem:[%s2662_s3 + $0x18] sm:$0xff] %vm1116_vm2, %v1055_v61  ;;  %1540 = vpow2.f32 %v1292_v54 }
  0xfc   :  { %v1521_v3 = vpop.eup %1520  ;;  %v1054_v11 = vmul.f32 %v1519_v2, %v2043_v20  ;;  %1152 = vst.msk [vmem:[%s2662_s3 + $0x118] sm:$0xff] %vm1116_vm2, %v1087_v6  ;;  %1542 = vpow2.f32 %v1259_v57  ;;  %v2182_v24 = vpop.f32.mrb[18].mxu0  ;;  %v1296_v43 = vmul.f32 -1.442695, %v2174_v17 }
  0xfd   :  { %v1523_v15 = vpop.eup %1522  ;;  %v1086_v14 = vmul.f32 %v1521_v3, %v2046_v21  ;;  %v2184_v20 = vpop.f32.mrb[18].mxu1  ;;  %1544 = vpow2.f32 %v1291_v9  ;;  %v2194_v21 = vadd.f32 %v2018_v1, %v2087_v23  ;;  %v2252_v3 = vmul.f32 -1.442695, %v2221_v49 }
  0xfe   :  { %v1525_v25 = vpop.eup %1524  ;;  %1119 = vst.msk [vmem:[%s2662_s3 + $0x10] sm:$0xff] %vm1116_vm2, %v1054_v11  ;;  %v1057_v22 = vmul.f32 %v1523_v15, %v2053_v28  ;;  %v439_v31 = vpop.f32.mrb[19].mxu0  ;;  %1546 = vpow2.f32 %v1262_v16  ;;  %v1264_v28 = vmul.f32 -1.442695, %v2164_v7  ;;  %v2256_v11 = vadd.f32 %v2102_v41, %v2018_v1 }
  0xff   :  { %v599_v34 = vpop.f32.mrb[19].mxu1  ;;  %v1527_v36 = vpop.eup %1526  ;;  %1151 = vst.msk [vmem:[%s2662_s3 + $0x110] sm:$0xff] %vm1116_vm2, %v1086_v14  ;;  %v1089_v37 = vmul.f32 %v1525_v25, %v2056_v29  ;;  %v2203_v38 = vadd.f32 %v2018_v1, %v439_v31  ;;  %1548 = vpow2.f32 %v1294_v12  ;;  %v2246_v9 = vmul.f32 -1.442695, %v2194_v21 }
 0x100   :  { %v1529_v42 = vpop.eup %1528  ;;  %1122 = vst.msk [vmem:[%s2662_s3 + $0x28] sm:$0xff] %vm1116_vm2, %v1057_v22  ;;  %v1056_v23 = vmul.f32 %v1527_v36, %v2059_v32  ;;  %v2212_v44 = vadd.f32 %v2018_v1, %v599_v34  ;;  %1550 = vpow2.f32 %v1261_v18  ;;  %v1414_v32 = vpop.f32.mrb[20].mxu0  ;;  %v2260_v18 = vadd.f32 %v2109_v46, %v2018_v1 }
 0x101   :  { %v1531_v29 = vpop.eup %1530  ;;  %1154 = vst.msk [vmem:[%s2662_s3 + $0x128] sm:$0xff] %vm1116_vm2, %v1089_v37  ;;  %v1088_v48 = vmul.f32 %v1529_v42, %v2062_v33  ;;  %v1462_v50 = vpop.f32.mrb[20].mxu1  ;;  %1552 = vpow2.f32 %v1293_v30  ;;  %v2229_v54 = vadd.f32 %v1414_v32, %v2018_v1  ;;  %v2273_v46 = vadd.f32 %v2018_v1, %v2111_v47 }
 0x102   :  { %v1533_v52 = vpop.eup %1532  ;;  %1121 = vst.msk [vmem:[%s2662_s3 + $0x20] sm:$0xff] %vm1116_vm2, %v1056_v23  ;;  %v1059_v53 = vmul.f32 %v1531_v29, %v2069_v40  ;;  %v449_v33 = vpop.f32.mrb[21].mxu0  ;;  %1554 = vpow2.f32 %v1264_v28  ;;  %v2236_v57 = vadd.f32 %v1462_v50, %v2018_v1  ;;  %v2283_v32 = vadd.f32 %v2018_v1, %v2118_v4 }
 0x103   :  { %v609_v55 = vpop.f32.mrb[21].mxu1  ;;  %v1535_v56 = vpop.eup %1534  ;;  %1153 = vst.msk [vmem:[%s2662_s3 + $0x120] sm:$0xff] %vm1116_vm2, %v1088_v48  ;;  %v899_v27 = vadd.f32 1.0, %v1533_v52  ;;  %v2239_v60 = vadd.f32 %v2018_v1, %v449_v33  ;;  %1556 = vpow2.f32 %v1296_v43  ;;  %v2279_v48 = vmul.f32 -1.442695, %v2256_v11 }
 0x104   :  { %v1537_v40 = vpop.eup %1536  ;;  %1124 = vst.msk [vmem:[%s2662_s3 + $0x38] sm:$0xff] %vm1116_vm2, %v1059_v53  ;;  %v866_v61 = vadd.f32 1.0, %v1535_v56  ;;  %v2249_v2 = vadd.f32 %v2018_v1, %v609_v55  ;;  %v1417_v12 = vpop.f32.mrb[22].mxu0  ;;  %v2286_v47 = vmul.f32 -1.442695, %v2260_v18 }
 0x105   :  { %v1539_v6 = vpop.eup %1538  ;;  %1558 = vrcp.f32 %v899_v27  ;;  %v898_v16 = vadd.f32 1.0, %v1537_v40  ;;  %v2263_v25 = vadd.f32 %v1417_v12, %v2018_v1  ;;  %v1465_v22 = vpop.f32.mrb[22].mxu1 }
 0x106   :  { %v1541_v15 = vpop.eup %1540  ;;  %1560 = vrcp.f32 %v866_v61  ;;  %v869_v14 = vadd.f32 1.0, %v1539_v6  ;;  %v459_v30 = vpop.f32.mrb[23].mxu0  ;;  %v2266_v36 = vadd.f32 %v1465_v22, %v2018_v1 }
 0x107   :  { %v1543_v31 = vpop.eup %1542  ;;  %1562 = vrcp.f32 %v898_v16  ;;  %v901_v34 = vadd.f32 1.0, %v1541_v15  ;;  %v2269_v41 = vadd.f32 %v2018_v1, %v459_v30  ;;  %v619_v37 = vpop.f32.mrb[23].mxu1  ;;  %v2298_v15 = vmul.f32 -1.442695, %v2273_v46 }
 0x108   :  { %v1545_v28 = vpop.eup %1544  ;;  %1564 = vrcp.f32 %v869_v14  ;;  %v868_v42 = vadd.f32 1.0, %v1543_v31  ;;  %v2276_v23 = vadd.f32 %v2018_v1, %v619_v37  ;;  %v1420_v50 = vpop.f32.mrb[24].mxu0  ;;  %v2304_v31 = vmul.f32 -1.442695, %v2283_v32 }
 0x109   :  { %v1547_v43 = vpop.eup %1546  ;;  %1566 = vrcp.f32 %v901_v34  ;;  %v900_v29 = vadd.f32 1.0, %v1545_v28  ;;  %v2289_v33 = vadd.f32 %v1420_v50, %v2018_v1  ;;  %v1468_v55 = vpop.f32.mrb[24].mxu1  ;;  %v2308_v34 = vadd.f32 %v2138_v8, %v2018_v1 }
 0x10a   :  { %v1549_v52 = vpop.eup %1548  ;;  %1568 = vrcp.f32 %v868_v42  ;;  %v871_v53 = vadd.f32 1.0, %v1547_v43  ;;  %v469_v56 = vpop.f32.mrb[25].mxu0  ;;  %v2292_v61 = vadd.f32 %v1468_v55, %v2018_v1  ;;  %v2312_v43 = vadd.f32 %v2140_v59, %v2018_v1 }
 0x10b   :  { %v1551_v27 = vpop.eup %1550  ;;  %1570 = vrcp.f32 %v900_v29  ;;  %v903_v40 = vadd.f32 1.0, %v1549_v52  ;;  %v2295_v4 = vadd.f32 %v2018_v1, %v469_v56  ;;  %v629_v6 = vpop.f32.mrb[25].mxu1  ;;  %v2326_v59 = vadd.f32 %v2018_v1, %v2152_v63 }
 0x10c   :  { %v1553_v16 = vpop.eup %1552  ;;  %1572 = vrcp.f32 %v871_v53  ;;  %v870_v12 = vadd.f32 1.0, %v1551_v27  ;;  %v2301_v14 = vadd.f32 %v2018_v1, %v629_v6  ;;  %v1423_v37 = vpop.f32.mrb[26].mxu0 }
 0x10d   :  { %v1555_v22 = vpop.eup %1554  ;;  %1574 = vrcp.f32 %v903_v40  ;;  %v902_v30 = vadd.f32 1.0, %v1553_v16  ;;  %v2315_v29 = vadd.f32 %v1423_v37, %v2018_v1  ;;  %v1471_v50 = vpop.f32.mrb[26].mxu1  ;;  %v2335_v37 = vadd.f32 %v2018_v1, %v2154_v0 }
 0x10e   :  { %v1557_v28 = vpop.eup %1556  ;;  %1576 = vrcp.f32 %v870_v12  ;;  %v873_v42 = vadd.f32 1.0, %v1555_v22  ;;  %v479_v52 = vpop.f32.mrb[27].mxu0  ;;  %v2318_v56 = vadd.f32 %v1471_v50, %v2018_v1 }
 0x10f   :  { %v1559_v53 = vpop.eup %1558  ;;  %1578 = vrcp.f32 %v902_v30  ;;  %v905_v55 = vadd.f32 1.0, %v1557_v28  ;;  %v2321_v8 = vadd.f32 %v2018_v1, %v479_v52  ;;  %v639_v27 = vpop.f32.mrb[27].mxu1  ;;  %v1268_v30 = vmul.f32 -1.442695, %v2308_v34 }
 0x110   :  { %v1561_v40 = vpop.eup %1560  ;;  %v1091_v6 = vmul.f32 %v1559_v53, %v2075_v10  ;;  %1580 = vrcp.f32 %v873_v42  ;;  %v2329_v16 = vadd.f32 %v2018_v1, %v639_v27  ;;  %v1426_v28 = vpop.f32.mrb[28].mxu0 }
 0x111   :  { %v1563_v12 = vpop.eup %1562  ;;  %v1058_v22 = vmul.f32 %v1561_v40, %v2078_v13  ;;  %1582 = vrcp.f32 %v905_v55  ;;  %v1474_v10 = vpop.f32.mrb[28].mxu1  ;;  %v1300_v13 = vmul.f32 -1.442695, %v2312_v43  ;;  %v2345_v50 = vadd.f32 %v1426_v28, %v2018_v1 }
 0x112   :  { %v1565_v42 = vpop.eup %1564  ;;  %1156 = vst.msk [vmem:[%s2662_s3 + $0x138] sm:$0xff] %vm1116_vm2, %v1091_v6  ;;  %v1090_v63 = vmul.f32 %v1563_v12, %v2083_v19  ;;  %1584 = vpow2.f32 %v2246_v9  ;;  %v489_v52 = vpop.f32.mrb[29].mxu0  ;;  %v2354_v19 = vadd.f32 %v1474_v10, %v2018_v1 }
 0x113   :  { %v649_v0 = vpop.f32.mrb[29].mxu1  ;;  %v1567_v53 = vpop.eup %1566  ;;  %1123 = vst.msk [vmem:[%s2662_s3 + $0x30] sm:$0xff] %vm1116_vm2, %v1058_v22  ;;  %v1061_v55 = vmul.f32 %v1565_v42, %v2090_v26  ;;  %1586 = vpow2.f32 %v2252_v3  ;;  %v2357_v9 = vadd.f32 %v2018_v1, %v489_v52  ;;  %v2367_v26 = vadd.f32 %v2182_v24, %v2018_v1 }
 0x114   :  { %v1569_v27 = vpop.eup %1568  ;;  %1155 = vst.msk [vmem:[%s2662_s3 + $0x130] sm:$0xff] %vm1116_vm2, %v1090_v63  ;;  %v1093_v40 = vmul.f32 %v1567_v53, %v2096_v35  ;;  %1588 = vpow2.f32 %v2279_v48  ;;  %v2370_v3 = vadd.f32 %v2018_v1, %v649_v0  ;;  %v1267_v35 = vmul.f32 -1.442695, %v2326_v59  ;;  %v1429_v24 = vpop.f32.mrb[30].mxu0 }
 0x115   :  { %v1571_v6 = vpop.eup %1570  ;;  %1126 = vst.msk [vmem:[%s2662_s3 + $0x48] sm:$0xff] %vm1116_vm2, %v1061_v55  ;;  %v1060_v12 = vmul.f32 %v1569_v27, %v2100_v39  ;;  %1590 = vpow2.f32 %v2286_v47  ;;  %v2381_v48 = vadd.f32 %v2184_v20, %v2018_v1  ;;  %v1477_v22 = vpop.f32.mrb[30].mxu1  ;;  %v1299_v39 = vmul.f32 -1.442695, %v2335_v37 }
 0x116   :  { %v1573_v28 = vpop.eup %1572  ;;  %1158 = vst.msk [vmem:[%s2662_s3 + $0x148] sm:$0xff] %vm1116_vm2, %v1093_v40  ;;  %v1092_v10 = vmul.f32 %v1571_v6, %v2107_v45  ;;  %1592 = vpow2.f32 %v2298_v15  ;;  %v2391_v47 = vadd.f32 %v1429_v24, %v2018_v1  ;;  %v499_v42 = vpop.f32.mrb[31].mxu0  ;;  %v2400_v45 = vadd.f32 %v1477_v22, %v2018_v1 }
 0x117   :  { %v659_v20 = vpop.f32.mrb[31].mxu1  ;;  %v1575_v63 = vpop.eup %1574  ;;  %1125 = vst.msk [vmem:[%s2662_s3 + $0x40] sm:$0xff] %vm1116_vm2, %v1060_v12  ;;  %v1063_v52 = vmul.f32 %v1573_v28, %v2116_v51  ;;  %1594 = vpow2.f32 %v2304_v31  ;;  %v2403_v15 = vadd.f32 %v2018_v1, %v499_v42  ;;  %v1270_v55 = vmul.f32 -1.442695, %v2367_v26 }
 0x118   :  { %v1577_v0 = vpop.eup %1576  ;;  %1157 = vst.msk [vmem:[%s2662_s3 + $0x140] sm:$0xff] %vm1116_vm2, %v1092_v10  ;;  %v1095_v53 = vmul.f32 %v1575_v63, %v2127_v5  ;;  %1596 = vpow2.f32 %v1268_v30  ;;  %v2412_v51 = vadd.f32 %v2018_v1, %v659_v20  ;;  %v1302_v40 = vmul.f32 -1.442695, %v2381_v48 }
 0x119   :  { %v1579_v31 = vpop.eup %1578  ;;  %1128 = vst.msk [vmem:[%s2662_s3 + $0x58] sm:$0xff] %vm1116_vm2, %v1063_v52  ;;  %v1062_v27 = vmul.f32 %v1577_v0, %v2136_v58  ;;  %1598 = vpow2.f32 %v1300_v13  ;;  %v1269_v5 = vmul.f32 -1.442695, %v2203_v38 }
 0x11a   :  { %v1581_v6 = vpop.eup %1580  ;;  %1160 = vst.msk [vmem:[%s2662_s3 + $0x158] sm:$0xff] %vm1116_vm2, %v1095_v53  ;;  %v1094_v1 = vmul.f32 %v1579_v31, %v2150_v62  ;;  %1600 = vpow2.f32 %v1267_v35 }
 0x11b   :  { %v1583_v30 = vpop.eup %1582  ;;  %1127 = vst.msk [vmem:[%s2662_s3 + $0x50] sm:$0xff] %vm1116_vm2, %v1062_v27  ;;  %v1065_v58 = vmul.f32 %v1581_v6, %v2164_v7  ;;  %1602 = vpow2.f32 %v1299_v39 }
 0x11c   :  { %v1585_v13 = vpop.eup %1584  ;;  %1159 = vst.msk [vmem:[%s2662_s3 + $0x150] sm:$0xff] %vm1116_vm2, %v1094_v1  ;;  %v1097_v62 = vmul.f32 %v1583_v30, %v2174_v17  ;;  %1604 = vpow2.f32 %v1270_v55 }
 0x11d   :  { %v1587_v12 = vpop.eup %1586  ;;  %1130 = vst.msk [vmem:[%s2662_s3 + $0x68] sm:$0xff] %vm1116_vm2, %v1065_v58  ;;  %v872_v35 = vadd.f32 1.0, %v1585_v13  ;;  %1606 = vpow2.f32 %v1302_v40  ;;  %v1301_v13 = vmul.f32 -1.442695, %v2212_v44 }
 0x11e   :  { %v1589_v24 = vpop.eup %1588  ;;  %1162 = vst.msk [vmem:[%s2662_s3 + $0x168] sm:$0xff] %vm1116_vm2, %v1097_v62  ;;  %v904_v7 = vadd.f32 1.0, %v1587_v12  ;;  %1608 = vpow2.f32 %v1269_v5 }
 0x11f   :  { %v1591_v22 = vpop.eup %1590  ;;  %1610 = vrcp.f32 %v872_v35  ;;  %v875_v17 = vadd.f32 1.0, %v1589_v24  ;;  %v1272_v35 = vmul.f32 -1.442695, %v2229_v54 }
 0x120   :  { %v1593_v28 = vpop.eup %1592  ;;  %1612 = vrcp.f32 %v904_v7  ;;  %v907_v10 = vadd.f32 1.0, %v1591_v22  ;;  %v1304_v22 = vmul.f32 -1.442695, %v2236_v57 }
 0x121   :  { %v1595_v39 = vpop.eup %1594  ;;  %1614 = vrcp.f32 %v875_v17  ;;  %v874_v42 = vadd.f32 1.0, %v1593_v28 }
 0x122   :  { %v1597_v20 = vpop.eup %1596  ;;  %1616 = vrcp.f32 %v907_v10  ;;  %v906_v63 = vadd.f32 1.0, %v1595_v39  ;;  %v1271_v10 = vmul.f32 -1.442695, %v2239_v60 }
 0x123   :  { %v1599_v52 = vpop.eup %1598  ;;  %1618 = vrcp.f32 %v874_v42  ;;  %v877_v0 = vadd.f32 1.0, %v1597_v20 }
 0x124   :  { %v1601_v53 = vpop.eup %1600  ;;  %1620 = vrcp.f32 %v906_v63  ;;  %v909_v55 = vadd.f32 1.0, %v1599_v52  ;;  %v1274_v63 = vmul.f32 -1.442695, %v2263_v25 }
 0x125   :  { %v1603_v31 = vpop.eup %1602  ;;  %1622 = vrcp.f32 %v877_v0  ;;  %v876_v27 = vadd.f32 1.0, %v1601_v53  ;;  %v1306_v0 = vmul.f32 -1.442695, %v2266_v36 }
 0x126   :  { %v1605_v40 = vpop.eup %1604  ;;  %1624 = vrcp.f32 %v909_v55  ;;  %v908_v6 = vadd.f32 1.0, %v1603_v31  ;;  %v1273_v55 = vmul.f32 -1.442695, %v2269_v41 }
 0x127   :  { %v1607_v1 = vpop.eup %1606  ;;  %1626 = vrcp.f32 %v876_v27  ;;  %v879_v5 = vadd.f32 1.0, %v1605_v40  ;;  %v1305_v27 = vmul.f32 -1.442695, %v2276_v23 }
 0x128   :  { %v1609_v30 = vpop.eup %1608  ;;  %1628 = vrcp.f32 %v908_v6  ;;  %v911_v58 = vadd.f32 1.0, %v1607_v1  ;;  %v1276_v6 = vmul.f32 -1.442695, %v2289_v33 }
 0x129   :  { %v1611_v62 = vpop.eup %1610  ;;  %1630 = vrcp.f32 %v879_v5  ;;  %v878_v12 = vadd.f32 1.0, %v1609_v30  ;;  %v1308_v5 = vmul.f32 -1.442695, %v2292_v61 }
 0x12a   :  { %v1613_v24 = vpop.eup %1612  ;;  %v1064_v7 = vmul.f32 %v1611_v62, %v2194_v21  ;;  %1632 = vrcp.f32 %v911_v58  ;;  %v1303_v21 = vmul.f32 -1.442695, %v2249_v2  ;;  %v1275_v58 = vmul.f32 -1.442695, %v2295_v4 }
 0x12b   :  { %v1615_v17 = vpop.eup %1614  ;;  %v1096_v28 = vmul.f32 %v1613_v24, %v2221_v49  ;;  %1634 = vrcp.f32 %v878_v12  ;;  %v1307_v62 = vmul.f32 -1.442695, %v2301_v14 }
 0x12c   :  { %v1617_v39 = vpop.eup %1616  ;;  %1129 = vst.msk [vmem:[%s2662_s3 + $0x60] sm:$0xff] %vm1116_vm2, %v1064_v7  ;;  %v1067_v42 = vmul.f32 %v1615_v17, %v2256_v11  ;;  %1636 = vpow2.f32 %v1301_v13 }
 0x12d   :  { %v1619_v20 = vpop.eup %1618  ;;  %1161 = vst.msk [vmem:[%s2662_s3 + $0x160] sm:$0xff] %vm1116_vm2, %v1096_v28  ;;  %v1099_v49 = vmul.f32 %v1617_v39, %v2260_v18  ;;  %1638 = vpow2.f32 %v1272_v35 }
 0x12e   :  { %v1621_v52 = vpop.eup %1620  ;;  %1132 = vst.msk [vmem:[%s2662_s3 + $0x78] sm:$0xff] %vm1116_vm2, %v1067_v42  ;;  %v1066_v11 = vmul.f32 %v1619_v20, %v2273_v46  ;;  %1640 = vpow2.f32 %v1304_v22 }
 0x12f   :  { %v1623_v53 = vpop.eup %1622  ;;  %1164 = vst.msk [vmem:[%s2662_s3 + $0x178] sm:$0xff] %vm1116_vm2, %v1099_v49  ;;  %v1098_v18 = vmul.f32 %v1621_v52, %v2283_v32  ;;  %1642 = vpow2.f32 %v1271_v10 }
 0x130   :  { %v1625_v31 = vpop.eup %1624  ;;  %1131 = vst.msk [vmem:[%s2662_s3 + $0x70] sm:$0xff] %vm1116_vm2, %v1066_v11  ;;  %v1069_v46 = vmul.f32 %v1623_v53, %v2308_v34  ;;  %1644 = vpow2.f32 %v1303_v21 }
 0x131   :  { %v1627_v40 = vpop.eup %1626  ;;  %1163 = vst.msk [vmem:[%s2662_s3 + $0x170] sm:$0xff] %vm1116_vm2, %v1098_v18  ;;  %v1101_v32 = vmul.f32 %v1625_v31, %v2312_v43  ;;  %1646 = vpow2.f32 %v1274_v63 }
 0x132   :  { %v1629_v1 = vpop.eup %1628  ;;  %1134 = vst.msk [vmem:[%s2662_s3 + $0x88] sm:$0xff] %vm1116_vm2, %v1069_v46  ;;  %v1068_v34 = vmul.f32 %v1627_v40, %v2326_v59  ;;  %1648 = vpow2.f32 %v1306_v0 }
 0x133   :  { %v1631_v30 = vpop.eup %1630  ;;  %1166 = vst.msk [vmem:[%s2662_s3 + $0x188] sm:$0xff] %vm1116_vm2, %v1101_v32  ;;  %v1100_v43 = vmul.f32 %v1629_v1, %v2335_v37  ;;  %1650 = vpow2.f32 %v1273_v55  ;;  %v1278_v32 = vmul.f32 -1.442695, %v2315_v29 }
 0x134   :  { %v1633_v13 = vpop.eup %1632  ;;  %1133 = vst.msk [vmem:[%s2662_s3 + $0x80] sm:$0xff] %vm1116_vm2, %v1068_v34  ;;  %v1071_v59 = vmul.f32 %v1631_v30, %v2367_v26  ;;  %1652 = vpow2.f32 %v1305_v27  ;;  %v1310_v34 = vmul.f32 -1.442695, %v2318_v56 }
 0x135   :  { %v1635_v12 = vpop.eup %1634  ;;  %1165 = vst.msk [vmem:[%s2662_s3 + $0x180] sm:$0xff] %vm1116_vm2, %v1100_v43  ;;  %v1103_v37 = vmul.f32 %v1633_v13, %v2381_v48  ;;  %1654 = vpow2.f32 %v1276_v6  ;;  %v1277_v43 = vmul.f32 -1.442695, %v2321_v8 }
 0x136   :  { %v1637_v35 = vpop.eup %1636  ;;  %1136 = vst.msk [vmem:[%s2662_s3 + $0x98] sm:$0xff] %vm1116_vm2, %v1071_v59  ;;  %v1070_v26 = vmul.f32 %v1635_v12, %v2203_v38  ;;  %1656 = vpow2.f32 %v1308_v5  ;;  %v1309_v59 = vmul.f32 -1.442695, %v2329_v16 }
 0x137   :  { %v1639_v24 = vpop.eup %1638  ;;  %1168 = vst.msk [vmem:[%s2662_s3 + $0x198] sm:$0xff] %vm1116_vm2, %v1103_v37  ;;  %v910_v7 = vadd.f32 1.0, %v1637_v35  ;;  %1658 = vpow2.f32 %v1275_v58  ;;  %v1312_v35 = vmul.f32 -1.442695, %v2354_v19 }
 0x138   :  { %v1641_v22 = vpop.eup %1640  ;;  %1135 = vst.msk [vmem:[%s2662_s3 + $0x90] sm:$0xff] %vm1116_vm2, %v1070_v26  ;;  %v881_v48 = vadd.f32 1.0, %v1639_v24  ;;  %1660 = vpow2.f32 %v1307_v62  ;;  %v1279_v24 = vmul.f32 -1.442695, %v2357_v9 }
 0x139   :  { %v1643_v17 = vpop.eup %1642  ;;  %1662 = vrcp.f32 %v910_v7  ;;  %v913_v38 = vadd.f32 1.0, %v1641_v22  ;;  %v1311_v22 = vmul.f32 -1.442695, %v2370_v3 }
 0x13a   :  { %v1645_v28 = vpop.eup %1644  ;;  %1664 = vrcp.f32 %v881_v48  ;;  %v880_v10 = vadd.f32 1.0, %v1643_v17  ;;  %v1282_v17 = vmul.f32 -1.442695, %v2391_v47 }
 0x13b   :  { %v1647_v39 = vpop.eup %1646  ;;  %1666 = vrcp.f32 %v913_v38  ;;  %v912_v42 = vadd.f32 1.0, %v1645_v28  ;;  %v1314_v28 = vmul.f32 -1.442695, %v2400_v45 }
 0x13c   :  { %v1649_v21 = vpop.eup %1648  ;;  %1668 = vrcp.f32 %v880_v10  ;;  %v883_v20 = vadd.f32 1.0, %v1647_v39  ;;  %v1281_v39 = vmul.f32 -1.442695, %v2403_v15 }
 0x13d   :  { %v1651_v49 = vpop.eup %1650  ;;  %1670 = vrcp.f32 %v912_v42  ;;  %v915_v63 = vadd.f32 1.0, %v1649_v21  ;;  %v1313_v21 = vmul.f32 -1.442695, %v2412_v51 }
 0x13e   :  { %v1653_v52 = vpop.eup %1652  ;;  %1672 = vrcp.f32 %v883_v20  ;;  %v882_v11 = vadd.f32 1.0, %v1651_v49 }
 0x13f   :  { %v1655_v0 = vpop.eup %1654  ;;  %1674 = vrcp.f32 %v915_v63  ;;  %v914_v53 = vadd.f32 1.0, %v1653_v52 }
 0x140   :  { %v1657_v18 = vpop.eup %1656  ;;  %1676 = vrcp.f32 %v882_v11  ;;  %v885_v55 = vadd.f32 1.0, %v1655_v0 }
 0x141   :  { %v1659_v31 = vpop.eup %1658  ;;  %1678 = vrcp.f32 %v914_v53  ;;  %v917_v46 = vadd.f32 1.0, %v1657_v18 }
 0x142   :  { %v1661_v27 = vpop.eup %1660  ;;  %1680 = vrcp.f32 %v885_v55  ;;  %v884_v40 = vadd.f32 1.0, %v1659_v31 }
 0x143   :  { %v1663_v6 = vpop.eup %1662  ;;  %1682 = vrcp.f32 %v917_v46  ;;  %v916_v1 = vadd.f32 1.0, %v1661_v27 }
 0x144   :  { %v1665_v5 = vpop.eup %1664  ;;  %v1102_v30 = vmul.f32 %v1663_v6, %v2212_v44  ;;  %1684 = vrcp.f32 %v884_v40  ;;  %v1280_v44 = vmul.f32 -1.442695, %v2345_v50 }
 0x145   :  { %v1667_v58 = vpop.eup %1666  ;;  %v1073_v13 = vmul.f32 %v1665_v5, %v2229_v54  ;;  %1686 = vrcp.f32 %v916_v1 }
 0x146   :  { %v1669_v62 = vpop.eup %1668  ;;  %1167 = vst.msk [vmem:[%s2662_s3 + $0x190] sm:$0xff] %vm1116_vm2, %v1102_v30  ;;  %v1105_v12 = vmul.f32 %v1667_v58, %v2236_v57  ;;  %1688 = vpow2.f32 %v1278_v32 }
 0x147   :  { %v1671_v37 = vpop.eup %1670  ;;  %1138 = vst.msk [vmem:[%s2662_s3 + $0xa8] sm:$0xff] %vm1116_vm2, %v1073_v13  ;;  %v1072_v54 = vmul.f32 %v1669_v62, %v2239_v60  ;;  %1690 = vpow2.f32 %v1310_v34 }
 0x148   :  { %v1673_v26 = vpop.eup %1672  ;;  %1170 = vst.msk [vmem:[%s2662_s3 + $0x1a8] sm:$0xff] %vm1116_vm2, %v1105_v12  ;;  %v1104_v57 = vmul.f32 %v1671_v37, %v2249_v2  ;;  %1692 = vpow2.f32 %v1277_v43 }
 0x149   :  { %v1675_v7 = vpop.eup %1674  ;;  %1137 = vst.msk [vmem:[%s2662_s3 + $0xa0] sm:$0xff] %vm1116_vm2, %v1072_v54  ;;  %v1075_v60 = vmul.f32 %v1673_v26, %v2263_v25  ;;  %1694 = vpow2.f32 %v1309_v59 }
 0x14a   :  { %v1677_v48 = vpop.eup %1676  ;;  %1169 = vst.msk [vmem:[%s2662_s3 + $0x1a0] sm:$0xff] %vm1116_vm2, %v1104_v57  ;;  %v1107_v2 = vmul.f32 %v1675_v7, %v2266_v36  ;;  %1696 = vpow2.f32 %v1280_v44 }
 0x14b   :  { %v1679_v38 = vpop.eup %1678  ;;  %1140 = vst.msk [vmem:[%s2662_s3 + $0xb8] sm:$0xff] %vm1116_vm2, %v1075_v60  ;;  %v1074_v25 = vmul.f32 %v1677_v48, %v2269_v41  ;;  %1698 = vpow2.f32 %v1312_v35 }
 0x14c   :  { %v1681_v10 = vpop.eup %1680  ;;  %1172 = vst.msk [vmem:[%s2662_s3 + $0x1b8] sm:$0xff] %vm1116_vm2, %v1107_v2  ;;  %v1106_v36 = vmul.f32 %v1679_v38, %v2276_v23  ;;  %1700 = vpow2.f32 %v1279_v24 }
 0x14d   :  { %v1683_v42 = vpop.eup %1682  ;;  %1139 = vst.msk [vmem:[%s2662_s3 + $0xb0] sm:$0xff] %vm1116_vm2, %v1074_v25  ;;  %v1077_v41 = vmul.f32 %v1681_v10, %v2289_v33  ;;  %1702 = vpow2.f32 %v1311_v22 }
 0x14e   :  { %v1685_v20 = vpop.eup %1684  ;;  %1171 = vst.msk [vmem:[%s2662_s3 + $0x1b0] sm:$0xff] %vm1116_vm2, %v1106_v36  ;;  %v1109_v23 = vmul.f32 %v1683_v42, %v2292_v61  ;;  %1704 = vpow2.f32 %v1282_v17 }
 0x14f   :  { %v1687_v49 = vpop.eup %1686  ;;  %1142 = vst.msk [vmem:[%s2662_s3 + $0xc8] sm:$0xff] %vm1116_vm2, %v1077_v41  ;;  %v1076_v33 = vmul.f32 %v1685_v20, %v2295_v4  ;;  %1706 = vpow2.f32 %v1314_v28 }
 0x150   :  { %v1689_v63 = vpop.eup %1688  ;;  %1174 = vst.msk [vmem:[%s2662_s3 + $0x1c8] sm:$0xff] %vm1116_vm2, %v1109_v23  ;;  %v1108_v52 = vmul.f32 %v1687_v49, %v2301_v14  ;;  %1708 = vpow2.f32 %v1281_v39 }
 0x151   :  { %v1691_v61 = vpop.eup %1690  ;;  %1141 = vst.msk [vmem:[%s2662_s3 + $0xc0] sm:$0xff] %vm1116_vm2, %v1076_v33  ;;  %v887_v11 = vadd.f32 1.0, %v1689_v63  ;;  %1710 = vpow2.f32 %v1313_v21 }
 0x152   :  { %v1693_v0 = vpop.eup %1692  ;;  %1173 = vst.msk [vmem:[%s2662_s3 + $0x1c0] sm:$0xff] %vm1116_vm2, %v1108_v52  ;;  %v919_v4 = vadd.f32 1.0, %v1691_v61 }
 0x153   :  { %v1695_v53 = vpop.eup %1694  ;;  %1712 = vrcp.f32 %v887_v11  ;;  %v886_v18 = vadd.f32 1.0, %v1693_v0 }
 0x154   :  { %v1697_v14 = vpop.eup %1696  ;;  %1714 = vrcp.f32 %v919_v4  ;;  %v918_v55 = vadd.f32 1.0, %v1695_v53 }
 0x155   :  { %v1699_v31 = vpop.eup %1698  ;;  %1716 = vrcp.f32 %v886_v18  ;;  %v889_v46 = vadd.f32 1.0, %v1697_v14 }
 0x156   :  { %v1701_v27 = vpop.eup %1700  ;;  %1718 = vrcp.f32 %v918_v55  ;;  %v921_v40 = vadd.f32 1.0, %v1699_v31 }
 0x157   :  { %v1703_v32 = vpop.eup %1702  ;;  %1720 = vrcp.f32 %v889_v46  ;;  %v888_v6 = vadd.f32 1.0, %v1701_v27 }
 0x158   :  { %v1705_v1 = vpop.eup %1704  ;;  %1722 = vrcp.f32 %v921_v40  ;;  %v920_v34 = vadd.f32 1.0, %v1703_v32 }
 0x159   :  { %v1707_v5 = vpop.eup %1706  ;;  %1724 = vrcp.f32 %v888_v6  ;;  %v891_v30 = vadd.f32 1.0, %v1705_v1 }
 0x15a   :  { %v1709_v43 = vpop.eup %1708  ;;  %1726 = vrcp.f32 %v920_v34  ;;  %v923_v58 = vadd.f32 1.0, %v1707_v5 }
 0x15b   :  { %v1711_v13 = vpop.eup %1710  ;;  %1728 = vrcp.f32 %v891_v30  ;;  %v890_v59 = vadd.f32 1.0, %v1709_v43 }
 0x15c   :  { %1730 = vrcp.f32 %v923_v58  ;;  %v922_v62 = vadd.f32 1.0, %v1711_v13 }
 0x15d   :  { %v1713_v12 = vpop.eup %1712  ;;  %1732 = vrcp.f32 %v890_v59 }
 0x15e   :  { %v1715_v44 = vpop.eup %1714  ;;  %v1079_v37 = vmul.f32 %v1713_v12, %v2315_v29  ;;  %1734 = vrcp.f32 %v922_v62 }
 0x15f   :  { %v1717_v54 = vpop.eup %1716  ;;  %v1111_v35 = vmul.f32 %v1715_v44, %v2318_v56 }
 0x160   :  { %v1719_v26 = vpop.eup %1718  ;;  %1144 = vst.msk [vmem:[%s2662_s3 + $0xd8] sm:$0xff] %vm1116_vm2, %v1079_v37  ;;  %v1078_v57 = vmul.f32 %v1717_v54, %v2321_v8 }
 0x161   :  { %v1721_v24 = vpop.eup %1720  ;;  %1176 = vst.msk [vmem:[%s2662_s3 + $0x1d8] sm:$0xff] %vm1116_vm2, %v1111_v35  ;;  %v1110_v29 = vmul.f32 %v1719_v26, %v2329_v16 }
 0x162   :  { %v1723_v7 = vpop.eup %1722  ;;  %1143 = vst.msk [vmem:[%s2662_s3 + $0xd0] sm:$0xff] %vm1116_vm2, %v1078_v57  ;;  %v1081_v56 = vmul.f32 %v1721_v24, %v2345_v50 }
 0x163   :  { %v1725_v60 = vpop.eup %1724  ;;  %1175 = vst.msk [vmem:[%s2662_s3 + $0x1d0] sm:$0xff] %vm1116_vm2, %v1110_v29  ;;  %v1113_v8 = vmul.f32 %v1723_v7, %v2354_v19 }
 0x164   :  { %v1727_v22 = vpop.eup %1726  ;;  %1146 = vst.msk [vmem:[%s2662_s3 + $0xe8] sm:$0xff] %vm1116_vm2, %v1081_v56  ;;  %v1080_v16 = vmul.f32 %v1725_v60, %v2357_v9 }
 0x165   :  { %v1729_v48 = vpop.eup %1728  ;;  %1178 = vst.msk [vmem:[%s2662_s3 + $0x1e8] sm:$0xff] %vm1116_vm2, %v1113_v8  ;;  %v1112_v50 = vmul.f32 %v1727_v22, %v2370_v3 }
 0x166   :  { %v1731_v2 = vpop.eup %1730  ;;  %1145 = vst.msk [vmem:[%s2662_s3 + $0xe0] sm:$0xff] %vm1116_vm2, %v1080_v16  ;;  %v1083_v19 = vmul.f32 %v1729_v48, %v2391_v47 }
 0x167   :  { %v1733_v17 = vpop.eup %1732  ;;  %1177 = vst.msk [vmem:[%s2662_s3 + $0x1e0] sm:$0xff] %vm1116_vm2, %v1112_v50  ;;  %v1115_v9 = vmul.f32 %v1731_v2, %v2400_v45 }
 0x168   :  { %v1735_v38 = vpop.eup %1734  ;;  %1148 = vst.msk [vmem:[%s2662_s3 + $0xf8] sm:$0xff] %vm1116_vm2, %v1083_v19  ;;  %v1082_v3 = vmul.f32 %v1733_v17, %v2403_v15 }
 0x169   :  { %1180 = vst.msk [vmem:[%s2662_s3 + $0x1f8] sm:$0xff] %vm1116_vm2, %v1115_v9  ;;  %v1114_v47 = vmul.f32 %v1735_v38, %v2412_v51 }
 0x16a   :  { %1147 = vst.msk [vmem:[%s2662_s3 + $0xf0] sm:$0xff] %vm1116_vm2, %v1082_v3 }
 0x16b   :  { %1179 = vst.msk [vmem:[%s2662_s3 + $0x1f0] sm:$0xff] %vm1116_vm2, %v1114_v47 }

// kernel: _lambda_.9
= control target key start
LH: loop header
LB: loop body
LE: loop exit
PB: predicated region body
PF: predicated region fallthrough
CT: control target
= control target key end

     0   :  { %vm279_vm0 = vcmask 1043456   ;;  %vm86_vm1 = vcmask 31744   ;;  %vm668_vm2 = vcmask 130048   ;;  %s1572_s1 = inlined_call_operand.vmem [shape: f32[4,16], index: 1, kind: input, shape index: {}]   ;;  %s1573_s0 = inlined_call_operand.vmem [shape: f32[512,4], index: 0, kind: input, shape index: {}]   ;;  %s1574_s2 = inlined_call_operand.vmem [shape: f32[1,16], index: 2, kind: input, shape index: {}]   ;;  %s1575_s3 = inlined_call_operand.vmem [shape: f32[512,16], index: 3, kind: output, shape index: {}]  }
   0x1   :  { %v78_v0 = vld [vmem:[%s1572_s1] sm:$0xf]  ;;  %v15_v3 = vld [vmem:[%s1573_s0 + $0x8] sm:$0xff]  ;;  %v16_v5 = vld [vmem:[%s1573_s0 + $0x10] sm:$0xff] }
   0x2   :  { %v14_v1 = vld [vmem:[%s1573_s0] sm:$0xff]  ;;  %868 = vmatprep.subr.msk.mxu0 %vm279_vm0, %v78_v0  ;;  %966 = vmatprep.subr.msk.mxu1 %vm279_vm0, %v78_v0  ;;  %v47_v4 = vld [vmem:[%s1573_s0 + $0x108] sm:$0xff]  ;;  %v48_v6 = vld [vmem:[%s1573_s0 + $0x110] sm:$0xff] }
   0x3   :  { %v46_v2 = vld [vmem:[%s1573_s0 + $0x100] sm:$0xff]  ;;  %869 = vmatpush3.msk.msra.mxu0 %vm279_vm0, %v78_v0  ;;  %967 = vmatpush3.msk.msra.mxu1 %vm279_vm0, %v78_v0  ;;  %v17_v7 = vld [vmem:[%s1573_s0 + $0x18] sm:$0xff]  ;;  %v19_v11 = vld [vmem:[%s1573_s0 + $0x28] sm:$0xff] }
   0x4   :  { %870 = vmatprep.mubr.msk.f32.mxu0 %vm86_vm1, %v14_v1  ;;  %918 = vmatprep.mubr.msk.f32.mxu1 %vm86_vm1, %v46_v2  ;;  %v49_v8 = vld [vmem:[%s1573_s0 + $0x118] sm:$0xff]  ;;  %v18_v9 = vld [vmem:[%s1573_s0 + $0x20] sm:$0xff]  ;;  %v51_v12 = vld [vmem:[%s1573_s0 + $0x128] sm:$0xff] }
   0x5   :  { %871 = vmatmul.mubr.msk.f32.vlgmr.msra.gmra.mrb[0].mxu0 %vm86_vm1, %v15_v3  ;;  %919 = vmatmul.mubr.msk.f32.vlgmr.msra.gmra.mrb[0].mxu1 %vm86_vm1, %v47_v4  ;;  %v50_v10 = vld [vmem:[%s1573_s0 + $0x120] sm:$0xff]  ;;  %v20_v13 = vld [vmem:[%s1573_s0 + $0x30] sm:$0xff]  ;;  %v21_v15 = vld [vmem:[%s1573_s0 + $0x38] sm:$0xff] }
   0x6   :  { %873 = vmatprep.mubr.msk.f32.mxu0 %vm86_vm1, %v16_v5  ;;  %921 = vmatprep.mubr.msk.f32.mxu1 %vm86_vm1, %v48_v6  ;;  %v52_v14 = vld [vmem:[%s1573_s0 + $0x130] sm:$0xff]  ;;  %v53_v16 = vld [vmem:[%s1573_s0 + $0x138] sm:$0xff]  ;;  %v22_v17 = vld [vmem:[%s1573_s0 + $0x40] sm:$0xff] }
   0x7   :  { %v54_v18 = vld [vmem:[%s1573_s0 + $0x140] sm:$0xff]  ;;  %v23_v19 = vld [vmem:[%s1573_s0 + $0x48] sm:$0xff]  ;;  %v24_v21 = vld [vmem:[%s1573_s0 + $0x50] sm:$0xff] }
   0x8   :  { %v55_v20 = vld [vmem:[%s1573_s0 + $0x148] sm:$0xff]  ;;  %v56_v22 = vld [vmem:[%s1573_s0 + $0x150] sm:$0xff]  ;;  %v25_v23 = vld [vmem:[%s1573_s0 + $0x58] sm:$0xff] }
   0x9   :  { %874 = vmatmul.mubr.msk.f32.gmra.mrb[2].mxu0 %vm86_vm1, %v17_v7  ;;  %922 = vmatmul.mubr.msk.f32.gmra.mrb[2].mxu1 %vm86_vm1, %v49_v8  ;;  %v57_v24 = vld [vmem:[%s1573_s0 + $0x158] sm:$0xff]  ;;  %v26_v25 = vld [vmem:[%s1573_s0 + $0x60] sm:$0xff]  ;;  %v27_v27 = vld [vmem:[%s1573_s0 + $0x68] sm:$0xff] }
   0xa   :  { %876 = vmatprep.mubr.msk.f32.mxu0 %vm86_vm1, %v18_v9  ;;  %924 = vmatprep.mubr.msk.f32.mxu1 %vm86_vm1, %v50_v10  ;;  %v58_v26 = vld [vmem:[%s1573_s0 + $0x160] sm:$0xff]  ;;  %v59_v28 = vld [vmem:[%s1573_s0 + $0x168] sm:$0xff]  ;;  %v28_v29 = vld [vmem:[%s1573_s0 + $0x70] sm:$0xff] }
   0xb   :  { %v60_v30 = vld [vmem:[%s1573_s0 + $0x170] sm:$0xff]  ;;  %v29_v31 = vld [vmem:[%s1573_s0 + $0x78] sm:$0xff]  ;;  %v30_v33 = vld [vmem:[%s1573_s0 + $0x80] sm:$0xff] }
   0xc   :  { %v61_v32 = vld [vmem:[%s1573_s0 + $0x178] sm:$0xff]  ;;  %v62_v34 = vld [vmem:[%s1573_s0 + $0x180] sm:$0xff]  ;;  %v31_v35 = vld [vmem:[%s1573_s0 + $0x88] sm:$0xff] }
   0xd   :  { %877 = vmatmul.mubr.msk.f32.gmra.mrb[4].mxu0 %vm86_vm1, %v19_v11  ;;  %925 = vmatmul.mubr.msk.f32.gmra.mrb[4].mxu1 %vm86_vm1, %v51_v12  ;;  %v63_v36 = vld [vmem:[%s1573_s0 + $0x188] sm:$0xff]  ;;  %v32_v37 = vld [vmem:[%s1573_s0 + $0x90] sm:$0xff]  ;;  %v33_v39 = vld [vmem:[%s1573_s0 + $0x98] sm:$0xff] }
   0xe   :  { %879 = vmatprep.mubr.msk.f32.mxu0 %vm86_vm1, %v20_v13  ;;  %927 = vmatprep.mubr.msk.f32.mxu1 %vm86_vm1, %v52_v14  ;;  %v64_v38 = vld [vmem:[%s1573_s0 + $0x190] sm:$0xff]  ;;  %v65_v40 = vld [vmem:[%s1573_s0 + $0x198] sm:$0xff]  ;;  %v34_v41 = vld [vmem:[%s1573_s0 + $0xa0] sm:$0xff] }
   0xf   :  { %v66_v42 = vld [vmem:[%s1573_s0 + $0x1a0] sm:$0xff]  ;;  %v35_v43 = vld [vmem:[%s1573_s0 + $0xa8] sm:$0xff]  ;;  %v36_v45 = vld [vmem:[%s1573_s0 + $0xb0] sm:$0xff] }
  0x10   :  { %v67_v44 = vld [vmem:[%s1573_s0 + $0x1a8] sm:$0xff]  ;;  %v68_v46 = vld [vmem:[%s1573_s0 + $0x1b0] sm:$0xff]  ;;  %v37_v47 = vld [vmem:[%s1573_s0 + $0xb8] sm:$0xff] }
  0x11   :  { %880 = vmatmul.mubr.msk.f32.gmra.mrb[6].mxu0 %vm86_vm1, %v21_v15  ;;  %928 = vmatmul.mubr.msk.f32.gmra.mrb[6].mxu1 %vm86_vm1, %v53_v16  ;;  %v69_v48 = vld [vmem:[%s1573_s0 + $0x1b8] sm:$0xff]  ;;  %v38_v49 = vld [vmem:[%s1573_s0 + $0xc0] sm:$0xff]  ;;  %v39_v51 = vld [vmem:[%s1573_s0 + $0xc8] sm:$0xff] }
  0x12   :  { %882 = vmatprep.mubr.msk.f32.mxu0 %vm86_vm1, %v22_v17  ;;  %930 = vmatprep.mubr.msk.f32.mxu1 %vm86_vm1, %v54_v18  ;;  %v70_v50 = vld [vmem:[%s1573_s0 + $0x1c0] sm:$0xff]  ;;  %v71_v52 = vld [vmem:[%s1573_s0 + $0x1c8] sm:$0xff]  ;;  %v40_v53 = vld [vmem:[%s1573_s0 + $0xd0] sm:$0xff] }
  0x13   :  { %v72_v54 = vld [vmem:[%s1573_s0 + $0x1d0] sm:$0xff]  ;;  %v41_v55 = vld [vmem:[%s1573_s0 + $0xd8] sm:$0xff]  ;;  %v42_v57 = vld [vmem:[%s1573_s0 + $0xe0] sm:$0xff] }
  0x14   :  { %v73_v56 = vld [vmem:[%s1573_s0 + $0x1d8] sm:$0xff]  ;;  %v74_v58 = vld [vmem:[%s1573_s0 + $0x1e0] sm:$0xff]  ;;  %v43_v59 = vld [vmem:[%s1573_s0 + $0xe8] sm:$0xff] }
  0x15   :  { %883 = vmatmul.mubr.msk.f32.gmra.mrb[8].mxu0 %vm86_vm1, %v23_v19  ;;  %931 = vmatmul.mubr.msk.f32.gmra.mrb[8].mxu1 %vm86_vm1, %v55_v20  ;;  %v75_v60 = vld [vmem:[%s1573_s0 + $0x1e8] sm:$0xff]  ;;  %v44_v61 = vld [vmem:[%s1573_s0 + $0xf0] sm:$0xff]  ;;  %v45_v63 = vld [vmem:[%s1573_s0 + $0xf8] sm:$0xff] }
  0x16   :  { %885 = vmatprep.mubr.msk.f32.mxu0 %vm86_vm1, %v24_v21  ;;  %933 = vmatprep.mubr.msk.f32.mxu1 %vm86_vm1, %v56_v22  ;;  %v76_v62 = vld [vmem:[%s1573_s0 + $0x1f0] sm:$0xff]  ;;  %v77_v0 = vld [vmem:[%s1573_s0 + $0x1f8] sm:$0xff]  ;;  %v1250_v1 = vld [vmem:[%s1574_s2] ss:$0 sm:$0xff] }
  0x19   :  { %886 = vmatmul.mubr.msk.f32.gmra.mrb[10].mxu0 %vm86_vm1, %v25_v23  ;;  %934 = vmatmul.mubr.msk.f32.gmra.mrb[10].mxu1 %vm86_vm1, %v57_v24 }
  0x1a   :  { %888 = vmatprep.mubr.msk.f32.mxu0 %vm86_vm1, %v26_v25  ;;  %936 = vmatprep.mubr.msk.f32.mxu1 %vm86_vm1, %v58_v26 }
  0x1d   :  { %889 = vmatmul.mubr.msk.f32.gmra.mrb[12].mxu0 %vm86_vm1, %v27_v27  ;;  %937 = vmatmul.mubr.msk.f32.gmra.mrb[12].mxu1 %vm86_vm1, %v59_v28 }
  0x1e   :  { %891 = vmatprep.mubr.msk.f32.mxu0 %vm86_vm1, %v28_v29  ;;  %939 = vmatprep.mubr.msk.f32.mxu1 %vm86_vm1, %v60_v30 }
  0x21   :  { %892 = vmatmul.mubr.msk.f32.gmra.mrb[14].mxu0 %vm86_vm1, %v29_v31  ;;  %940 = vmatmul.mubr.msk.f32.gmra.mrb[14].mxu1 %vm86_vm1, %v61_v32 }
  0x22   :  { %894 = vmatprep.mubr.msk.f32.mxu0 %vm86_vm1, %v30_v33  ;;  %942 = vmatprep.mubr.msk.f32.mxu1 %vm86_vm1, %v62_v34 }
  0x25   :  { %895 = vmatmul.mubr.msk.f32.gmra.mrb[16].mxu0 %vm86_vm1, %v31_v35  ;;  %943 = vmatmul.mubr.msk.f32.gmra.mrb[16].mxu1 %vm86_vm1, %v63_v36 }
  0x26   :  { %897 = vmatprep.mubr.msk.f32.mxu0 %vm86_vm1, %v32_v37  ;;  %945 = vmatprep.mubr.msk.f32.mxu1 %vm86_vm1, %v64_v38 }
  0x29   :  { %898 = vmatmul.mubr.msk.f32.gmra.mrb[18].mxu0 %vm86_vm1, %v33_v39  ;;  %946 = vmatmul.mubr.msk.f32.gmra.mrb[18].mxu1 %vm86_vm1, %v65_v40 }
  0x2a   :  { %900 = vmatprep.mubr.msk.f32.mxu0 %vm86_vm1, %v34_v41  ;;  %948 = vmatprep.mubr.msk.f32.mxu1 %vm86_vm1, %v66_v42 }
  0x2d   :  { %901 = vmatmul.mubr.msk.f32.gmra.mrb[20].mxu0 %vm86_vm1, %v35_v43  ;;  %949 = vmatmul.mubr.msk.f32.gmra.mrb[20].mxu1 %vm86_vm1, %v67_v44 }
  0x2e   :  { %903 = vmatprep.mubr.msk.f32.mxu0 %vm86_vm1, %v36_v45  ;;  %951 = vmatprep.mubr.msk.f32.mxu1 %vm86_vm1, %v68_v46 }
  0x31   :  { %904 = vmatmul.mubr.msk.f32.gmra.mrb[22].mxu0 %vm86_vm1, %v37_v47  ;;  %952 = vmatmul.mubr.msk.f32.gmra.mrb[22].mxu1 %vm86_vm1, %v69_v48 }
  0x32   :  { %906 = vmatprep.mubr.msk.f32.mxu0 %vm86_vm1, %v38_v49  ;;  %954 = vmatprep.mubr.msk.f32.mxu1 %vm86_vm1, %v70_v50 }
  0x35   :  { %907 = vmatmul.mubr.msk.f32.gmra.mrb[24].mxu0 %vm86_vm1, %v39_v51  ;;  %955 = vmatmul.mubr.msk.f32.gmra.mrb[24].mxu1 %vm86_vm1, %v71_v52 }
  0x36   :  { %909 = vmatprep.mubr.msk.f32.mxu0 %vm86_vm1, %v40_v53  ;;  %957 = vmatprep.mubr.msk.f32.mxu1 %vm86_vm1, %v72_v54 }
  0x39   :  { %910 = vmatmul.mubr.msk.f32.gmra.mrb[26].mxu0 %vm86_vm1, %v41_v55  ;;  %958 = vmatmul.mubr.msk.f32.gmra.mrb[26].mxu1 %vm86_vm1, %v73_v56 }
  0x3a   :  { %912 = vmatprep.mubr.msk.f32.mxu0 %vm86_vm1, %v42_v57  ;;  %960 = vmatprep.mubr.msk.f32.mxu1 %vm86_vm1, %v74_v58 }
  0x3d   :  { %913 = vmatmul.mubr.msk.f32.gmra.mrb[28].mxu0 %vm86_vm1, %v43_v59  ;;  %961 = vmatmul.mubr.msk.f32.gmra.mrb[28].mxu1 %vm86_vm1, %v75_v60 }
  0x3e   :  { %915 = vmatprep.mubr.msk.f32.mxu0 %vm86_vm1, %v44_v61  ;;  %963 = vmatprep.mubr.msk.f32.mxu1 %vm86_vm1, %v76_v62 }
  0x41   :  { %916 = vmatmul.mubr.msk.f32.gmra.mrb[30].mxu0 %vm86_vm1, %v45_v63  ;;  %964 = vmatmul.mubr.msk.f32.gmra.mrb[30].mxu1 %vm86_vm1, %v77_v0 }
  0xd8   :  { %v872_v2 = vpop.f32.mrb[0].mxu0  ;;  %v920_v3 = vpop.f32.mrb[0].mxu1 }
  0xd9   :  { %v355_v4 = vadd.f32 %v872_v2, %v1250_v1  ;;  %v515_v5 = vadd.f32 %v920_v3, %v1250_v1  ;;  %v349_v6 = vpop.f32.mrb[1].mxu0  ;;  %v509_v7 = vpop.f32.mrb[1].mxu1 }
  0xda   :  { %v350_v8 = vadd.f32 %v1250_v1, %v349_v6  ;;  %v510_v9 = vadd.f32 %v1250_v1, %v509_v7 }
  0xdb   :  { %670 = vst.msk [vmem:[%s1575_s3 + $0x8] sm:$0xff] %vm668_vm2, %v355_v4  ;;  %702 = vst.msk [vmem:[%s1575_s3 + $0x108] sm:$0xff] %vm668_vm2, %v515_v5 }
  0xdc   :  { %669 = vst.msk [vmem:[%s1575_s3] sm:$0xff] %vm668_vm2, %v350_v8  ;;  %701 = vst.msk [vmem:[%s1575_s3 + $0x100] sm:$0xff] %vm668_vm2, %v510_v9  ;;  %v875_v10 = vpop.f32.mrb[2].mxu0  ;;  %v923_v11 = vpop.f32.mrb[2].mxu1 }
  0xdd   :  { %v365_v12 = vadd.f32 %v875_v10, %v1250_v1  ;;  %v525_v13 = vadd.f32 %v923_v11, %v1250_v1  ;;  %v359_v14 = vpop.f32.mrb[3].mxu0  ;;  %v519_v15 = vpop.f32.mrb[3].mxu1 }
  0xde   :  { %v360_v16 = vadd.f32 %v1250_v1, %v359_v14  ;;  %v520_v17 = vadd.f32 %v1250_v1, %v519_v15 }
  0xdf   :  { %672 = vst.msk [vmem:[%s1575_s3 + $0x18] sm:$0xff] %vm668_vm2, %v365_v12  ;;  %704 = vst.msk [vmem:[%s1575_s3 + $0x118] sm:$0xff] %vm668_vm2, %v525_v13 }
  0xe0   :  { %671 = vst.msk [vmem:[%s1575_s3 + $0x10] sm:$0xff] %vm668_vm2, %v360_v16  ;;  %703 = vst.msk [vmem:[%s1575_s3 + $0x110] sm:$0xff] %vm668_vm2, %v520_v17  ;;  %v878_v18 = vpop.f32.mrb[4].mxu0  ;;  %v926_v19 = vpop.f32.mrb[4].mxu1 }
  0xe1   :  { %v375_v20 = vadd.f32 %v878_v18, %v1250_v1  ;;  %v535_v21 = vadd.f32 %v926_v19, %v1250_v1  ;;  %v369_v22 = vpop.f32.mrb[5].mxu0  ;;  %v529_v23 = vpop.f32.mrb[5].mxu1 }
  0xe2   :  { %v370_v24 = vadd.f32 %v1250_v1, %v369_v22  ;;  %v530_v25 = vadd.f32 %v1250_v1, %v529_v23 }
  0xe3   :  { %674 = vst.msk [vmem:[%s1575_s3 + $0x28] sm:$0xff] %vm668_vm2, %v375_v20  ;;  %706 = vst.msk [vmem:[%s1575_s3 + $0x128] sm:$0xff] %vm668_vm2, %v535_v21 }
  0xe4   :  { %673 = vst.msk [vmem:[%s1575_s3 + $0x20] sm:$0xff] %vm668_vm2, %v370_v24  ;;  %705 = vst.msk [vmem:[%s1575_s3 + $0x120] sm:$0xff] %vm668_vm2, %v530_v25  ;;  %v881_v26 = vpop.f32.mrb[6].mxu0  ;;  %v929_v27 = vpop.f32.mrb[6].mxu1 }
  0xe5   :  { %v385_v28 = vadd.f32 %v881_v26, %v1250_v1  ;;  %v545_v29 = vadd.f32 %v929_v27, %v1250_v1  ;;  %v379_v30 = vpop.f32.mrb[7].mxu0  ;;  %v539_v31 = vpop.f32.mrb[7].mxu1 }
  0xe6   :  { %v380_v32 = vadd.f32 %v1250_v1, %v379_v30  ;;  %v540_v33 = vadd.f32 %v1250_v1, %v539_v31 }
  0xe7   :  { %676 = vst.msk [vmem:[%s1575_s3 + $0x38] sm:$0xff] %vm668_vm2, %v385_v28  ;;  %708 = vst.msk [vmem:[%s1575_s3 + $0x138] sm:$0xff] %vm668_vm2, %v545_v29 }
  0xe8   :  { %675 = vst.msk [vmem:[%s1575_s3 + $0x30] sm:$0xff] %vm668_vm2, %v380_v32  ;;  %707 = vst.msk [vmem:[%s1575_s3 + $0x130] sm:$0xff] %vm668_vm2, %v540_v33  ;;  %v884_v34 = vpop.f32.mrb[8].mxu0  ;;  %v932_v35 = vpop.f32.mrb[8].mxu1 }
  0xe9   :  { %v395_v36 = vadd.f32 %v884_v34, %v1250_v1  ;;  %v555_v37 = vadd.f32 %v932_v35, %v1250_v1  ;;  %v389_v38 = vpop.f32.mrb[9].mxu0  ;;  %v549_v39 = vpop.f32.mrb[9].mxu1 }
  0xea   :  { %v390_v40 = vadd.f32 %v1250_v1, %v389_v38  ;;  %v550_v41 = vadd.f32 %v1250_v1, %v549_v39 }
  0xeb   :  { %678 = vst.msk [vmem:[%s1575_s3 + $0x48] sm:$0xff] %vm668_vm2, %v395_v36  ;;  %710 = vst.msk [vmem:[%s1575_s3 + $0x148] sm:$0xff] %vm668_vm2, %v555_v37 }
  0xec   :  { %677 = vst.msk [vmem:[%s1575_s3 + $0x40] sm:$0xff] %vm668_vm2, %v390_v40  ;;  %709 = vst.msk [vmem:[%s1575_s3 + $0x140] sm:$0xff] %vm668_vm2, %v550_v41  ;;  %v887_v42 = vpop.f32.mrb[10].mxu0  ;;  %v935_v43 = vpop.f32.mrb[10].mxu1 }
  0xed   :  { %v405_v44 = vadd.f32 %v887_v42, %v1250_v1  ;;  %v565_v45 = vadd.f32 %v935_v43, %v1250_v1  ;;  %v399_v46 = vpop.f32.mrb[11].mxu0  ;;  %v559_v47 = vpop.f32.mrb[11].mxu1 }
  0xee   :  { %v400_v48 = vadd.f32 %v1250_v1, %v399_v46  ;;  %v560_v49 = vadd.f32 %v1250_v1, %v559_v47 }
  0xef   :  { %680 = vst.msk [vmem:[%s1575_s3 + $0x58] sm:$0xff] %vm668_vm2, %v405_v44  ;;  %712 = vst.msk [vmem:[%s1575_s3 + $0x158] sm:$0xff] %vm668_vm2, %v565_v45 }
  0xf0   :  { %679 = vst.msk [vmem:[%s1575_s3 + $0x50] sm:$0xff] %vm668_vm2, %v400_v48  ;;  %711 = vst.msk [vmem:[%s1575_s3 + $0x150] sm:$0xff] %vm668_vm2, %v560_v49  ;;  %v890_v50 = vpop.f32.mrb[12].mxu0  ;;  %v938_v51 = vpop.f32.mrb[12].mxu1 }
  0xf1   :  { %v415_v52 = vadd.f32 %v890_v50, %v1250_v1  ;;  %v575_v53 = vadd.f32 %v938_v51, %v1250_v1  ;;  %v409_v54 = vpop.f32.mrb[13].mxu0  ;;  %v569_v55 = vpop.f32.mrb[13].mxu1 }
  0xf2   :  { %v410_v56 = vadd.f32 %v1250_v1, %v409_v54  ;;  %v570_v57 = vadd.f32 %v1250_v1, %v569_v55 }
  0xf3   :  { %682 = vst.msk [vmem:[%s1575_s3 + $0x68] sm:$0xff] %vm668_vm2, %v415_v52  ;;  %714 = vst.msk [vmem:[%s1575_s3 + $0x168] sm:$0xff] %vm668_vm2, %v575_v53 }
  0xf4   :  { %681 = vst.msk [vmem:[%s1575_s3 + $0x60] sm:$0xff] %vm668_vm2, %v410_v56  ;;  %713 = vst.msk [vmem:[%s1575_s3 + $0x160] sm:$0xff] %vm668_vm2, %v570_v57  ;;  %v893_v58 = vpop.f32.mrb[14].mxu0  ;;  %v941_v59 = vpop.f32.mrb[14].mxu1 }
  0xf5   :  { %v425_v60 = vadd.f32 %v893_v58, %v1250_v1  ;;  %v585_v61 = vadd.f32 %v941_v59, %v1250_v1  ;;  %v419_v62 = vpop.f32.mrb[15].mxu0  ;;  %v579_v63 = vpop.f32.mrb[15].mxu1 }
  0xf6   :  { %v420_v0 = vadd.f32 %v1250_v1, %v419_v62  ;;  %v580_v2 = vadd.f32 %v1250_v1, %v579_v63 }
  0xf7   :  { %684 = vst.msk [vmem:[%s1575_s3 + $0x78] sm:$0xff] %vm668_vm2, %v425_v60  ;;  %716 = vst.msk [vmem:[%s1575_s3 + $0x178] sm:$0xff] %vm668_vm2, %v585_v61 }
  0xf8   :  { %683 = vst.msk [vmem:[%s1575_s3 + $0x70] sm:$0xff] %vm668_vm2, %v420_v0  ;;  %715 = vst.msk [vmem:[%s1575_s3 + $0x170] sm:$0xff] %vm668_vm2, %v580_v2  ;;  %v896_v3 = vpop.f32.mrb[16].mxu0  ;;  %v944_v4 = vpop.f32.mrb[16].mxu1 }
  0xf9   :  { %v435_v5 = vadd.f32 %v896_v3, %v1250_v1  ;;  %v595_v6 = vadd.f32 %v944_v4, %v1250_v1  ;;  %v429_v7 = vpop.f32.mrb[17].mxu0  ;;  %v589_v8 = vpop.f32.mrb[17].mxu1 }
  0xfa   :  { %v430_v9 = vadd.f32 %v1250_v1, %v429_v7  ;;  %v590_v10 = vadd.f32 %v1250_v1, %v589_v8 }
  0xfb   :  { %686 = vst.msk [vmem:[%s1575_s3 + $0x88] sm:$0xff] %vm668_vm2, %v435_v5  ;;  %718 = vst.msk [vmem:[%s1575_s3 + $0x188] sm:$0xff] %vm668_vm2, %v595_v6 }
  0xfc   :  { %685 = vst.msk [vmem:[%s1575_s3 + $0x80] sm:$0xff] %vm668_vm2, %v430_v9  ;;  %717 = vst.msk [vmem:[%s1575_s3 + $0x180] sm:$0xff] %vm668_vm2, %v590_v10  ;;  %v899_v11 = vpop.f32.mrb[18].mxu0  ;;  %v947_v12 = vpop.f32.mrb[18].mxu1 }
  0xfd   :  { %v445_v13 = vadd.f32 %v899_v11, %v1250_v1  ;;  %v605_v14 = vadd.f32 %v947_v12, %v1250_v1  ;;  %v439_v15 = vpop.f32.mrb[19].mxu0  ;;  %v599_v16 = vpop.f32.mrb[19].mxu1 }
  0xfe   :  { %v440_v17 = vadd.f32 %v1250_v1, %v439_v15  ;;  %v600_v18 = vadd.f32 %v1250_v1, %v599_v16 }
  0xff   :  { %688 = vst.msk [vmem:[%s1575_s3 + $0x98] sm:$0xff] %vm668_vm2, %v445_v13  ;;  %720 = vst.msk [vmem:[%s1575_s3 + $0x198] sm:$0xff] %vm668_vm2, %v605_v14 }
 0x100   :  { %687 = vst.msk [vmem:[%s1575_s3 + $0x90] sm:$0xff] %vm668_vm2, %v440_v17  ;;  %719 = vst.msk [vmem:[%s1575_s3 + $0x190] sm:$0xff] %vm668_vm2, %v600_v18  ;;  %v902_v19 = vpop.f32.mrb[20].mxu0  ;;  %v950_v20 = vpop.f32.mrb[20].mxu1 }
 0x101   :  { %v455_v21 = vadd.f32 %v902_v19, %v1250_v1  ;;  %v615_v22 = vadd.f32 %v950_v20, %v1250_v1  ;;  %v449_v23 = vpop.f32.mrb[21].mxu0  ;;  %v609_v24 = vpop.f32.mrb[21].mxu1 }
 0x102   :  { %v450_v25 = vadd.f32 %v1250_v1, %v449_v23  ;;  %v610_v26 = vadd.f32 %v1250_v1, %v609_v24 }
 0x103   :  { %690 = vst.msk [vmem:[%s1575_s3 + $0xa8] sm:$0xff] %vm668_vm2, %v455_v21  ;;  %722 = vst.msk [vmem:[%s1575_s3 + $0x1a8] sm:$0xff] %vm668_vm2, %v615_v22 }
 0x104   :  { %689 = vst.msk [vmem:[%s1575_s3 + $0xa0] sm:$0xff] %vm668_vm2, %v450_v25  ;;  %721 = vst.msk [vmem:[%s1575_s3 + $0x1a0] sm:$0xff] %vm668_vm2, %v610_v26  ;;  %v905_v27 = vpop.f32.mrb[22].mxu0  ;;  %v953_v28 = vpop.f32.mrb[22].mxu1 }
 0x105   :  { %v465_v29 = vadd.f32 %v905_v27, %v1250_v1  ;;  %v625_v30 = vadd.f32 %v953_v28, %v1250_v1  ;;  %v459_v31 = vpop.f32.mrb[23].mxu0  ;;  %v619_v32 = vpop.f32.mrb[23].mxu1 }
 0x106   :  { %v460_v33 = vadd.f32 %v1250_v1, %v459_v31  ;;  %v620_v34 = vadd.f32 %v1250_v1, %v619_v32 }
 0x107   :  { %692 = vst.msk [vmem:[%s1575_s3 + $0xb8] sm:$0xff] %vm668_vm2, %v465_v29  ;;  %724 = vst.msk [vmem:[%s1575_s3 + $0x1b8] sm:$0xff] %vm668_vm2, %v625_v30 }
 0x108   :  { %691 = vst.msk [vmem:[%s1575_s3 + $0xb0] sm:$0xff] %vm668_vm2, %v460_v33  ;;  %723 = vst.msk [vmem:[%s1575_s3 + $0x1b0] sm:$0xff] %vm668_vm2, %v620_v34  ;;  %v908_v35 = vpop.f32.mrb[24].mxu0  ;;  %v956_v36 = vpop.f32.mrb[24].mxu1 }
 0x109   :  { %v475_v37 = vadd.f32 %v908_v35, %v1250_v1  ;;  %v635_v38 = vadd.f32 %v956_v36, %v1250_v1  ;;  %v469_v39 = vpop.f32.mrb[25].mxu0  ;;  %v629_v40 = vpop.f32.mrb[25].mxu1 }
 0x10a   :  { %v470_v41 = vadd.f32 %v1250_v1, %v469_v39  ;;  %v630_v42 = vadd.f32 %v1250_v1, %v629_v40 }
 0x10b   :  { %694 = vst.msk [vmem:[%s1575_s3 + $0xc8] sm:$0xff] %vm668_vm2, %v475_v37  ;;  %726 = vst.msk [vmem:[%s1575_s3 + $0x1c8] sm:$0xff] %vm668_vm2, %v635_v38 }
 0x10c   :  { %693 = vst.msk [vmem:[%s1575_s3 + $0xc0] sm:$0xff] %vm668_vm2, %v470_v41  ;;  %725 = vst.msk [vmem:[%s1575_s3 + $0x1c0] sm:$0xff] %vm668_vm2, %v630_v42  ;;  %v911_v43 = vpop.f32.mrb[26].mxu0  ;;  %v959_v44 = vpop.f32.mrb[26].mxu1 }
 0x10d   :  { %v485_v45 = vadd.f32 %v911_v43, %v1250_v1  ;;  %v645_v46 = vadd.f32 %v959_v44, %v1250_v1  ;;  %v479_v47 = vpop.f32.mrb[27].mxu0  ;;  %v639_v48 = vpop.f32.mrb[27].mxu1 }
 0x10e   :  { %v480_v49 = vadd.f32 %v1250_v1, %v479_v47  ;;  %v640_v50 = vadd.f32 %v1250_v1, %v639_v48 }
 0x10f   :  { %696 = vst.msk [vmem:[%s1575_s3 + $0xd8] sm:$0xff] %vm668_vm2, %v485_v45  ;;  %728 = vst.msk [vmem:[%s1575_s3 + $0x1d8] sm:$0xff] %vm668_vm2, %v645_v46 }
 0x110   :  { %695 = vst.msk [vmem:[%s1575_s3 + $0xd0] sm:$0xff] %vm668_vm2, %v480_v49  ;;  %727 = vst.msk [vmem:[%s1575_s3 + $0x1d0] sm:$0xff] %vm668_vm2, %v640_v50  ;;  %v914_v51 = vpop.f32.mrb[28].mxu0  ;;  %v962_v52 = vpop.f32.mrb[28].mxu1 }
 0x111   :  { %v495_v53 = vadd.f32 %v914_v51, %v1250_v1  ;;  %v655_v54 = vadd.f32 %v962_v52, %v1250_v1  ;;  %v489_v55 = vpop.f32.mrb[29].mxu0  ;;  %v649_v56 = vpop.f32.mrb[29].mxu1 }
 0x112   :  { %v490_v57 = vadd.f32 %v1250_v1, %v489_v55  ;;  %v650_v58 = vadd.f32 %v1250_v1, %v649_v56 }
 0x113   :  { %698 = vst.msk [vmem:[%s1575_s3 + $0xe8] sm:$0xff] %vm668_vm2, %v495_v53  ;;  %730 = vst.msk [vmem:[%s1575_s3 + $0x1e8] sm:$0xff] %vm668_vm2, %v655_v54 }
 0x114   :  { %697 = vst.msk [vmem:[%s1575_s3 + $0xe0] sm:$0xff] %vm668_vm2, %v490_v57  ;;  %729 = vst.msk [vmem:[%s1575_s3 + $0x1e0] sm:$0xff] %vm668_vm2, %v650_v58  ;;  %v917_v59 = vpop.f32.mrb[30].mxu0  ;;  %v965_v60 = vpop.f32.mrb[30].mxu1 }
 0x115   :  { %v505_v61 = vadd.f32 %v917_v59, %v1250_v1  ;;  %v665_v62 = vadd.f32 %v965_v60, %v1250_v1  ;;  %v499_v63 = vpop.f32.mrb[31].mxu0  ;;  %v659_v0 = vpop.f32.mrb[31].mxu1 }
 0x116   :  { %v500_v2 = vadd.f32 %v1250_v1, %v499_v63  ;;  %v660_v3 = vadd.f32 %v1250_v1, %v659_v0 }
 0x117   :  { %700 = vst.msk [vmem:[%s1575_s3 + $0xf8] sm:$0xff] %vm668_vm2, %v505_v61  ;;  %732 = vst.msk [vmem:[%s1575_s3 + $0x1f8] sm:$0xff] %vm668_vm2, %v665_v62 }
 0x118   :  { %699 = vst.msk [vmem:[%s1575_s3 + $0xf0] sm:$0xff] %vm668_vm2, %v500_v2  ;;  %731 = vst.msk [vmem:[%s1575_s3 + $0x1f0] sm:$0xff] %vm668_vm2, %v660_v3 }

// kernel: _lambda_.10
= control target key start
LH: loop header
LB: loop body
LE: loop exit
PB: predicated region body
PF: predicated region fallthrough
CT: control target
= control target key end

     0   :  { %vm89_vm0 = vcmask 64512   ;;  %vm859_vm1 = vcmask 130048   ;;  %s1959_s1 = inlined_call_operand.vmem [shape: f32[8,16], index: 1, kind: input, shape index: {}]   ;;  %s1960_s0 = inlined_call_operand.vmem [shape: f32[512,8], index: 0, kind: input, shape index: {}]   ;;  %s1961_s2 = inlined_call_operand.vmem [shape: f32[1,16], index: 2, kind: input, shape index: {}]   ;;  %s1962_s3 = inlined_call_operand.vmem [shape: f32[512,16], index: 3, kind: input, shape index: {}]   ;;  %s1963_s4 = inlined_call_operand.vmem [shape: f32[512,16], index: 4, kind: output, shape index: {}]  }
   0x1   :  { %v81_v0 = vld [vmem:[%s1959_s1] sm:$0xff]  ;;  %v18_v3 = vld [vmem:[%s1960_s0 + $0x8] sm:$0xff]  ;;  %v19_v5 = vld [vmem:[%s1960_s0 + $0x10] sm:$0xff] }
   0x2   :  { %v17_v1 = vld [vmem:[%s1960_s0] sm:$0xff]  ;;  %1058 = vmatprep.subr.mxu0 %v81_v0  ;;  %1156 = vmatprep.subr.mxu1 %v81_v0  ;;  %v50_v4 = vld [vmem:[%s1960_s0 + $0x108] sm:$0xff]  ;;  %v51_v6 = vld [vmem:[%s1960_s0 + $0x110] sm:$0xff] }
   0x3   :  { %v49_v2 = vld [vmem:[%s1960_s0 + $0x100] sm:$0xff]  ;;  %1059 = vmatpush3.msra.mxu0 %v81_v0  ;;  %1157 = vmatpush3.msra.mxu1 %v81_v0  ;;  %v20_v7 = vld [vmem:[%s1960_s0 + $0x18] sm:$0xff]  ;;  %v22_v11 = vld [vmem:[%s1960_s0 + $0x28] sm:$0xff] }
   0x4   :  { %1060 = vmatprep.mubr.msk.f32.mxu0 %vm89_vm0, %v17_v1  ;;  %1108 = vmatprep.mubr.msk.f32.mxu1 %vm89_vm0, %v49_v2  ;;  %v52_v8 = vld [vmem:[%s1960_s0 + $0x118] sm:$0xff]  ;;  %v21_v9 = vld [vmem:[%s1960_s0 + $0x20] sm:$0xff]  ;;  %v54_v12 = vld [vmem:[%s1960_s0 + $0x128] sm:$0xff] }
   0x5   :  { %1061 = vmatmul.mubr.msk.f32.vlgmr.msra.gmra.mrb[0].mxu0 %vm89_vm0, %v18_v3  ;;  %1109 = vmatmul.mubr.msk.f32.vlgmr.msra.gmra.mrb[0].mxu1 %vm89_vm0, %v50_v4  ;;  %v53_v10 = vld [vmem:[%s1960_s0 + $0x120] sm:$0xff]  ;;  %v23_v13 = vld [vmem:[%s1960_s0 + $0x30] sm:$0xff]  ;;  %v24_v15 = vld [vmem:[%s1960_s0 + $0x38] sm:$0xff] }
   0x6   :  { %1063 = vmatprep.mubr.msk.f32.mxu0 %vm89_vm0, %v19_v5  ;;  %1111 = vmatprep.mubr.msk.f32.mxu1 %vm89_vm0, %v51_v6  ;;  %v55_v14 = vld [vmem:[%s1960_s0 + $0x130] sm:$0xff]  ;;  %v56_v16 = vld [vmem:[%s1960_s0 + $0x138] sm:$0xff]  ;;  %v25_v17 = vld [vmem:[%s1960_s0 + $0x40] sm:$0xff] }
   0x7   :  { %v57_v18 = vld [vmem:[%s1960_s0 + $0x140] sm:$0xff]  ;;  %v26_v19 = vld [vmem:[%s1960_s0 + $0x48] sm:$0xff]  ;;  %v27_v21 = vld [vmem:[%s1960_s0 + $0x50] sm:$0xff] }
   0x8   :  { %v58_v20 = vld [vmem:[%s1960_s0 + $0x148] sm:$0xff]  ;;  %v59_v22 = vld [vmem:[%s1960_s0 + $0x150] sm:$0xff]  ;;  %v28_v23 = vld [vmem:[%s1960_s0 + $0x58] sm:$0xff] }
   0x9   :  { %1064 = vmatmul.mubr.msk.f32.gmra.mrb[2].mxu0 %vm89_vm0, %v20_v7  ;;  %1112 = vmatmul.mubr.msk.f32.gmra.mrb[2].mxu1 %vm89_vm0, %v52_v8  ;;  %v60_v24 = vld [vmem:[%s1960_s0 + $0x158] sm:$0xff]  ;;  %v29_v25 = vld [vmem:[%s1960_s0 + $0x60] sm:$0xff]  ;;  %v30_v27 = vld [vmem:[%s1960_s0 + $0x68] sm:$0xff] }
   0xa   :  { %1066 = vmatprep.mubr.msk.f32.mxu0 %vm89_vm0, %v21_v9  ;;  %1114 = vmatprep.mubr.msk.f32.mxu1 %vm89_vm0, %v53_v10  ;;  %v61_v26 = vld [vmem:[%s1960_s0 + $0x160] sm:$0xff]  ;;  %v62_v28 = vld [vmem:[%s1960_s0 + $0x168] sm:$0xff]  ;;  %v31_v29 = vld [vmem:[%s1960_s0 + $0x70] sm:$0xff] }
   0xb   :  { %v63_v30 = vld [vmem:[%s1960_s0 + $0x170] sm:$0xff]  ;;  %v32_v31 = vld [vmem:[%s1960_s0 + $0x78] sm:$0xff]  ;;  %v33_v33 = vld [vmem:[%s1960_s0 + $0x80] sm:$0xff] }
   0xc   :  { %v64_v32 = vld [vmem:[%s1960_s0 + $0x178] sm:$0xff]  ;;  %v65_v34 = vld [vmem:[%s1960_s0 + $0x180] sm:$0xff]  ;;  %v34_v35 = vld [vmem:[%s1960_s0 + $0x88] sm:$0xff] }
   0xd   :  { %1067 = vmatmul.mubr.msk.f32.gmra.mrb[4].mxu0 %vm89_vm0, %v22_v11  ;;  %1115 = vmatmul.mubr.msk.f32.gmra.mrb[4].mxu1 %vm89_vm0, %v54_v12  ;;  %v66_v36 = vld [vmem:[%s1960_s0 + $0x188] sm:$0xff]  ;;  %v35_v37 = vld [vmem:[%s1960_s0 + $0x90] sm:$0xff]  ;;  %v36_v39 = vld [vmem:[%s1960_s0 + $0x98] sm:$0xff] }
   0xe   :  { %1069 = vmatprep.mubr.msk.f32.mxu0 %vm89_vm0, %v23_v13  ;;  %1117 = vmatprep.mubr.msk.f32.mxu1 %vm89_vm0, %v55_v14  ;;  %v67_v38 = vld [vmem:[%s1960_s0 + $0x190] sm:$0xff]  ;;  %v68_v40 = vld [vmem:[%s1960_s0 + $0x198] sm:$0xff]  ;;  %v37_v41 = vld [vmem:[%s1960_s0 + $0xa0] sm:$0xff] }
   0xf   :  { %v69_v42 = vld [vmem:[%s1960_s0 + $0x1a0] sm:$0xff]  ;;  %v38_v43 = vld [vmem:[%s1960_s0 + $0xa8] sm:$0xff]  ;;  %v39_v45 = vld [vmem:[%s1960_s0 + $0xb0] sm:$0xff] }
  0x10   :  { %v70_v44 = vld [vmem:[%s1960_s0 + $0x1a8] sm:$0xff]  ;;  %v71_v46 = vld [vmem:[%s1960_s0 + $0x1b0] sm:$0xff]  ;;  %v40_v47 = vld [vmem:[%s1960_s0 + $0xb8] sm:$0xff] }
  0x11   :  { %1070 = vmatmul.mubr.msk.f32.gmra.mrb[6].mxu0 %vm89_vm0, %v24_v15  ;;  %1118 = vmatmul.mubr.msk.f32.gmra.mrb[6].mxu1 %vm89_vm0, %v56_v16  ;;  %v72_v48 = vld [vmem:[%s1960_s0 + $0x1b8] sm:$0xff]  ;;  %v41_v49 = vld [vmem:[%s1960_s0 + $0xc0] sm:$0xff]  ;;  %v42_v51 = vld [vmem:[%s1960_s0 + $0xc8] sm:$0xff] }
  0x12   :  { %1072 = vmatprep.mubr.msk.f32.mxu0 %vm89_vm0, %v25_v17  ;;  %1120 = vmatprep.mubr.msk.f32.mxu1 %vm89_vm0, %v57_v18  ;;  %v73_v50 = vld [vmem:[%s1960_s0 + $0x1c0] sm:$0xff]  ;;  %v74_v52 = vld [vmem:[%s1960_s0 + $0x1c8] sm:$0xff]  ;;  %v43_v53 = vld [vmem:[%s1960_s0 + $0xd0] sm:$0xff] }
  0x13   :  { %v75_v54 = vld [vmem:[%s1960_s0 + $0x1d0] sm:$0xff]  ;;  %v44_v55 = vld [vmem:[%s1960_s0 + $0xd8] sm:$0xff]  ;;  %v45_v57 = vld [vmem:[%s1960_s0 + $0xe0] sm:$0xff] }
  0x14   :  { %v76_v56 = vld [vmem:[%s1960_s0 + $0x1d8] sm:$0xff]  ;;  %v77_v58 = vld [vmem:[%s1960_s0 + $0x1e0] sm:$0xff]  ;;  %v46_v59 = vld [vmem:[%s1960_s0 + $0xe8] sm:$0xff] }
  0x15   :  { %1073 = vmatmul.mubr.msk.f32.gmra.mrb[8].mxu0 %vm89_vm0, %v26_v19  ;;  %1121 = vmatmul.mubr.msk.f32.gmra.mrb[8].mxu1 %vm89_vm0, %v58_v20  ;;  %v78_v60 = vld [vmem:[%s1960_s0 + $0x1e8] sm:$0xff]  ;;  %v47_v61 = vld [vmem:[%s1960_s0 + $0xf0] sm:$0xff]  ;;  %v48_v63 = vld [vmem:[%s1960_s0 + $0xf8] sm:$0xff] }
  0x16   :  { %1075 = vmatprep.mubr.msk.f32.mxu0 %vm89_vm0, %v27_v21  ;;  %1123 = vmatprep.mubr.msk.f32.mxu1 %vm89_vm0, %v59_v22  ;;  %v79_v62 = vld [vmem:[%s1960_s0 + $0x1f0] sm:$0xff]  ;;  %v80_v0 = vld [vmem:[%s1960_s0 + $0x1f8] sm:$0xff]  ;;  %v1445_v1 = vld [vmem:[%s1961_s2] ss:$0 sm:$0xff] }
  0x17   :  { %v668_v3 = vld [vmem:[%s1962_s3 + $0x8] sm:$0xff]  ;;  %v667_v9 = vld [vmem:[%s1962_s3] sm:$0xff]  ;;  %v670_v19 = vld [vmem:[%s1962_s3 + $0x18] sm:$0xff] }
  0x18   :  { %v700_v5 = vld [vmem:[%s1962_s3 + $0x108] sm:$0xff]  ;;  %v699_v11 = vld [vmem:[%s1962_s3 + $0x100] sm:$0xff]  ;;  %v702_v21 = vld [vmem:[%s1962_s3 + $0x118] sm:$0xff] }
  0x19   :  { %1076 = vmatmul.mubr.msk.f32.gmra.mrb[10].mxu0 %vm89_vm0, %v28_v23  ;;  %1124 = vmatmul.mubr.msk.f32.gmra.mrb[10].mxu1 %vm89_vm0, %v60_v24 }
  0x1a   :  { %1078 = vmatprep.mubr.msk.f32.mxu0 %vm89_vm0, %v29_v25  ;;  %1126 = vmatprep.mubr.msk.f32.mxu1 %vm89_vm0, %v61_v26 }
  0x1d   :  { %1079 = vmatmul.mubr.msk.f32.gmra.mrb[12].mxu0 %vm89_vm0, %v30_v27  ;;  %1127 = vmatmul.mubr.msk.f32.gmra.mrb[12].mxu1 %vm89_vm0, %v62_v28  ;;  %v669_v27 = vld [vmem:[%s1962_s3 + $0x10] sm:$0xff] }
  0x1e   :  { %1081 = vmatprep.mubr.msk.f32.mxu0 %vm89_vm0, %v31_v29  ;;  %1129 = vmatprep.mubr.msk.f32.mxu1 %vm89_vm0, %v63_v30  ;;  %v701_v29 = vld [vmem:[%s1962_s3 + $0x110] sm:$0xff] }
  0x21   :  { %1082 = vmatmul.mubr.msk.f32.gmra.mrb[14].mxu0 %vm89_vm0, %v32_v31  ;;  %1130 = vmatmul.mubr.msk.f32.gmra.mrb[14].mxu1 %vm89_vm0, %v64_v32 }
  0x22   :  { %1084 = vmatprep.mubr.msk.f32.mxu0 %vm89_vm0, %v33_v33  ;;  %1132 = vmatprep.mubr.msk.f32.mxu1 %vm89_vm0, %v65_v34 }
  0x25   :  { %1085 = vmatmul.mubr.msk.f32.gmra.mrb[16].mxu0 %vm89_vm0, %v34_v35  ;;  %1133 = vmatmul.mubr.msk.f32.gmra.mrb[16].mxu1 %vm89_vm0, %v66_v36 }
  0x26   :  { %1087 = vmatprep.mubr.msk.f32.mxu0 %vm89_vm0, %v35_v37  ;;  %1135 = vmatprep.mubr.msk.f32.mxu1 %vm89_vm0, %v67_v38 }
  0x29   :  { %1088 = vmatmul.mubr.msk.f32.gmra.mrb[18].mxu0 %vm89_vm0, %v36_v39  ;;  %1136 = vmatmul.mubr.msk.f32.gmra.mrb[18].mxu1 %vm89_vm0, %v68_v40  ;;  %v672_v39 = vld [vmem:[%s1962_s3 + $0x28] sm:$0xff] }
  0x2a   :  { %1090 = vmatprep.mubr.msk.f32.mxu0 %vm89_vm0, %v37_v41  ;;  %1138 = vmatprep.mubr.msk.f32.mxu1 %vm89_vm0, %v69_v42  ;;  %v704_v41 = vld [vmem:[%s1962_s3 + $0x128] sm:$0xff] }
  0x2d   :  { %1091 = vmatmul.mubr.msk.f32.gmra.mrb[20].mxu0 %vm89_vm0, %v38_v43  ;;  %1139 = vmatmul.mubr.msk.f32.gmra.mrb[20].mxu1 %vm89_vm0, %v70_v44 }
  0x2e   :  { %1093 = vmatprep.mubr.msk.f32.mxu0 %vm89_vm0, %v39_v45  ;;  %1141 = vmatprep.mubr.msk.f32.mxu1 %vm89_vm0, %v71_v46 }
  0x31   :  { %1094 = vmatmul.mubr.msk.f32.gmra.mrb[22].mxu0 %vm89_vm0, %v40_v47  ;;  %1142 = vmatmul.mubr.msk.f32.gmra.mrb[22].mxu1 %vm89_vm0, %v72_v48  ;;  %v671_v47 = vld [vmem:[%s1962_s3 + $0x20] sm:$0xff] }
  0x32   :  { %1096 = vmatprep.mubr.msk.f32.mxu0 %vm89_vm0, %v41_v49  ;;  %1144 = vmatprep.mubr.msk.f32.mxu1 %vm89_vm0, %v73_v50  ;;  %v703_v49 = vld [vmem:[%s1962_s3 + $0x120] sm:$0xff] }
  0x35   :  { %1097 = vmatmul.mubr.msk.f32.gmra.mrb[24].mxu0 %vm89_vm0, %v42_v51  ;;  %1145 = vmatmul.mubr.msk.f32.gmra.mrb[24].mxu1 %vm89_vm0, %v74_v52 }
  0x36   :  { %1099 = vmatprep.mubr.msk.f32.mxu0 %vm89_vm0, %v43_v53  ;;  %1147 = vmatprep.mubr.msk.f32.mxu1 %vm89_vm0, %v75_v54 }
  0x39   :  { %1100 = vmatmul.mubr.msk.f32.gmra.mrb[26].mxu0 %vm89_vm0, %v44_v55  ;;  %1148 = vmatmul.mubr.msk.f32.gmra.mrb[26].mxu1 %vm89_vm0, %v76_v56 }
  0x3a   :  { %1102 = vmatprep.mubr.msk.f32.mxu0 %vm89_vm0, %v45_v57  ;;  %1150 = vmatprep.mubr.msk.f32.mxu1 %vm89_vm0, %v77_v58 }
  0x3d   :  { %1103 = vmatmul.mubr.msk.f32.gmra.mrb[28].mxu0 %vm89_vm0, %v46_v59  ;;  %1151 = vmatmul.mubr.msk.f32.gmra.mrb[28].mxu1 %vm89_vm0, %v78_v60  ;;  %v674_v59 = vld [vmem:[%s1962_s3 + $0x38] sm:$0xff] }
  0x3e   :  { %1105 = vmatprep.mubr.msk.f32.mxu0 %vm89_vm0, %v47_v61  ;;  %1153 = vmatprep.mubr.msk.f32.mxu1 %vm89_vm0, %v79_v62  ;;  %v706_v61 = vld [vmem:[%s1962_s3 + $0x138] sm:$0xff] }
  0x41   :  { %1106 = vmatmul.mubr.msk.f32.gmra.mrb[30].mxu0 %vm89_vm0, %v48_v63  ;;  %1154 = vmatmul.mubr.msk.f32.gmra.mrb[30].mxu1 %vm89_vm0, %v80_v0 }
  0xd8   :  { %v1062_v2 = vpop.f32.mrb[0].mxu0  ;;  %v1110_v4 = vpop.f32.mrb[0].mxu1 }
  0xd9   :  { %v354_v6 = vadd.f32 %v1062_v2, %v1445_v1  ;;  %v514_v7 = vadd.f32 %v1110_v4, %v1445_v1  ;;  %v348_v8 = vpop.f32.mrb[1].mxu0  ;;  %v508_v10 = vpop.f32.mrb[1].mxu1  ;;  %v673_v4 = vld [vmem:[%s1962_s3 + $0x30] sm:$0xff] }
  0xda   :  { %v349_v12 = vadd.f32 %v1445_v1, %v348_v8  ;;  %v509_v13 = vadd.f32 %v1445_v1, %v508_v10 }
  0xdb   :  { %v732_v14 = vadd.f32 %v668_v3, %v354_v6  ;;  %v764_v15 = vadd.f32 %v700_v5, %v514_v7  ;;  %v705_v6 = vld [vmem:[%s1962_s3 + $0x130] sm:$0xff] }
  0xdc   :  { %v731_v16 = vadd.f32 %v667_v9, %v349_v12  ;;  %v763_v17 = vadd.f32 %v699_v11, %v509_v13  ;;  %v1065_v18 = vpop.f32.mrb[2].mxu0  ;;  %v1113_v20 = vpop.f32.mrb[2].mxu1 }
  0xdd   :  { %v796_v22 = vmax.f32 %v732_v14, 0.0  ;;  %v828_v23 = vmax.f32 %v764_v15, 0.0  ;;  %v364_v24 = vadd.f32 %v1065_v18, %v1445_v1  ;;  %v524_v25 = vadd.f32 %v1113_v20, %v1445_v1  ;;  %v358_v26 = vpop.f32.mrb[3].mxu0  ;;  %v518_v28 = vpop.f32.mrb[3].mxu1  ;;  %v708_v18 = vld [vmem:[%s1962_s3 + $0x148] sm:$0xff] }
  0xde   :  { %v795_v30 = vmax.f32 %v731_v16, 0.0  ;;  %v827_v31 = vmax.f32 %v763_v17, 0.0  ;;  %v359_v32 = vadd.f32 %v1445_v1, %v358_v26  ;;  %v519_v33 = vadd.f32 %v1445_v1, %v518_v28  ;;  %v676_v16 = vld [vmem:[%s1962_s3 + $0x48] sm:$0xff]  ;;  %v707_v26 = vld [vmem:[%s1962_s3 + $0x140] sm:$0xff] }
  0xdf   :  { %861 = vst.msk [vmem:[%s1963_s4 + $0x8] sm:$0xff] %vm859_vm1, %v796_v22  ;;  %893 = vst.msk [vmem:[%s1963_s4 + $0x108] sm:$0xff] %vm859_vm1, %v828_v23  ;;  %v734_v34 = vadd.f32 %v670_v19, %v364_v24  ;;  %v766_v35 = vadd.f32 %v702_v21, %v524_v25  ;;  %v675_v24 = vld [vmem:[%s1962_s3 + $0x40] sm:$0xff] }
  0xe0   :  { %860 = vst.msk [vmem:[%s1963_s4] sm:$0xff] %vm859_vm1, %v795_v30  ;;  %892 = vst.msk [vmem:[%s1963_s4 + $0x100] sm:$0xff] %vm859_vm1, %v827_v31  ;;  %v733_v36 = vadd.f32 %v669_v27, %v359_v32  ;;  %v765_v37 = vadd.f32 %v701_v29, %v519_v33  ;;  %v1068_v38 = vpop.f32.mrb[4].mxu0  ;;  %v1116_v40 = vpop.f32.mrb[4].mxu1 }
  0xe1   :  { %v798_v42 = vmax.f32 %v734_v34, 0.0  ;;  %v830_v43 = vmax.f32 %v766_v35, 0.0  ;;  %v374_v44 = vadd.f32 %v1068_v38, %v1445_v1  ;;  %v534_v45 = vadd.f32 %v1116_v40, %v1445_v1  ;;  %v368_v46 = vpop.f32.mrb[5].mxu0  ;;  %v528_v48 = vpop.f32.mrb[5].mxu1  ;;  %v710_v38 = vld [vmem:[%s1962_s3 + $0x158] sm:$0xff] }
  0xe2   :  { %v797_v50 = vmax.f32 %v733_v36, 0.0  ;;  %v829_v51 = vmax.f32 %v765_v37, 0.0  ;;  %v369_v52 = vadd.f32 %v1445_v1, %v368_v46  ;;  %v529_v53 = vadd.f32 %v1445_v1, %v528_v48  ;;  %v678_v36 = vld [vmem:[%s1962_s3 + $0x58] sm:$0xff]  ;;  %v709_v46 = vld [vmem:[%s1962_s3 + $0x150] sm:$0xff] }
  0xe3   :  { %863 = vst.msk [vmem:[%s1963_s4 + $0x18] sm:$0xff] %vm859_vm1, %v798_v42  ;;  %895 = vst.msk [vmem:[%s1963_s4 + $0x118] sm:$0xff] %vm859_vm1, %v830_v43  ;;  %v736_v54 = vadd.f32 %v672_v39, %v374_v44  ;;  %v768_v55 = vadd.f32 %v704_v41, %v534_v45  ;;  %v677_v44 = vld [vmem:[%s1962_s3 + $0x50] sm:$0xff] }
  0xe4   :  { %862 = vst.msk [vmem:[%s1963_s4 + $0x10] sm:$0xff] %vm859_vm1, %v797_v50  ;;  %894 = vst.msk [vmem:[%s1963_s4 + $0x110] sm:$0xff] %vm859_vm1, %v829_v51  ;;  %v735_v56 = vadd.f32 %v671_v47, %v369_v52  ;;  %v767_v57 = vadd.f32 %v703_v49, %v529_v53  ;;  %v1071_v58 = vpop.f32.mrb[6].mxu0  ;;  %v1119_v60 = vpop.f32.mrb[6].mxu1 }
  0xe5   :  { %v800_v62 = vmax.f32 %v736_v54, 0.0  ;;  %v832_v63 = vmax.f32 %v768_v55, 0.0  ;;  %v384_v0 = vadd.f32 %v1071_v58, %v1445_v1  ;;  %v544_v2 = vadd.f32 %v1119_v60, %v1445_v1  ;;  %v378_v3 = vpop.f32.mrb[7].mxu0  ;;  %v538_v5 = vpop.f32.mrb[7].mxu1  ;;  %v712_v58 = vld [vmem:[%s1962_s3 + $0x168] sm:$0xff] }
  0xe6   :  { %v799_v7 = vmax.f32 %v735_v56, 0.0  ;;  %v831_v8 = vmax.f32 %v767_v57, 0.0  ;;  %v379_v9 = vadd.f32 %v1445_v1, %v378_v3  ;;  %v539_v10 = vadd.f32 %v1445_v1, %v538_v5  ;;  %v680_v56 = vld [vmem:[%s1962_s3 + $0x68] sm:$0xff]  ;;  %v711_v3 = vld [vmem:[%s1962_s3 + $0x160] sm:$0xff] }
  0xe7   :  { %865 = vst.msk [vmem:[%s1963_s4 + $0x28] sm:$0xff] %vm859_vm1, %v800_v62  ;;  %897 = vst.msk [vmem:[%s1963_s4 + $0x128] sm:$0xff] %vm859_vm1, %v832_v63  ;;  %v738_v11 = vadd.f32 %v674_v59, %v384_v0  ;;  %v770_v12 = vadd.f32 %v706_v61, %v544_v2  ;;  %v679_v0 = vld [vmem:[%s1962_s3 + $0x60] sm:$0xff] }
  0xe8   :  { %864 = vst.msk [vmem:[%s1963_s4 + $0x20] sm:$0xff] %vm859_vm1, %v799_v7  ;;  %896 = vst.msk [vmem:[%s1963_s4 + $0x120] sm:$0xff] %vm859_vm1, %v831_v8  ;;  %v737_v13 = vadd.f32 %v673_v4, %v379_v9  ;;  %v769_v14 = vadd.f32 %v705_v6, %v539_v10  ;;  %v1074_v15 = vpop.f32.mrb[8].mxu0  ;;  %v1122_v17 = vpop.f32.mrb[8].mxu1 }
  0xe9   :  { %v802_v19 = vmax.f32 %v738_v11, 0.0  ;;  %v834_v20 = vmax.f32 %v770_v12, 0.0  ;;  %v394_v21 = vadd.f32 %v1074_v15, %v1445_v1  ;;  %v554_v22 = vadd.f32 %v1122_v17, %v1445_v1  ;;  %v388_v23 = vpop.f32.mrb[9].mxu0  ;;  %v548_v25 = vpop.f32.mrb[9].mxu1  ;;  %v714_v15 = vld [vmem:[%s1962_s3 + $0x178] sm:$0xff] }
  0xea   :  { %v801_v27 = vmax.f32 %v737_v13, 0.0  ;;  %v833_v28 = vmax.f32 %v769_v14, 0.0  ;;  %v389_v29 = vadd.f32 %v1445_v1, %v388_v23  ;;  %v549_v30 = vadd.f32 %v1445_v1, %v548_v25  ;;  %v682_v13 = vld [vmem:[%s1962_s3 + $0x78] sm:$0xff]  ;;  %v713_v23 = vld [vmem:[%s1962_s3 + $0x170] sm:$0xff] }
  0xeb   :  { %867 = vst.msk [vmem:[%s1963_s4 + $0x38] sm:$0xff] %vm859_vm1, %v802_v19  ;;  %899 = vst.msk [vmem:[%s1963_s4 + $0x138] sm:$0xff] %vm859_vm1, %v834_v20  ;;  %v740_v31 = vadd.f32 %v676_v16, %v394_v21  ;;  %v772_v32 = vadd.f32 %v708_v18, %v554_v22  ;;  %v681_v21 = vld [vmem:[%s1962_s3 + $0x70] sm:$0xff] }
  0xec   :  { %866 = vst.msk [vmem:[%s1963_s4 + $0x30] sm:$0xff] %vm859_vm1, %v801_v27  ;;  %898 = vst.msk [vmem:[%s1963_s4 + $0x130] sm:$0xff] %vm859_vm1, %v833_v28  ;;  %v739_v33 = vadd.f32 %v675_v24, %v389_v29  ;;  %v771_v34 = vadd.f32 %v707_v26, %v549_v30  ;;  %v1077_v35 = vpop.f32.mrb[10].mxu0  ;;  %v1125_v37 = vpop.f32.mrb[10].mxu1 }
  0xed   :  { %v804_v39 = vmax.f32 %v740_v31, 0.0  ;;  %v836_v40 = vmax.f32 %v772_v32, 0.0  ;;  %v404_v41 = vadd.f32 %v1077_v35, %v1445_v1  ;;  %v564_v42 = vadd.f32 %v1125_v37, %v1445_v1  ;;  %v398_v43 = vpop.f32.mrb[11].mxu0  ;;  %v558_v45 = vpop.f32.mrb[11].mxu1  ;;  %v716_v35 = vld [vmem:[%s1962_s3 + $0x188] sm:$0xff] }
  0xee   :  { %v803_v47 = vmax.f32 %v739_v33, 0.0  ;;  %v835_v48 = vmax.f32 %v771_v34, 0.0  ;;  %v399_v49 = vadd.f32 %v1445_v1, %v398_v43  ;;  %v559_v50 = vadd.f32 %v1445_v1, %v558_v45  ;;  %v684_v33 = vld [vmem:[%s1962_s3 + $0x88] sm:$0xff]  ;;  %v715_v43 = vld [vmem:[%s1962_s3 + $0x180] sm:$0xff] }
  0xef   :  { %869 = vst.msk [vmem:[%s1963_s4 + $0x48] sm:$0xff] %vm859_vm1, %v804_v39  ;;  %901 = vst.msk [vmem:[%s1963_s4 + $0x148] sm:$0xff] %vm859_vm1, %v836_v40  ;;  %v742_v51 = vadd.f32 %v678_v36, %v404_v41  ;;  %v774_v52 = vadd.f32 %v710_v38, %v564_v42  ;;  %v683_v41 = vld [vmem:[%s1962_s3 + $0x80] sm:$0xff] }
  0xf0   :  { %868 = vst.msk [vmem:[%s1963_s4 + $0x40] sm:$0xff] %vm859_vm1, %v803_v47  ;;  %900 = vst.msk [vmem:[%s1963_s4 + $0x140] sm:$0xff] %vm859_vm1, %v835_v48  ;;  %v741_v53 = vadd.f32 %v677_v44, %v399_v49  ;;  %v773_v54 = vadd.f32 %v709_v46, %v559_v50  ;;  %v1080_v55 = vpop.f32.mrb[12].mxu0  ;;  %v1128_v57 = vpop.f32.mrb[12].mxu1 }
  0xf1   :  { %v806_v59 = vmax.f32 %v742_v51, 0.0  ;;  %v838_v60 = vmax.f32 %v774_v52, 0.0  ;;  %v414_v61 = vadd.f32 %v1080_v55, %v1445_v1  ;;  %v574_v62 = vadd.f32 %v1128_v57, %v1445_v1  ;;  %v408_v63 = vpop.f32.mrb[13].mxu0  ;;  %v568_v2 = vpop.f32.mrb[13].mxu1  ;;  %v718_v55 = vld [vmem:[%s1962_s3 + $0x198] sm:$0xff] }
  0xf2   :  { %v805_v4 = vmax.f32 %v741_v53, 0.0  ;;  %v837_v5 = vmax.f32 %v773_v54, 0.0  ;;  %v409_v6 = vadd.f32 %v1445_v1, %v408_v63  ;;  %v569_v7 = vadd.f32 %v1445_v1, %v568_v2  ;;  %v686_v53 = vld [vmem:[%s1962_s3 + $0x98] sm:$0xff]  ;;  %v717_v63 = vld [vmem:[%s1962_s3 + $0x190] sm:$0xff] }
  0xf3   :  { %871 = vst.msk [vmem:[%s1963_s4 + $0x58] sm:$0xff] %vm859_vm1, %v806_v59  ;;  %903 = vst.msk [vmem:[%s1963_s4 + $0x158] sm:$0xff] %vm859_vm1, %v838_v60  ;;  %v744_v8 = vadd.f32 %v680_v56, %v414_v61  ;;  %v776_v9 = vadd.f32 %v712_v58, %v574_v62  ;;  %v685_v61 = vld [vmem:[%s1962_s3 + $0x90] sm:$0xff] }
  0xf4   :  { %870 = vst.msk [vmem:[%s1963_s4 + $0x50] sm:$0xff] %vm859_vm1, %v805_v4  ;;  %902 = vst.msk [vmem:[%s1963_s4 + $0x150] sm:$0xff] %vm859_vm1, %v837_v5  ;;  %v743_v10 = vadd.f32 %v679_v0, %v409_v6  ;;  %v775_v11 = vadd.f32 %v711_v3, %v569_v7  ;;  %v1083_v12 = vpop.f32.mrb[14].mxu0  ;;  %v1131_v14 = vpop.f32.mrb[14].mxu1 }
  0xf5   :  { %v808_v16 = vmax.f32 %v744_v8, 0.0  ;;  %v840_v17 = vmax.f32 %v776_v9, 0.0  ;;  %v424_v18 = vadd.f32 %v1083_v12, %v1445_v1  ;;  %v584_v19 = vadd.f32 %v1131_v14, %v1445_v1  ;;  %v418_v20 = vpop.f32.mrb[15].mxu0  ;;  %v578_v22 = vpop.f32.mrb[15].mxu1  ;;  %v720_v12 = vld [vmem:[%s1962_s3 + $0x1a8] sm:$0xff] }
  0xf6   :  { %v807_v24 = vmax.f32 %v743_v10, 0.0  ;;  %v839_v25 = vmax.f32 %v775_v11, 0.0  ;;  %v419_v26 = vadd.f32 %v1445_v1, %v418_v20  ;;  %v579_v27 = vadd.f32 %v1445_v1, %v578_v22  ;;  %v688_v10 = vld [vmem:[%s1962_s3 + $0xa8] sm:$0xff]  ;;  %v719_v20 = vld [vmem:[%s1962_s3 + $0x1a0] sm:$0xff] }
  0xf7   :  { %873 = vst.msk [vmem:[%s1963_s4 + $0x68] sm:$0xff] %vm859_vm1, %v808_v16  ;;  %905 = vst.msk [vmem:[%s1963_s4 + $0x168] sm:$0xff] %vm859_vm1, %v840_v17  ;;  %v746_v28 = vadd.f32 %v682_v13, %v424_v18  ;;  %v778_v29 = vadd.f32 %v714_v15, %v584_v19  ;;  %v687_v18 = vld [vmem:[%s1962_s3 + $0xa0] sm:$0xff] }
  0xf8   :  { %872 = vst.msk [vmem:[%s1963_s4 + $0x60] sm:$0xff] %vm859_vm1, %v807_v24  ;;  %904 = vst.msk [vmem:[%s1963_s4 + $0x160] sm:$0xff] %vm859_vm1, %v839_v25  ;;  %v745_v30 = vadd.f32 %v681_v21, %v419_v26  ;;  %v777_v31 = vadd.f32 %v713_v23, %v579_v27  ;;  %v1086_v32 = vpop.f32.mrb[16].mxu0  ;;  %v1134_v34 = vpop.f32.mrb[16].mxu1 }
  0xf9   :  { %v810_v36 = vmax.f32 %v746_v28, 0.0  ;;  %v842_v37 = vmax.f32 %v778_v29, 0.0  ;;  %v434_v38 = vadd.f32 %v1086_v32, %v1445_v1  ;;  %v594_v39 = vadd.f32 %v1134_v34, %v1445_v1  ;;  %v428_v40 = vpop.f32.mrb[17].mxu0  ;;  %v588_v42 = vpop.f32.mrb[17].mxu1  ;;  %v722_v32 = vld [vmem:[%s1962_s3 + $0x1b8] sm:$0xff] }
  0xfa   :  { %v809_v44 = vmax.f32 %v745_v30, 0.0  ;;  %v841_v45 = vmax.f32 %v777_v31, 0.0  ;;  %v429_v46 = vadd.f32 %v1445_v1, %v428_v40  ;;  %v589_v47 = vadd.f32 %v1445_v1, %v588_v42  ;;  %v690_v30 = vld [vmem:[%s1962_s3 + $0xb8] sm:$0xff]  ;;  %v721_v40 = vld [vmem:[%s1962_s3 + $0x1b0] sm:$0xff] }
  0xfb   :  { %875 = vst.msk [vmem:[%s1963_s4 + $0x78] sm:$0xff] %vm859_vm1, %v810_v36  ;;  %907 = vst.msk [vmem:[%s1963_s4 + $0x178] sm:$0xff] %vm859_vm1, %v842_v37  ;;  %v748_v48 = vadd.f32 %v684_v33, %v434_v38  ;;  %v780_v49 = vadd.f32 %v716_v35, %v594_v39  ;;  %v689_v38 = vld [vmem:[%s1962_s3 + $0xb0] sm:$0xff] }
  0xfc   :  { %874 = vst.msk [vmem:[%s1963_s4 + $0x70] sm:$0xff] %vm859_vm1, %v809_v44  ;;  %906 = vst.msk [vmem:[%s1963_s4 + $0x170] sm:$0xff] %vm859_vm1, %v841_v45  ;;  %v747_v50 = vadd.f32 %v683_v41, %v429_v46  ;;  %v779_v51 = vadd.f32 %v715_v43, %v589_v47  ;;  %v1089_v52 = vpop.f32.mrb[18].mxu0  ;;  %v1137_v54 = vpop.f32.mrb[18].mxu1 }
  0xfd   :  { %v812_v56 = vmax.f32 %v748_v48, 0.0  ;;  %v844_v57 = vmax.f32 %v780_v49, 0.0  ;;  %v444_v58 = vadd.f32 %v1089_v52, %v1445_v1  ;;  %v604_v59 = vadd.f32 %v1137_v54, %v1445_v1  ;;  %v438_v60 = vpop.f32.mrb[19].mxu0  ;;  %v598_v62 = vpop.f32.mrb[19].mxu1  ;;  %v724_v52 = vld [vmem:[%s1962_s3 + $0x1c8] sm:$0xff] }
  0xfe   :  { %v811_v0 = vmax.f32 %v747_v50, 0.0  ;;  %v843_v2 = vmax.f32 %v779_v51, 0.0  ;;  %v439_v3 = vadd.f32 %v1445_v1, %v438_v60  ;;  %v599_v4 = vadd.f32 %v1445_v1, %v598_v62  ;;  %v692_v50 = vld [vmem:[%s1962_s3 + $0xc8] sm:$0xff]  ;;  %v723_v60 = vld [vmem:[%s1962_s3 + $0x1c0] sm:$0xff] }
  0xff   :  { %877 = vst.msk [vmem:[%s1963_s4 + $0x88] sm:$0xff] %vm859_vm1, %v812_v56  ;;  %909 = vst.msk [vmem:[%s1963_s4 + $0x188] sm:$0xff] %vm859_vm1, %v844_v57  ;;  %v750_v5 = vadd.f32 %v686_v53, %v444_v58  ;;  %v782_v6 = vadd.f32 %v718_v55, %v604_v59  ;;  %v691_v58 = vld [vmem:[%s1962_s3 + $0xc0] sm:$0xff] }
 0x100   :  { %876 = vst.msk [vmem:[%s1963_s4 + $0x80] sm:$0xff] %vm859_vm1, %v811_v0  ;;  %908 = vst.msk [vmem:[%s1963_s4 + $0x180] sm:$0xff] %vm859_vm1, %v843_v2  ;;  %v749_v7 = vadd.f32 %v685_v61, %v439_v3  ;;  %v781_v8 = vadd.f32 %v717_v63, %v599_v4  ;;  %v1092_v9 = vpop.f32.mrb[20].mxu0  ;;  %v1140_v11 = vpop.f32.mrb[20].mxu1 }
 0x101   :  { %v814_v13 = vmax.f32 %v750_v5, 0.0  ;;  %v846_v14 = vmax.f32 %v782_v6, 0.0  ;;  %v454_v15 = vadd.f32 %v1092_v9, %v1445_v1  ;;  %v614_v16 = vadd.f32 %v1140_v11, %v1445_v1  ;;  %v448_v17 = vpop.f32.mrb[21].mxu0  ;;  %v608_v19 = vpop.f32.mrb[21].mxu1  ;;  %v726_v9 = vld [vmem:[%s1962_s3 + $0x1d8] sm:$0xff] }
 0x102   :  { %v813_v21 = vmax.f32 %v749_v7, 0.0  ;;  %v845_v22 = vmax.f32 %v781_v8, 0.0  ;;  %v449_v23 = vadd.f32 %v1445_v1, %v448_v17  ;;  %v609_v24 = vadd.f32 %v1445_v1, %v608_v19  ;;  %v694_v7 = vld [vmem:[%s1962_s3 + $0xd8] sm:$0xff]  ;;  %v725_v17 = vld [vmem:[%s1962_s3 + $0x1d0] sm:$0xff] }
 0x103   :  { %879 = vst.msk [vmem:[%s1963_s4 + $0x98] sm:$0xff] %vm859_vm1, %v814_v13  ;;  %911 = vst.msk [vmem:[%s1963_s4 + $0x198] sm:$0xff] %vm859_vm1, %v846_v14  ;;  %v752_v25 = vadd.f32 %v688_v10, %v454_v15  ;;  %v784_v26 = vadd.f32 %v720_v12, %v614_v16  ;;  %v693_v15 = vld [vmem:[%s1962_s3 + $0xd0] sm:$0xff] }
 0x104   :  { %878 = vst.msk [vmem:[%s1963_s4 + $0x90] sm:$0xff] %vm859_vm1, %v813_v21  ;;  %910 = vst.msk [vmem:[%s1963_s4 + $0x190] sm:$0xff] %vm859_vm1, %v845_v22  ;;  %v751_v27 = vadd.f32 %v687_v18, %v449_v23  ;;  %v783_v28 = vadd.f32 %v719_v20, %v609_v24  ;;  %v1095_v29 = vpop.f32.mrb[22].mxu0  ;;  %v1143_v31 = vpop.f32.mrb[22].mxu1 }
 0x105   :  { %v816_v33 = vmax.f32 %v752_v25, 0.0  ;;  %v848_v34 = vmax.f32 %v784_v26, 0.0  ;;  %v464_v35 = vadd.f32 %v1095_v29, %v1445_v1  ;;  %v624_v36 = vadd.f32 %v1143_v31, %v1445_v1  ;;  %v458_v37 = vpop.f32.mrb[23].mxu0  ;;  %v618_v39 = vpop.f32.mrb[23].mxu1  ;;  %v728_v29 = vld [vmem:[%s1962_s3 + $0x1e8] sm:$0xff] }
 0x106   :  { %v815_v41 = vmax.f32 %v751_v27, 0.0  ;;  %v847_v42 = vmax.f32 %v783_v28, 0.0  ;;  %v459_v43 = vadd.f32 %v1445_v1, %v458_v37  ;;  %v619_v44 = vadd.f32 %v1445_v1, %v618_v39  ;;  %v696_v27 = vld [vmem:[%s1962_s3 + $0xe8] sm:$0xff]  ;;  %v727_v37 = vld [vmem:[%s1962_s3 + $0x1e0] sm:$0xff] }
 0x107   :  { %881 = vst.msk [vmem:[%s1963_s4 + $0xa8] sm:$0xff] %vm859_vm1, %v816_v33  ;;  %913 = vst.msk [vmem:[%s1963_s4 + $0x1a8] sm:$0xff] %vm859_vm1, %v848_v34  ;;  %v754_v45 = vadd.f32 %v690_v30, %v464_v35  ;;  %v786_v46 = vadd.f32 %v722_v32, %v624_v36  ;;  %v695_v35 = vld [vmem:[%s1962_s3 + $0xe0] sm:$0xff] }
 0x108   :  { %880 = vst.msk [vmem:[%s1963_s4 + $0xa0] sm:$0xff] %vm859_vm1, %v815_v41  ;;  %912 = vst.msk [vmem:[%s1963_s4 + $0x1a0] sm:$0xff] %vm859_vm1, %v847_v42  ;;  %v753_v47 = vadd.f32 %v689_v38, %v459_v43  ;;  %v785_v48 = vadd.f32 %v721_v40, %v619_v44  ;;  %v1098_v49 = vpop.f32.mrb[24].mxu0  ;;  %v1146_v51 = vpop.f32.mrb[24].mxu1 }
 0x109   :  { %v818_v53 = vmax.f32 %v754_v45, 0.0  ;;  %v850_v54 = vmax.f32 %v786_v46, 0.0  ;;  %v474_v55 = vadd.f32 %v1098_v49, %v1445_v1  ;;  %v634_v56 = vadd.f32 %v1146_v51, %v1445_v1  ;;  %v468_v57 = vpop.f32.mrb[25].mxu0  ;;  %v628_v59 = vpop.f32.mrb[25].mxu1  ;;  %v730_v49 = vld [vmem:[%s1962_s3 + $0x1f8] sm:$0xff] }
 0x10a   :  { %v817_v61 = vmax.f32 %v753_v47, 0.0  ;;  %v849_v62 = vmax.f32 %v785_v48, 0.0  ;;  %v469_v63 = vadd.f32 %v1445_v1, %v468_v57  ;;  %v629_v0 = vadd.f32 %v1445_v1, %v628_v59  ;;  %v698_v47 = vld [vmem:[%s1962_s3 + $0xf8] sm:$0xff]  ;;  %v729_v57 = vld [vmem:[%s1962_s3 + $0x1f0] sm:$0xff] }
 0x10b   :  { %883 = vst.msk [vmem:[%s1963_s4 + $0xb8] sm:$0xff] %vm859_vm1, %v818_v53  ;;  %915 = vst.msk [vmem:[%s1963_s4 + $0x1b8] sm:$0xff] %vm859_vm1, %v850_v54  ;;  %v756_v2 = vadd.f32 %v692_v50, %v474_v55  ;;  %v788_v3 = vadd.f32 %v724_v52, %v634_v56  ;;  %v697_v55 = vld [vmem:[%s1962_s3 + $0xf0] sm:$0xff] }
 0x10c   :  { %882 = vst.msk [vmem:[%s1963_s4 + $0xb0] sm:$0xff] %vm859_vm1, %v817_v61  ;;  %914 = vst.msk [vmem:[%s1963_s4 + $0x1b0] sm:$0xff] %vm859_vm1, %v849_v62  ;;  %v755_v4 = vadd.f32 %v691_v58, %v469_v63  ;;  %v787_v5 = vadd.f32 %v723_v60, %v629_v0  ;;  %v1101_v6 = vpop.f32.mrb[26].mxu0  ;;  %v1149_v8 = vpop.f32.mrb[26].mxu1 }
 0x10d   :  { %v820_v10 = vmax.f32 %v756_v2, 0.0  ;;  %v852_v11 = vmax.f32 %v788_v3, 0.0  ;;  %v484_v12 = vadd.f32 %v1101_v6, %v1445_v1  ;;  %v644_v13 = vadd.f32 %v1149_v8, %v1445_v1  ;;  %v478_v14 = vpop.f32.mrb[27].mxu0  ;;  %v638_v16 = vpop.f32.mrb[27].mxu1 }
 0x10e   :  { %v819_v18 = vmax.f32 %v755_v4, 0.0  ;;  %v851_v19 = vmax.f32 %v787_v5, 0.0  ;;  %v479_v20 = vadd.f32 %v1445_v1, %v478_v14  ;;  %v639_v21 = vadd.f32 %v1445_v1, %v638_v16 }
 0x10f   :  { %885 = vst.msk [vmem:[%s1963_s4 + $0xc8] sm:$0xff] %vm859_vm1, %v820_v10  ;;  %917 = vst.msk [vmem:[%s1963_s4 + $0x1c8] sm:$0xff] %vm859_vm1, %v852_v11  ;;  %v758_v22 = vadd.f32 %v694_v7, %v484_v12  ;;  %v790_v23 = vadd.f32 %v726_v9, %v644_v13 }
 0x110   :  { %884 = vst.msk [vmem:[%s1963_s4 + $0xc0] sm:$0xff] %vm859_vm1, %v819_v18  ;;  %916 = vst.msk [vmem:[%s1963_s4 + $0x1c0] sm:$0xff] %vm859_vm1, %v851_v19  ;;  %v757_v24 = vadd.f32 %v693_v15, %v479_v20  ;;  %v789_v25 = vadd.f32 %v725_v17, %v639_v21  ;;  %v1104_v26 = vpop.f32.mrb[28].mxu0  ;;  %v1152_v28 = vpop.f32.mrb[28].mxu1 }
 0x111   :  { %v822_v30 = vmax.f32 %v758_v22, 0.0  ;;  %v854_v31 = vmax.f32 %v790_v23, 0.0  ;;  %v494_v32 = vadd.f32 %v1104_v26, %v1445_v1  ;;  %v654_v33 = vadd.f32 %v1152_v28, %v1445_v1  ;;  %v488_v34 = vpop.f32.mrb[29].mxu0  ;;  %v648_v36 = vpop.f32.mrb[29].mxu1 }
 0x112   :  { %v821_v38 = vmax.f32 %v757_v24, 0.0  ;;  %v853_v39 = vmax.f32 %v789_v25, 0.0  ;;  %v489_v40 = vadd.f32 %v1445_v1, %v488_v34  ;;  %v649_v41 = vadd.f32 %v1445_v1, %v648_v36 }
 0x113   :  { %887 = vst.msk [vmem:[%s1963_s4 + $0xd8] sm:$0xff] %vm859_vm1, %v822_v30  ;;  %919 = vst.msk [vmem:[%s1963_s4 + $0x1d8] sm:$0xff] %vm859_vm1, %v854_v31  ;;  %v760_v42 = vadd.f32 %v696_v27, %v494_v32  ;;  %v792_v43 = vadd.f32 %v728_v29, %v654_v33 }
 0x114   :  { %886 = vst.msk [vmem:[%s1963_s4 + $0xd0] sm:$0xff] %vm859_vm1, %v821_v38  ;;  %918 = vst.msk [vmem:[%s1963_s4 + $0x1d0] sm:$0xff] %vm859_vm1, %v853_v39  ;;  %v759_v44 = vadd.f32 %v695_v35, %v489_v40  ;;  %v791_v45 = vadd.f32 %v727_v37, %v649_v41  ;;  %v1107_v46 = vpop.f32.mrb[30].mxu0  ;;  %v1155_v48 = vpop.f32.mrb[30].mxu1 }
 0x115   :  { %v824_v50 = vmax.f32 %v760_v42, 0.0  ;;  %v856_v51 = vmax.f32 %v792_v43, 0.0  ;;  %v504_v52 = vadd.f32 %v1107_v46, %v1445_v1  ;;  %v664_v53 = vadd.f32 %v1155_v48, %v1445_v1  ;;  %v498_v54 = vpop.f32.mrb[31].mxu0  ;;  %v658_v56 = vpop.f32.mrb[31].mxu1 }
 0x116   :  { %v823_v58 = vmax.f32 %v759_v44, 0.0  ;;  %v855_v59 = vmax.f32 %v791_v45, 0.0  ;;  %v499_v60 = vadd.f32 %v1445_v1, %v498_v54  ;;  %v659_v61 = vadd.f32 %v1445_v1, %v658_v56 }
 0x117   :  { %889 = vst.msk [vmem:[%s1963_s4 + $0xe8] sm:$0xff] %vm859_vm1, %v824_v50  ;;  %921 = vst.msk [vmem:[%s1963_s4 + $0x1e8] sm:$0xff] %vm859_vm1, %v856_v51  ;;  %v762_v62 = vadd.f32 %v698_v47, %v504_v52  ;;  %v794_v63 = vadd.f32 %v730_v49, %v664_v53 }
 0x118   :  { %888 = vst.msk [vmem:[%s1963_s4 + $0xe0] sm:$0xff] %vm859_vm1, %v823_v58  ;;  %920 = vst.msk [vmem:[%s1963_s4 + $0x1e0] sm:$0xff] %vm859_vm1, %v855_v59  ;;  %v761_v1 = vadd.f32 %v697_v55, %v499_v60  ;;  %v793_v0 = vadd.f32 %v729_v57, %v659_v61 }
 0x119   :  { %v826_v2 = vmax.f32 %v762_v62, 0.0  ;;  %v858_v3 = vmax.f32 %v794_v63, 0.0 }
 0x11a   :  { %v825_v4 = vmax.f32 %v761_v1, 0.0  ;;  %v857_v5 = vmax.f32 %v793_v0, 0.0 }
 0x11b   :  { %891 = vst.msk [vmem:[%s1963_s4 + $0xf8] sm:$0xff] %vm859_vm1, %v826_v2  ;;  %923 = vst.msk [vmem:[%s1963_s4 + $0x1f8] sm:$0xff] %vm859_vm1, %v858_v3 }
 0x11c   :  { %890 = vst.msk [vmem:[%s1963_s4 + $0xf0] sm:$0xff] %vm859_vm1, %v825_v4  ;;  %922 = vst.msk [vmem:[%s1963_s4 + $0x1f0] sm:$0xff] %vm859_vm1, %v857_v5 }

// kernel: _lambda_.11
= control target key start
LH: loop header
LB: loop body
LE: loop exit
PB: predicated region body
PF: predicated region fallthrough
CT: control target
= control target key end

     0   :  { %vm87_vm0 = vcmask 130048   ;;  %vm1113_vm1 = vcmask 64512   ;;  %s2665_s1 = inlined_call_operand.vmem [shape: f32[16,8], index: 1, kind: input, shape index: {}]   ;;  %s2666_s0 = inlined_call_operand.vmem [shape: f32[512,16], index: 0, kind: input, shape index: {}]   ;;  %s2667_s2 = inlined_call_operand.vmem [shape: f32[1,8], index: 2, kind: input, shape index: {}]   ;;  %s2668_s3 = inlined_call_operand.vmem [shape: f32[512,8], index: 3, kind: output, shape index: {}]  }
   0x1   :  { %v78_v0 = vld [vmem:[%s2665_s1] sm:$0xff]  ;;  %v79_v1 = vld [vmem:[%s2665_s1 + $0x8] sm:$0xff]  ;;  %v16_v7 = vld [vmem:[%s2666_s0 + $0x10] sm:$0xff] }
   0x2   :  { %v14_v2 = vld [vmem:[%s2666_s0] sm:$0xff]  ;;  %v1477_v3 = vpack.c.bf16 %v79_v1, %v78_v0  ;;  %v15_v5 = vld [vmem:[%s2666_s0 + $0x8] sm:$0xff]  ;;  %v48_v8 = vld [vmem:[%s2666_s0 + $0x110] sm:$0xff] }
   0x3   :  { %1381 = vmatprep.mubr.msk.f32.mxu0 %vm87_vm0, %v14_v2  ;;  %v46_v4 = vld [vmem:[%s2666_s0 + $0x100] sm:$0xff]  ;;  %v47_v6 = vld [vmem:[%s2666_s0 + $0x108] sm:$0xff]  ;;  %v17_v9 = vld [vmem:[%s2666_s0 + $0x18] sm:$0xff] }
   0x4   :  { %1429 = vmatprep.mubr.msk.f32.mxu1 %vm87_vm0, %v46_v4  ;;  %1478 = vmatprep.subr.bf16.mxu0 %v1477_v3  ;;  %v49_v10 = vld [vmem:[%s2666_s0 + $0x118] sm:$0xff]  ;;  %v18_v11 = vld [vmem:[%s2666_s0 + $0x20] sm:$0xff]  ;;  %v19_v13 = vld [vmem:[%s2666_s0 + $0x28] sm:$0xff] }
   0x5   :  { %1481 = vmatprep.subr.bf16.mxu1 %v1477_v3  ;;  %1480 = vmatpush3.bf16.msra.mxu0 %v1477_v3  ;;  %v50_v12 = vld [vmem:[%s2666_s0 + $0x120] sm:$0xff]  ;;  %v51_v14 = vld [vmem:[%s2666_s0 + $0x128] sm:$0xff]  ;;  %v20_v15 = vld [vmem:[%s2666_s0 + $0x30] sm:$0xff] }
   0x6   :  { %1482 = vmatpush3.bf16.msra.mxu1 %v1477_v3  ;;  %v52_v16 = vld [vmem:[%s2666_s0 + $0x130] sm:$0xff]  ;;  %v21_v17 = vld [vmem:[%s2666_s0 + $0x38] sm:$0xff]  ;;  %v22_v19 = vld [vmem:[%s2666_s0 + $0x40] sm:$0xff] }
   0x7   :  { %v53_v18 = vld [vmem:[%s2666_s0 + $0x138] sm:$0xff]  ;;  %v54_v20 = vld [vmem:[%s2666_s0 + $0x140] sm:$0xff]  ;;  %v23_v21 = vld [vmem:[%s2666_s0 + $0x48] sm:$0xff] }
   0x8   :  { %1382 = vmatmul.mubr.msk.f32.vlgmr.msra.gmra.mrb[0].mxu0 %vm87_vm0, %v15_v5  ;;  %v55_v22 = vld [vmem:[%s2666_s0 + $0x148] sm:$0xff]  ;;  %v24_v23 = vld [vmem:[%s2666_s0 + $0x50] sm:$0xff]  ;;  %v25_v25 = vld [vmem:[%s2666_s0 + $0x58] sm:$0xff] }
   0x9   :  { %1430 = vmatmul.mubr.msk.f32.vlgmr.msra.gmra.mrb[0].mxu1 %vm87_vm0, %v47_v6  ;;  %1384 = vmatprep.mubr.msk.f32.mxu0 %vm87_vm0, %v16_v7  ;;  %v56_v24 = vld [vmem:[%s2666_s0 + $0x150] sm:$0xff]  ;;  %v57_v26 = vld [vmem:[%s2666_s0 + $0x158] sm:$0xff]  ;;  %v26_v27 = vld [vmem:[%s2666_s0 + $0x60] sm:$0xff] }
   0xa   :  { %1432 = vmatprep.mubr.msk.f32.mxu1 %vm87_vm0, %v48_v8  ;;  %v58_v28 = vld [vmem:[%s2666_s0 + $0x160] sm:$0xff]  ;;  %v27_v29 = vld [vmem:[%s2666_s0 + $0x68] sm:$0xff]  ;;  %v28_v31 = vld [vmem:[%s2666_s0 + $0x70] sm:$0xff] }
   0xb   :  { %v59_v30 = vld [vmem:[%s2666_s0 + $0x168] sm:$0xff]  ;;  %v60_v32 = vld [vmem:[%s2666_s0 + $0x170] sm:$0xff]  ;;  %v29_v33 = vld [vmem:[%s2666_s0 + $0x78] sm:$0xff] }
   0xc   :  { %1385 = vmatmul.mubr.msk.f32.gmra.mrb[2].mxu0 %vm87_vm0, %v17_v9  ;;  %v61_v34 = vld [vmem:[%s2666_s0 + $0x178] sm:$0xff]  ;;  %v30_v35 = vld [vmem:[%s2666_s0 + $0x80] sm:$0xff]  ;;  %v31_v37 = vld [vmem:[%s2666_s0 + $0x88] sm:$0xff] }
   0xd   :  { %1433 = vmatmul.mubr.msk.f32.gmra.mrb[2].mxu1 %vm87_vm0, %v49_v10  ;;  %1387 = vmatprep.mubr.msk.f32.mxu0 %vm87_vm0, %v18_v11  ;;  %v62_v36 = vld [vmem:[%s2666_s0 + $0x180] sm:$0xff]  ;;  %v63_v38 = vld [vmem:[%s2666_s0 + $0x188] sm:$0xff]  ;;  %v32_v39 = vld [vmem:[%s2666_s0 + $0x90] sm:$0xff] }
   0xe   :  { %1435 = vmatprep.mubr.msk.f32.mxu1 %vm87_vm0, %v50_v12  ;;  %v64_v40 = vld [vmem:[%s2666_s0 + $0x190] sm:$0xff]  ;;  %v33_v41 = vld [vmem:[%s2666_s0 + $0x98] sm:$0xff]  ;;  %v34_v43 = vld [vmem:[%s2666_s0 + $0xa0] sm:$0xff] }
   0xf   :  { %v65_v42 = vld [vmem:[%s2666_s0 + $0x198] sm:$0xff]  ;;  %v66_v44 = vld [vmem:[%s2666_s0 + $0x1a0] sm:$0xff]  ;;  %v35_v45 = vld [vmem:[%s2666_s0 + $0xa8] sm:$0xff] }
  0x10   :  { %1388 = vmatmul.mubr.msk.f32.gmra.mrb[4].mxu0 %vm87_vm0, %v19_v13  ;;  %v67_v46 = vld [vmem:[%s2666_s0 + $0x1a8] sm:$0xff]  ;;  %v36_v47 = vld [vmem:[%s2666_s0 + $0xb0] sm:$0xff]  ;;  %v37_v49 = vld [vmem:[%s2666_s0 + $0xb8] sm:$0xff] }
  0x11   :  { %1436 = vmatmul.mubr.msk.f32.gmra.mrb[4].mxu1 %vm87_vm0, %v51_v14  ;;  %1390 = vmatprep.mubr.msk.f32.mxu0 %vm87_vm0, %v20_v15  ;;  %v68_v48 = vld [vmem:[%s2666_s0 + $0x1b0] sm:$0xff]  ;;  %v69_v50 = vld [vmem:[%s2666_s0 + $0x1b8] sm:$0xff]  ;;  %v38_v51 = vld [vmem:[%s2666_s0 + $0xc0] sm:$0xff] }
  0x12   :  { %1438 = vmatprep.mubr.msk.f32.mxu1 %vm87_vm0, %v52_v16  ;;  %v70_v52 = vld [vmem:[%s2666_s0 + $0x1c0] sm:$0xff]  ;;  %v39_v53 = vld [vmem:[%s2666_s0 + $0xc8] sm:$0xff]  ;;  %v40_v55 = vld [vmem:[%s2666_s0 + $0xd0] sm:$0xff] }
  0x13   :  { %v71_v54 = vld [vmem:[%s2666_s0 + $0x1c8] sm:$0xff]  ;;  %v72_v56 = vld [vmem:[%s2666_s0 + $0x1d0] sm:$0xff]  ;;  %v41_v57 = vld [vmem:[%s2666_s0 + $0xd8] sm:$0xff] }
  0x14   :  { %1391 = vmatmul.mubr.msk.f32.gmra.mrb[6].mxu0 %vm87_vm0, %v21_v17  ;;  %v73_v58 = vld [vmem:[%s2666_s0 + $0x1d8] sm:$0xff]  ;;  %v42_v59 = vld [vmem:[%s2666_s0 + $0xe0] sm:$0xff]  ;;  %v43_v61 = vld [vmem:[%s2666_s0 + $0xe8] sm:$0xff] }
  0x15   :  { %1439 = vmatmul.mubr.msk.f32.gmra.mrb[6].mxu1 %vm87_vm0, %v53_v18  ;;  %1393 = vmatprep.mubr.msk.f32.mxu0 %vm87_vm0, %v22_v19  ;;  %v74_v60 = vld [vmem:[%s2666_s0 + $0x1e0] sm:$0xff]  ;;  %v75_v62 = vld [vmem:[%s2666_s0 + $0x1e8] sm:$0xff]  ;;  %v44_v63 = vld [vmem:[%s2666_s0 + $0xf0] sm:$0xff] }
  0x16   :  { %1441 = vmatprep.mubr.msk.f32.mxu1 %vm87_vm0, %v54_v20  ;;  %v76_v0 = vld [vmem:[%s2666_s0 + $0x1f0] sm:$0xff]  ;;  %v45_v1 = vld [vmem:[%s2666_s0 + $0xf8] sm:$0xff]  ;;  %v2024_v3 = vld [vmem:[%s2667_s2] ss:$0 sm:$0xff] }
  0x17   :  { %v77_v2 = vld [vmem:[%s2666_s0 + $0x1f8] sm:$0xff] }
  0x18   :  { %1394 = vmatmul.mubr.msk.f32.gmra.mrb[8].mxu0 %vm87_vm0, %v23_v21 }
  0x19   :  { %1442 = vmatmul.mubr.msk.f32.gmra.mrb[8].mxu1 %vm87_vm0, %v55_v22  ;;  %1396 = vmatprep.mubr.msk.f32.mxu0 %vm87_vm0, %v24_v23 }
  0x1a   :  { %1444 = vmatprep.mubr.msk.f32.mxu1 %vm87_vm0, %v56_v24 }
  0x1c   :  { %1397 = vmatmul.mubr.msk.f32.gmra.mrb[10].mxu0 %vm87_vm0, %v25_v25 }
  0x1d   :  { %1445 = vmatmul.mubr.msk.f32.gmra.mrb[10].mxu1 %vm87_vm0, %v57_v26  ;;  %1399 = vmatprep.mubr.msk.f32.mxu0 %vm87_vm0, %v26_v27 }
  0x1e   :  { %1447 = vmatprep.mubr.msk.f32.mxu1 %vm87_vm0, %v58_v28 }
  0x20   :  { %1400 = vmatmul.mubr.msk.f32.gmra.mrb[12].mxu0 %vm87_vm0, %v27_v29 }
  0x21   :  { %1448 = vmatmul.mubr.msk.f32.gmra.mrb[12].mxu1 %vm87_vm0, %v59_v30  ;;  %1402 = vmatprep.mubr.msk.f32.mxu0 %vm87_vm0, %v28_v31 }
  0x22   :  { %1450 = vmatprep.mubr.msk.f32.mxu1 %vm87_vm0, %v60_v32 }
  0x24   :  { %1403 = vmatmul.mubr.msk.f32.gmra.mrb[14].mxu0 %vm87_vm0, %v29_v33 }
  0x25   :  { %1451 = vmatmul.mubr.msk.f32.gmra.mrb[14].mxu1 %vm87_vm0, %v61_v34  ;;  %1405 = vmatprep.mubr.msk.f32.mxu0 %vm87_vm0, %v30_v35 }
  0x26   :  { %1453 = vmatprep.mubr.msk.f32.mxu1 %vm87_vm0, %v62_v36 }
  0x28   :  { %1406 = vmatmul.mubr.msk.f32.gmra.mrb[16].mxu0 %vm87_vm0, %v31_v37 }
  0x29   :  { %1454 = vmatmul.mubr.msk.f32.gmra.mrb[16].mxu1 %vm87_vm0, %v63_v38  ;;  %1408 = vmatprep.mubr.msk.f32.mxu0 %vm87_vm0, %v32_v39 }
  0x2a   :  { %1456 = vmatprep.mubr.msk.f32.mxu1 %vm87_vm0, %v64_v40 }
  0x2c   :  { %1409 = vmatmul.mubr.msk.f32.gmra.mrb[18].mxu0 %vm87_vm0, %v33_v41 }
  0x2d   :  { %1457 = vmatmul.mubr.msk.f32.gmra.mrb[18].mxu1 %vm87_vm0, %v65_v42  ;;  %1411 = vmatprep.mubr.msk.f32.mxu0 %vm87_vm0, %v34_v43 }
  0x2e   :  { %1459 = vmatprep.mubr.msk.f32.mxu1 %vm87_vm0, %v66_v44 }
  0x30   :  { %1412 = vmatmul.mubr.msk.f32.gmra.mrb[20].mxu0 %vm87_vm0, %v35_v45 }
  0x31   :  { %1460 = vmatmul.mubr.msk.f32.gmra.mrb[20].mxu1 %vm87_vm0, %v67_v46  ;;  %1414 = vmatprep.mubr.msk.f32.mxu0 %vm87_vm0, %v36_v47 }
  0x32   :  { %1462 = vmatprep.mubr.msk.f32.mxu1 %vm87_vm0, %v68_v48 }
  0x34   :  { %1415 = vmatmul.mubr.msk.f32.gmra.mrb[22].mxu0 %vm87_vm0, %v37_v49 }
  0x35   :  { %1463 = vmatmul.mubr.msk.f32.gmra.mrb[22].mxu1 %vm87_vm0, %v69_v50  ;;  %1417 = vmatprep.mubr.msk.f32.mxu0 %vm87_vm0, %v38_v51 }
  0x36   :  { %1465 = vmatprep.mubr.msk.f32.mxu1 %vm87_vm0, %v70_v52 }
  0x38   :  { %1418 = vmatmul.mubr.msk.f32.gmra.mrb[24].mxu0 %vm87_vm0, %v39_v53 }
  0x39   :  { %1466 = vmatmul.mubr.msk.f32.gmra.mrb[24].mxu1 %vm87_vm0, %v71_v54  ;;  %1420 = vmatprep.mubr.msk.f32.mxu0 %vm87_vm0, %v40_v55 }
  0x3a   :  { %1468 = vmatprep.mubr.msk.f32.mxu1 %vm87_vm0, %v72_v56 }
  0x3c   :  { %1421 = vmatmul.mubr.msk.f32.gmra.mrb[26].mxu0 %vm87_vm0, %v41_v57 }
  0x3d   :  { %1469 = vmatmul.mubr.msk.f32.gmra.mrb[26].mxu1 %vm87_vm0, %v73_v58  ;;  %1423 = vmatprep.mubr.msk.f32.mxu0 %vm87_vm0, %v42_v59 }
  0x3e   :  { %1471 = vmatprep.mubr.msk.f32.mxu1 %vm87_vm0, %v74_v60 }
  0x40   :  { %1424 = vmatmul.mubr.msk.f32.gmra.mrb[28].mxu0 %vm87_vm0, %v43_v61 }
  0x41   :  { %1472 = vmatmul.mubr.msk.f32.gmra.mrb[28].mxu1 %vm87_vm0, %v75_v62  ;;  %1426 = vmatprep.mubr.msk.f32.mxu0 %vm87_vm0, %v44_v63 }
  0x42   :  { %1474 = vmatprep.mubr.msk.f32.mxu1 %vm87_vm0, %v76_v0 }
  0x44   :  { %1427 = vmatmul.mubr.msk.f32.gmra.mrb[30].mxu0 %vm87_vm0, %v45_v1 }
  0x45   :  { %1475 = vmatmul.mubr.msk.f32.gmra.mrb[30].mxu1 %vm87_vm0, %v77_v2 }
  0xdb   :  { %v1383_v4 = vpop.f32.mrb[0].mxu0 }
  0xdc   :  { %v1431_v5 = vpop.f32.mrb[0].mxu1  ;;  %v2027_v6 = vadd.f32 %v1383_v4, %v2024_v3  ;;  %v346_v8 = vpop.f32.mrb[1].mxu0 }
  0xdd   :  { %v2030_v7 = vadd.f32 %v1431_v5, %v2024_v3  ;;  %v506_v9 = vpop.f32.mrb[1].mxu1  ;;  %v2033_v10 = vadd.f32 %v2024_v3, %v346_v8 }
  0xde   :  { %v2036_v11 = vadd.f32 %v2024_v3, %v506_v9  ;;  %v1248_v12 = vmul.f32 -1.442695, %v2027_v6 }
  0xdf   :  { %v1280_v13 = vmul.f32 -1.442695, %v2030_v7  ;;  %v1247_v14 = vmul.f32 -1.442695, %v2033_v10  ;;  %v1386_v16 = vpop.f32.mrb[2].mxu0 }
  0xe0   :  { %v1279_v15 = vmul.f32 -1.442695, %v2036_v11  ;;  %v1434_v17 = vpop.f32.mrb[2].mxu1  ;;  %1483 = vpow2.f32 %v1248_v12  ;;  %v2043_v18 = vadd.f32 %v1386_v16, %v2024_v3  ;;  %v356_v20 = vpop.f32.mrb[3].mxu0 }
  0xe1   :  { %v2046_v19 = vadd.f32 %v1434_v17, %v2024_v3  ;;  %v516_v21 = vpop.f32.mrb[3].mxu1  ;;  %1485 = vpow2.f32 %v1280_v13  ;;  %v2049_v22 = vadd.f32 %v2024_v3, %v356_v20 }
  0xe2   :  { %v2052_v23 = vadd.f32 %v2024_v3, %v516_v21  ;;  %1487 = vpow2.f32 %v1247_v14  ;;  %v1250_v24 = vmul.f32 -1.442695, %v2043_v18 }
  0xe3   :  { %v1282_v25 = vmul.f32 -1.442695, %v2046_v19  ;;  %1489 = vpow2.f32 %v1279_v15  ;;  %v1249_v26 = vmul.f32 -1.442695, %v2049_v22  ;;  %v1389_v28 = vpop.f32.mrb[4].mxu0 }
  0xe4   :  { %v1281_v27 = vmul.f32 -1.442695, %v2052_v23  ;;  %v1437_v29 = vpop.f32.mrb[4].mxu1  ;;  %1491 = vpow2.f32 %v1250_v24  ;;  %v2059_v30 = vadd.f32 %v1389_v28, %v2024_v3  ;;  %v366_v32 = vpop.f32.mrb[5].mxu0 }
  0xe5   :  { %v2062_v31 = vadd.f32 %v1437_v29, %v2024_v3  ;;  %v526_v33 = vpop.f32.mrb[5].mxu1  ;;  %1493 = vpow2.f32 %v1282_v25  ;;  %v2065_v34 = vadd.f32 %v2024_v3, %v366_v32 }
  0xe6   :  { %v2068_v35 = vadd.f32 %v2024_v3, %v526_v33  ;;  %1495 = vpow2.f32 %v1249_v26  ;;  %v1252_v36 = vmul.f32 -1.442695, %v2059_v30 }
  0xe7   :  { %v1284_v37 = vmul.f32 -1.442695, %v2062_v31  ;;  %1497 = vpow2.f32 %v1281_v27  ;;  %v1251_v38 = vmul.f32 -1.442695, %v2065_v34  ;;  %v1392_v40 = vpop.f32.mrb[6].mxu0 }
  0xe8   :  { %v1283_v39 = vmul.f32 -1.442695, %v2068_v35  ;;  %v1440_v41 = vpop.f32.mrb[6].mxu1  ;;  %1499 = vpow2.f32 %v1252_v36  ;;  %v2075_v42 = vadd.f32 %v1392_v40, %v2024_v3  ;;  %v376_v43 = vpop.f32.mrb[7].mxu0 }
  0xe9   :  { %v536_v44 = vpop.f32.mrb[7].mxu1  ;;  %1501 = vpow2.f32 %v1284_v37  ;;  %v2081_v12 = vadd.f32 %v1440_v41, %v2024_v3  ;;  %v2084_v15 = vadd.f32 %v2024_v3, %v376_v43 }
  0xea   :  { %v1484_v45 = vpop.eup %1483  ;;  %1503 = vpow2.f32 %v1251_v38  ;;  %v1254_v46 = vmul.f32 -1.442695, %v2075_v42  ;;  %v2089_v21 = vadd.f32 %v2024_v3, %v536_v44 }
  0xeb   :  { %v1486_v47 = vpop.eup %1485  ;;  %v858_v48 = vadd.f32 1.0, %v1484_v45  ;;  %1505 = vpow2.f32 %v1283_v39  ;;  %v1395_v49 = vpop.f32.mrb[8].mxu0  ;;  %v1286_v36 = vmul.f32 -1.442695, %v2081_v12  ;;  %v1253_v40 = vmul.f32 -1.442695, %v2084_v15 }
  0xec   :  { %v1488_v50 = vpop.eup %1487  ;;  %v890_v51 = vadd.f32 1.0, %v1486_v47  ;;  %1507 = vpow2.f32 %v1254_v46  ;;  %v1443_v52 = vpop.f32.mrb[8].mxu1  ;;  %v2096_v28 = vadd.f32 %v1395_v49, %v2024_v3  ;;  %v1285_v46 = vmul.f32 -1.442695, %v2089_v21 }
  0xed   :  { %v386_v53 = vpop.f32.mrb[9].mxu0  ;;  %v1490_v54 = vpop.eup %1489  ;;  %1509 = vrcp.f32 %v858_v48  ;;  %v857_v55 = vadd.f32 1.0, %v1488_v50  ;;  %v2102_v37 = vadd.f32 %v1443_v52, %v2024_v3 }
  0xee   :  { %v546_v56 = vpop.f32.mrb[9].mxu1  ;;  %v1492_v57 = vpop.eup %1491  ;;  %1511 = vrcp.f32 %v890_v51  ;;  %v889_v58 = vadd.f32 1.0, %v1490_v54  ;;  %v2106_v41 = vadd.f32 %v2024_v3, %v386_v53  ;;  %v1256_v52 = vmul.f32 -1.442695, %v2096_v28 }
  0xef   :  { %v1494_v59 = vpop.eup %1493  ;;  %1513 = vrcp.f32 %v857_v55  ;;  %v860_v60 = vadd.f32 1.0, %v1492_v57  ;;  %v1398_v61 = vpop.f32.mrb[10].mxu0  ;;  %v2113_v47 = vadd.f32 %v2024_v3, %v546_v56  ;;  %v1288_v56 = vmul.f32 -1.442695, %v2102_v37 }
  0xf0   :  { %v1496_v62 = vpop.eup %1495  ;;  %1515 = vrcp.f32 %v889_v58  ;;  %v892_v63 = vadd.f32 1.0, %v1494_v59  ;;  %v1446_v0 = vpop.f32.mrb[10].mxu1  ;;  %v2122_v53 = vadd.f32 %v1398_v61, %v2024_v3  ;;  %v1255_v59 = vmul.f32 -1.442695, %v2106_v41 }
  0xf1   :  { %v396_v1 = vpop.f32.mrb[11].mxu0  ;;  %v1498_v2 = vpop.eup %1497  ;;  %1517 = vrcp.f32 %v860_v60  ;;  %v859_v4 = vadd.f32 1.0, %v1496_v62 }
  0xf2   :  { %v2078_v5 = vpop.f32.mrb[11].mxu1  ;;  %v1500_v8 = vpop.eup %1499  ;;  %1519 = vrcp.f32 %v892_v63  ;;  %v891_v9 = vadd.f32 1.0, %v1498_v2  ;;  %v2142_v60 = vadd.f32 %v2024_v3, %v396_v1 }
  0xf3   :  { %v1502_v13 = vpop.eup %1501  ;;  %1521 = vrcp.f32 %v859_v4  ;;  %v862_v14 = vadd.f32 1.0, %v1500_v8  ;;  %v2086_v16 = vpop.f32.mrb[12].mxu0 }
  0xf4   :  { %v1504_v17 = vpop.eup %1503  ;;  %1523 = vrcp.f32 %v891_v9  ;;  %v894_v20 = vadd.f32 1.0, %v1502_v13  ;;  %v2091_v24 = vpop.f32.mrb[12].mxu1  ;;  %v2170_v9 = vadd.f32 %v2086_v16, %v2024_v3 }
  0xf5   :  { %v2093_v25 = vpop.f32.mrb[13].mxu0  ;;  %v1506_v26 = vpop.eup %1505  ;;  %1525 = vrcp.f32 %v862_v14  ;;  %v861_v27 = vadd.f32 1.0, %v1504_v17 }
  0xf6   :  { %v2098_v29 = vpop.f32.mrb[13].mxu1  ;;  %v1508_v32 = vpop.eup %1507  ;;  %1527 = vrcp.f32 %v894_v20  ;;  %v893_v33 = vadd.f32 1.0, %v1506_v26  ;;  %v1257_v20 = vmul.f32 -1.442695, %v2142_v60 }
  0xf7   :  { %v1510_v38 = vpop.eup %1509  ;;  %1529 = vrcp.f32 %v861_v27  ;;  %v864_v39 = vadd.f32 1.0, %v1508_v32  ;;  %v2108_v43 = vpop.f32.mrb[14].mxu0 }
  0xf8   :  { %v1512_v44 = vpop.eup %1511  ;;  %v1050_v45 = vmul.f32 %v1510_v38, %v2027_v6  ;;  %1531 = vrcp.f32 %v893_v33  ;;  %v2115_v48 = vpop.f32.mrb[14].mxu1 }
  0xf9   :  { %v2117_v49 = vpop.f32.mrb[15].mxu0  ;;  %v1514_v50 = vpop.eup %1513  ;;  %v1082_v51 = vmul.f32 %v1512_v44, %v2030_v7  ;;  %1533 = vrcp.f32 %v864_v39  ;;  %v2133_v7 = vadd.f32 %v1446_v0, %v2024_v3  ;;  %v2156_v0 = vadd.f32 %v2024_v3, %v2078_v5 }
  0xfa   :  { %v2124_v6 = vpop.f32.mrb[15].mxu1  ;;  %v1516_v54 = vpop.eup %1515  ;;  %1115 = vst.msk [vmem:[%s2668_s3 + $0x8] sm:$0xff] %vm1113_vm1, %v1050_v45  ;;  %v1049_v55 = vmul.f32 %v1514_v50, %v2033_v10  ;;  %1535 = vpow2.f32 %v1286_v36 }
  0xfb   :  { %v1518_v57 = vpop.eup %1517  ;;  %1147 = vst.msk [vmem:[%s2668_s3 + $0x108] sm:$0xff] %vm1113_vm1, %v1082_v51  ;;  %v1081_v58 = vmul.f32 %v1516_v54, %v2036_v11  ;;  %1537 = vpow2.f32 %v1253_v40  ;;  %v2144_v10 = vpop.f32.mrb[16].mxu0  ;;  %v1287_v11 = vmul.f32 -1.442695, %v2113_v47  ;;  %v1290_v14 = vmul.f32 -1.442695, %v2133_v7 }
  0xfc   :  { %v2146_v61 = vpop.f32.mrb[16].mxu1  ;;  %v1520_v62 = vpop.eup %1519  ;;  %1114 = vst.msk [vmem:[%s2668_s3] sm:$0xff] %vm1113_vm1, %v1049_v55  ;;  %v1052_v63 = vmul.f32 %v1518_v57, %v2043_v18  ;;  %1539 = vpow2.f32 %v1285_v46  ;;  %v1258_v18 = vmul.f32 -1.442695, %v2122_v53  ;;  %v1289_v32 = vmul.f32 -1.442695, %v2156_v0 }
  0xfd   :  { %v2158_v1 = vpop.f32.mrb[17].mxu0  ;;  %v2160_v2 = vpop.f32.mrb[17].mxu1  ;;  %1146 = vst.msk [vmem:[%s2668_s3 + $0x100] sm:$0xff] %vm1113_vm1, %v1081_v58  ;;  %v1084_v8 = vmul.f32 %v1520_v62, %v2046_v19  ;;  %1541 = vpow2.f32 %v1256_v52  ;;  %v2180_v19 = vadd.f32 %v2091_v24, %v2024_v3  ;;  %v2227_v51 = vadd.f32 %v2024_v3, %v2098_v29 }
  0xfe   :  { %v1522_v4 = vpop.eup %1521  ;;  %1117 = vst.msk [vmem:[%s2668_s3 + $0x18] sm:$0xff] %vm1113_vm1, %v1052_v63  ;;  %1543 = vpow2.f32 %v1288_v56 }
  0xff   :  { %v1524_v5 = vpop.eup %1523  ;;  %v1051_v13 = vmul.f32 %v1522_v4, %v2049_v22  ;;  %1149 = vst.msk [vmem:[%s2668_s3 + $0x118] sm:$0xff] %vm1113_vm1, %v1084_v8  ;;  %1545 = vpow2.f32 %v1255_v59  ;;  %v2188_v26 = vpop.f32.mrb[18].mxu0  ;;  %v1292_v45 = vmul.f32 -1.442695, %v2180_v19 }
 0x100   :  { %v1526_v17 = vpop.eup %1525  ;;  %v1083_v16 = vmul.f32 %v1524_v5, %v2052_v23  ;;  %v2190_v22 = vpop.f32.mrb[18].mxu1  ;;  %1547 = vpow2.f32 %v1287_v11  ;;  %v2200_v23 = vadd.f32 %v2024_v3, %v2093_v25  ;;  %v2258_v5 = vmul.f32 -1.442695, %v2227_v51 }
 0x101   :  { %v1528_v27 = vpop.eup %1527  ;;  %1116 = vst.msk [vmem:[%s2668_s3 + $0x10] sm:$0xff] %vm1113_vm1, %v1051_v13  ;;  %v1054_v24 = vmul.f32 %v1526_v17, %v2059_v30  ;;  %v436_v33 = vpop.f32.mrb[19].mxu0  ;;  %1549 = vpow2.f32 %v1258_v18  ;;  %v1260_v30 = vmul.f32 -1.442695, %v2170_v9  ;;  %v2262_v13 = vadd.f32 %v2108_v43, %v2024_v3 }
 0x102   :  { %v596_v36 = vpop.f32.mrb[19].mxu1  ;;  %v1530_v38 = vpop.eup %1529  ;;  %1148 = vst.msk [vmem:[%s2668_s3 + $0x110] sm:$0xff] %vm1113_vm1, %v1083_v16  ;;  %v1086_v39 = vmul.f32 %v1528_v27, %v2062_v31  ;;  %v2209_v40 = vadd.f32 %v2024_v3, %v436_v33  ;;  %1551 = vpow2.f32 %v1290_v14  ;;  %v2252_v11 = vmul.f32 -1.442695, %v2200_v23 }
 0x103   :  { %v1532_v44 = vpop.eup %1531  ;;  %1119 = vst.msk [vmem:[%s2668_s3 + $0x28] sm:$0xff] %vm1113_vm1, %v1054_v24  ;;  %v1053_v25 = vmul.f32 %v1530_v38, %v2065_v34  ;;  %v2218_v46 = vadd.f32 %v2024_v3, %v596_v36  ;;  %1553 = vpow2.f32 %v1257_v20  ;;  %v1413_v34 = vpop.f32.mrb[20].mxu0  ;;  %v2266_v20 = vadd.f32 %v2115_v48, %v2024_v3 }
 0x104   :  { %v1534_v31 = vpop.eup %1533  ;;  %1151 = vst.msk [vmem:[%s2668_s3 + $0x128] sm:$0xff] %vm1113_vm1, %v1086_v39  ;;  %v1085_v50 = vmul.f32 %v1532_v44, %v2068_v35  ;;  %v1461_v52 = vpop.f32.mrb[20].mxu1  ;;  %1555 = vpow2.f32 %v1289_v32  ;;  %v2235_v56 = vadd.f32 %v1413_v34, %v2024_v3  ;;  %v2279_v48 = vadd.f32 %v2024_v3, %v2117_v49 }
 0x105   :  { %v1536_v54 = vpop.eup %1535  ;;  %1118 = vst.msk [vmem:[%s2668_s3 + $0x20] sm:$0xff] %vm1113_vm1, %v1053_v25  ;;  %v1056_v55 = vmul.f32 %v1534_v31, %v2075_v42  ;;  %v446_v35 = vpop.f32.mrb[21].mxu0  ;;  %1557 = vpow2.f32 %v1260_v30  ;;  %v2242_v59 = vadd.f32 %v1461_v52, %v2024_v3  ;;  %v2289_v34 = vadd.f32 %v2024_v3, %v2124_v6 }
 0x106   :  { %v606_v57 = vpop.f32.mrb[21].mxu1  ;;  %v1538_v58 = vpop.eup %1537  ;;  %1150 = vst.msk [vmem:[%s2668_s3 + $0x120] sm:$0xff] %vm1113_vm1, %v1085_v50  ;;  %v896_v29 = vadd.f32 1.0, %v1536_v54  ;;  %v2245_v62 = vadd.f32 %v2024_v3, %v446_v35  ;;  %1559 = vpow2.f32 %v1292_v45  ;;  %v2285_v50 = vmul.f32 -1.442695, %v2262_v13 }
 0x107   :  { %v1540_v42 = vpop.eup %1539  ;;  %1121 = vst.msk [vmem:[%s2668_s3 + $0x38] sm:$0xff] %vm1113_vm1, %v1056_v55  ;;  %v863_v63 = vadd.f32 1.0, %v1538_v58  ;;  %v2255_v4 = vadd.f32 %v2024_v3, %v606_v57  ;;  %v1416_v14 = vpop.f32.mrb[22].mxu0  ;;  %v2292_v49 = vmul.f32 -1.442695, %v2266_v20 }
 0x108   :  { %v1542_v8 = vpop.eup %1541  ;;  %1561 = vrcp.f32 %v896_v29  ;;  %v895_v18 = vadd.f32 1.0, %v1540_v42  ;;  %v2269_v27 = vadd.f32 %v1416_v14, %v2024_v3  ;;  %v1464_v24 = vpop.f32.mrb[22].mxu1 }
 0x109   :  { %v1544_v17 = vpop.eup %1543  ;;  %1563 = vrcp.f32 %v863_v63  ;;  %v866_v16 = vadd.f32 1.0, %v1542_v8  ;;  %v456_v32 = vpop.f32.mrb[23].mxu0  ;;  %v2272_v38 = vadd.f32 %v1464_v24, %v2024_v3 }
 0x10a   :  { %v1546_v33 = vpop.eup %1545  ;;  %1565 = vrcp.f32 %v895_v18  ;;  %v898_v36 = vadd.f32 1.0, %v1544_v17  ;;  %v2275_v43 = vadd.f32 %v2024_v3, %v456_v32  ;;  %v616_v39 = vpop.f32.mrb[23].mxu1  ;;  %v2304_v17 = vmul.f32 -1.442695, %v2279_v48 }
 0x10b   :  { %v1548_v30 = vpop.eup %1547  ;;  %1567 = vrcp.f32 %v866_v16  ;;  %v865_v44 = vadd.f32 1.0, %v1546_v33  ;;  %v2282_v25 = vadd.f32 %v2024_v3, %v616_v39  ;;  %v1419_v52 = vpop.f32.mrb[24].mxu0  ;;  %v2310_v33 = vmul.f32 -1.442695, %v2289_v34 }
 0x10c   :  { %v1550_v45 = vpop.eup %1549  ;;  %1569 = vrcp.f32 %v898_v36  ;;  %v897_v31 = vadd.f32 1.0, %v1548_v30  ;;  %v2295_v35 = vadd.f32 %v1419_v52, %v2024_v3  ;;  %v1467_v57 = vpop.f32.mrb[24].mxu1  ;;  %v2314_v36 = vadd.f32 %v2144_v10, %v2024_v3 }
 0x10d   :  { %v1552_v54 = vpop.eup %1551  ;;  %1571 = vrcp.f32 %v865_v44  ;;  %v868_v55 = vadd.f32 1.0, %v1550_v45  ;;  %v466_v58 = vpop.f32.mrb[25].mxu0  ;;  %v2298_v63 = vadd.f32 %v1467_v57, %v2024_v3  ;;  %v2318_v45 = vadd.f32 %v2146_v61, %v2024_v3 }
 0x10e   :  { %v1554_v29 = vpop.eup %1553  ;;  %1573 = vrcp.f32 %v897_v31  ;;  %v900_v42 = vadd.f32 1.0, %v1552_v54  ;;  %v2301_v6 = vadd.f32 %v2024_v3, %v466_v58  ;;  %v626_v8 = vpop.f32.mrb[25].mxu1  ;;  %v2332_v61 = vadd.f32 %v2024_v3, %v2158_v1 }
 0x10f   :  { %v1556_v18 = vpop.eup %1555  ;;  %1575 = vrcp.f32 %v868_v55  ;;  %v867_v14 = vadd.f32 1.0, %v1554_v29  ;;  %v2307_v16 = vadd.f32 %v2024_v3, %v626_v8  ;;  %v1422_v39 = vpop.f32.mrb[26].mxu0 }
 0x110   :  { %v1558_v24 = vpop.eup %1557  ;;  %1577 = vrcp.f32 %v900_v42  ;;  %v899_v32 = vadd.f32 1.0, %v1556_v18  ;;  %v2321_v31 = vadd.f32 %v1422_v39, %v2024_v3  ;;  %v1470_v52 = vpop.f32.mrb[26].mxu1  ;;  %v2341_v39 = vadd.f32 %v2024_v3, %v2160_v2 }
 0x111   :  { %v1560_v30 = vpop.eup %1559  ;;  %1579 = vrcp.f32 %v867_v14  ;;  %v870_v44 = vadd.f32 1.0, %v1558_v24  ;;  %v476_v54 = vpop.f32.mrb[27].mxu0  ;;  %v2324_v58 = vadd.f32 %v1470_v52, %v2024_v3 }
 0x112   :  { %v1562_v55 = vpop.eup %1561  ;;  %1581 = vrcp.f32 %v899_v32  ;;  %v902_v57 = vadd.f32 1.0, %v1560_v30  ;;  %v2327_v10 = vadd.f32 %v2024_v3, %v476_v54  ;;  %v636_v29 = vpop.f32.mrb[27].mxu1  ;;  %v1264_v32 = vmul.f32 -1.442695, %v2314_v36 }
 0x113   :  { %v1564_v42 = vpop.eup %1563  ;;  %v1088_v8 = vmul.f32 %v1562_v55, %v2081_v12  ;;  %1583 = vrcp.f32 %v870_v44  ;;  %v2335_v18 = vadd.f32 %v2024_v3, %v636_v29  ;;  %v1425_v30 = vpop.f32.mrb[28].mxu0 }
 0x114   :  { %v1566_v14 = vpop.eup %1565  ;;  %v1055_v24 = vmul.f32 %v1564_v42, %v2084_v15  ;;  %1585 = vrcp.f32 %v902_v57  ;;  %v1473_v12 = vpop.f32.mrb[28].mxu1  ;;  %v1296_v15 = vmul.f32 -1.442695, %v2318_v45  ;;  %v2351_v52 = vadd.f32 %v1425_v30, %v2024_v3 }
 0x115   :  { %v1568_v44 = vpop.eup %1567  ;;  %1153 = vst.msk [vmem:[%s2668_s3 + $0x138] sm:$0xff] %vm1113_vm1, %v1088_v8  ;;  %v1087_v1 = vmul.f32 %v1566_v14, %v2089_v21  ;;  %1587 = vpow2.f32 %v2252_v11  ;;  %v486_v54 = vpop.f32.mrb[29].mxu0  ;;  %v2360_v21 = vadd.f32 %v1473_v12, %v2024_v3 }
 0x116   :  { %v646_v2 = vpop.f32.mrb[29].mxu1  ;;  %v1570_v55 = vpop.eup %1569  ;;  %1120 = vst.msk [vmem:[%s2668_s3 + $0x30] sm:$0xff] %vm1113_vm1, %v1055_v24  ;;  %v1058_v57 = vmul.f32 %v1568_v44, %v2096_v28  ;;  %1589 = vpow2.f32 %v2258_v5  ;;  %v2363_v11 = vadd.f32 %v2024_v3, %v486_v54  ;;  %v2373_v28 = vadd.f32 %v2188_v26, %v2024_v3 }
 0x117   :  { %v1572_v29 = vpop.eup %1571  ;;  %1152 = vst.msk [vmem:[%s2668_s3 + $0x130] sm:$0xff] %vm1113_vm1, %v1087_v1  ;;  %v1090_v42 = vmul.f32 %v1570_v55, %v2102_v37  ;;  %1591 = vpow2.f32 %v2285_v50  ;;  %v2376_v5 = vadd.f32 %v2024_v3, %v646_v2  ;;  %v1263_v37 = vmul.f32 -1.442695, %v2332_v61  ;;  %v1428_v26 = vpop.f32.mrb[30].mxu0 }
 0x118   :  { %v1574_v8 = vpop.eup %1573  ;;  %1123 = vst.msk [vmem:[%s2668_s3 + $0x48] sm:$0xff] %vm1113_vm1, %v1058_v57  ;;  %v1057_v14 = vmul.f32 %v1572_v29, %v2106_v41  ;;  %1593 = vpow2.f32 %v2292_v49  ;;  %v2387_v50 = vadd.f32 %v2190_v22, %v2024_v3  ;;  %v1476_v24 = vpop.f32.mrb[30].mxu1  ;;  %v1295_v41 = vmul.f32 -1.442695, %v2341_v39 }
 0x119   :  { %v1576_v30 = vpop.eup %1575  ;;  %1155 = vst.msk [vmem:[%s2668_s3 + $0x148] sm:$0xff] %vm1113_vm1, %v1090_v42  ;;  %v1089_v12 = vmul.f32 %v1574_v8, %v2113_v47  ;;  %1595 = vpow2.f32 %v2304_v17  ;;  %v2397_v49 = vadd.f32 %v1428_v26, %v2024_v3  ;;  %v496_v44 = vpop.f32.mrb[31].mxu0  ;;  %v2406_v47 = vadd.f32 %v1476_v24, %v2024_v3 }
 0x11a   :  { %v656_v22 = vpop.f32.mrb[31].mxu1  ;;  %v1578_v1 = vpop.eup %1577  ;;  %1122 = vst.msk [vmem:[%s2668_s3 + $0x40] sm:$0xff] %vm1113_vm1, %v1057_v14  ;;  %v1060_v54 = vmul.f32 %v1576_v30, %v2122_v53  ;;  %1597 = vpow2.f32 %v2310_v33  ;;  %v2409_v17 = vadd.f32 %v2024_v3, %v496_v44  ;;  %v1266_v57 = vmul.f32 -1.442695, %v2373_v28 }
 0x11b   :  { %v1580_v2 = vpop.eup %1579  ;;  %1154 = vst.msk [vmem:[%s2668_s3 + $0x140] sm:$0xff] %vm1113_vm1, %v1089_v12  ;;  %v1092_v55 = vmul.f32 %v1578_v1, %v2133_v7  ;;  %1599 = vpow2.f32 %v1264_v32  ;;  %v2418_v53 = vadd.f32 %v2024_v3, %v656_v22  ;;  %v1298_v42 = vmul.f32 -1.442695, %v2387_v50 }
 0x11c   :  { %v1582_v33 = vpop.eup %1581  ;;  %1125 = vst.msk [vmem:[%s2668_s3 + $0x58] sm:$0xff] %vm1113_vm1, %v1060_v54  ;;  %v1059_v29 = vmul.f32 %v1580_v2, %v2142_v60  ;;  %1601 = vpow2.f32 %v1296_v15  ;;  %v1265_v7 = vmul.f32 -1.442695, %v2209_v40 }
 0x11d   :  { %v1584_v8 = vpop.eup %1583  ;;  %1157 = vst.msk [vmem:[%s2668_s3 + $0x158] sm:$0xff] %vm1113_vm1, %v1092_v55  ;;  %v1091_v3 = vmul.f32 %v1582_v33, %v2156_v0  ;;  %1603 = vpow2.f32 %v1263_v37 }
 0x11e   :  { %v1586_v32 = vpop.eup %1585  ;;  %1124 = vst.msk [vmem:[%s2668_s3 + $0x50] sm:$0xff] %vm1113_vm1, %v1059_v29  ;;  %v1062_v60 = vmul.f32 %v1584_v8, %v2170_v9  ;;  %1605 = vpow2.f32 %v1295_v41 }
 0x11f   :  { %v1588_v15 = vpop.eup %1587  ;;  %1156 = vst.msk [vmem:[%s2668_s3 + $0x150] sm:$0xff] %vm1113_vm1, %v1091_v3  ;;  %v1094_v0 = vmul.f32 %v1586_v32, %v2180_v19  ;;  %1607 = vpow2.f32 %v1266_v57 }
 0x120   :  { %v1590_v14 = vpop.eup %1589  ;;  %1127 = vst.msk [vmem:[%s2668_s3 + $0x68] sm:$0xff] %vm1113_vm1, %v1062_v60  ;;  %v869_v37 = vadd.f32 1.0, %v1588_v15  ;;  %1609 = vpow2.f32 %v1298_v42  ;;  %v1297_v15 = vmul.f32 -1.442695, %v2218_v46 }
 0x121   :  { %v1592_v26 = vpop.eup %1591  ;;  %1159 = vst.msk [vmem:[%s2668_s3 + $0x168] sm:$0xff] %vm1113_vm1, %v1094_v0  ;;  %v901_v9 = vadd.f32 1.0, %v1590_v14  ;;  %1611 = vpow2.f32 %v1265_v7 }
 0x122   :  { %v1594_v24 = vpop.eup %1593  ;;  %1613 = vrcp.f32 %v869_v37  ;;  %v872_v19 = vadd.f32 1.0, %v1592_v26  ;;  %v1268_v37 = vmul.f32 -1.442695, %v2235_v56 }
 0x123   :  { %v1596_v30 = vpop.eup %1595  ;;  %1615 = vrcp.f32 %v901_v9  ;;  %v904_v12 = vadd.f32 1.0, %v1594_v24  ;;  %v1300_v24 = vmul.f32 -1.442695, %v2242_v59 }
 0x124   :  { %v1598_v41 = vpop.eup %1597  ;;  %1617 = vrcp.f32 %v872_v19  ;;  %v871_v44 = vadd.f32 1.0, %v1596_v30 }
 0x125   :  { %v1600_v22 = vpop.eup %1599  ;;  %1619 = vrcp.f32 %v904_v12  ;;  %v903_v1 = vadd.f32 1.0, %v1598_v41  ;;  %v1267_v12 = vmul.f32 -1.442695, %v2245_v62 }
 0x126   :  { %v1602_v54 = vpop.eup %1601  ;;  %1621 = vrcp.f32 %v871_v44  ;;  %v874_v2 = vadd.f32 1.0, %v1600_v22 }
 0x127   :  { %v1604_v55 = vpop.eup %1603  ;;  %1623 = vrcp.f32 %v903_v1  ;;  %v906_v57 = vadd.f32 1.0, %v1602_v54  ;;  %v1270_v1 = vmul.f32 -1.442695, %v2269_v27 }
 0x128   :  { %v1606_v33 = vpop.eup %1605  ;;  %1625 = vrcp.f32 %v874_v2  ;;  %v873_v29 = vadd.f32 1.0, %v1604_v55  ;;  %v1302_v2 = vmul.f32 -1.442695, %v2272_v38 }
 0x129   :  { %v1608_v42 = vpop.eup %1607  ;;  %1627 = vrcp.f32 %v906_v57  ;;  %v905_v8 = vadd.f32 1.0, %v1606_v33  ;;  %v1269_v57 = vmul.f32 -1.442695, %v2275_v43 }
 0x12a   :  { %v1610_v3 = vpop.eup %1609  ;;  %1629 = vrcp.f32 %v873_v29  ;;  %v876_v7 = vadd.f32 1.0, %v1608_v42  ;;  %v1301_v29 = vmul.f32 -1.442695, %v2282_v25 }
 0x12b   :  { %v1612_v32 = vpop.eup %1611  ;;  %1631 = vrcp.f32 %v905_v8  ;;  %v908_v60 = vadd.f32 1.0, %v1610_v3  ;;  %v1272_v8 = vmul.f32 -1.442695, %v2295_v35 }
 0x12c   :  { %v1614_v0 = vpop.eup %1613  ;;  %1633 = vrcp.f32 %v876_v7  ;;  %v875_v14 = vadd.f32 1.0, %v1612_v32  ;;  %v1304_v7 = vmul.f32 -1.442695, %v2298_v63 }
 0x12d   :  { %v1616_v26 = vpop.eup %1615  ;;  %v1061_v9 = vmul.f32 %v1614_v0, %v2200_v23  ;;  %1635 = vrcp.f32 %v908_v60  ;;  %v1299_v23 = vmul.f32 -1.442695, %v2255_v4  ;;  %v1271_v60 = vmul.f32 -1.442695, %v2301_v6 }
 0x12e   :  { %v1618_v19 = vpop.eup %1617  ;;  %v1093_v30 = vmul.f32 %v1616_v26, %v2227_v51  ;;  %1637 = vrcp.f32 %v875_v14  ;;  %v1303_v0 = vmul.f32 -1.442695, %v2307_v16 }
 0x12f   :  { %v1620_v41 = vpop.eup %1619  ;;  %1126 = vst.msk [vmem:[%s2668_s3 + $0x60] sm:$0xff] %vm1113_vm1, %v1061_v9  ;;  %v1064_v44 = vmul.f32 %v1618_v19, %v2262_v13  ;;  %1639 = vpow2.f32 %v1297_v15 }
 0x130   :  { %v1622_v22 = vpop.eup %1621  ;;  %1158 = vst.msk [vmem:[%s2668_s3 + $0x160] sm:$0xff] %vm1113_vm1, %v1093_v30  ;;  %v1096_v51 = vmul.f32 %v1620_v41, %v2266_v20  ;;  %1641 = vpow2.f32 %v1268_v37 }
 0x131   :  { %v1624_v54 = vpop.eup %1623  ;;  %1129 = vst.msk [vmem:[%s2668_s3 + $0x78] sm:$0xff] %vm1113_vm1, %v1064_v44  ;;  %v1063_v13 = vmul.f32 %v1622_v22, %v2279_v48  ;;  %1643 = vpow2.f32 %v1300_v24 }
 0x132   :  { %v1626_v55 = vpop.eup %1625  ;;  %1161 = vst.msk [vmem:[%s2668_s3 + $0x178] sm:$0xff] %vm1113_vm1, %v1096_v51  ;;  %v1095_v20 = vmul.f32 %v1624_v54, %v2289_v34  ;;  %1645 = vpow2.f32 %v1267_v12 }
 0x133   :  { %v1628_v33 = vpop.eup %1627  ;;  %1128 = vst.msk [vmem:[%s2668_s3 + $0x70] sm:$0xff] %vm1113_vm1, %v1063_v13  ;;  %v1066_v48 = vmul.f32 %v1626_v55, %v2314_v36  ;;  %1647 = vpow2.f32 %v1299_v23 }
 0x134   :  { %v1630_v42 = vpop.eup %1629  ;;  %1160 = vst.msk [vmem:[%s2668_s3 + $0x170] sm:$0xff] %vm1113_vm1, %v1095_v20  ;;  %v1098_v34 = vmul.f32 %v1628_v33, %v2318_v45  ;;  %1649 = vpow2.f32 %v1270_v1 }
 0x135   :  { %v1632_v3 = vpop.eup %1631  ;;  %1131 = vst.msk [vmem:[%s2668_s3 + $0x88] sm:$0xff] %vm1113_vm1, %v1066_v48  ;;  %v1065_v36 = vmul.f32 %v1630_v42, %v2332_v61  ;;  %1651 = vpow2.f32 %v1302_v2 }
 0x136   :  { %v1634_v32 = vpop.eup %1633  ;;  %1163 = vst.msk [vmem:[%s2668_s3 + $0x188] sm:$0xff] %vm1113_vm1, %v1098_v34  ;;  %v1097_v45 = vmul.f32 %v1632_v3, %v2341_v39  ;;  %1653 = vpow2.f32 %v1269_v57  ;;  %v1274_v34 = vmul.f32 -1.442695, %v2321_v31 }
 0x137   :  { %v1636_v15 = vpop.eup %1635  ;;  %1130 = vst.msk [vmem:[%s2668_s3 + $0x80] sm:$0xff] %vm1113_vm1, %v1065_v36  ;;  %v1068_v61 = vmul.f32 %v1634_v32, %v2373_v28  ;;  %1655 = vpow2.f32 %v1301_v29  ;;  %v1306_v36 = vmul.f32 -1.442695, %v2324_v58 }
 0x138   :  { %v1638_v14 = vpop.eup %1637  ;;  %1162 = vst.msk [vmem:[%s2668_s3 + $0x180] sm:$0xff] %vm1113_vm1, %v1097_v45  ;;  %v1100_v39 = vmul.f32 %v1636_v15, %v2387_v50  ;;  %1657 = vpow2.f32 %v1272_v8  ;;  %v1273_v45 = vmul.f32 -1.442695, %v2327_v10 }
 0x139   :  { %v1640_v37 = vpop.eup %1639  ;;  %1133 = vst.msk [vmem:[%s2668_s3 + $0x98] sm:$0xff] %vm1113_vm1, %v1068_v61  ;;  %v1067_v28 = vmul.f32 %v1638_v14, %v2209_v40  ;;  %1659 = vpow2.f32 %v1304_v7  ;;  %v1305_v61 = vmul.f32 -1.442695, %v2335_v18 }
 0x13a   :  { %v1642_v26 = vpop.eup %1641  ;;  %1165 = vst.msk [vmem:[%s2668_s3 + $0x198] sm:$0xff] %vm1113_vm1, %v1100_v39  ;;  %v907_v9 = vadd.f32 1.0, %v1640_v37  ;;  %1661 = vpow2.f32 %v1271_v60  ;;  %v1308_v37 = vmul.f32 -1.442695, %v2360_v21 }
 0x13b   :  { %v1644_v24 = vpop.eup %1643  ;;  %1132 = vst.msk [vmem:[%s2668_s3 + $0x90] sm:$0xff] %vm1113_vm1, %v1067_v28  ;;  %v878_v50 = vadd.f32 1.0, %v1642_v26  ;;  %1663 = vpow2.f32 %v1303_v0  ;;  %v1275_v26 = vmul.f32 -1.442695, %v2363_v11 }
 0x13c   :  { %v1646_v19 = vpop.eup %1645  ;;  %1665 = vrcp.f32 %v907_v9  ;;  %v910_v40 = vadd.f32 1.0, %v1644_v24  ;;  %v1307_v24 = vmul.f32 -1.442695, %v2376_v5 }
 0x13d   :  { %v1648_v30 = vpop.eup %1647  ;;  %1667 = vrcp.f32 %v878_v50  ;;  %v877_v12 = vadd.f32 1.0, %v1646_v19  ;;  %v1278_v19 = vmul.f32 -1.442695, %v2397_v49 }
 0x13e   :  { %v1650_v41 = vpop.eup %1649  ;;  %1669 = vrcp.f32 %v910_v40  ;;  %v909_v44 = vadd.f32 1.0, %v1648_v30  ;;  %v1310_v30 = vmul.f32 -1.442695, %v2406_v47 }
 0x13f   :  { %v1652_v23 = vpop.eup %1651  ;;  %1671 = vrcp.f32 %v877_v12  ;;  %v880_v22 = vadd.f32 1.0, %v1650_v41  ;;  %v1277_v41 = vmul.f32 -1.442695, %v2409_v17 }
 0x140   :  { %v1654_v51 = vpop.eup %1653  ;;  %1673 = vrcp.f32 %v909_v44  ;;  %v912_v1 = vadd.f32 1.0, %v1652_v23  ;;  %v1309_v23 = vmul.f32 -1.442695, %v2418_v53 }
 0x141   :  { %v1656_v54 = vpop.eup %1655  ;;  %1675 = vrcp.f32 %v880_v22  ;;  %v879_v13 = vadd.f32 1.0, %v1654_v51 }
 0x142   :  { %v1658_v2 = vpop.eup %1657  ;;  %1677 = vrcp.f32 %v912_v1  ;;  %v911_v55 = vadd.f32 1.0, %v1656_v54 }
 0x143   :  { %v1660_v20 = vpop.eup %1659  ;;  %1679 = vrcp.f32 %v879_v13  ;;  %v882_v57 = vadd.f32 1.0, %v1658_v2 }
 0x144   :  { %v1662_v33 = vpop.eup %1661  ;;  %1681 = vrcp.f32 %v911_v55  ;;  %v914_v48 = vadd.f32 1.0, %v1660_v20 }
 0x145   :  { %v1664_v29 = vpop.eup %1663  ;;  %1683 = vrcp.f32 %v882_v57  ;;  %v881_v42 = vadd.f32 1.0, %v1662_v33 }
 0x146   :  { %v1666_v8 = vpop.eup %1665  ;;  %1685 = vrcp.f32 %v914_v48  ;;  %v913_v3 = vadd.f32 1.0, %v1664_v29 }
 0x147   :  { %v1668_v7 = vpop.eup %1667  ;;  %v1099_v32 = vmul.f32 %v1666_v8, %v2218_v46  ;;  %1687 = vrcp.f32 %v881_v42  ;;  %v1276_v46 = vmul.f32 -1.442695, %v2351_v52 }
 0x148   :  { %v1670_v60 = vpop.eup %1669  ;;  %v1070_v15 = vmul.f32 %v1668_v7, %v2235_v56  ;;  %1689 = vrcp.f32 %v913_v3 }
 0x149   :  { %v1672_v0 = vpop.eup %1671  ;;  %1164 = vst.msk [vmem:[%s2668_s3 + $0x190] sm:$0xff] %vm1113_vm1, %v1099_v32  ;;  %v1102_v14 = vmul.f32 %v1670_v60, %v2242_v59  ;;  %1691 = vpow2.f32 %v1274_v34 }
 0x14a   :  { %v1674_v39 = vpop.eup %1673  ;;  %1135 = vst.msk [vmem:[%s2668_s3 + $0xa8] sm:$0xff] %vm1113_vm1, %v1070_v15  ;;  %v1069_v56 = vmul.f32 %v1672_v0, %v2245_v62  ;;  %1693 = vpow2.f32 %v1306_v36 }
 0x14b   :  { %v1676_v28 = vpop.eup %1675  ;;  %1167 = vst.msk [vmem:[%s2668_s3 + $0x1a8] sm:$0xff] %vm1113_vm1, %v1102_v14  ;;  %v1101_v59 = vmul.f32 %v1674_v39, %v2255_v4  ;;  %1695 = vpow2.f32 %v1273_v45 }
 0x14c   :  { %v1678_v9 = vpop.eup %1677  ;;  %1134 = vst.msk [vmem:[%s2668_s3 + $0xa0] sm:$0xff] %vm1113_vm1, %v1069_v56  ;;  %v1072_v62 = vmul.f32 %v1676_v28, %v2269_v27  ;;  %1697 = vpow2.f32 %v1305_v61 }
 0x14d   :  { %v1680_v50 = vpop.eup %1679  ;;  %1166 = vst.msk [vmem:[%s2668_s3 + $0x1a0] sm:$0xff] %vm1113_vm1, %v1101_v59  ;;  %v1104_v4 = vmul.f32 %v1678_v9, %v2272_v38  ;;  %1699 = vpow2.f32 %v1276_v46 }
 0x14e   :  { %v1682_v40 = vpop.eup %1681  ;;  %1137 = vst.msk [vmem:[%s2668_s3 + $0xb8] sm:$0xff] %vm1113_vm1, %v1072_v62  ;;  %v1071_v27 = vmul.f32 %v1680_v50, %v2275_v43  ;;  %1701 = vpow2.f32 %v1308_v37 }
 0x14f   :  { %v1684_v12 = vpop.eup %1683  ;;  %1169 = vst.msk [vmem:[%s2668_s3 + $0x1b8] sm:$0xff] %vm1113_vm1, %v1104_v4  ;;  %v1103_v38 = vmul.f32 %v1682_v40, %v2282_v25  ;;  %1703 = vpow2.f32 %v1275_v26 }
 0x150   :  { %v1686_v44 = vpop.eup %1685  ;;  %1136 = vst.msk [vmem:[%s2668_s3 + $0xb0] sm:$0xff] %vm1113_vm1, %v1071_v27  ;;  %v1074_v43 = vmul.f32 %v1684_v12, %v2295_v35  ;;  %1705 = vpow2.f32 %v1307_v24 }
 0x151   :  { %v1688_v22 = vpop.eup %1687  ;;  %1168 = vst.msk [vmem:[%s2668_s3 + $0x1b0] sm:$0xff] %vm1113_vm1, %v1103_v38  ;;  %v1106_v25 = vmul.f32 %v1686_v44, %v2298_v63  ;;  %1707 = vpow2.f32 %v1278_v19 }
 0x152   :  { %v1690_v51 = vpop.eup %1689  ;;  %1139 = vst.msk [vmem:[%s2668_s3 + $0xc8] sm:$0xff] %vm1113_vm1, %v1074_v43  ;;  %v1073_v35 = vmul.f32 %v1688_v22, %v2301_v6  ;;  %1709 = vpow2.f32 %v1310_v30 }
 0x153   :  { %v1692_v1 = vpop.eup %1691  ;;  %1171 = vst.msk [vmem:[%s2668_s3 + $0x1c8] sm:$0xff] %vm1113_vm1, %v1106_v25  ;;  %v1105_v54 = vmul.f32 %v1690_v51, %v2307_v16  ;;  %1711 = vpow2.f32 %v1277_v41 }
 0x154   :  { %v1694_v63 = vpop.eup %1693  ;;  %1138 = vst.msk [vmem:[%s2668_s3 + $0xc0] sm:$0xff] %vm1113_vm1, %v1073_v35  ;;  %v884_v13 = vadd.f32 1.0, %v1692_v1  ;;  %1713 = vpow2.f32 %v1309_v23 }
 0x155   :  { %v1696_v2 = vpop.eup %1695  ;;  %1170 = vst.msk [vmem:[%s2668_s3 + $0x1c0] sm:$0xff] %vm1113_vm1, %v1105_v54  ;;  %v916_v6 = vadd.f32 1.0, %v1694_v63 }
 0x156   :  { %v1698_v55 = vpop.eup %1697  ;;  %1715 = vrcp.f32 %v884_v13  ;;  %v883_v20 = vadd.f32 1.0, %v1696_v2 }
 0x157   :  { %v1700_v16 = vpop.eup %1699  ;;  %1717 = vrcp.f32 %v916_v6  ;;  %v915_v57 = vadd.f32 1.0, %v1698_v55 }
 0x158   :  { %v1702_v33 = vpop.eup %1701  ;;  %1719 = vrcp.f32 %v883_v20  ;;  %v886_v48 = vadd.f32 1.0, %v1700_v16 }
 0x159   :  { %v1704_v29 = vpop.eup %1703  ;;  %1721 = vrcp.f32 %v915_v57  ;;  %v918_v42 = vadd.f32 1.0, %v1702_v33 }
 0x15a   :  { %v1706_v34 = vpop.eup %1705  ;;  %1723 = vrcp.f32 %v886_v48  ;;  %v885_v8 = vadd.f32 1.0, %v1704_v29 }
 0x15b   :  { %v1708_v3 = vpop.eup %1707  ;;  %1725 = vrcp.f32 %v918_v42  ;;  %v917_v36 = vadd.f32 1.0, %v1706_v34 }
 0x15c   :  { %v1710_v7 = vpop.eup %1709  ;;  %1727 = vrcp.f32 %v885_v8  ;;  %v888_v32 = vadd.f32 1.0, %v1708_v3 }
 0x15d   :  { %v1712_v45 = vpop.eup %1711  ;;  %1729 = vrcp.f32 %v917_v36  ;;  %v920_v60 = vadd.f32 1.0, %v1710_v7 }
 0x15e   :  { %v1714_v15 = vpop.eup %1713  ;;  %1731 = vrcp.f32 %v888_v32  ;;  %v887_v61 = vadd.f32 1.0, %v1712_v45 }
 0x15f   :  { %1733 = vrcp.f32 %v920_v60  ;;  %v919_v0 = vadd.f32 1.0, %v1714_v15 }
 0x160   :  { %v1716_v14 = vpop.eup %1715  ;;  %1735 = vrcp.f32 %v887_v61 }
 0x161   :  { %v1718_v46 = vpop.eup %1717  ;;  %v1076_v39 = vmul.f32 %v1716_v14, %v2321_v31  ;;  %1737 = vrcp.f32 %v919_v0 }
 0x162   :  { %v1720_v56 = vpop.eup %1719  ;;  %v1108_v37 = vmul.f32 %v1718_v46, %v2324_v58 }
 0x163   :  { %v1722_v28 = vpop.eup %1721  ;;  %1141 = vst.msk [vmem:[%s2668_s3 + $0xd8] sm:$0xff] %vm1113_vm1, %v1076_v39  ;;  %v1075_v59 = vmul.f32 %v1720_v56, %v2327_v10 }
 0x164   :  { %v1724_v26 = vpop.eup %1723  ;;  %1173 = vst.msk [vmem:[%s2668_s3 + $0x1d8] sm:$0xff] %vm1113_vm1, %v1108_v37  ;;  %v1107_v31 = vmul.f32 %v1722_v28, %v2335_v18 }
 0x165   :  { %v1726_v9 = vpop.eup %1725  ;;  %1140 = vst.msk [vmem:[%s2668_s3 + $0xd0] sm:$0xff] %vm1113_vm1, %v1075_v59  ;;  %v1078_v58 = vmul.f32 %v1724_v26, %v2351_v52 }
 0x166   :  { %v1728_v62 = vpop.eup %1727  ;;  %1172 = vst.msk [vmem:[%s2668_s3 + $0x1d0] sm:$0xff] %vm1113_vm1, %v1107_v31  ;;  %v1110_v10 = vmul.f32 %v1726_v9, %v2360_v21 }
 0x167   :  { %v1730_v24 = vpop.eup %1729  ;;  %1143 = vst.msk [vmem:[%s2668_s3 + $0xe8] sm:$0xff] %vm1113_vm1, %v1078_v58  ;;  %v1077_v18 = vmul.f32 %v1728_v62, %v2363_v11 }
 0x168   :  { %v1732_v50 = vpop.eup %1731  ;;  %1175 = vst.msk [vmem:[%s2668_s3 + $0x1e8] sm:$0xff] %vm1113_vm1, %v1110_v10  ;;  %v1109_v52 = vmul.f32 %v1730_v24, %v2376_v5 }
 0x169   :  { %v1734_v4 = vpop.eup %1733  ;;  %1142 = vst.msk [vmem:[%s2668_s3 + $0xe0] sm:$0xff] %vm1113_vm1, %v1077_v18  ;;  %v1080_v21 = vmul.f32 %v1732_v50, %v2397_v49 }
 0x16a   :  { %v1736_v19 = vpop.eup %1735  ;;  %1174 = vst.msk [vmem:[%s2668_s3 + $0x1e0] sm:$0xff] %vm1113_vm1, %v1109_v52  ;;  %v1112_v11 = vmul.f32 %v1734_v4, %v2406_v47 }
 0x16b   :  { %v1738_v40 = vpop.eup %1737  ;;  %1145 = vst.msk [vmem:[%s2668_s3 + $0xf8] sm:$0xff] %vm1113_vm1, %v1080_v21  ;;  %v1079_v5 = vmul.f32 %v1736_v19, %v2409_v17 }
 0x16c   :  { %1177 = vst.msk [vmem:[%s2668_s3 + $0x1f8] sm:$0xff] %vm1113_vm1, %v1112_v11  ;;  %v1111_v49 = vmul.f32 %v1738_v40, %v2418_v53 }
 0x16d   :  { %1144 = vst.msk [vmem:[%s2668_s3 + $0xf0] sm:$0xff] %vm1113_vm1, %v1079_v5 }
 0x16e   :  { %1176 = vst.msk [vmem:[%s2668_s3 + $0x1f0] sm:$0xff] %vm1113_vm1, %v1111_v49 }

// kernel: _lambda_.8
= control target key start
LH: loop header
LB: loop body
LE: loop exit
PB: predicated region body
PF: predicated region fallthrough
CT: control target
= control target key end

     0   :  { %s8062_s15 = smov 0   ;;  %s8064_s16 = smov 0   ;;  %s9610_s0 = inlined_call_operand.vmem [shape: f32[2,1,480,8], index: 0, kind: input, shape index: {}, may-alias: {0,1}]   ;;  %s9611_s1 = inlined_call_operand.vmem [shape: f32[2,1,480,8], index: 1, kind: input, shape index: {}, may-alias: {0,1}]   ;;  %s9612_s2 = inlined_call_operand.vmem [shape: f32[9,8,8], index: 2, kind: input, shape index: {}]   ;;  %s9613_s3 = inlined_call_operand.vmem [shape: f32[1,8], index: 3, kind: input, shape index: {}]   ;;  %s9614_s4 = inlined_call_operand.vmem [shape: f32[2,384,8], index: 4, kind: output, shape index: {}]  }
   0x1   :  { %s8066_s17 = smov 0  }
   0x2 LB: > { %s26_s18 = sadd.s32 1, %s8031_s16  ;;  %p5802_p0 = scmp.ge.s32.totalorder %s8035_s17, 1  ;;  %s8035_s17 = sphi %s8066_s17, %s14_s17   ;;  %s8031_s16 = sphi %s8064_s16, %s9742_s16   ;;  %s8027_s15 = sphi %s8062_s15, %s9741_s15  }
   0x3   : > { %p28_p1 = scmp.ge.s32.totalorder %s26_s18, 2  ;;  %p216_p2 = scmp.lt.s32.totalorder %s8035_s17, 3 }
   0x5   : > { %s9744_s18 = smov (%p28_p1, %s26_s18), 0  ;;  %p217_p3 = pnand %p5802_p0, %p216_p2 }
   0x7   : > { %220 = sbr.rel (%p217_p3) target bundleno = 711 (0x2c7), region = 36 }
   0xe   : > { %v5806_v0 = vld [vmem:[%s9612_s2 + $0x8] sm:$0xff]  ;;  %v8086_v1 = vld [vmem:[%s9612_s2 + $0x20] sm:$0xff]  ;;  %p270_p4 = scmp.lt.s32.totalorder %s8027_s15, 1  ;;  %vm355_vm0 = vcmask 64512   ;;  %v8170_v36 = vld [vmem:[%s9612_s2 + $0x30] sm:$0xff] }
   0xf   : > { %v8091_v2 = vld [vmem:[%s9612_s2] sm:$0xff]  ;;  %6740 = vmatprep.subr.mxu1 %v5806_v0  ;;  %7036 = vmatprep.subr.mxu0 %v8086_v1  ;;  %v8097_v3 = vld [vmem:[%s9612_s2 + $0x28] sm:$0xff]  ;;  %v8177_v37 = vld [vmem:[%s9612_s2 + $0x10] sm:$0xff] }
  0x10   : > { %6741 = vmatpush3.msra.mxu1 %v5806_v0  ;;  %7037 = vmatpush3.msra.mxu0 %v8086_v1  ;;  %s9746_s15 = smov (!%p270_p4, %s8027_s15), 1 }
  0x11   : > { %6814 = vmatprep.subr.mxu1 %v8091_v2  ;;  %7110 = vmatprep.subr.mxu0 %v8097_v3  ;;  %s7792_s27 = smul.u32 480, %s9746_s15 }
  0x13   : > { %s8110_s30 = scalar_lea.vmem %s9610_s0, %s7792_s27  ;;  %s6298_s9 = sadd.s32 384, %s7792_s27 }
  0x14   : > { %v307_v4 = vld [vmem:[%s8110_s30] sm:$0xff]  ;;  %v308_v5 = vld [vmem:[%s8110_s30 + $0x8] sm:$0xff]  ;;  %v310_v6 = vld [vmem:[%s8110_s30 + $0x18] sm:$0xff]  ;;  %s8249_s12 = scalar_lea.vmem %s9611_s1, %s6298_s9  ;;  %s7794_s27 = smul.u32 384, %s9746_s15 }
  0x15   : > { %356 = vst.msk [vmem:[#allocation2] sm:$0xff] %vm355_vm0, %v307_v4  ;;  %357 = vst.msk [vmem:[#allocation2 + $0x8] sm:$0xff] %vm355_vm0, %v308_v5  ;;  %v311_v7 = vld [vmem:[%s8110_s30 + $0x20] sm:$0xff]  ;;  %v309_v8 = vld [vmem:[%s8110_s30 + $0x10] sm:$0xff] }
  0x16   : > { %359 = vst.msk [vmem:[#allocation2 + $0x18] sm:$0xff] %vm355_vm0, %v310_v6  ;;  %v312_v9 = vld [vmem:[%s8110_s30 + $0x28] sm:$0xff]  ;;  %360 = vst.msk [vmem:[#allocation2 + $0x20] sm:$0xff] %vm355_vm0, %v311_v7  ;;  %v313_v10 = vld [vmem:[%s8110_s30 + $0x30] sm:$0xff]  ;;  %s9309_s29 = scalar_lea.vmem %s9614_s4, %s7794_s27 }
  0x17   : > { %358 = vst.msk [vmem:[#allocation2 + $0x10] sm:$0xff] %vm355_vm0, %v309_v8  ;;  %361 = vst.msk [vmem:[#allocation2 + $0x28] sm:$0xff] %vm355_vm0, %v312_v9  ;;  %v314_v11 = vld [vmem:[%s8110_s30 + $0x38] sm:$0xff]  ;;  %v315_v12 = vld [vmem:[%s8110_s30 + $0x40] sm:$0xff] }
  0x18   : > { %362 = vst.msk [vmem:[#allocation2 + $0x30] sm:$0xff] %vm355_vm0, %v313_v10  ;;  %363 = vst.msk [vmem:[#allocation2 + $0x38] sm:$0xff] %vm355_vm0, %v314_v11  ;;  %v316_v13 = vld [vmem:[%s8110_s30 + $0x48] sm:$0xff]  ;;  %v317_v14 = vld [vmem:[%s8110_s30 + $0x50] sm:$0xff] }
  0x19   : > { %364 = vst.msk [vmem:[#allocation2 + $0x40] sm:$0xff] %vm355_vm0, %v315_v12  ;;  %v318_v15 = vld [vmem:[%s8110_s30 + $0x58] sm:$0xff]  ;;  %365 = vst.msk [vmem:[#allocation2 + $0x48] sm:$0xff] %vm355_vm0, %v316_v13  ;;  %v319_v16 = vld [vmem:[%s8110_s30 + $0x60] sm:$0xff] }
  0x1a   : > { %366 = vst.msk [vmem:[#allocation2 + $0x50] sm:$0xff] %vm355_vm0, %v317_v14  ;;  %367 = vst.msk [vmem:[#allocation2 + $0x58] sm:$0xff] %vm355_vm0, %v318_v15  ;;  %v320_v17 = vld [vmem:[%s8110_s30 + $0x68] sm:$0xff]  ;;  %v321_v18 = vld [vmem:[%s8110_s30 + $0x70] sm:$0xff] }
  0x1b   : > { %368 = vst.msk [vmem:[#allocation2 + $0x60] sm:$0xff] %vm355_vm0, %v319_v16  ;;  %369 = vst.msk [vmem:[#allocation2 + $0x68] sm:$0xff] %vm355_vm0, %v320_v17  ;;  %v322_v19 = vld [vmem:[%s8110_s30 + $0x78] sm:$0xff]  ;;  %v323_v20 = vld [vmem:[%s8110_s30 + $0x80] sm:$0xff] }
  0x1c   : > { %370 = vst.msk [vmem:[#allocation2 + $0x70] sm:$0xff] %vm355_vm0, %v321_v18  ;;  %v324_v21 = vld [vmem:[%s8110_s30 + $0x88] sm:$0xff]  ;;  %371 = vst.msk [vmem:[#allocation2 + $0x78] sm:$0xff] %vm355_vm0, %v322_v19  ;;  %v325_v22 = vld [vmem:[%s8110_s30 + $0x90] sm:$0xff] }
  0x1d   : > { %372 = vst.msk [vmem:[#allocation2 + $0x80] sm:$0xff] %vm355_vm0, %v323_v20  ;;  %373 = vst.msk [vmem:[#allocation2 + $0x88] sm:$0xff] %vm355_vm0, %v324_v21  ;;  %v326_v23 = vld [vmem:[%s8110_s30 + $0x98] sm:$0xff]  ;;  %v327_v24 = vld [vmem:[%s8110_s30 + $0xa0] sm:$0xff] }
  0x1e   : > { %374 = vst.msk [vmem:[#allocation2 + $0x90] sm:$0xff] %vm355_vm0, %v325_v22  ;;  %375 = vst.msk [vmem:[#allocation2 + $0x98] sm:$0xff] %vm355_vm0, %v326_v23  ;;  %v328_v25 = vld [vmem:[%s8110_s30 + $0xa8] sm:$0xff]  ;;  %v329_v26 = vld [vmem:[%s8110_s30 + $0xb0] sm:$0xff] }
  0x1f   : > { %376 = vst.msk [vmem:[#allocation2 + $0xa0] sm:$0xff] %vm355_vm0, %v327_v24  ;;  %v330_v27 = vld [vmem:[%s8110_s30 + $0xb8] sm:$0xff]  ;;  %v477_v28 = vld [vmem:[#allocation2 + $0x1] sm:$0xff]  ;;  %377 = vst.msk [vmem:[#allocation2 + $0xa8] sm:$0xff] %vm355_vm0, %v328_v25 }
  0x20   : > { %378 = vst.msk [vmem:[#allocation2 + $0xb0] sm:$0xff] %vm355_vm0, %v329_v26  ;;  %379 = vst.msk [vmem:[#allocation2 + $0xb8] sm:$0xff] %vm355_vm0, %v330_v27  ;;  %v331_v29 = vld [vmem:[%s8110_s30 + $0xc0] sm:$0xff]  ;;  %v332_v30 = vld [vmem:[%s8110_s30 + $0xc8] sm:$0xff]  ;;  %6742 = vmatprep.mubr.msk.f32.mxu1 %vm355_vm0, %v477_v28 }
  0x21   : > { %v2519_v31 = vld [vmem:[#allocation2 + $0x19] sm:$0xff]  ;;  %v478_v32 = vld [vmem:[#allocation2 + $0x9] sm:$0xff]  ;;  %v2520_v33 = vld [vmem:[#allocation2 + $0x21] sm:$0xff]  ;;  %380 = vst.msk [vmem:[#allocation2 + $0xc0] sm:$0xff] %vm355_vm0, %v331_v29 }
  0x22   : > { %381 = vst.msk [vmem:[#allocation2 + $0xc8] sm:$0xff] %vm355_vm0, %v332_v30  ;;  %7038 = vmatprep.mubr.msk.f32.mxu0 %vm355_vm0, %v2519_v31  ;;  %6743 = vmatmul.mubr.msk.f32.vlgmr.msra.gmra.mrb[0].mxu1 %vm355_vm0, %v478_v32  ;;  %v479_v34 = vld [vmem:[#allocation2 + $0x11] sm:$0xff]  ;;  %v2521_v35 = vld [vmem:[#allocation2 + $0x29] sm:$0xff]  ;;  %v2523_v39 = vld [vmem:[#allocation2 + $0x39] sm:$0xff] }
  0x23   : > { %6815 = vmatpush3.msra.mxu1 %v8091_v2  ;;  %7039 = vmatmul.mubr.msk.f32.vlgmr.msra.gmra.mrb[0].mxu0 %vm355_vm0, %v2520_v33  ;;  %v2522_v38 = vld [vmem:[#allocation2 + $0x31] sm:$0xff]  ;;  %v2524_v40 = vld [vmem:[#allocation2 + $0x41] sm:$0xff]  ;;  %v2525_v41 = vld [vmem:[#allocation2 + $0x49] sm:$0xff] }
  0x24   : > { %7111 = vmatpush3.msra.mxu0 %v8097_v3  ;;  %6745 = vmatprep.mubr.msk.f32.mxu1 %vm355_vm0, %v479_v34  ;;  %v333_v42 = vld [vmem:[%s8110_s30 + $0xd0] sm:$0xff]  ;;  %v334_v43 = vld [vmem:[%s8110_s30 + $0xd8] sm:$0xff]  ;;  %v335_v44 = vld [vmem:[%s8110_s30 + $0xe0] sm:$0xff] }
  0x25   : > { %7041 = vmatprep.mubr.msk.f32.mxu0 %vm355_vm0, %v2521_v35  ;;  %7184 = vmatprep.subr.mxu0 %v8170_v36  ;;  %382 = vst.msk [vmem:[#allocation2 + $0xd0] sm:$0xff] %vm355_vm0, %v333_v42  ;;  %383 = vst.msk [vmem:[#allocation2 + $0xd8] sm:$0xff] %vm355_vm0, %v334_v43  ;;  %v336_v45 = vld [vmem:[%s8110_s30 + $0xe8] sm:$0xff]  ;;  %v2526_v46 = vld [vmem:[#allocation2 + $0x51] sm:$0xff] }
  0x26   : > { %6746 = vmatmul.mubr.msk.f32.gmra.mrb[2].mxu1 %vm355_vm0, %v2519_v31  ;;  %6888 = vmatprep.subr.mxu1 %v8177_v37  ;;  %384 = vst.msk [vmem:[#allocation2 + $0xe0] sm:$0xff] %vm355_vm0, %v335_v44  ;;  %385 = vst.msk [vmem:[#allocation2 + $0xe8] sm:$0xff] %vm355_vm0, %v336_v45  ;;  %v337_v47 = vld [vmem:[%s8110_s30 + $0xf0] sm:$0xff]  ;;  %v338_v48 = vld [vmem:[%s8110_s30 + $0xf8] sm:$0xff] }
  0x27   : > { %7042 = vmatmul.mubr.msk.f32.gmra.mrb[2].mxu0 %vm355_vm0, %v2522_v38  ;;  %6748 = vmatprep.mubr.msk.f32.mxu1 %vm355_vm0, %v2520_v33  ;;  %v2527_v49 = vld [vmem:[#allocation2 + $0x59] sm:$0xff]  ;;  %386 = vst.msk [vmem:[#allocation2 + $0xf0] sm:$0xff] %vm355_vm0, %v337_v47  ;;  %387 = vst.msk [vmem:[#allocation2 + $0xf8] sm:$0xff] %vm355_vm0, %v338_v48  ;;  %v340_v51 = vld [vmem:[%s8110_s30 + $0x108] sm:$0xff] }
  0x28   : > { %7044 = vmatprep.mubr.msk.f32.mxu0 %vm355_vm0, %v2523_v39  ;;  %v339_v50 = vld [vmem:[%s8110_s30 + $0x100] sm:$0xff]  ;;  %v341_v52 = vld [vmem:[%s8110_s30 + $0x110] sm:$0xff]  ;;  %389 = vst.msk [vmem:[#allocation2 + $0x108] sm:$0xff] %vm355_vm0, %v340_v51  ;;  %v342_v53 = vld [vmem:[%s8110_s30 + $0x118] sm:$0xff] }
  0x29   : > { %388 = vst.msk [vmem:[#allocation2 + $0x100] sm:$0xff] %vm355_vm0, %v339_v50  ;;  %390 = vst.msk [vmem:[#allocation2 + $0x110] sm:$0xff] %vm355_vm0, %v341_v52  ;;  %v2528_v54 = vld [vmem:[#allocation2 + $0x61] sm:$0xff]  ;;  %v2529_v57 = vld [vmem:[#allocation2 + $0x69] sm:$0xff] }
  0x2a   : > { %6749 = vmatmul.mubr.msk.f32.gmra.mrb[4].mxu1 %vm355_vm0, %v2521_v35  ;;  %391 = vst.msk [vmem:[#allocation2 + $0x118] sm:$0xff] %vm355_vm0, %v342_v53  ;;  %v343_v55 = vld [vmem:[%s8110_s30 + $0x120] sm:$0xff]  ;;  %v344_v56 = vld [vmem:[%s8110_s30 + $0x128] sm:$0xff]  ;;  %v345_v58 = vld [vmem:[%s8110_s30 + $0x130] sm:$0xff] }
  0x2b   : > { %7045 = vmatmul.mubr.msk.f32.gmra.mrb[4].mxu0 %vm355_vm0, %v2524_v40  ;;  %6751 = vmatprep.mubr.msk.f32.mxu1 %vm355_vm0, %v2522_v38  ;;  %392 = vst.msk [vmem:[#allocation2 + $0x120] sm:$0xff] %vm355_vm0, %v343_v55  ;;  %393 = vst.msk [vmem:[#allocation2 + $0x128] sm:$0xff] %vm355_vm0, %v344_v56  ;;  %v346_v59 = vld [vmem:[%s8110_s30 + $0x138] sm:$0xff]  ;;  %v347_v61 = vld [vmem:[%s8110_s30 + $0x140] sm:$0xff] }
  0x2c   : > { %7047 = vmatprep.mubr.msk.f32.mxu0 %vm355_vm0, %v2525_v41  ;;  %394 = vst.msk [vmem:[#allocation2 + $0x130] sm:$0xff] %vm355_vm0, %v345_v58  ;;  %v2530_v60 = vld [vmem:[#allocation2 + $0x71] sm:$0xff]  ;;  %395 = vst.msk [vmem:[#allocation2 + $0x138] sm:$0xff] %vm355_vm0, %v346_v59  ;;  %v2531_v62 = vld [vmem:[#allocation2 + $0x79] sm:$0xff] }
  0x2d   : > { %396 = vst.msk [vmem:[#allocation2 + $0x140] sm:$0xff] %vm355_vm0, %v347_v61  ;;  %v348_v63 = vld [vmem:[%s8110_s30 + $0x148] sm:$0xff]  ;;  %v349_v0 = vld [vmem:[%s8110_s30 + $0x150] sm:$0xff]  ;;  %v350_v3 = vld [vmem:[%s8110_s30 + $0x158] sm:$0xff] }
  0x2e   : > { %6752 = vmatmul.mubr.msk.f32.gmra.mrb[6].mxu1 %vm355_vm0, %v2523_v39  ;;  %397 = vst.msk [vmem:[#allocation2 + $0x148] sm:$0xff] %vm355_vm0, %v348_v63  ;;  %v2532_v2 = vld [vmem:[#allocation2 + $0x81] sm:$0xff]  ;;  %398 = vst.msk [vmem:[#allocation2 + $0x150] sm:$0xff] %vm355_vm0, %v349_v0  ;;  %v2533_v4 = vld [vmem:[#allocation2 + $0x89] sm:$0xff] }
  0x2f   : > { %7048 = vmatmul.mubr.msk.f32.gmra.mrb[6].mxu0 %vm355_vm0, %v2526_v46  ;;  %6754 = vmatprep.mubr.msk.f32.mxu1 %vm355_vm0, %v2524_v40  ;;  %399 = vst.msk [vmem:[#allocation2 + $0x158] sm:$0xff] %vm355_vm0, %v350_v3  ;;  %v351_v5 = vld [vmem:[%s8110_s30 + $0x160] sm:$0xff]  ;;  %v352_v6 = vld [vmem:[%s8110_s30 + $0x168] sm:$0xff]  ;;  %v353_v7 = vld [vmem:[%s8110_s30 + $0x170] sm:$0xff] }
  0x30   : > { %7050 = vmatprep.mubr.msk.f32.mxu0 %vm355_vm0, %v2527_v49  ;;  %400 = vst.msk [vmem:[#allocation2 + $0x160] sm:$0xff] %vm355_vm0, %v351_v5  ;;  %401 = vst.msk [vmem:[#allocation2 + $0x168] sm:$0xff] %vm355_vm0, %v352_v6  ;;  %v2534_v8 = vld [vmem:[#allocation2 + $0x91] sm:$0xff]  ;;  %v2535_v10 = vld [vmem:[#allocation2 + $0x99] sm:$0xff] }
  0x31   : > { %402 = vst.msk [vmem:[#allocation2 + $0x170] sm:$0xff] %vm355_vm0, %v353_v7  ;;  %v354_v9 = vld [vmem:[%s8110_s30 + $0x178] sm:$0xff]  ;;  %v404_v11 = vld [vmem:[%s8249_s12] sm:$0xff]  ;;  %v2537_v13 = vld [vmem:[#allocation2 + $0xa9] sm:$0xff] }
  0x32   : > { %6755 = vmatmul.mubr.msk.f32.gmra.mrb[8].mxu1 %vm355_vm0, %v2525_v41  ;;  %403 = vst.msk [vmem:[#allocation2 + $0x178] sm:$0xff] %vm355_vm0, %v354_v9  ;;  %416 = vst.msk [vmem:[#allocation2 + $0x180] sm:$0xff] %vm355_vm0, %v404_v11  ;;  %v2536_v12 = vld [vmem:[#allocation2 + $0xa1] sm:$0xff]  ;;  %v2538_v14 = vld [vmem:[#allocation2 + $0xb1] sm:$0xff] }
  0x33   : > { %7051 = vmatmul.mubr.msk.f32.gmra.mrb[8].mxu0 %vm355_vm0, %v2528_v54  ;;  %6757 = vmatprep.mubr.msk.f32.mxu1 %vm355_vm0, %v2526_v46  ;;  %v2539_v15 = vld [vmem:[#allocation2 + $0xb9] sm:$0xff]  ;;  %v2540_v16 = vld [vmem:[#allocation2 + $0xc1] sm:$0xff]  ;;  %v2541_v17 = vld [vmem:[#allocation2 + $0xc9] sm:$0xff] }
  0x34   : > { %7053 = vmatprep.mubr.msk.f32.mxu0 %vm355_vm0, %v2529_v57  ;;  %v2542_v18 = vld [vmem:[#allocation2 + $0xd1] sm:$0xff]  ;;  %v8277_v19 = vld [vmem:[#allocation2 + $0x1a] sm:$0xff]  ;;  %v8284_v20 = vld [vmem:[#allocation2 + $0x22] sm:$0xff] }
  0x35   : > { %v405_v21 = vld [vmem:[%s8249_s12 + $0x8] sm:$0xff]  ;;  %v406_v23 = vld [vmem:[%s8249_s12 + $0x10] sm:$0xff]  ;;  %v407_v24 = vld [vmem:[%s8249_s12 + $0x18] sm:$0xff] }
  0x36   : > { %6758 = vmatmul.mubr.msk.f32.gmra.mrb[10].mxu1 %vm355_vm0, %v2527_v49  ;;  %v8287_v22 = vld [vmem:[#allocation2 + $0x2a] sm:$0xff]  ;;  %417 = vst.msk [vmem:[#allocation2 + $0x188] sm:$0xff] %vm355_vm0, %v405_v21  ;;  %418 = vst.msk [vmem:[#allocation2 + $0x190] sm:$0xff] %vm355_vm0, %v406_v23  ;;  %v8298_v25 = vld [vmem:[%s9612_s2 + $0x38] sm:$0xff] }
  0x37   : > { %7054 = vmatmul.mubr.msk.f32.gmra.mrb[10].mxu0 %vm355_vm0, %v2530_v60  ;;  %6760 = vmatprep.mubr.msk.f32.mxu1 %vm355_vm0, %v2528_v54  ;;  %419 = vst.msk [vmem:[#allocation2 + $0x198] sm:$0xff] %vm355_vm0, %v407_v24  ;;  %v504_v26 = vld [vmem:[#allocation2 + $0xd9] sm:$0xff]  ;;  %v505_v28 = vld [vmem:[#allocation2 + $0xe1] sm:$0xff]  ;;  %v506_v30 = vld [vmem:[#allocation2 + $0xe9] sm:$0xff] }
  0x38   : > { %7056 = vmatprep.mubr.msk.f32.mxu0 %vm355_vm0, %v2531_v62  ;;  %v8306_v27 = vld [vmem:[#allocation2 + $0x32] sm:$0xff]  ;;  %v8308_v29 = vld [vmem:[#allocation2 + $0x3a] sm:$0xff]  ;;  %v8317_v31 = vld [vmem:[#allocation2 + $0x42] sm:$0xff] }
  0x39   : > { %v507_v32 = vld [vmem:[#allocation2 + $0xf1] sm:$0xff]  ;;  %v508_v34 = vld [vmem:[#allocation2 + $0xf9] sm:$0xff]  ;;  %v510_v39 = vld [vmem:[#allocation2 + $0x109] sm:$0xff] }
  0x3a   : > { %6761 = vmatmul.mubr.msk.f32.gmra.mrb[12].mxu1 %vm355_vm0, %v2529_v57  ;;  %v8319_v33 = vld [vmem:[#allocation2 + $0x4a] sm:$0xff]  ;;  %v8327_v35 = vld [vmem:[#allocation2 + $0x52] sm:$0xff]  ;;  %v8329_v38 = vld [vmem:[#allocation2 + $0x5a] sm:$0xff] }
  0x3b   : > { %7057 = vmatmul.mubr.msk.f32.gmra.mrb[12].mxu0 %vm355_vm0, %v2532_v2  ;;  %6763 = vmatprep.mubr.msk.f32.mxu1 %vm355_vm0, %v2530_v60  ;;  %v8337_v40 = vld [vmem:[#allocation2 + $0x62] sm:$0xff]  ;;  %v511_v41 = vld [vmem:[#allocation2 + $0x111] sm:$0xff]  ;;  %v512_v43 = vld [vmem:[#allocation2 + $0x119] sm:$0xff] }
  0x3c   : > { %7059 = vmatprep.mubr.msk.f32.mxu0 %vm355_vm0, %v2533_v4  ;;  %v8339_v42 = vld [vmem:[#allocation2 + $0x6a] sm:$0xff]  ;;  %v8347_v44 = vld [vmem:[#allocation2 + $0x72] sm:$0xff]  ;;  %v513_v45 = vld [vmem:[#allocation2 + $0x121] sm:$0xff] }
  0x3d   : > { %v8349_v46 = vld [vmem:[#allocation2 + $0x7a] sm:$0xff]  ;;  %v514_v47 = vld [vmem:[#allocation2 + $0x129] sm:$0xff]  ;;  %v8359_v49 = vld [vmem:[#allocation2 + $0x131] sm:$0xff] }
  0x3e   : > { %6764 = vmatmul.mubr.msk.f32.gmra.mrb[14].mxu1 %vm355_vm0, %v2531_v62  ;;  %v8357_v48 = vld [vmem:[#allocation2 + $0x82] sm:$0xff]  ;;  %9657 = vst [vmem:[#allocation3_spill] sm:$0xff] %v8359_v49  ;;  %v8361_v50 = vld [vmem:[#allocation2 + $0x8a] sm:$0xff]  ;;  %v8368_v51 = vld [vmem:[#allocation2 + $0x139] sm:$0xff] }
  0x3f   : > { %7060 = vmatmul.mubr.msk.f32.gmra.mrb[14].mxu0 %vm355_vm0, %v2534_v8  ;;  %6766 = vmatprep.mubr.msk.f32.mxu1 %vm355_vm0, %v2532_v2  ;;  %9658 = vst [vmem:[#allocation4_spill] sm:$0xff] %v8368_v51  ;;  %v8372_v52 = vld [vmem:[#allocation2 + $0x92] sm:$0xff]  ;;  %v8374_v53 = vld [vmem:[#allocation2 + $0x141] sm:$0xff]  ;;  %v8384_v55 = vld [vmem:[#allocation2 + $0x149] sm:$0xff] }
  0x40   : > { %7062 = vmatprep.mubr.msk.f32.mxu0 %vm355_vm0, %v2535_v10  ;;  %9659 = vst [vmem:[#allocation5_spill] sm:$0xff] %v8374_v53  ;;  %v8376_v54 = vld [vmem:[#allocation2 + $0x9a] sm:$0xff]  ;;  %9660 = vst [vmem:[#allocation6_spill] sm:$0xff] %v8384_v55  ;;  %v8388_v56 = vld [vmem:[#allocation2 + $0xa2] sm:$0xff] }
  0x41   : > { %v8390_v57 = vld [vmem:[#allocation2 + $0x151] sm:$0xff]  ;;  %v8400_v59 = vld [vmem:[#allocation2 + $0x159] sm:$0xff]  ;;  %v8406_v61 = vld [vmem:[#allocation2 + $0x161] sm:$0xff] }
  0x42   : > { %6767 = vmatmul.mubr.msk.f32.gmra.mrb[16].mxu1 %vm355_vm0, %v2533_v4  ;;  %9661 = vst [vmem:[#allocation7_spill] sm:$0xff] %v8390_v57  ;;  %v8392_v58 = vld [vmem:[#allocation2 + $0xaa] sm:$0xff]  ;;  %9662 = vst [vmem:[#allocation8_spill] sm:$0xff] %v8400_v59  ;;  %v8404_v60 = vld [vmem:[#allocation2 + $0xb2] sm:$0xff] }
  0x43   : > { %7063 = vmatmul.mubr.msk.f32.gmra.mrb[16].mxu0 %vm355_vm0, %v2536_v12  ;;  %6769 = vmatprep.mubr.msk.f32.mxu1 %vm355_vm0, %v2534_v8  ;;  %9663 = vst [vmem:[#allocation9_spill] sm:$0xff] %v8406_v61  ;;  %v8408_v62 = vld [vmem:[#allocation2 + $0xba] sm:$0xff]  ;;  %v8416_v63 = vld [vmem:[#allocation2 + $0x169] sm:$0xff]  ;;  %v8422_v2 = vld [vmem:[#allocation2 + $0x171] sm:$0xff] }
  0x44   : > { %7065 = vmatprep.mubr.msk.f32.mxu0 %vm355_vm0, %v2537_v13  ;;  %9664 = vst [vmem:[#allocation10_spill] sm:$0xff] %v8416_v63  ;;  %v8420_v0 = vld [vmem:[#allocation2 + $0xc2] sm:$0xff]  ;;  %9665 = vst [vmem:[#allocation11_spill] sm:$0xff] %v8422_v2  ;;  %v8424_v3 = vld [vmem:[#allocation2 + $0xca] sm:$0xff] }
  0x45   : > { %v8432_v4 = vld [vmem:[#allocation2 + $0x179] sm:$0xff]  ;;  %v429_v8 = vld [vmem:[#allocation2 + $0x8] sm:$0xff]  ;;  %v8488_v23 = vld [vmem:[#allocation2 + $0x30] sm:$0xff] }
  0x46   : > { %6770 = vmatmul.mubr.msk.f32.gmra.mrb[18].mxu1 %vm355_vm0, %v2535_v10  ;;  %9666 = vst [vmem:[#allocation12_spill] sm:$0xff] %v8432_v4  ;;  %v8436_v5 = vld [vmem:[#allocation2 + $0xd2] sm:$0xff]  ;;  %v428_v6 = vld [vmem:[#allocation2] sm:$0xff]  ;;  %v8449_v11 = vld [vmem:[#allocation2 + $0xea] sm:$0xff] }
  0x47   : > { %7066 = vmatmul.mubr.msk.f32.gmra.mrb[18].mxu0 %vm355_vm0, %v2538_v14  ;;  %6772 = vmatprep.mubr.msk.f32.mxu1 %vm355_vm0, %v2536_v12  ;;  %v8438_v7 = vld [vmem:[#allocation2 + $0xda] sm:$0xff]  ;;  %v8447_v9 = vld [vmem:[#allocation2 + $0xe2] sm:$0xff]  ;;  %v430_v10 = vld [vmem:[#allocation2 + $0x10] sm:$0xff]  ;;  %9670 = vst [vmem:[#allocation16_spill] sm:$0xff] %v8488_v23 }
  0x48   : > { %7068 = vmatprep.mubr.msk.f32.mxu0 %vm355_vm0, %v2539_v15  ;;  %v8455_v12 = vld [vmem:[%s9612_s2 + $0x18] sm:$0xff]  ;;  %v8486_v21 = vld [vmem:[#allocation2 + $0x102] sm:$0xff]  ;;  %v8490_v24 = vld [vmem:[#allocation2 + $0x10a] sm:$0xff] }
  0x4a   : > { %6773 = vmatmul.mubr.msk.f32.gmra.mrb[20].mxu1 %vm355_vm0, %v2537_v13  ;;  %v8460_v13 = vld [vmem:[#allocation2 + $0x18] sm:$0xff] }
  0x4b   : > { %7069 = vmatmul.mubr.msk.f32.gmra.mrb[20].mxu0 %vm355_vm0, %v2540_v16  ;;  %6775 = vmatprep.mubr.msk.f32.mxu1 %vm355_vm0, %v2538_v14  ;;  %9667 = vst [vmem:[#allocation13_spill] sm:$0xff] %v8460_v13  ;;  %v8465_v14 = vld [vmem:[#allocation2 + $0xf2] sm:$0xff] }
  0x4c   : > { %7071 = vmatprep.mubr.msk.f32.mxu0 %vm355_vm0, %v2541_v17 }
  0x4e   : > { %6776 = vmatmul.mubr.msk.f32.gmra.mrb[22].mxu1 %vm355_vm0, %v2539_v15  ;;  %v8467_v15 = vld [vmem:[#allocation2 + $0x20] sm:$0xff] }
  0x4f   : > { %7072 = vmatmul.mubr.msk.f32.gmra.mrb[22].mxu0 %vm355_vm0, %v2542_v18  ;;  %6778 = vmatprep.mubr.msk.f32.mxu1 %vm355_vm0, %v2540_v16  ;;  %9668 = vst [vmem:[#allocation14_spill] sm:$0xff] %v8467_v15  ;;  %v8469_v16 = vld [vmem:[#allocation2 + $0xfa] sm:$0xff] }
  0x50   : > { %7112 = vmatprep.mubr.msk.f32.mxu0 %vm355_vm0, %v8277_v19 }
  0x52   : > { %6779 = vmatmul.mubr.msk.f32.gmra.mrb[24].mxu1 %vm355_vm0, %v2541_v17  ;;  %v408_v17 = vld [vmem:[%s8249_s12 + $0x20] sm:$0xff] }
  0x53   : > { %7113 = vmatmul.mubr.msk.f32.vlgmr.msra.gmra.mrb[0].mxu0 %vm355_vm0, %v8284_v20  ;;  %6781 = vmatprep.mubr.msk.f32.mxu1 %vm355_vm0, %v2542_v18  ;;  %420 = vst.msk [vmem:[#allocation2 + $0x1a0] sm:$0xff] %vm355_vm0, %v408_v17  ;;  %v8481_v18 = vld [vmem:[#allocation2 + $0x28] sm:$0xff]  ;;  %v8552_v17 = vld [vmem:[#allocation2 + $0x70] sm:$0xff] }
  0x54   : > { %7185 = vmatpush3.msra.mxu0 %v8170_v36  ;;  %7115 = vmatprep.mubr.msk.f32.mxu0 %vm355_vm0, %v8287_v22  ;;  %v509_v36 = vld [vmem:[#allocation2 + $0x101] sm:$0xff]  ;;  %9669 = vst [vmem:[#allocation15_spill] sm:$0xff] %v8481_v18  ;;  %9678 = vst [vmem:[#allocation24_spill] sm:$0xff] %v8552_v17 }
  0x55   : > { %7258 = vmatprep.subr.mxu0 %v8298_v25 }
  0x56   : > { %6782 = vmatmul.mubr.msk.f32.gmra.mrb[26].mxu1 %vm355_vm0, %v504_v26  ;;  %v8498_v26 = vld [vmem:[#allocation2 + $0x38] sm:$0xff] }
  0x57   : > { %7116 = vmatmul.mubr.msk.f32.gmra.mrb[2].mxu0 %vm355_vm0, %v8306_v27  ;;  %6784 = vmatprep.mubr.msk.f32.mxu1 %vm355_vm0, %v505_v28  ;;  %9671 = vst [vmem:[#allocation17_spill] sm:$0xff] %v8498_v26  ;;  %v8502_v28 = vld [vmem:[#allocation2 + $0x112] sm:$0xff] }
  0x58   : > { %7118 = vmatprep.mubr.msk.f32.mxu0 %vm355_vm0, %v8308_v29 }
  0x5a   : > { %6785 = vmatmul.mubr.msk.f32.gmra.mrb[28].mxu1 %vm355_vm0, %v506_v30  ;;  %v8504_v30 = vld [vmem:[#allocation2 + $0x40] sm:$0xff] }
  0x5b   : > { %7119 = vmatmul.mubr.msk.f32.gmra.mrb[4].mxu0 %vm355_vm0, %v8317_v31  ;;  %6787 = vmatprep.mubr.msk.f32.mxu1 %vm355_vm0, %v507_v32  ;;  %9672 = vst [vmem:[#allocation18_spill] sm:$0xff] %v8504_v30  ;;  %v8506_v32 = vld [vmem:[#allocation2 + $0x11a] sm:$0xff] }
  0x5c   : > { %7121 = vmatprep.mubr.msk.f32.mxu0 %vm355_vm0, %v8319_v33 }
  0x5e   : > { %6788 = vmatmul.mubr.msk.f32.gmra.mrb[30].mxu1 %vm355_vm0, %v508_v34  ;;  %v8514_v34 = vld [vmem:[#allocation2 + $0x48] sm:$0xff] }
  0x5f   : > { %7122 = vmatmul.mubr.msk.f32.gmra.mrb[6].mxu0 %vm355_vm0, %v8327_v35  ;;  %6790 = vmatprep.mubr.msk.f32.mxu1 %vm355_vm0, %v509_v36  ;;  %9673 = vst [vmem:[#allocation19_spill] sm:$0xff] %v8514_v34  ;;  %v8518_v36 = vld [vmem:[#allocation2 + $0x122] sm:$0xff] }
  0x60   : > { %7124 = vmatprep.mubr.msk.f32.mxu0 %vm355_vm0, %v8329_v38 }
  0x62   : > { %6791 = vmatmul.mubr.msk.f32.gmra.mrb[32].mxu1 %vm355_vm0, %v510_v39  ;;  %v8520_v39 = vld [vmem:[#allocation2 + $0x50] sm:$0xff] }
  0x63   : > { %7125 = vmatmul.mubr.msk.f32.gmra.mrb[8].mxu0 %vm355_vm0, %v8337_v40  ;;  %6793 = vmatprep.mubr.msk.f32.mxu1 %vm355_vm0, %v511_v41  ;;  %9674 = vst [vmem:[#allocation20_spill] sm:$0xff] %v8520_v39  ;;  %v8522_v41 = vld [vmem:[#allocation2 + $0x12a] sm:$0xff] }
  0x64   : > { %7127 = vmatprep.mubr.msk.f32.mxu0 %vm355_vm0, %v8339_v42 }
  0x66   : > { %6794 = vmatmul.mubr.msk.f32.gmra.mrb[34].mxu1 %vm355_vm0, %v512_v43  ;;  %v8530_v43 = vld [vmem:[#allocation2 + $0x58] sm:$0xff] }
  0x67   : > { %7128 = vmatmul.mubr.msk.f32.gmra.mrb[10].mxu0 %vm355_vm0, %v8347_v44  ;;  %6796 = vmatprep.mubr.msk.f32.mxu1 %vm355_vm0, %v513_v45  ;;  %9675 = vst [vmem:[#allocation21_spill] sm:$0xff] %v8530_v43  ;;  %v8534_v45 = vld [vmem:[#allocation2 + $0x132] sm:$0xff] }
  0x68   : > { %7130 = vmatprep.mubr.msk.f32.mxu0 %vm355_vm0, %v8349_v46 }
  0x6a   : > { %6797 = vmatmul.mubr.msk.f32.gmra.mrb[36].mxu1 %vm355_vm0, %v514_v47  ;;  %v8536_v47 = vld [vmem:[#allocation2 + $0x60] sm:$0xff] }
  0x6b   : > { %7131 = vmatmul.mubr.msk.f32.gmra.mrb[12].mxu0 %vm355_vm0, %v8357_v48  ;;  %6799 = vmatprep.mubr.msk.f32.mxu1 %vm355_vm0, %v8359_v49  ;;  %9676 = vst [vmem:[#allocation22_spill] sm:$0xff] %v8536_v47  ;;  %v8598_v49 = vld [vmem:[#allocation2 + $0x172] sm:$0xff] }
  0x6c   : > { %7133 = vmatprep.mubr.msk.f32.mxu0 %vm355_vm0, %v8361_v50  ;;  %9689 = vst [vmem:[#allocation35_spill] sm:$0xff] %v8598_v49 }
  0x6e   : > { %6800 = vmatmul.mubr.msk.f32.gmra.mrb[38].mxu1 %vm355_vm0, %v8368_v51  ;;  %v8594_v51 = vld [vmem:[#allocation2 + $0x98] sm:$0xff] }
  0x6f   : > { %7134 = vmatmul.mubr.msk.f32.gmra.mrb[14].mxu0 %vm355_vm0, %v8372_v52  ;;  %6802 = vmatprep.mubr.msk.f32.mxu1 %vm355_vm0, %v8374_v53  ;;  %v8586_v53 = vld [vmem:[#allocation2 + $0x16a] sm:$0xff]  ;;  %9688 = vst [vmem:[#allocation34_spill] sm:$0xff] %v8594_v51 }
  0x70   : > { %7136 = vmatprep.mubr.msk.f32.mxu0 %vm355_vm0, %v8376_v54  ;;  %9687 = vst [vmem:[#allocation33_spill] sm:$0xff] %v8586_v53 }
  0x72   : > { %6803 = vmatmul.mubr.msk.f32.gmra.mrb[40].mxu1 %vm355_vm0, %v8384_v55  ;;  %v8584_v55 = vld [vmem:[#allocation2 + $0x90] sm:$0xff] }
  0x73   : > { %7137 = vmatmul.mubr.msk.f32.gmra.mrb[16].mxu0 %vm355_vm0, %v8388_v56  ;;  %6805 = vmatprep.mubr.msk.f32.mxu1 %vm355_vm0, %v8390_v57  ;;  %v8582_v57 = vld [vmem:[#allocation2 + $0x162] sm:$0xff]  ;;  %9686 = vst [vmem:[#allocation32_spill] sm:$0xff] %v8584_v55 }
  0x74   : > { %7139 = vmatprep.mubr.msk.f32.mxu0 %vm355_vm0, %v8392_v58  ;;  %9685 = vst [vmem:[#allocation31_spill] sm:$0xff] %v8582_v57 }
  0x76   : > { %6806 = vmatmul.mubr.msk.f32.gmra.mrb[42].mxu1 %vm355_vm0, %v8400_v59  ;;  %v8578_v59 = vld [vmem:[#allocation2 + $0x88] sm:$0xff] }
  0x77   : > { %7140 = vmatmul.mubr.msk.f32.gmra.mrb[18].mxu0 %vm355_vm0, %v8404_v60  ;;  %6808 = vmatprep.mubr.msk.f32.mxu1 %vm355_vm0, %v8406_v61  ;;  %v8570_v61 = vld [vmem:[#allocation2 + $0x15a] sm:$0xff]  ;;  %9684 = vst [vmem:[#allocation30_spill] sm:$0xff] %v8578_v59 }
  0x78   : > { %7142 = vmatprep.mubr.msk.f32.mxu0 %vm355_vm0, %v8408_v62  ;;  %9683 = vst [vmem:[#allocation29_spill] sm:$0xff] %v8570_v61 }
  0x7a   : > { %6809 = vmatmul.mubr.msk.f32.gmra.mrb[44].mxu1 %vm355_vm0, %v8416_v63  ;;  %v8568_v63 = vld [vmem:[#allocation2 + $0x80] sm:$0xff] }
  0x7b   : > { %7143 = vmatmul.mubr.msk.f32.gmra.mrb[20].mxu0 %vm355_vm0, %v8420_v0  ;;  %6811 = vmatprep.mubr.msk.f32.mxu1 %vm355_vm0, %v8422_v2  ;;  %v8566_v2 = vld [vmem:[#allocation2 + $0x152] sm:$0xff]  ;;  %9682 = vst [vmem:[#allocation28_spill] sm:$0xff] %v8568_v63 }
  0x7c   : > { %7145 = vmatprep.mubr.msk.f32.mxu0 %vm355_vm0, %v8424_v3  ;;  %9681 = vst [vmem:[#allocation27_spill] sm:$0xff] %v8566_v2 }
  0x7e   : > { %6812 = vmatmul.mubr.msk.f32.gmra.mrb[46].mxu1 %vm355_vm0, %v8432_v4  ;;  %v8562_v4 = vld [vmem:[#allocation2 + $0x78] sm:$0xff] }
  0x7f   : > { %7146 = vmatmul.mubr.msk.f32.gmra.mrb[22].mxu0 %vm355_vm0, %v8436_v5  ;;  %6816 = vmatprep.mubr.msk.f32.mxu1 %vm355_vm0, %v428_v6  ;;  %v8538_v6 = vld [vmem:[#allocation2 + $0x13a] sm:$0xff]  ;;  %9680 = vst [vmem:[#allocation26_spill] sm:$0xff] %v8562_v4 }
  0x80   : > { %7148 = vmatprep.mubr.msk.f32.mxu0 %vm355_vm0, %v8438_v7 }
  0x82   : > { %6817 = vmatmul.mubr.msk.f32.vlgmr.msra.gmra.mrb[0].mxu1 %vm355_vm0, %v429_v8  ;;  %v8546_v8 = vld [vmem:[#allocation2 + $0x68] sm:$0xff] }
  0x83   : > { %6889 = vmatpush3.msra.mxu1 %v8177_v37  ;;  %7149 = vmatmul.mubr.msk.f32.gmra.mrb[24].mxu0 %vm355_vm0, %v8447_v9  ;;  %v409_v37 = vld [vmem:[%s8249_s12 + $0x28] sm:$0xff]  ;;  %9677 = vst [vmem:[#allocation23_spill] sm:$0xff] %v8546_v8 }
  0x84   : > { %6819 = vmatprep.mubr.msk.f32.mxu1 %vm355_vm0, %v430_v10  ;;  %7151 = vmatprep.mubr.msk.f32.mxu0 %vm355_vm0, %v8449_v11  ;;  %421 = vst.msk [vmem:[#allocation2 + $0x1a8] sm:$0xff] %vm355_vm0, %v409_v37  ;;  %v8550_v10 = vld [vmem:[#allocation2 + $0x142] sm:$0xff]  ;;  %v8554_v37 = vld [vmem:[#allocation2 + $0x14a] sm:$0xff] }
  0x85   : > { %6962 = vmatprep.subr.mxu1 %v8455_v12  ;;  %9679 = vst [vmem:[#allocation25_spill] sm:$0xff] %v8554_v37 }
  0x86   : > { %6820 = vmatmul.mubr.msk.f32.gmra.mrb[2].mxu1 %vm355_vm0, %v8460_v13  ;;  %v8610_v13 = vld [vmem:[#allocation2 + $0xa8] sm:$0xff] }
  0x87   : > { %7152 = vmatmul.mubr.msk.f32.gmra.mrb[26].mxu0 %vm355_vm0, %v8465_v14  ;;  %6822 = vmatprep.mubr.msk.f32.mxu1 %vm355_vm0, %v8467_v15  ;;  %v8602_v15 = vld [vmem:[#allocation2 + $0x17a] sm:$0xff]  ;;  %9692 = vst [vmem:[#allocation38_spill] sm:$0xff] %v8610_v13 }
  0x88   : > { %7154 = vmatprep.mubr.msk.f32.mxu0 %vm355_vm0, %v8469_v16  ;;  %9691 = vst [vmem:[#allocation37_spill] sm:$0xff] %v8602_v15 }
  0x8a   : > { %6823 = vmatmul.mubr.msk.f32.gmra.mrb[4].mxu1 %vm355_vm0, %v8481_v18  ;;  %v8600_v18 = vld [vmem:[#allocation2 + $0xa0] sm:$0xff] }
  0x8b   : > { %7155 = vmatmul.mubr.msk.f32.gmra.mrb[28].mxu0 %vm355_vm0, %v8486_v21  ;;  %6825 = vmatprep.mubr.msk.f32.mxu1 %vm355_vm0, %v8488_v23  ;;  %9690 = vst [vmem:[#allocation36_spill] sm:$0xff] %v8600_v18 }
  0x8c   : > { %7157 = vmatprep.mubr.msk.f32.mxu0 %vm355_vm0, %v8490_v24 }
  0x8e   : > { %6826 = vmatmul.mubr.msk.f32.gmra.mrb[6].mxu1 %vm355_vm0, %v8498_v26 }
  0x8f   : > { %7158 = vmatmul.mubr.msk.f32.gmra.mrb[30].mxu0 %vm355_vm0, %v8502_v28  ;;  %6828 = vmatprep.mubr.msk.f32.mxu1 %vm355_vm0, %v8504_v30 }
  0x90   : > { %7160 = vmatprep.mubr.msk.f32.mxu0 %vm355_vm0, %v8506_v32 }
  0x92   : > { %6829 = vmatmul.mubr.msk.f32.gmra.mrb[8].mxu1 %vm355_vm0, %v8514_v34 }
  0x93   : > { %7161 = vmatmul.mubr.msk.f32.gmra.mrb[32].mxu0 %vm355_vm0, %v8518_v36  ;;  %6831 = vmatprep.mubr.msk.f32.mxu1 %vm355_vm0, %v8520_v39 }
  0x94   : > { %7163 = vmatprep.mubr.msk.f32.mxu0 %vm355_vm0, %v8522_v41 }
  0x96   : > { %6832 = vmatmul.mubr.msk.f32.gmra.mrb[10].mxu1 %vm355_vm0, %v8530_v43 }
  0x97   : > { %7164 = vmatmul.mubr.msk.f32.gmra.mrb[34].mxu0 %vm355_vm0, %v8534_v45  ;;  %6834 = vmatprep.mubr.msk.f32.mxu1 %vm355_vm0, %v8536_v47 }
  0x98   : > { %7166 = vmatprep.mubr.msk.f32.mxu0 %vm355_vm0, %v8538_v6 }
  0x9a   : > { %6835 = vmatmul.mubr.msk.f32.gmra.mrb[12].mxu1 %vm355_vm0, %v8546_v8 }
  0x9b   : > { %7167 = vmatmul.mubr.msk.f32.gmra.mrb[36].mxu0 %vm355_vm0, %v8550_v10  ;;  %6837 = vmatprep.mubr.msk.f32.mxu1 %vm355_vm0, %v8552_v17 }
  0x9c   : > { %7169 = vmatprep.mubr.msk.f32.mxu0 %vm355_vm0, %v8554_v37  ;;  %v8624_v37 = vld [vmem:[#allocation2 + $0xc0] sm:$0xff] }
  0x9d   : > { %9695 = vst [vmem:[#allocation41_spill] sm:$0xff] %v8624_v37 }
  0x9e   : > { %6838 = vmatmul.mubr.msk.f32.gmra.mrb[14].mxu1 %vm355_vm0, %v8562_v4 }
  0x9f   : > { %7170 = vmatmul.mubr.msk.f32.gmra.mrb[38].mxu0 %vm355_vm0, %v8566_v2  ;;  %6840 = vmatprep.mubr.msk.f32.mxu1 %vm355_vm0, %v8568_v63  ;;  %v3113_v2 = vld [vmem:[#allocation2 + $0x192] sm:$0xff] }
  0xa0   : > { %7172 = vmatprep.mubr.msk.f32.mxu0 %vm355_vm0, %v8570_v61  ;;  %v3112_v61 = vld [vmem:[#allocation2 + $0x18a] sm:$0xff] }
  0xa2   : > { %6841 = vmatmul.mubr.msk.f32.gmra.mrb[16].mxu1 %vm355_vm0, %v8578_v59 }
  0xa3   : > { %7173 = vmatmul.mubr.msk.f32.gmra.mrb[40].mxu0 %vm355_vm0, %v8582_v57  ;;  %6843 = vmatprep.mubr.msk.f32.mxu1 %vm355_vm0, %v8584_v55  ;;  %v8614_v57 = vld [vmem:[#allocation2 + $0xb0] sm:$0xff] }
  0xa4   : > { %7175 = vmatprep.mubr.msk.f32.mxu0 %vm355_vm0, %v8586_v53  ;;  %v3111_v53 = vld [vmem:[#allocation2 + $0x182] sm:$0xff]  ;;  %9693 = vst [vmem:[#allocation39_spill] sm:$0xff] %v8614_v57 }
  0xa6   : > { %6844 = vmatmul.mubr.msk.f32.gmra.mrb[18].mxu1 %vm355_vm0, %v8594_v51 }
  0xa7   : > { %7176 = vmatmul.mubr.msk.f32.gmra.mrb[42].mxu0 %vm355_vm0, %v8598_v49  ;;  %6846 = vmatprep.mubr.msk.f32.mxu1 %vm355_vm0, %v8600_v18  ;;  %v8621_v49 = vld [vmem:[#allocation2 + $0xb8] sm:$0xff] }
  0xa8   : > { %7178 = vmatprep.mubr.msk.f32.mxu0 %vm355_vm0, %v8602_v15  ;;  %9694 = vst [vmem:[#allocation40_spill] sm:$0xff] %v8621_v49  ;;  %v8631_v15 = vld [vmem:[#allocation2 + $0xc8] sm:$0xff] }
  0xa9   : > { %9696 = vst [vmem:[#allocation42_spill] sm:$0xff] %v8631_v15 }
  0xaa   : > { %6847 = vmatmul.mubr.msk.f32.gmra.mrb[20].mxu1 %vm355_vm0, %v8610_v13 }
  0xab   : > { %7179 = vmatmul.mubr.msk.f32.gmra.mrb[44].mxu0 %vm355_vm0, %v3111_v53  ;;  %6849 = vmatprep.mubr.msk.f32.mxu1 %vm355_vm0, %v8614_v57  ;;  %v8635_v53 = vld [vmem:[#allocation2 + $0xd0] sm:$0xff] }
  0xac   : > { %7181 = vmatprep.mubr.msk.f32.mxu0 %vm355_vm0, %v3112_v61  ;;  %9697 = vst [vmem:[#allocation43_spill] sm:$0xff] %v8635_v53  ;;  %v8642_v61 = vld [vmem:[%s9612_s2 + $0x40] sm:$0xff] }
  0xae   : > { %6850 = vmatmul.mubr.msk.f32.gmra.mrb[22].mxu1 %vm355_vm0, %v8621_v49 }
  0xaf   : > { %7182 = vmatmul.mubr.msk.f32.gmra.mrb[46].mxu0 %vm355_vm0, %v3113_v2  ;;  %6852 = vmatprep.mubr.msk.f32.mxu1 %vm355_vm0, %v8624_v37  ;;  %v8648_v2 = vld [vmem:[#allocation2 + $0xd8] sm:$0xff] }
  0xb0   : > { %7186 = vmatprep.mubr.msk.f32.mxu0 %vm355_vm0, %v8488_v23  ;;  %9698 = vst [vmem:[#allocation44_spill] sm:$0xff] %v8648_v2  ;;  %v8653_v23 = vld [vmem:[#allocation2 + $0xe0] sm:$0xff] }
  0xb2   : > { %6853 = vmatmul.mubr.msk.f32.gmra.mrb[24].mxu1 %vm355_vm0, %v8631_v15 }
  0xb3   : > { %7187 = vmatmul.mubr.msk.f32.vlgmr.msra.gmra.mrb[0].mxu0 %vm355_vm0, %v8498_v26  ;;  %6855 = vmatprep.mubr.msk.f32.mxu1 %vm355_vm0, %v8635_v53  ;;  %v8662_v26 = vld [vmem:[#allocation2 + $0xe8] sm:$0xff] }
  0xb4   : > { %7259 = vmatpush3.msra.mxu0 %v8298_v25  ;;  %7189 = vmatprep.mubr.msk.f32.mxu0 %vm355_vm0, %v8504_v30  ;;  %v8666_v25 = vld [vmem:[#allocation2 + $0xf0] sm:$0xff]  ;;  %v8678_v30 = vld [vmem:[#allocation2 + $0x100] sm:$0xff] }
  0xb5   : > { %7332 = vmatprep.subr.mxu0 %v8642_v61 }
  0xb6   : > { %6856 = vmatmul.mubr.msk.f32.gmra.mrb[26].mxu1 %vm355_vm0, %v8648_v2 }
  0xb7   : > { %7190 = vmatmul.mubr.msk.f32.gmra.mrb[2].mxu0 %vm355_vm0, %v8514_v34  ;;  %6858 = vmatprep.mubr.msk.f32.mxu1 %vm355_vm0, %v8653_v23  ;;  %v8674_v34 = vld [vmem:[#allocation2 + $0xf8] sm:$0xff] }
  0xb8   : > { %7192 = vmatprep.mubr.msk.f32.mxu0 %vm355_vm0, %v8520_v39  ;;  %v8690_v39 = vld [vmem:[#allocation2 + $0x110] sm:$0xff] }
  0xba   : > { %6859 = vmatmul.mubr.msk.f32.gmra.mrb[28].mxu1 %vm355_vm0, %v8662_v26 }
  0xbb   : > { %7193 = vmatmul.mubr.msk.f32.gmra.mrb[4].mxu0 %vm355_vm0, %v8530_v43  ;;  %6861 = vmatprep.mubr.msk.f32.mxu1 %vm355_vm0, %v8666_v25  ;;  %v8686_v43 = vld [vmem:[#allocation2 + $0x108] sm:$0xff] }
  0xbc   : > { %7195 = vmatprep.mubr.msk.f32.mxu0 %vm355_vm0, %v8536_v47  ;;  %v8702_v47 = vld [vmem:[#allocation2 + $0x120] sm:$0xff] }
  0xbe   : > { %6862 = vmatmul.mubr.msk.f32.gmra.mrb[30].mxu1 %vm355_vm0, %v8674_v34 }
  0xbf   : > { %7196 = vmatmul.mubr.msk.f32.gmra.mrb[6].mxu0 %vm355_vm0, %v8546_v8  ;;  %6864 = vmatprep.mubr.msk.f32.mxu1 %vm355_vm0, %v8678_v30  ;;  %v8698_v8 = vld [vmem:[#allocation2 + $0x118] sm:$0xff] }
  0xc0   : > { %7198 = vmatprep.mubr.msk.f32.mxu0 %vm355_vm0, %v8552_v17  ;;  %v8714_v17 = vld [vmem:[#allocation2 + $0x130] sm:$0xff] }
  0xc2   : > { %6865 = vmatmul.mubr.msk.f32.gmra.mrb[32].mxu1 %vm355_vm0, %v8686_v43 }
  0xc3   : > { %7199 = vmatmul.mubr.msk.f32.gmra.mrb[8].mxu0 %vm355_vm0, %v8562_v4  ;;  %6867 = vmatprep.mubr.msk.f32.mxu1 %vm355_vm0, %v8690_v39  ;;  %v8710_v4 = vld [vmem:[#allocation2 + $0x128] sm:$0xff] }
  0xc4   : > { %7201 = vmatprep.mubr.msk.f32.mxu0 %vm355_vm0, %v8568_v63  ;;  %v8726_v63 = vld [vmem:[#allocation2 + $0x140] sm:$0xff] }
  0xc6   : > { %6868 = vmatmul.mubr.msk.f32.gmra.mrb[34].mxu1 %vm355_vm0, %v8698_v8 }
  0xc7   : > { %7202 = vmatmul.mubr.msk.f32.gmra.mrb[10].mxu0 %vm355_vm0, %v8578_v59  ;;  %6870 = vmatprep.mubr.msk.f32.mxu1 %vm355_vm0, %v8702_v47  ;;  %v8722_v59 = vld [vmem:[#allocation2 + $0x138] sm:$0xff] }
  0xc8   : > { %7204 = vmatprep.mubr.msk.f32.mxu0 %vm355_vm0, %v8584_v55  ;;  %v8738_v55 = vld [vmem:[#allocation2 + $0x150] sm:$0xff] }
  0xca   : > { %6871 = vmatmul.mubr.msk.f32.gmra.mrb[36].mxu1 %vm355_vm0, %v8710_v4 }
  0xcb   : > { %7205 = vmatmul.mubr.msk.f32.gmra.mrb[12].mxu0 %vm355_vm0, %v8594_v51  ;;  %6873 = vmatprep.mubr.msk.f32.mxu1 %vm355_vm0, %v8714_v17  ;;  %v8734_v51 = vld [vmem:[#allocation2 + $0x148] sm:$0xff] }
  0xcc   : > { %7207 = vmatprep.mubr.msk.f32.mxu0 %vm355_vm0, %v8600_v18  ;;  %v8750_v18 = vld [vmem:[#allocation2 + $0x160] sm:$0xff] }
  0xce   : > { %6874 = vmatmul.mubr.msk.f32.gmra.mrb[38].mxu1 %vm355_vm0, %v8722_v59 }
  0xcf   : > { %7208 = vmatmul.mubr.msk.f32.gmra.mrb[14].mxu0 %vm355_vm0, %v8610_v13  ;;  %6876 = vmatprep.mubr.msk.f32.mxu1 %vm355_vm0, %v8726_v63  ;;  %v8746_v13 = vld [vmem:[#allocation2 + $0x158] sm:$0xff] }
  0xd0   : > { %7210 = vmatprep.mubr.msk.f32.mxu0 %vm355_vm0, %v8614_v57  ;;  %v8762_v57 = vld [vmem:[#allocation2 + $0x170] sm:$0xff] }
  0xd2   : > { %6877 = vmatmul.mubr.msk.f32.gmra.mrb[40].mxu1 %vm355_vm0, %v8734_v51 }
  0xd3   : > { %7211 = vmatmul.mubr.msk.f32.gmra.mrb[16].mxu0 %vm355_vm0, %v8621_v49  ;;  %6879 = vmatprep.mubr.msk.f32.mxu1 %vm355_vm0, %v8738_v55  ;;  %v8758_v49 = vld [vmem:[#allocation2 + $0x168] sm:$0xff] }
  0xd4   : > { %7213 = vmatprep.mubr.msk.f32.mxu0 %vm355_vm0, %v8624_v37  ;;  %v1425_v37 = vld [vmem:[#allocation2 + $0x2] sm:$0xff] }
  0xd6   : > { %6880 = vmatmul.mubr.msk.f32.gmra.mrb[42].mxu1 %vm355_vm0, %v8746_v13 }
  0xd7   : > { %7214 = vmatmul.mubr.msk.f32.gmra.mrb[18].mxu0 %vm355_vm0, %v8631_v15  ;;  %6882 = vmatprep.mubr.msk.f32.mxu1 %vm355_vm0, %v8750_v18  ;;  %v8770_v15 = vld [vmem:[#allocation2 + $0x178] sm:$0xff] }
  0xd8   : > { %7216 = vmatprep.mubr.msk.f32.mxu0 %vm355_vm0, %v8635_v53  ;;  %v1426_v53 = vld [vmem:[#allocation2 + $0xa] sm:$0xff] }
  0xda   : > { %6883 = vmatmul.mubr.msk.f32.gmra.mrb[44].mxu1 %vm355_vm0, %v8758_v49 }
  0xdb   : > { %7217 = vmatmul.mubr.msk.f32.gmra.mrb[20].mxu0 %vm355_vm0, %v8648_v2  ;;  %6885 = vmatprep.mubr.msk.f32.mxu1 %vm355_vm0, %v8762_v57  ;;  %v1427_v2 = vld [vmem:[#allocation2 + $0x12] sm:$0xff] }
  0xdc   : > { %7219 = vmatprep.mubr.msk.f32.mxu0 %vm355_vm0, %v8653_v23 }
  0xde   : > { %6886 = vmatmul.mubr.msk.f32.gmra.mrb[46].mxu1 %vm355_vm0, %v8770_v15 }
  0xdf   : > { %7220 = vmatmul.mubr.msk.f32.gmra.mrb[22].mxu0 %vm355_vm0, %v8662_v26  ;;  %6890 = vmatprep.mubr.msk.f32.mxu1 %vm355_vm0, %v1425_v37  ;;  %v410_v37 = vld [vmem:[%s8249_s12 + $0x30] sm:$0xff] }
  0xe0   : > { %7222 = vmatprep.mubr.msk.f32.mxu0 %vm355_vm0, %v8666_v25  ;;  %422 = vst.msk [vmem:[#allocation2 + $0x1b0] sm:$0xff] %vm355_vm0, %v410_v37  ;;  %v9708_v37 = vld [vmem:[#allocation15_spill] sm:$0xff] }
  0xe2   : > { %6891 = vmatmul.mubr.msk.f32.vlgmr.msra.gmra.mrb[0].mxu1 %vm355_vm0, %v1426_v53  ;;  %v8968_v53 = vld [vmem:[#allocation2 + $0x101] sm:$0xff] }
  0xe3   : > { %6963 = vmatpush3.msra.mxu1 %v8455_v12  ;;  %7223 = vmatmul.mubr.msk.f32.gmra.mrb[24].mxu0 %vm355_vm0, %v8674_v34  ;;  %v4180_v12 = vld [vmem:[#allocation2 + $0xd1] sm:$0xff] }
  0xe4   : > { %6893 = vmatprep.mubr.msk.f32.mxu1 %vm355_vm0, %v1427_v2  ;;  %7225 = vmatprep.mubr.msk.f32.mxu0 %vm355_vm0, %v8678_v30  ;;  %v8012_v2 = vld [vmem:[%s9612_s2 + $0x20] sm:$0xff] }
  0xe5   : > { %7406 = vmatprep.subr.mxu1 %v8086_v1  ;;  %v8847_v1 = vld [vmem:[#allocation2 + $0x180] sm:$0xff] }
  0xe6   : > { %6894 = vmatmul.mubr.msk.f32.gmra.mrb[2].mxu1 %vm355_vm0, %v8277_v19  ;;  %v8857_v19 = vld [vmem:[#allocation2 + $0x188] sm:$0xff] }
  0xe7   : > { %7226 = vmatmul.mubr.msk.f32.gmra.mrb[26].mxu0 %vm355_vm0, %v8686_v43  ;;  %6896 = vmatprep.mubr.msk.f32.mxu1 %vm355_vm0, %v8284_v20  ;;  %v8859_v20 = vld [vmem:[#allocation2 + $0x190] sm:$0xff] }
  0xe8   : > { %7228 = vmatprep.mubr.msk.f32.mxu0 %vm355_vm0, %v8690_v39 }
  0xea   : > { %6897 = vmatmul.mubr.msk.f32.gmra.mrb[4].mxu1 %vm355_vm0, %v8287_v22  ;;  %v3658_v22 = vld [vmem:[#allocation2 + $0x198] sm:$0xff] }
  0xeb   : > { %7229 = vmatmul.mubr.msk.f32.gmra.mrb[28].mxu0 %vm355_vm0, %v8698_v8  ;;  %6899 = vmatprep.mubr.msk.f32.mxu1 %vm355_vm0, %v8306_v27  ;;  %v3659_v27 = vld [vmem:[#allocation2 + $0x1a0] sm:$0xff] }
  0xec   : > { %7231 = vmatprep.mubr.msk.f32.mxu0 %vm355_vm0, %v8702_v47 }
  0xee   : > { %6900 = vmatmul.mubr.msk.f32.gmra.mrb[6].mxu1 %vm355_vm0, %v8308_v29  ;;  %v3660_v29 = vld [vmem:[#allocation2 + $0x1a8] sm:$0xff] }
  0xef   : > { %7232 = vmatmul.mubr.msk.f32.gmra.mrb[30].mxu0 %vm355_vm0, %v8710_v4  ;;  %6902 = vmatprep.mubr.msk.f32.mxu1 %vm355_vm0, %v8317_v31  ;;  %v4160_v31 = vld [vmem:[#allocation2 + $0x31] sm:$0xff] }
  0xf0   : > { %7234 = vmatprep.mubr.msk.f32.mxu0 %vm355_vm0, %v8714_v17 }
  0xf2   : > { %6903 = vmatmul.mubr.msk.f32.gmra.mrb[8].mxu1 %vm355_vm0, %v8319_v33  ;;  %v4161_v33 = vld [vmem:[#allocation2 + $0x39] sm:$0xff] }
  0xf3   : > { %7235 = vmatmul.mubr.msk.f32.gmra.mrb[32].mxu0 %vm355_vm0, %v8722_v59  ;;  %6905 = vmatprep.mubr.msk.f32.mxu1 %vm355_vm0, %v8327_v35  ;;  %v4162_v35 = vld [vmem:[#allocation2 + $0x41] sm:$0xff] }
  0xf4   : > { %7237 = vmatprep.mubr.msk.f32.mxu0 %vm355_vm0, %v8726_v63 }
  0xf6   : > { %6906 = vmatmul.mubr.msk.f32.gmra.mrb[10].mxu1 %vm355_vm0, %v8329_v38  ;;  %v4163_v38 = vld [vmem:[#allocation2 + $0x49] sm:$0xff] }
  0xf7   : > { %7238 = vmatmul.mubr.msk.f32.gmra.mrb[34].mxu0 %vm355_vm0, %v8734_v51  ;;  %6908 = vmatprep.mubr.msk.f32.mxu1 %vm355_vm0, %v8337_v40  ;;  %v4164_v40 = vld [vmem:[#allocation2 + $0x51] sm:$0xff] }
  0xf8   : > { %7240 = vmatprep.mubr.msk.f32.mxu0 %vm355_vm0, %v8738_v55 }
  0xfa   : > { %6909 = vmatmul.mubr.msk.f32.gmra.mrb[12].mxu1 %vm355_vm0, %v8339_v42  ;;  %v4165_v42 = vld [vmem:[#allocation2 + $0x59] sm:$0xff] }
  0xfb   : > { %7241 = vmatmul.mubr.msk.f32.gmra.mrb[36].mxu0 %vm355_vm0, %v8746_v13  ;;  %6911 = vmatprep.mubr.msk.f32.mxu1 %vm355_vm0, %v8347_v44  ;;  %v4166_v44 = vld [vmem:[#allocation2 + $0x61] sm:$0xff] }
  0xfc   : > { %7243 = vmatprep.mubr.msk.f32.mxu0 %vm355_vm0, %v8750_v18 }
  0xfe   : > { %6912 = vmatmul.mubr.msk.f32.gmra.mrb[14].mxu1 %vm355_vm0, %v8349_v46  ;;  %v4167_v46 = vld [vmem:[#allocation2 + $0x69] sm:$0xff] }
  0xff   : > { %7244 = vmatmul.mubr.msk.f32.gmra.mrb[38].mxu0 %vm355_vm0, %v8758_v49  ;;  %6914 = vmatprep.mubr.msk.f32.mxu1 %vm355_vm0, %v8357_v48  ;;  %v4168_v48 = vld [vmem:[#allocation2 + $0x71] sm:$0xff] }
 0x100   : > { %7246 = vmatprep.mubr.msk.f32.mxu0 %vm355_vm0, %v8762_v57 }
 0x102   : > { %6915 = vmatmul.mubr.msk.f32.gmra.mrb[16].mxu1 %vm355_vm0, %v8361_v50  ;;  %v4169_v50 = vld [vmem:[#allocation2 + $0x79] sm:$0xff] }
 0x103   : > { %7247 = vmatmul.mubr.msk.f32.gmra.mrb[40].mxu0 %vm355_vm0, %v8770_v15  ;;  %6917 = vmatprep.mubr.msk.f32.mxu1 %vm355_vm0, %v8372_v52  ;;  %v4170_v52 = vld [vmem:[#allocation2 + $0x81] sm:$0xff] }
 0x104   : > { %7249 = vmatprep.mubr.msk.f32.mxu0 %vm355_vm0, %v8847_v1 }
 0x106   : > { %6918 = vmatmul.mubr.msk.f32.gmra.mrb[18].mxu1 %vm355_vm0, %v8376_v54  ;;  %v4171_v54 = vld [vmem:[#allocation2 + $0x89] sm:$0xff] }
 0x107   : > { %7250 = vmatmul.mubr.msk.f32.gmra.mrb[42].mxu0 %vm355_vm0, %v8857_v19  ;;  %6920 = vmatprep.mubr.msk.f32.mxu1 %vm355_vm0, %v8388_v56  ;;  %v4172_v56 = vld [vmem:[#allocation2 + $0x91] sm:$0xff] }
 0x108   : > { %7252 = vmatprep.mubr.msk.f32.mxu0 %vm355_vm0, %v8859_v20 }
 0x10a   : > { %6921 = vmatmul.mubr.msk.f32.gmra.mrb[20].mxu1 %vm355_vm0, %v8392_v58  ;;  %v4173_v58 = vld [vmem:[#allocation2 + $0x99] sm:$0xff] }
 0x10b   : > { %7253 = vmatmul.mubr.msk.f32.gmra.mrb[44].mxu0 %vm355_vm0, %v3658_v22  ;;  %6923 = vmatprep.mubr.msk.f32.mxu1 %vm355_vm0, %v8404_v60  ;;  %v4174_v60 = vld [vmem:[#allocation2 + $0xa1] sm:$0xff]  ;;  %v8981_v22 = vld [vmem:[#allocation2 + $0x109] sm:$0xff] }
 0x10c   : > { %7255 = vmatprep.mubr.msk.f32.mxu0 %vm355_vm0, %v3659_v27  ;;  %v8983_v27 = vld [vmem:[#allocation2 + $0x111] sm:$0xff] }
 0x10e   : > { %6924 = vmatmul.mubr.msk.f32.gmra.mrb[22].mxu1 %vm355_vm0, %v8408_v62  ;;  %v4175_v62 = vld [vmem:[#allocation2 + $0xa9] sm:$0xff] }
 0x10f   : > { %7256 = vmatmul.mubr.msk.f32.gmra.mrb[46].mxu0 %vm355_vm0, %v3660_v29  ;;  %6926 = vmatprep.mubr.msk.f32.mxu1 %vm355_vm0, %v8420_v0  ;;  %v4176_v0 = vld [vmem:[#allocation2 + $0xb1] sm:$0xff]  ;;  %v9709_v29 = vld [vmem:[#allocation16_spill] sm:$0xff] }
 0x110   : > { %7260 = vmatprep.mubr.msk.f32.mxu0 %vm355_vm0, %v4160_v31  ;;  %v9710_v31 = vld [vmem:[#allocation17_spill] sm:$0xff] }
 0x112   : > { %6927 = vmatmul.mubr.msk.f32.gmra.mrb[24].mxu1 %vm355_vm0, %v8424_v3  ;;  %v4177_v3 = vld [vmem:[#allocation2 + $0xb9] sm:$0xff] }
 0x113   : > { %7261 = vmatmul.mubr.msk.f32.vlgmr.msra.gmra.mrb[0].mxu0 %vm355_vm0, %v4161_v33  ;;  %6929 = vmatprep.mubr.msk.f32.mxu1 %vm355_vm0, %v8436_v5  ;;  %v4178_v5 = vld [vmem:[#allocation2 + $0xc1] sm:$0xff]  ;;  %v8993_v33 = vld [vmem:[#allocation2 + $0x119] sm:$0xff] }
 0x114   : > { %7333 = vmatpush3.msra.mxu0 %v8642_v61  ;;  %7263 = vmatprep.mubr.msk.f32.mxu0 %vm355_vm0, %v4162_v35  ;;  %v9707_v61 = vld [vmem:[#allocation14_spill] sm:$0xff]  ;;  %v8995_v35 = vld [vmem:[#allocation2 + $0x121] sm:$0xff] }
 0x116   : > { %6930 = vmatmul.mubr.msk.f32.gmra.mrb[26].mxu1 %vm355_vm0, %v8438_v7  ;;  %v9699_v7 = vld [vmem:[#allocation25_spill] sm:$0xff] }
 0x117   : > { %7264 = vmatmul.mubr.msk.f32.gmra.mrb[2].mxu0 %vm355_vm0, %v4163_v38  ;;  %6932 = vmatprep.mubr.msk.f32.mxu1 %vm355_vm0, %v8447_v9  ;;  %v9700_v9 = vld [vmem:[#allocation27_spill] sm:$0xff]  ;;  %v9711_v38 = vld [vmem:[#allocation18_spill] sm:$0xff] }
 0x118   : > { %7266 = vmatprep.mubr.msk.f32.mxu0 %vm355_vm0, %v4164_v40  ;;  %v9712_v40 = vld [vmem:[#allocation19_spill] sm:$0xff] }
 0x11a   : > { %6933 = vmatmul.mubr.msk.f32.gmra.mrb[28].mxu1 %vm355_vm0, %v8449_v11  ;;  %v4179_v11 = vld [vmem:[#allocation2 + $0xc9] sm:$0xff] }
 0x11b   : > { %7267 = vmatmul.mubr.msk.f32.gmra.mrb[4].mxu0 %vm355_vm0, %v4165_v42  ;;  %6935 = vmatprep.mubr.msk.f32.mxu1 %vm355_vm0, %v8465_v14  ;;  %v9701_v14 = vld [vmem:[#allocation29_spill] sm:$0xff] }
 0x11c   : > { %7269 = vmatprep.mubr.msk.f32.mxu0 %vm355_vm0, %v4166_v44  ;;  %v9005_v42 = vld [vmem:[#allocation2 + $0x129] sm:$0xff] }
 0x11d   : > { %v9713_v44 = vld [vmem:[#allocation20_spill] sm:$0xff] }
 0x11e   : > { %6936 = vmatmul.mubr.msk.f32.gmra.mrb[30].mxu1 %vm355_vm0, %v8469_v16  ;;  %v9702_v16 = vld [vmem:[#allocation31_spill] sm:$0xff] }
 0x11f   : > { %7270 = vmatmul.mubr.msk.f32.gmra.mrb[6].mxu0 %vm355_vm0, %v4167_v46  ;;  %6938 = vmatprep.mubr.msk.f32.mxu1 %vm355_vm0, %v8486_v21  ;;  %v8942_v21 = vld [vmem:[#allocation2 + $0xd9] sm:$0xff]  ;;  %v9714_v46 = vld [vmem:[#allocation21_spill] sm:$0xff] }
 0x120   : > { %7272 = vmatprep.mubr.msk.f32.mxu0 %vm355_vm0, %v4168_v48  ;;  %v9715_v48 = vld [vmem:[#allocation3_spill] sm:$0xff] }
 0x122   : > { %6939 = vmatmul.mubr.msk.f32.gmra.mrb[32].mxu1 %vm355_vm0, %v8490_v24  ;;  %v8944_v24 = vld [vmem:[#allocation2 + $0xe1] sm:$0xff] }
 0x123   : > { %7273 = vmatmul.mubr.msk.f32.gmra.mrb[8].mxu0 %vm355_vm0, %v4169_v50  ;;  %6941 = vmatprep.mubr.msk.f32.mxu1 %vm355_vm0, %v8502_v28  ;;  %v9703_v28 = vld [vmem:[#allocation33_spill] sm:$0xff]  ;;  %v9716_v50 = vld [vmem:[#allocation22_spill] sm:$0xff] }
 0x124   : > { %7275 = vmatprep.mubr.msk.f32.mxu0 %vm355_vm0, %v4170_v52  ;;  %v9717_v52 = vld [vmem:[#allocation4_spill] sm:$0xff] }
 0x126   : > { %6942 = vmatmul.mubr.msk.f32.gmra.mrb[34].mxu1 %vm355_vm0, %v8506_v32  ;;  %v9704_v32 = vld [vmem:[#allocation35_spill] sm:$0xff] }
 0x127   : > { %7276 = vmatmul.mubr.msk.f32.gmra.mrb[10].mxu0 %vm355_vm0, %v4171_v54  ;;  %6944 = vmatprep.mubr.msk.f32.mxu1 %vm355_vm0, %v8518_v36  ;;  %v8954_v36 = vld [vmem:[#allocation2 + $0xe9] sm:$0xff]  ;;  %v9718_v54 = vld [vmem:[#allocation23_spill] sm:$0xff] }
 0x128   : > { %7278 = vmatprep.mubr.msk.f32.mxu0 %vm355_vm0, %v4172_v56  ;;  %v9719_v56 = vld [vmem:[#allocation5_spill] sm:$0xff] }
 0x12a   : > { %6945 = vmatmul.mubr.msk.f32.gmra.mrb[36].mxu1 %vm355_vm0, %v8522_v41  ;;  %v8956_v41 = vld [vmem:[#allocation2 + $0xf1] sm:$0xff] }
 0x12b   : > { %7279 = vmatmul.mubr.msk.f32.gmra.mrb[12].mxu0 %vm355_vm0, %v4173_v58  ;;  %6947 = vmatprep.mubr.msk.f32.mxu1 %vm355_vm0, %v8534_v45  ;;  %v9705_v45 = vld [vmem:[#allocation37_spill] sm:$0xff]  ;;  %v9720_v58 = vld [vmem:[#allocation24_spill] sm:$0xff] }
 0x12c   : > { %7281 = vmatprep.mubr.msk.f32.mxu0 %vm355_vm0, %v4174_v60  ;;  %v9721_v60 = vld [vmem:[#allocation6_spill] sm:$0xff] }
 0x12e   : > { %6948 = vmatmul.mubr.msk.f32.gmra.mrb[38].mxu1 %vm355_vm0, %v8538_v6  ;;  %v9706_v6 = vld [vmem:[#allocation13_spill] sm:$0xff] }
 0x12f   : > { %7282 = vmatmul.mubr.msk.f32.gmra.mrb[14].mxu0 %vm355_vm0, %v4175_v62  ;;  %6950 = vmatprep.mubr.msk.f32.mxu1 %vm355_vm0, %v8550_v10  ;;  %v8966_v10 = vld [vmem:[#allocation2 + $0xf9] sm:$0xff] }
 0x130   : > { %7284 = vmatprep.mubr.msk.f32.mxu0 %vm355_vm0, %v4176_v0  ;;  %v9722_v62 = vld [vmem:[#allocation26_spill] sm:$0xff]  ;;  %v9723_v0 = vld [vmem:[#allocation7_spill] sm:$0xff] }
 0x132   : > { %6951 = vmatmul.mubr.msk.f32.gmra.mrb[40].mxu1 %vm355_vm0, %v9699_v7  ;;  %v9726_v7 = vld [vmem:[#allocation30_spill] sm:$0xff] }
 0x133   : > { %7285 = vmatmul.mubr.msk.f32.gmra.mrb[16].mxu0 %vm355_vm0, %v4177_v3  ;;  %6953 = vmatprep.mubr.msk.f32.mxu1 %vm355_vm0, %v9700_v9  ;;  %v9724_v3 = vld [vmem:[#allocation28_spill] sm:$0xff]  ;;  %v9727_v9 = vld [vmem:[#allocation9_spill] sm:$0xff] }
 0x134   : > { %7287 = vmatprep.mubr.msk.f32.mxu0 %vm355_vm0, %v4178_v5  ;;  %v9725_v5 = vld [vmem:[#allocation8_spill] sm:$0xff] }
 0x136   : > { %6954 = vmatmul.mubr.msk.f32.gmra.mrb[42].mxu1 %vm355_vm0, %v9701_v14  ;;  %v9730_v14 = vld [vmem:[#allocation34_spill] sm:$0xff] }
 0x137   : > { %7288 = vmatmul.mubr.msk.f32.gmra.mrb[18].mxu0 %vm355_vm0, %v4179_v11  ;;  %6956 = vmatprep.mubr.msk.f32.mxu1 %vm355_vm0, %v9702_v16  ;;  %v9728_v11 = vld [vmem:[#allocation32_spill] sm:$0xff]  ;;  %v9731_v16 = vld [vmem:[#allocation11_spill] sm:$0xff] }
 0x138   : > { %7290 = vmatprep.mubr.msk.f32.mxu0 %vm355_vm0, %v4180_v12  ;;  %v9729_v12 = vld [vmem:[#allocation10_spill] sm:$0xff] }
 0x13a   : > { %6957 = vmatmul.mubr.msk.f32.gmra.mrb[44].mxu1 %vm355_vm0, %v9703_v28  ;;  %v9047_v28 = vld [vmem:[#allocation2 + $0x181] sm:$0xff] }
 0x13b   : > { %7291 = vmatmul.mubr.msk.f32.gmra.mrb[20].mxu0 %vm355_vm0, %v8942_v21  ;;  %6959 = vmatprep.mubr.msk.f32.mxu1 %vm355_vm0, %v9704_v32  ;;  %v9732_v32 = vld [vmem:[#allocation36_spill] sm:$0xff] }
 0x13c   : > { %7293 = vmatprep.mubr.msk.f32.mxu0 %vm355_vm0, %v8944_v24 }
 0x13e   : > { %6960 = vmatmul.mubr.msk.f32.gmra.mrb[46].mxu1 %vm355_vm0, %v9705_v45  ;;  %v9733_v45 = vld [vmem:[#allocation12_spill] sm:$0xff] }
 0x13f   : > { %7294 = vmatmul.mubr.msk.f32.gmra.mrb[22].mxu0 %vm355_vm0, %v8954_v36  ;;  %6964 = vmatprep.mubr.msk.f32.mxu1 %vm355_vm0, %v9706_v6  ;;  %v9734_v6 = vld [vmem:[#allocation38_spill] sm:$0xff] }
 0x140   : > { %7296 = vmatprep.mubr.msk.f32.mxu0 %vm355_vm0, %v8956_v41 }
 0x142   : > { %6965 = vmatmul.mubr.msk.f32.vlgmr.msra.gmra.mrb[0].mxu1 %vm355_vm0, %v9707_v61  ;;  %v9057_v61 = vld [vmem:[#allocation2 + $0x189] sm:$0xff] }
 0x143   : > { %7407 = vmatpush3.msra.mxu1 %v8012_v2  ;;  %7297 = vmatmul.mubr.msk.f32.gmra.mrb[24].mxu0 %vm355_vm0, %v8966_v10  ;;  %v9059_v2 = vld [vmem:[#allocation2 + $0x191] sm:$0xff] }
 0x144   : > { %6967 = vmatprep.mubr.msk.f32.mxu1 %vm355_vm0, %v9708_v37  ;;  %7299 = vmatprep.mubr.msk.f32.mxu0 %vm355_vm0, %v8968_v53  ;;  %v9735_v37 = vld [vmem:[#allocation39_spill] sm:$0xff] }
 0x146   : > { %6968 = vmatmul.mubr.msk.f32.gmra.mrb[2].mxu1 %vm355_vm0, %v9709_v29  ;;  %v9736_v29 = vld [vmem:[#allocation40_spill] sm:$0xff] }
 0x147   : > { %7300 = vmatmul.mubr.msk.f32.gmra.mrb[26].mxu0 %vm355_vm0, %v8981_v22  ;;  %6970 = vmatprep.mubr.msk.f32.mxu1 %vm355_vm0, %v9710_v31  ;;  %v4205_v31 = vld [vmem:[#allocation2 + $0x199] sm:$0xff] }
 0x148   : > { %7302 = vmatprep.mubr.msk.f32.mxu0 %vm355_vm0, %v8983_v27 }
 0x14a   : > { %6971 = vmatmul.mubr.msk.f32.gmra.mrb[4].mxu1 %vm355_vm0, %v9711_v38  ;;  %v4206_v38 = vld [vmem:[#allocation2 + $0x1a1] sm:$0xff] }
 0x14b   : > { %7303 = vmatmul.mubr.msk.f32.gmra.mrb[28].mxu0 %vm355_vm0, %v8993_v33  ;;  %6973 = vmatprep.mubr.msk.f32.mxu1 %vm355_vm0, %v9712_v40  ;;  %v9737_v40 = vld [vmem:[#allocation41_spill] sm:$0xff] }
 0x14c   : > { %7305 = vmatprep.mubr.msk.f32.mxu0 %vm355_vm0, %v8995_v35 }
 0x14e   : > { %6974 = vmatmul.mubr.msk.f32.gmra.mrb[6].mxu1 %vm355_vm0, %v9713_v44  ;;  %v9738_v44 = vld [vmem:[#allocation42_spill] sm:$0xff] }
 0x14f   : > { %7306 = vmatmul.mubr.msk.f32.gmra.mrb[30].mxu0 %vm355_vm0, %v9005_v42  ;;  %6976 = vmatprep.mubr.msk.f32.mxu1 %vm355_vm0, %v9714_v46  ;;  %v4207_v46 = vld [vmem:[#allocation2 + $0x1a9] sm:$0xff] }
 0x150   : > { %7308 = vmatprep.mubr.msk.f32.mxu0 %vm355_vm0, %v9715_v48  ;;  %v4707_v48 = vld [vmem:[#allocation2 + $0x32] sm:$0xff] }
 0x152   : > { %6977 = vmatmul.mubr.msk.f32.gmra.mrb[8].mxu1 %vm355_vm0, %v9716_v50  ;;  %v9739_v50 = vld [vmem:[#allocation43_spill] sm:$0xff] }
 0x153   : > { %7309 = vmatmul.mubr.msk.f32.gmra.mrb[32].mxu0 %vm355_vm0, %v9717_v52  ;;  %6979 = vmatprep.mubr.msk.f32.mxu1 %vm355_vm0, %v9718_v54  ;;  %v9740_v52 = vld [vmem:[#allocation44_spill] sm:$0xff]  ;;  %v4708_v54 = vld [vmem:[#allocation2 + $0x3a] sm:$0xff] }
 0x154   : > { %7311 = vmatprep.mubr.msk.f32.mxu0 %vm355_vm0, %v9719_v56  ;;  %v4709_v56 = vld [vmem:[#allocation2 + $0x42] sm:$0xff] }
 0x156   : > { %6980 = vmatmul.mubr.msk.f32.gmra.mrb[10].mxu1 %vm355_vm0, %v9720_v58  ;;  %v4710_v58 = vld [vmem:[#allocation2 + $0x4a] sm:$0xff] }
 0x157   : > { %7312 = vmatmul.mubr.msk.f32.gmra.mrb[34].mxu0 %vm355_vm0, %v9721_v60  ;;  %6982 = vmatprep.mubr.msk.f32.mxu1 %vm355_vm0, %v9722_v62  ;;  %v4711_v60 = vld [vmem:[#allocation2 + $0x52] sm:$0xff]  ;;  %v4713_v62 = vld [vmem:[#allocation2 + $0x62] sm:$0xff] }
 0x158   : > { %7314 = vmatprep.mubr.msk.f32.mxu0 %vm355_vm0, %v9723_v0  ;;  %v2555_v0 = vld [vmem:[#allocation2 + $0x139] sm:$0xff] }
 0x15a   : > { %6983 = vmatmul.mubr.msk.f32.gmra.mrb[12].mxu1 %vm355_vm0, %v9724_v3  ;;  %v4743_v3 = vld [vmem:[#allocation2 + $0x152] sm:$0xff] }
 0x15b   : > { %7315 = vmatmul.mubr.msk.f32.gmra.mrb[36].mxu0 %vm355_vm0, %v9725_v5  ;;  %6985 = vmatprep.mubr.msk.f32.mxu1 %vm355_vm0, %v9726_v7  ;;  %v2557_v5 = vld [vmem:[#allocation2 + $0x149] sm:$0xff] }
 0x15c   : > { %7317 = vmatprep.mubr.msk.f32.mxu0 %vm355_vm0, %v9727_v9  ;;  %v4745_v7 = vld [vmem:[#allocation2 + $0x162] sm:$0xff]  ;;  %v4746_v9 = vld [vmem:[#allocation2 + $0x16a] sm:$0xff] }
 0x15e   : > { %6986 = vmatmul.mubr.msk.f32.gmra.mrb[14].mxu1 %vm355_vm0, %v9728_v11  ;;  %v2559_v11 = vld [vmem:[#allocation2 + $0x159] sm:$0xff] }
 0x15f   : > { %7318 = vmatmul.mubr.msk.f32.gmra.mrb[38].mxu0 %vm355_vm0, %v9729_v12  ;;  %6988 = vmatprep.mubr.msk.f32.mxu1 %vm355_vm0, %v9730_v14  ;;  %v4747_v12 = vld [vmem:[#allocation2 + $0x172] sm:$0xff]  ;;  %v2560_v14 = vld [vmem:[#allocation2 + $0x161] sm:$0xff] }
 0x160   : > { %7320 = vmatprep.mubr.msk.f32.mxu0 %vm355_vm0, %v9731_v16  ;;  %v4748_v16 = vld [vmem:[#allocation2 + $0x17a] sm:$0xff] }
 0x162   : > { %6989 = vmatmul.mubr.msk.f32.gmra.mrb[16].mxu1 %vm355_vm0, %v9732_v32  ;;  %v2561_v32 = vld [vmem:[#allocation2 + $0x169] sm:$0xff] }
 0x163   : > { %7321 = vmatmul.mubr.msk.f32.gmra.mrb[40].mxu0 %vm355_vm0, %v9733_v45  ;;  %6991 = vmatprep.mubr.msk.f32.mxu1 %vm355_vm0, %v9734_v6  ;;  %v4749_v45 = vld [vmem:[#allocation2 + $0x182] sm:$0xff]  ;;  %v2562_v6 = vld [vmem:[#allocation2 + $0x171] sm:$0xff] }
 0x164   : > { %7323 = vmatprep.mubr.msk.f32.mxu0 %vm355_vm0, %v9047_v28 }
 0x166   : > { %6992 = vmatmul.mubr.msk.f32.gmra.mrb[18].mxu1 %vm355_vm0, %v9735_v37  ;;  %v4750_v37 = vld [vmem:[#allocation2 + $0x18a] sm:$0xff] }
 0x167   : > { %7324 = vmatmul.mubr.msk.f32.gmra.mrb[42].mxu0 %vm355_vm0, %v9057_v61  ;;  %6994 = vmatprep.mubr.msk.f32.mxu1 %vm355_vm0, %v9736_v29  ;;  %v2563_v29 = vld [vmem:[#allocation2 + $0x179] sm:$0xff] }
 0x168   : > { %7326 = vmatprep.mubr.msk.f32.mxu0 %vm355_vm0, %v9059_v2 }
 0x16a   : > { %6995 = vmatmul.mubr.msk.f32.gmra.mrb[20].mxu1 %vm355_vm0, %v9737_v40  ;;  %v4753_v40 = vld [vmem:[#allocation2 + $0x1a2] sm:$0xff] }
 0x16b   : > { %7327 = vmatmul.mubr.msk.f32.gmra.mrb[44].mxu0 %vm355_vm0, %v4205_v31  ;;  %6997 = vmatprep.mubr.msk.f32.mxu1 %vm355_vm0, %v9738_v44  ;;  %v4751_v31 = vld [vmem:[#allocation2 + $0x192] sm:$0xff]  ;;  %v4754_v44 = vld [vmem:[#allocation2 + $0x1aa] sm:$0xff] }
 0x16c   : > { %7329 = vmatprep.mubr.msk.f32.mxu0 %vm355_vm0, %v4206_v38  ;;  %v4752_v38 = vld [vmem:[#allocation2 + $0x19a] sm:$0xff] }
 0x16e   : > { %6998 = vmatmul.mubr.msk.f32.gmra.mrb[22].mxu1 %vm355_vm0, %v9739_v50 }
 0x16f   : > { %7330 = vmatmul.mubr.msk.f32.gmra.mrb[46].mxu0 %vm355_vm0, %v4207_v46  ;;  %7000 = vmatprep.mubr.msk.f32.mxu1 %vm355_vm0, %v9740_v52 }
 0x170   : > { %7334 = vmatprep.mubr.msk.f32.mxu0 %vm355_vm0, %v4707_v48 }
 0x172   : > { %7001 = vmatmul.mubr.msk.f32.gmra.mrb[24].mxu1 %vm355_vm0, %v8653_v23  ;;  %v4712_v23 = vld [vmem:[#allocation2 + $0x5a] sm:$0xff] }
 0x173   : > { %7335 = vmatmul.mubr.msk.f32.vlgmr.msra.gmra.mrb[0].mxu0 %vm355_vm0, %v4708_v54  ;;  %7003 = vmatprep.mubr.msk.f32.mxu1 %vm355_vm0, %v8662_v26  ;;  %v4714_v26 = vld [vmem:[#allocation2 + $0x6a] sm:$0xff] }
 0x174   : > { %7337 = vmatprep.mubr.msk.f32.mxu0 %vm355_vm0, %v4709_v56 }
 0x176   : > { %7004 = vmatmul.mubr.msk.f32.gmra.mrb[26].mxu1 %vm355_vm0, %v8666_v25  ;;  %v4715_v25 = vld [vmem:[#allocation2 + $0x72] sm:$0xff] }
 0x177   : > { %7338 = vmatmul.mubr.msk.f32.gmra.mrb[2].mxu0 %vm355_vm0, %v4710_v58  ;;  %7006 = vmatprep.mubr.msk.f32.mxu1 %vm355_vm0, %v8674_v34  ;;  %v4717_v34 = vld [vmem:[#allocation2 + $0x82] sm:$0xff] }
 0x178   : > { %7340 = vmatprep.mubr.msk.f32.mxu0 %vm355_vm0, %v4711_v60 }
 0x17a   : > { %7007 = vmatmul.mubr.msk.f32.gmra.mrb[28].mxu1 %vm355_vm0, %v8678_v30  ;;  %v4716_v30 = vld [vmem:[#allocation2 + $0x7a] sm:$0xff] }
 0x17b   : > { %7341 = vmatmul.mubr.msk.f32.gmra.mrb[4].mxu0 %vm355_vm0, %v4712_v23  ;;  %7009 = vmatprep.mubr.msk.f32.mxu1 %vm355_vm0, %v8686_v43  ;;  %v4719_v43 = vld [vmem:[#allocation2 + $0x92] sm:$0xff] }
 0x17c   : > { %7343 = vmatprep.mubr.msk.f32.mxu0 %vm355_vm0, %v4713_v62 }
 0x17e   : > { %7010 = vmatmul.mubr.msk.f32.gmra.mrb[30].mxu1 %vm355_vm0, %v8690_v39  ;;  %v4718_v39 = vld [vmem:[#allocation2 + $0x8a] sm:$0xff] }
 0x17f   : > { %7344 = vmatmul.mubr.msk.f32.gmra.mrb[6].mxu0 %vm355_vm0, %v4714_v26  ;;  %7012 = vmatprep.mubr.msk.f32.mxu1 %vm355_vm0, %v8698_v8  ;;  %v4721_v8 = vld [vmem:[#allocation2 + $0xa2] sm:$0xff] }
 0x180   : > { %7346 = vmatprep.mubr.msk.f32.mxu0 %vm355_vm0, %v4715_v25 }
 0x182   : > { %7013 = vmatmul.mubr.msk.f32.gmra.mrb[32].mxu1 %vm355_vm0, %v8702_v47  ;;  %v4720_v47 = vld [vmem:[#allocation2 + $0x9a] sm:$0xff] }
 0x183   : > { %7347 = vmatmul.mubr.msk.f32.gmra.mrb[8].mxu0 %vm355_vm0, %v4716_v30  ;;  %7015 = vmatprep.mubr.msk.f32.mxu1 %vm355_vm0, %v8710_v4  ;;  %v4722_v4 = vld [vmem:[#allocation2 + $0xaa] sm:$0xff] }
 0x184   : > { %7349 = vmatprep.mubr.msk.f32.mxu0 %vm355_vm0, %v4717_v34 }
 0x186   : > { %7016 = vmatmul.mubr.msk.f32.gmra.mrb[34].mxu1 %vm355_vm0, %v8714_v17  ;;  %v4723_v17 = vld [vmem:[#allocation2 + $0xb2] sm:$0xff] }
 0x187   : > { %7350 = vmatmul.mubr.msk.f32.gmra.mrb[10].mxu0 %vm355_vm0, %v4718_v39  ;;  %7018 = vmatprep.mubr.msk.f32.mxu1 %vm355_vm0, %v8722_v59  ;;  %v4724_v59 = vld [vmem:[#allocation2 + $0xba] sm:$0xff] }
 0x188   : > { %7352 = vmatprep.mubr.msk.f32.mxu0 %vm355_vm0, %v4719_v43 }
 0x18a   : > { %7019 = vmatmul.mubr.msk.f32.gmra.mrb[36].mxu1 %vm355_vm0, %v8726_v63  ;;  %v4725_v63 = vld [vmem:[#allocation2 + $0xc2] sm:$0xff] }
 0x18b   : > { %7353 = vmatmul.mubr.msk.f32.gmra.mrb[12].mxu0 %vm355_vm0, %v4720_v47  ;;  %7021 = vmatprep.mubr.msk.f32.mxu1 %vm355_vm0, %v8734_v51  ;;  %v4726_v51 = vld [vmem:[#allocation2 + $0xca] sm:$0xff] }
 0x18c   : > { %7355 = vmatprep.mubr.msk.f32.mxu0 %vm355_vm0, %v4721_v8 }
 0x18e   : > { %7022 = vmatmul.mubr.msk.f32.gmra.mrb[38].mxu1 %vm355_vm0, %v8738_v55  ;;  %v4727_v55 = vld [vmem:[#allocation2 + $0xd2] sm:$0xff] }
 0x18f   : > { %7356 = vmatmul.mubr.msk.f32.gmra.mrb[14].mxu0 %vm355_vm0, %v4722_v4  ;;  %7024 = vmatprep.mubr.msk.f32.mxu1 %vm355_vm0, %v8746_v13  ;;  %v4728_v13 = vld [vmem:[#allocation2 + $0xda] sm:$0xff] }
 0x190   : > { %7358 = vmatprep.mubr.msk.f32.mxu0 %vm355_vm0, %v4723_v17 }
 0x192   : > { %7025 = vmatmul.mubr.msk.f32.gmra.mrb[40].mxu1 %vm355_vm0, %v8750_v18  ;;  %v4729_v18 = vld [vmem:[#allocation2 + $0xe2] sm:$0xff] }
 0x193   : > { %7359 = vmatmul.mubr.msk.f32.gmra.mrb[16].mxu0 %vm355_vm0, %v4724_v59  ;;  %7027 = vmatprep.mubr.msk.f32.mxu1 %vm355_vm0, %v8758_v49  ;;  %v4730_v49 = vld [vmem:[#allocation2 + $0xea] sm:$0xff] }
 0x194   : > { %7361 = vmatprep.mubr.msk.f32.mxu0 %vm355_vm0, %v4725_v63 }
 0x196   : > { %7028 = vmatmul.mubr.msk.f32.gmra.mrb[42].mxu1 %vm355_vm0, %v8762_v57  ;;  %v4731_v57 = vld [vmem:[#allocation2 + $0xf2] sm:$0xff] }
 0x197   : > { %7362 = vmatmul.mubr.msk.f32.gmra.mrb[18].mxu0 %vm355_vm0, %v4726_v51  ;;  %7030 = vmatprep.mubr.msk.f32.mxu1 %vm355_vm0, %v8770_v15  ;;  %v4732_v15 = vld [vmem:[#allocation2 + $0xfa] sm:$0xff] }
 0x198   : > { %7364 = vmatprep.mubr.msk.f32.mxu0 %vm355_vm0, %v4727_v55  ;;  %v9243_v51 = vld [vmem:[%s9613_s3] ss:$0 sm:$0xff] }
 0x19a   : > { %7031 = vmatmul.mubr.msk.f32.gmra.mrb[44].mxu1 %vm355_vm0, %v8847_v1  ;;  %v4733_v1 = vld [vmem:[#allocation2 + $0x102] sm:$0xff] }
 0x19b   : > { %7365 = vmatmul.mubr.msk.f32.gmra.mrb[20].mxu0 %vm355_vm0, %v4728_v13  ;;  %7033 = vmatprep.mubr.msk.f32.mxu1 %vm355_vm0, %v8857_v19  ;;  %v4734_v19 = vld [vmem:[#allocation2 + $0x10a] sm:$0xff] }
 0x19c   : > { %7367 = vmatprep.mubr.msk.f32.mxu0 %vm355_vm0, %v4729_v18 }
 0x19e   : > { %7034 = vmatmul.mubr.msk.f32.gmra.mrb[46].mxu1 %vm355_vm0, %v8859_v20  ;;  %v4735_v20 = vld [vmem:[#allocation2 + $0x112] sm:$0xff] }
 0x19f   : > { %7368 = vmatmul.mubr.msk.f32.gmra.mrb[22].mxu0 %vm355_vm0, %v4730_v49  ;;  %7074 = vmatprep.mubr.msk.f32.mxu1 %vm355_vm0, %v8942_v21  ;;  %v4736_v21 = vld [vmem:[#allocation2 + $0x11a] sm:$0xff] }
 0x1a0   : > { %7370 = vmatprep.mubr.msk.f32.mxu0 %vm355_vm0, %v4731_v57 }
 0x1a2   : > { %7075 = vmatmul.mubr.msk.f32.vlgmr.msra.gmra.mrb[24].mxu1 %vm355_vm0, %v8944_v24  ;;  %v4737_v24 = vld [vmem:[#allocation2 + $0x122] sm:$0xff] }
 0x1a3   : > { %7371 = vmatmul.mubr.msk.f32.gmra.mrb[24].mxu0 %vm355_vm0, %v4732_v15  ;;  %7077 = vmatprep.mubr.msk.f32.mxu1 %vm355_vm0, %v8954_v36  ;;  %v4738_v36 = vld [vmem:[#allocation2 + $0x12a] sm:$0xff] }
 0x1a4   : > { %7373 = vmatprep.mubr.msk.f32.mxu0 %vm355_vm0, %v4733_v1 }
 0x1a6   : > { %7078 = vmatmul.mubr.msk.f32.gmra.mrb[26].mxu1 %vm355_vm0, %v8956_v41  ;;  %v4739_v41 = vld [vmem:[#allocation2 + $0x132] sm:$0xff] }
 0x1a7   : > { %7374 = vmatmul.mubr.msk.f32.gmra.mrb[26].mxu0 %vm355_vm0, %v4734_v19  ;;  %7080 = vmatprep.mubr.msk.f32.mxu1 %vm355_vm0, %v8966_v10  ;;  %v4740_v10 = vld [vmem:[#allocation2 + $0x13a] sm:$0xff] }
 0x1a8   : > { %7376 = vmatprep.mubr.msk.f32.mxu0 %vm355_vm0, %v4735_v20 }
 0x1aa   : > { %7081 = vmatmul.mubr.msk.f32.gmra.mrb[28].mxu1 %vm355_vm0, %v8968_v53  ;;  %v4741_v53 = vld [vmem:[#allocation2 + $0x142] sm:$0xff] }
 0x1ab   : > { %7377 = vmatmul.mubr.msk.f32.gmra.mrb[28].mxu0 %vm355_vm0, %v4736_v21  ;;  %7083 = vmatprep.mubr.msk.f32.mxu1 %vm355_vm0, %v8981_v22  ;;  %v2554_v22 = vld [vmem:[#allocation2 + $0x131] sm:$0xff] }
 0x1ac   : > { %7379 = vmatprep.mubr.msk.f32.mxu0 %vm355_vm0, %v4737_v24 }
 0x1ae   : > { %7084 = vmatmul.mubr.msk.f32.gmra.mrb[30].mxu1 %vm355_vm0, %v8983_v27  ;;  %v4742_v27 = vld [vmem:[#allocation2 + $0x14a] sm:$0xff] }
 0x1af   : > { %7380 = vmatmul.mubr.msk.f32.gmra.mrb[30].mxu0 %vm355_vm0, %v4738_v36  ;;  %7086 = vmatprep.mubr.msk.f32.mxu1 %vm355_vm0, %v8993_v33  ;;  %v2556_v33 = vld [vmem:[#allocation2 + $0x141] sm:$0xff] }
 0x1b0   : > { %7382 = vmatprep.mubr.msk.f32.mxu0 %vm355_vm0, %v4739_v41 }
 0x1b2   : > { %7087 = vmatmul.mubr.msk.f32.gmra.mrb[32].mxu1 %vm355_vm0, %v8995_v35  ;;  %v4744_v35 = vld [vmem:[#allocation2 + $0x15a] sm:$0xff] }
 0x1b3   : > { %7383 = vmatmul.mubr.msk.f32.gmra.mrb[32].mxu0 %vm355_vm0, %v4740_v10  ;;  %7089 = vmatprep.mubr.msk.f32.mxu1 %vm355_vm0, %v9005_v42  ;;  %v2558_v42 = vld [vmem:[#allocation2 + $0x151] sm:$0xff] }
 0x1b4   : > { %7385 = vmatprep.mubr.msk.f32.mxu0 %vm355_vm0, %v4741_v53 }
 0x1b6   : > { %7090 = vmatmul.mubr.msk.f32.gmra.mrb[34].mxu1 %vm355_vm0, %v2554_v22 }
 0x1b7   : > { %7386 = vmatmul.mubr.msk.f32.gmra.mrb[34].mxu0 %vm355_vm0, %v4742_v27  ;;  %7092 = vmatprep.mubr.msk.f32.mxu1 %vm355_vm0, %v2555_v0 }
 0x1b8   : > { %7388 = vmatprep.mubr.msk.f32.mxu0 %vm355_vm0, %v4743_v3 }
 0x1ba   : > { %7093 = vmatmul.mubr.msk.f32.gmra.mrb[36].mxu1 %vm355_vm0, %v2556_v33 }
 0x1bb   : > { %7389 = vmatmul.mubr.msk.f32.gmra.mrb[36].mxu0 %vm355_vm0, %v4744_v35  ;;  %7095 = vmatprep.mubr.msk.f32.mxu1 %vm355_vm0, %v2557_v5 }
 0x1bc   : > { %7391 = vmatprep.mubr.msk.f32.mxu0 %vm355_vm0, %v4745_v7 }
 0x1be   : > { %7096 = vmatmul.mubr.msk.f32.gmra.mrb[38].mxu1 %vm355_vm0, %v2558_v42 }
 0x1bf   : > { %7392 = vmatmul.mubr.msk.f32.gmra.mrb[38].mxu0 %vm355_vm0, %v4746_v9  ;;  %7098 = vmatprep.mubr.msk.f32.mxu1 %vm355_vm0, %v2559_v11 }
 0x1c0   : > { %7394 = vmatprep.mubr.msk.f32.mxu0 %vm355_vm0, %v4747_v12 }
 0x1c2   : > { %7099 = vmatmul.mubr.msk.f32.gmra.mrb[40].mxu1 %vm355_vm0, %v2560_v14 }
 0x1c3   : > { %7395 = vmatmul.mubr.msk.f32.gmra.mrb[40].mxu0 %vm355_vm0, %v4748_v16  ;;  %7101 = vmatprep.mubr.msk.f32.mxu1 %vm355_vm0, %v2561_v32 }
 0x1c4   : > { %7397 = vmatprep.mubr.msk.f32.mxu0 %vm355_vm0, %v4749_v45 }
 0x1c6   : > { %7102 = vmatmul.mubr.msk.f32.gmra.mrb[42].mxu1 %vm355_vm0, %v2562_v6 }
 0x1c7   : > { %7398 = vmatmul.mubr.msk.f32.gmra.mrb[42].mxu0 %vm355_vm0, %v4750_v37  ;;  %7104 = vmatprep.mubr.msk.f32.mxu1 %vm355_vm0, %v2563_v29 }
 0x1c8   : > { %7400 = vmatprep.mubr.msk.f32.mxu0 %vm355_vm0, %v4751_v31 }
 0x1ca   : > { %7105 = vmatmul.mubr.msk.f32.gmra.mrb[44].mxu1 %vm355_vm0, %v9047_v28 }
 0x1cb   : > { %7401 = vmatmul.mubr.msk.f32.gmra.mrb[44].mxu0 %vm355_vm0, %v4752_v38  ;;  %7107 = vmatprep.mubr.msk.f32.mxu1 %vm355_vm0, %v9057_v61 }
 0x1cc   : > { %7403 = vmatprep.mubr.msk.f32.mxu0 %vm355_vm0, %v4753_v40 }
 0x1ce   : > { %7108 = vmatmul.mubr.msk.f32.gmra.mrb[46].mxu1 %vm355_vm0, %v9059_v2 }
 0x1cf   : > { %7404 = vmatmul.mubr.msk.f32.gmra.mrb[46].mxu0 %vm355_vm0, %v4754_v44 }
 0x215   : > { %v6966_v46 = vpop.f32.mrb[0].mxu1 }
 0x216   : > { %v2232_v48 = vpop.f32.mrb[1].mxu1 }
 0x219   : > { %v6969_v50 = vpop.f32.mrb[2].mxu1 }
 0x21a   : > { %v2242_v52 = vpop.f32.mrb[3].mxu1 }
 0x21d   : > { %v6972_v54 = vpop.f32.mrb[4].mxu1 }
 0x21e   : > { %v2252_v56 = vpop.f32.mrb[5].mxu1 }
 0x221   : > { %v6975_v28 = vpop.f32.mrb[6].mxu1 }
 0x222   : > { %v2262_v58 = vpop.f32.mrb[7].mxu1 }
 0x225   : > { %v6978_v60 = vpop.f32.mrb[8].mxu1 }
 0x226   : > { %v2272_v23 = vpop.f32.mrb[9].mxu1 }
 0x229   : > { %v9212_v62 = vpop.f32.mrb[10].mxu1 }
 0x22a   : > { %v9214_v61 = vpop.f32.mrb[11].mxu1 }
 0x22d   : > { %v9216_v26 = vpop.f32.mrb[12].mxu1 }
 0x22e   : > { %v9218_v25 = vpop.f32.mrb[13].mxu1 }
 0x231   : > { %v9220_v2 = vpop.f32.mrb[14].mxu1 }
 0x232   : > { %v9222_v30 = vpop.f32.mrb[15].mxu1 }
 0x235   : > { %v9224_v34 = vpop.f32.mrb[16].mxu1 }
 0x236   : > { %v9226_v39 = vpop.f32.mrb[17].mxu1 }
 0x239   : > { %v9228_v43 = vpop.f32.mrb[18].mxu1 }
 0x23a   : > { %v9230_v47 = vpop.f32.mrb[19].mxu1 }
 0x23d   : > { %v9232_v8 = vpop.f32.mrb[20].mxu1 }
 0x23e   : > { %v9234_v4 = vpop.f32.mrb[21].mxu1 }
 0x241   : > { %v9236_v17 = vpop.f32.mrb[22].mxu1 }
 0x242   : > { %v9238_v59 = vpop.f32.mrb[23].mxu1 }
 0x246   : > { %v7336_v63 = vpop.f32.mrb[0].mxu0 }
 0x247   : > { %v7408_v55 = vadd.f32 %v7336_v63, %v6966_v46  ;;  %v4967_v13 = vpop.f32.mrb[1].mxu0 }
 0x248   : > { %v7409_v18 = vadd.f32 %v4967_v13, %v2232_v48 }
 0x249   : > { %v9246_v49 = vadd.f32 %v7408_v55, %v9243_v51 }
 0x24a   : > { %v9249_v57 = vadd.f32 %v7409_v18, %v9243_v51  ;;  %v7339_v15 = vpop.f32.mrb[2].mxu0 }
 0x24b   : > { %v6248_v1 = vmul.f32 -1.442695, %v9246_v49  ;;  %v7410_v19 = vadd.f32 %v7339_v15, %v6969_v50  ;;  %v4977_v20 = vpop.f32.mrb[3].mxu0 }
 0x24c   : > { %v6247_v21 = vmul.f32 -1.442695, %v9249_v57  ;;  %v7411_v24 = vadd.f32 %v4977_v20, %v2242_v52 }
 0x24d   : > { %7820 = vpow2.f32 %v6248_v1  ;;  %v9254_v36 = vadd.f32 %v7410_v19, %v9243_v51 }
 0x24e   : > { %7822 = vpow2.f32 %v6247_v21  ;;  %v9257_v41 = vadd.f32 %v7411_v24, %v9243_v51  ;;  %v7342_v10 = vpop.f32.mrb[4].mxu0 }
 0x24f   : > { %v6250_v53 = vmul.f32 -1.442695, %v9254_v36  ;;  %v7412_v22 = vadd.f32 %v7342_v10, %v6972_v54  ;;  %v4987_v27 = vpop.f32.mrb[5].mxu0 }
 0x250   : > { %v6249_v0 = vmul.f32 -1.442695, %v9257_v41  ;;  %v7413_v3 = vadd.f32 %v4987_v27, %v2252_v56 }
 0x251   : > { %7824 = vpow2.f32 %v6250_v53  ;;  %v9262_v33 = vadd.f32 %v7412_v22, %v9243_v51 }
 0x252   : > { %7826 = vpow2.f32 %v6249_v0  ;;  %v9265_v35 = vadd.f32 %v7413_v3, %v9243_v51  ;;  %v7345_v5 = vpop.f32.mrb[6].mxu0 }
 0x253   : > { %v6252_v7 = vmul.f32 -1.442695, %v9262_v33  ;;  %v7414_v42 = vadd.f32 %v7345_v5, %v6975_v28  ;;  %v4997_v9 = vpop.f32.mrb[7].mxu0 }
 0x254   : > { %v6251_v11 = vmul.f32 -1.442695, %v9265_v35  ;;  %v7415_v12 = vadd.f32 %v4997_v9, %v2262_v58 }
 0x255   : > { %7828 = vpow2.f32 %v6252_v7  ;;  %v9270_v14 = vadd.f32 %v7414_v42, %v9243_v51 }
 0x256   : > { %7830 = vpow2.f32 %v6251_v11  ;;  %v9273_v16 = vadd.f32 %v7415_v12, %v9243_v51  ;;  %v7348_v32 = vpop.f32.mrb[8].mxu0 }
 0x257   : > { %v7821_v45 = vpop.eup %7820  ;;  %v6254_v6 = vmul.f32 -1.442695, %v9270_v14  ;;  %v7416_v37 = vadd.f32 %v7348_v32, %v6978_v60  ;;  %v5007_v29 = vpop.f32.mrb[9].mxu0 }
 0x258   : > { %v7823_v31 = vpop.eup %7822  ;;  %v5454_v38 = vadd.f32 1.0, %v7821_v45  ;;  %v6253_v40 = vmul.f32 -1.442695, %v9273_v16  ;;  %v7417_v44 = vadd.f32 %v5007_v29, %v2272_v23 }
 0x259   : > { %v5453_v46 = vadd.f32 1.0, %v7823_v31  ;;  %7832 = vpow2.f32 %v6254_v6  ;;  %v9278_v48 = vadd.f32 %v7416_v37, %v9243_v51 }
 0x25a   : > { %7834 = vrcp.f32 %v5454_v38  ;;  %v9281_v50 = vadd.f32 %v7417_v44, %v9243_v51  ;;  %v7351_v52 = vpop.f32.mrb[10].mxu0 }
 0x25b   : > { %v7825_v54 = vpop.eup %7824  ;;  %7836 = vrcp.f32 %v5453_v46  ;;  %v6256_v56 = vmul.f32 -1.442695, %v9278_v48  ;;  %v7418_v28 = vadd.f32 %v7351_v52, %v9212_v62  ;;  %v5017_v58 = vpop.f32.mrb[11].mxu0 }
 0x25c   : > { %v7827_v60 = vpop.eup %7826  ;;  %v5456_v63 = vadd.f32 1.0, %v7825_v54  ;;  %7838 = vpow2.f32 %v6253_v40  ;;  %v6255_v23 = vmul.f32 -1.442695, %v9281_v50  ;;  %v7419_v55 = vadd.f32 %v5017_v58, %v9214_v61 }
 0x25d   : > { %v5455_v13 = vadd.f32 1.0, %v7827_v60  ;;  %7840 = vpow2.f32 %v6256_v56  ;;  %v9288_v18 = vadd.f32 %v7418_v28, %v9243_v51 }
 0x25e   : > { %7842 = vrcp.f32 %v5456_v63  ;;  %v9291_v15 = vadd.f32 %v7419_v55, %v9243_v51  ;;  %v7354_v1 = vpop.f32.mrb[12].mxu0 }
 0x25f   : > { %v7829_v62 = vpop.eup %7828  ;;  %7844 = vrcp.f32 %v5455_v13  ;;  %v6258_v19 = vmul.f32 -1.442695, %v9288_v18  ;;  %v7420_v20 = vadd.f32 %v7354_v1, %v9216_v26  ;;  %v5027_v21 = vpop.f32.mrb[13].mxu0 }
 0x260   : > { %v7831_v24 = vpop.eup %7830  ;;  %v5458_v61 = vadd.f32 1.0, %v7829_v62  ;;  %7846 = vpow2.f32 %v6255_v23  ;;  %v6257_v10 = vmul.f32 -1.442695, %v9291_v15  ;;  %v7421_v53 = vadd.f32 %v5027_v21, %v9218_v25 }
 0x261   : > { %v5457_v22 = vadd.f32 1.0, %v7831_v24  ;;  %7848 = vpow2.f32 %v6258_v19  ;;  %v9299_v27 = vadd.f32 %v7420_v20, %v9243_v51 }
 0x262   : > { %7850 = vrcp.f32 %v5458_v61  ;;  %v9302_v0 = vadd.f32 %v7421_v53, %v9243_v51  ;;  %v7357_v3 = vpop.f32.mrb[14].mxu0 }
 0x263   : > { %v7833_v26 = vpop.eup %7832  ;;  %7852 = vrcp.f32 %v5457_v22  ;;  %v6260_v5 = vmul.f32 -1.442695, %v9299_v27  ;;  %v7422_v7 = vadd.f32 %v7357_v3, %v9220_v2  ;;  %v5037_v42 = vpop.f32.mrb[15].mxu0 }
 0x264   : > { %v7835_v9 = vpop.eup %7834  ;;  %v5460_v25 = vadd.f32 1.0, %v7833_v26  ;;  %7854 = vpow2.f32 %v6257_v10  ;;  %v6259_v11 = vmul.f32 -1.442695, %v9302_v0  ;;  %v7423_v12 = vadd.f32 %v5037_v42, %v9222_v30 }
 0x265   : > { %v7837_v32 = vpop.eup %7836  ;;  %v5598_v45 = vmul.f32 %v7835_v9, %v9246_v49  ;;  %7856 = vpow2.f32 %v6260_v5  ;;  %v9315_v2 = vadd.f32 %v7422_v7, %v9243_v51 }
 0x266   : > { %v7839_v6 = vpop.eup %7838  ;;  %v5597_v37 = vmul.f32 %v7837_v32, %v9249_v57  ;;  %7858 = vrcp.f32 %v5460_v25  ;;  %v9319_v29 = vadd.f32 %v7423_v12, %v9243_v51  ;;  %v7360_v31 = vpop.f32.mrb[16].mxu0 }
 0x267   : > { %v7841_v38 = vpop.eup %7840  ;;  %5646 = vst.msk [vmem:[%s9309_s29 + $0x8] sm:$0xff] %vm355_vm0, %v5598_v45  ;;  %v5459_v30 = vadd.f32 1.0, %v7839_v6  ;;  %7860 = vpow2.f32 %v6259_v11  ;;  %v6262_v49 = vmul.f32 -1.442695, %v9315_v2  ;;  %v7424_v40 = vadd.f32 %v7360_v31, %v9224_v34  ;;  %v5047_v44 = vpop.f32.mrb[17].mxu0 }
 0x268   : > { %v7843_v46 = vpop.eup %7842  ;;  %5645 = vst.msk [vmem:[%s9309_s29] sm:$0xff] %vm355_vm0, %v5597_v37  ;;  %v5462_v57 = vadd.f32 1.0, %v7841_v38  ;;  %v6261_v52 = vmul.f32 -1.442695, %v9319_v29  ;;  %v7425_v54 = vadd.f32 %v5047_v44, %v9226_v39 }
 0x269   : > { %v7845_v56 = vpop.eup %7844  ;;  %v5600_v28 = vmul.f32 %v7843_v46, %v9254_v36  ;;  %7862 = vrcp.f32 %v5459_v30  ;;  %v9331_v58 = vadd.f32 %v7424_v40, %v9243_v51 }
 0x26a   : > { %v7847_v60 = vpop.eup %7846  ;;  %v5599_v34 = vmul.f32 %v7845_v56, %v9257_v41  ;;  %7864 = vrcp.f32 %v5462_v57  ;;  %v9335_v63 = vadd.f32 %v7425_v54, %v9243_v51  ;;  %v7363_v23 = vpop.f32.mrb[18].mxu0 }
 0x26b   : > { %v7849_v55 = vpop.eup %7848  ;;  %5648 = vst.msk [vmem:[%s9309_s29 + $0x18] sm:$0xff] %vm355_vm0, %v5600_v28  ;;  %v5461_v39 = vadd.f32 1.0, %v7847_v60  ;;  %7866 = vpow2.f32 %v6262_v49  ;;  %v6264_v36 = vmul.f32 -1.442695, %v9331_v58  ;;  %v7426_v13 = vadd.f32 %v7363_v23, %v9228_v43  ;;  %v5057_v1 = vpop.f32.mrb[19].mxu0 }
 0x26c   : > { %v7851_v62 = vpop.eup %7850  ;;  %5647 = vst.msk [vmem:[%s9309_s29 + $0x10] sm:$0xff] %vm355_vm0, %v5599_v34  ;;  %v5464_v41 = vadd.f32 1.0, %v7849_v55  ;;  %7868 = vpow2.f32 %v6261_v52  ;;  %v6263_v19 = vmul.f32 -1.442695, %v9335_v63  ;;  %v7427_v20 = vadd.f32 %v5057_v1, %v9230_v47 }
 0x26d   : > { %v7853_v21 = vpop.eup %7852  ;;  %v5602_v24 = vmul.f32 %v7851_v62, %v9262_v33  ;;  %7870 = vrcp.f32 %v5461_v39  ;;  %v9347_v61 = vadd.f32 %v7426_v13, %v9243_v51 }
 0x26e   : > { %v7855_v43 = vpop.eup %7854  ;;  %v5601_v10 = vmul.f32 %v7853_v21, %v9265_v35  ;;  %7872 = vrcp.f32 %v5464_v41  ;;  %v9351_v53 = vadd.f32 %v7427_v20, %v9243_v51  ;;  %v7366_v22 = vpop.f32.mrb[20].mxu0 }
 0x26f   : > { %v7857_v3 = vpop.eup %7856  ;;  %5650 = vst.msk [vmem:[%s9309_s29 + $0x28] sm:$0xff] %vm355_vm0, %v5602_v24  ;;  %v5463_v47 = vadd.f32 1.0, %v7855_v43  ;;  %7874 = vpow2.f32 %v6264_v36  ;;  %v6266_v33 = vmul.f32 -1.442695, %v9347_v61  ;;  %v7428_v26 = vadd.f32 %v7366_v22, %v9232_v8  ;;  %v5067_v5 = vpop.f32.mrb[21].mxu0 }
 0x270   : > { %v7859_v7 = vpop.eup %7858  ;;  %5649 = vst.msk [vmem:[%s9309_s29 + $0x20] sm:$0xff] %vm355_vm0, %v5601_v10  ;;  %v5466_v35 = vadd.f32 1.0, %v7857_v3  ;;  %7876 = vpow2.f32 %v6263_v19  ;;  %v7429_v42 = vadd.f32 %v5067_v5, %v9234_v4  ;;  %v6265_v11 = vmul.f32 -1.442695, %v9351_v53 }
 0x271   : > { %v7861_v9 = vpop.eup %7860  ;;  %v5604_v25 = vmul.f32 %v7859_v7, %v9270_v14  ;;  %7878 = vrcp.f32 %v5463_v47  ;;  %v9363_v12 = vadd.f32 %v7428_v26, %v9243_v51 }
 0x272   : > { %7880 = vrcp.f32 %v5466_v35  ;;  %v5465_v8 = vadd.f32 1.0, %v7861_v9  ;;  %v9366_v32 = vadd.f32 %v7429_v42, %v9243_v51  ;;  %v7369_v45 = vpop.f32.mrb[22].mxu0 }
 0x273   : > { %v7863_v6 = vpop.eup %7862  ;;  %5652 = vst.msk [vmem:[%s9309_s29 + $0x38] sm:$0xff] %vm355_vm0, %v5604_v25  ;;  %7882 = vpow2.f32 %v6266_v33  ;;  %v6268_v4 = vmul.f32 -1.442695, %v9363_v12  ;;  %v7430_v14 = vadd.f32 %v7369_v45, %v9236_v17  ;;  %v5077_v37 = vpop.f32.mrb[23].mxu0 }
 0x274   : > { %v7865_v31 = vpop.eup %7864  ;;  %v5603_v38 = vmul.f32 %v7863_v6, %v9273_v16  ;;  %7884 = vrcp.f32 %v5465_v8  ;;  %v6267_v30 = vmul.f32 -1.442695, %v9366_v32  ;;  %v7431_v49 = vadd.f32 %v5077_v37, %v9238_v59 }
 0x275   : > { %v7867_v40 = vpop.eup %7866  ;;  %v5606_v44 = vmul.f32 %v7865_v31, %v9278_v48  ;;  %7886 = vpow2.f32 %v6265_v11  ;;  %v9377_v46 = vadd.f32 %v7430_v14, %v9243_v51  ;;  %v7076_v57 = vpop.f32.mrb[24].mxu1 }
 0x276   : > { %v7869_v52 = vpop.eup %7868  ;;  %5651 = vst.msk [vmem:[%s9309_s29 + $0x30] sm:$0xff] %vm355_vm0, %v5603_v38  ;;  %v5468_v17 = vadd.f32 1.0, %v7867_v40  ;;  %7888 = vpow2.f32 %v6268_v4  ;;  %v9382_v16 = vadd.f32 %v7431_v49, %v9243_v51  ;;  %v7372_v54 = vpop.f32.mrb[24].mxu0 }
 0x277   : > { %v2899_v56 = vpop.f32.mrb[25].mxu1  ;;  %v7871_v28 = vpop.eup %7870  ;;  %5654 = vst.msk [vmem:[%s9309_s29 + $0x48] sm:$0xff] %vm355_vm0, %v5606_v44  ;;  %v5467_v59 = vadd.f32 1.0, %v7869_v52  ;;  %7890 = vpow2.f32 %v6267_v30  ;;  %v6270_v48 = vmul.f32 -1.442695, %v9377_v46  ;;  %v7432_v60 = vadd.f32 %v7372_v54, %v7076_v57 }
 0x278   : > { %v5087_v34 = vpop.f32.mrb[25].mxu0  ;;  %v7873_v23 = vpop.eup %7872  ;;  %v5605_v55 = vmul.f32 %v7871_v28, %v9281_v50  ;;  %7892 = vrcp.f32 %v5468_v17  ;;  %v6269_v39 = vmul.f32 -1.442695, %v9382_v16 }
 0x279   : > { %v7433_v36 = vadd.f32 %v5087_v34, %v2899_v56  ;;  %v7875_v13 = vpop.eup %7874  ;;  %v5608_v1 = vmul.f32 %v7873_v23, %v9288_v18  ;;  %7894 = vrcp.f32 %v5467_v59  ;;  %v9391_v62 = vadd.f32 %v7432_v60, %v9243_v51  ;;  %v7079_v41 = vpop.f32.mrb[26].mxu1 }
 0x27a   : > { %v7877_v19 = vpop.eup %7876  ;;  %5653 = vst.msk [vmem:[%s9309_s29 + $0x40] sm:$0xff] %vm355_vm0, %v5605_v55  ;;  %v5470_v20 = vadd.f32 1.0, %v7875_v13  ;;  %7896 = vpow2.f32 %v6270_v48  ;;  %v7375_v21 = vpop.f32.mrb[26].mxu0 }
 0x27b   : > { %v9396_v50 = vadd.f32 %v7433_v36, %v9243_v51  ;;  %v2909_v24 = vpop.f32.mrb[27].mxu1  ;;  %v7879_v43 = vpop.eup %7878  ;;  %5656 = vst.msk [vmem:[%s9309_s29 + $0x58] sm:$0xff] %vm355_vm0, %v5608_v1  ;;  %v5469_v10 = vadd.f32 1.0, %v7877_v19  ;;  %7898 = vpow2.f32 %v6269_v39  ;;  %v6272_v18 = vmul.f32 -1.442695, %v9391_v62 }
 0x27c   : > { %v7434_v22 = vadd.f32 %v7375_v21, %v7079_v41  ;;  %v5097_v3 = vpop.f32.mrb[27].mxu0  ;;  %v7881_v47 = vpop.eup %7880  ;;  %v5607_v33 = vmul.f32 %v7879_v43, %v9291_v15  ;;  %7900 = vrcp.f32 %v5470_v20 }
 0x27d   : > { %v6271_v26 = vmul.f32 -1.442695, %v9396_v50  ;;  %v7435_v5 = vadd.f32 %v5097_v3, %v2909_v24  ;;  %v7883_v7 = vpop.eup %7882  ;;  %v5610_v35 = vmul.f32 %v7881_v47, %v9299_v27  ;;  %7902 = vrcp.f32 %v5469_v10  ;;  %v7082_v9 = vpop.f32.mrb[28].mxu1 }
 0x27e   : > { %v9405_v42 = vadd.f32 %v7434_v22, %v9243_v51  ;;  %v7885_v25 = vpop.eup %7884  ;;  %5655 = vst.msk [vmem:[%s9309_s29 + $0x50] sm:$0xff] %vm355_vm0, %v5607_v33  ;;  %v5472_v11 = vadd.f32 1.0, %v7883_v7  ;;  %7904 = vpow2.f32 %v6272_v18  ;;  %v7378_v8 = vpop.f32.mrb[28].mxu0 }
 0x27f   : > { %v9410_v15 = vadd.f32 %v7435_v5, %v9243_v51  ;;  %v2919_v45 = vpop.f32.mrb[29].mxu1  ;;  %v7887_v6 = vpop.eup %7886  ;;  %5658 = vst.msk [vmem:[%s9309_s29 + $0x68] sm:$0xff] %vm355_vm0, %v5610_v35  ;;  %v5609_v27 = vmul.f32 %v7885_v25, %v9302_v0  ;;  %7906 = vpow2.f32 %v6271_v26  ;;  %v7436_v14 = vadd.f32 %v7378_v8, %v7082_v9 }
 0x280   : > { %v6274_v4 = vmul.f32 -1.442695, %v9405_v42  ;;  %v5107_v37 = vpop.f32.mrb[29].mxu0  ;;  %v7889_v31 = vpop.eup %7888  ;;  %7908 = vrcp.f32 %v5472_v11  ;;  %v5471_v38 = vadd.f32 1.0, %v7887_v6 }
 0x281   : > { %v7437_v30 = vadd.f32 %v5107_v37, %v2919_v45  ;;  %v7891_v49 = vpop.eup %7890  ;;  %5657 = vst.msk [vmem:[%s9309_s29 + $0x60] sm:$0xff] %vm355_vm0, %v5609_v27  ;;  %v5474_v40 = vadd.f32 1.0, %v7889_v31  ;;  %v6273_v44 = vmul.f32 -1.442695, %v9410_v15  ;;  %v9420_v57 = vadd.f32 %v7436_v14, %v9243_v51  ;;  %v7085_v0 = vpop.f32.mrb[30].mxu1 }
 0x282   : > { %7910 = vpow2.f32 %v6274_v4  ;;  %v7893_v52 = vpop.eup %7892  ;;  %v5473_v17 = vadd.f32 1.0, %v7891_v49  ;;  %v7381_v56 = vpop.f32.mrb[30].mxu0 }
 0x283   : > { %7912 = vrcp.f32 %v5471_v38  ;;  %v9423_v54 = vadd.f32 %v7437_v30, %v9243_v51  ;;  %v2929_v28 = vpop.f32.mrb[31].mxu1  ;;  %v7895_v59 = vpop.eup %7894  ;;  %v5612_v48 = vmul.f32 %v7893_v52, %v9315_v2  ;;  %v6276_v60 = vmul.f32 -1.442695, %v9420_v57 }
 0x284   : > { %7914 = vrcp.f32 %v5474_v40  ;;  %v7438_v34 = vadd.f32 %v7381_v56, %v7085_v0  ;;  %v5117_v23 = vpop.f32.mrb[31].mxu0  ;;  %v7897_v55 = vpop.eup %7896  ;;  %v5611_v39 = vmul.f32 %v7895_v59, %v9319_v29 }
 0x285   : > { %7916 = vrcp.f32 %v5473_v17  ;;  %v7439_v36 = vadd.f32 %v5117_v23, %v2929_v28  ;;  %v7899_v13 = vpop.eup %7898  ;;  %5660 = vst.msk [vmem:[%s9309_s29 + $0x78] sm:$0xff] %vm355_vm0, %v5612_v48  ;;  %v5476_v1 = vadd.f32 1.0, %v7897_v55  ;;  %v6275_v41 = vmul.f32 -1.442695, %v9423_v54  ;;  %v7088_v19 = vpop.f32.mrb[32].mxu1 }
 0x286   : > { %7918 = vpow2.f32 %v6273_v44  ;;  %v9432_v2 = vadd.f32 %v7438_v34, %v9243_v51  ;;  %v7901_v20 = vpop.eup %7900  ;;  %5659 = vst.msk [vmem:[%s9309_s29 + $0x70] sm:$0xff] %vm355_vm0, %v5611_v39  ;;  %v5475_v21 = vadd.f32 1.0, %v7899_v13  ;;  %v7384_v24 = vpop.f32.mrb[32].mxu0 }
 0x287   : > { %7920 = vpow2.f32 %v6276_v60  ;;  %v9437_v29 = vadd.f32 %v7439_v36, %v9243_v51  ;;  %v2939_v43 = vpop.f32.mrb[33].mxu1  ;;  %v7903_v10 = vpop.eup %7902  ;;  %v5614_v18 = vmul.f32 %v7901_v20, %v9331_v58  ;;  %v7440_v3 = vadd.f32 %v7384_v24, %v7088_v19 }
 0x288   : > { %7922 = vrcp.f32 %v5476_v1  ;;  %v6278_v22 = vmul.f32 -1.442695, %v9432_v2  ;;  %v5127_v47 = vpop.f32.mrb[33].mxu0  ;;  %v7905_v33 = vpop.eup %7904  ;;  %v5613_v26 = vmul.f32 %v7903_v10, %v9335_v63 }
 0x289   : > { %7924 = vrcp.f32 %v5475_v21  ;;  %v7441_v5 = vadd.f32 %v5127_v47, %v2939_v43  ;;  %v7907_v7 = vpop.eup %7906  ;;  %5662 = vst.msk [vmem:[%s9309_s29 + $0x88] sm:$0xff] %vm355_vm0, %v5614_v18  ;;  %v5478_v35 = vadd.f32 1.0, %v7905_v33  ;;  %v6277_v9 = vmul.f32 -1.442695, %v9437_v29  ;;  %v7091_v25 = vpop.f32.mrb[34].mxu1 }
 0x28a   : > { %7926 = vpow2.f32 %v6275_v41  ;;  %v9446_v58 = vadd.f32 %v7440_v3, %v9243_v51  ;;  %v7909_v11 = vpop.eup %7908  ;;  %5661 = vst.msk [vmem:[%s9309_s29 + $0x80] sm:$0xff] %vm355_vm0, %v5613_v26  ;;  %v5477_v8 = vadd.f32 1.0, %v7907_v7  ;;  %v7387_v45 = vpop.f32.mrb[34].mxu0 }
 0x28b   : > { %7928 = vpow2.f32 %v6278_v22  ;;  %v9451_v63 = vadd.f32 %v7441_v5, %v9243_v51  ;;  %v2949_v6 = vpop.f32.mrb[35].mxu1  ;;  %v5616_v4 = vmul.f32 %v7909_v11, %v9347_v61  ;;  %v7442_v37 = vadd.f32 %v7387_v45, %v7091_v25  ;;  %v5137_v31 = vpop.f32.mrb[35].mxu0 }
 0x28c   : > { %v7911_v27 = vpop.eup %7910  ;;  %7930 = vrcp.f32 %v5478_v35  ;;  %v6280_v14 = vmul.f32 -1.442695, %v9446_v58  ;;  %v7443_v40 = vadd.f32 %v5137_v31, %v2949_v6 }
 0x28d   : > { %v7913_v38 = vpop.eup %7912  ;;  %7932 = vrcp.f32 %v5477_v8  ;;  %v5480_v30 = vadd.f32 1.0, %v7911_v27  ;;  %v6279_v49 = vmul.f32 -1.442695, %v9451_v63  ;;  %5664 = vst.msk [vmem:[%s9309_s29 + $0x98] sm:$0xff] %vm355_vm0, %v5616_v4  ;;  %v9460_v61 = vadd.f32 %v7442_v37, %v9243_v51  ;;  %v7094_v52 = vpop.f32.mrb[36].mxu1 }
 0x28e   : > { %v7915_v44 = vpop.eup %7914  ;;  %v5615_v0 = vmul.f32 %v7913_v38, %v9351_v53  ;;  %7934 = vpow2.f32 %v6277_v9  ;;  %v9464_v28 = vadd.f32 %v7443_v40, %v9243_v51  ;;  %v7390_v59 = vpop.f32.mrb[36].mxu0 }
 0x28f   : > { %v7917_v17 = vpop.eup %7916  ;;  %v5618_v56 = vmul.f32 %v7915_v44, %v9363_v12  ;;  %7936 = vrcp.f32 %v5480_v30  ;;  %v2959_v48 = vpop.f32.mrb[37].mxu1  ;;  %v6282_v34 = vmul.f32 -1.442695, %v9460_v61  ;;  %v7444_v23 = vadd.f32 %v7390_v59, %v7094_v52 }
 0x290   : > { %v7919_v60 = vpop.eup %7918  ;;  %5663 = vst.msk [vmem:[%s9309_s29 + $0x90] sm:$0xff] %vm355_vm0, %v5615_v0  ;;  %v5617_v53 = vmul.f32 %v7917_v17, %v9366_v32  ;;  %7938 = vpow2.f32 %v6280_v14  ;;  %v5147_v55 = vpop.f32.mrb[37].mxu0  ;;  %v6281_v36 = vmul.f32 -1.442695, %v9464_v28 }
 0x291   : > { %v7921_v39 = vpop.eup %7920  ;;  %5666 = vst.msk [vmem:[%s9309_s29 + $0xa8] sm:$0xff] %vm355_vm0, %v5618_v56  ;;  %v5479_v12 = vadd.f32 1.0, %v7919_v60  ;;  %7940 = vpow2.f32 %v6279_v49  ;;  %v7445_v13 = vadd.f32 %v5147_v55, %v2959_v48  ;;  %v9476_v32 = vadd.f32 %v7444_v23, %v9243_v51  ;;  %v7097_v19 = vpop.f32.mrb[38].mxu1 }
 0x292   : > { %v7923_v1 = vpop.eup %7922  ;;  %5665 = vst.msk [vmem:[%s9309_s29 + $0xa0] sm:$0xff] %vm355_vm0, %v5617_v53  ;;  %v5482_v41 = vadd.f32 1.0, %v7921_v39  ;;  %7942 = vpow2.f32 %v6282_v34  ;;  %v7393_v43 = vpop.f32.mrb[38].mxu0 }
 0x293   : > { %v7925_v20 = vpop.eup %7924  ;;  %v5620_v21 = vmul.f32 %v7923_v1, %v9377_v46  ;;  %7944 = vrcp.f32 %v5479_v12  ;;  %v9480_v24 = vadd.f32 %v7445_v13, %v9243_v51  ;;  %v2969_v10 = vpop.f32.mrb[39].mxu1  ;;  %v6284_v3 = vmul.f32 -1.442695, %v9476_v32 }
 0x294   : > { %v7927_v18 = vpop.eup %7926  ;;  %v5619_v22 = vmul.f32 %v7925_v20, %v9382_v16  ;;  %7946 = vrcp.f32 %v5482_v41  ;;  %v7446_v47 = vadd.f32 %v7393_v43, %v7097_v19  ;;  %v5157_v33 = vpop.f32.mrb[39].mxu0 }
 0x295   : > { %v7929_v26 = vpop.eup %7928  ;;  %5668 = vst.msk [vmem:[%s9309_s29 + $0xb8] sm:$0xff] %vm355_vm0, %v5620_v21  ;;  %v5481_v5 = vadd.f32 1.0, %v7927_v18  ;;  %7948 = vpow2.f32 %v6281_v36  ;;  %v6283_v46 = vmul.f32 -1.442695, %v9480_v24  ;;  %v7447_v7 = vadd.f32 %v5157_v33, %v2969_v10  ;;  %v7100_v25 = vpop.f32.mrb[40].mxu1 }
 0x296   : > { %v7931_v35 = vpop.eup %7930  ;;  %5667 = vst.msk [vmem:[%s9309_s29 + $0xb0] sm:$0xff] %vm355_vm0, %v5619_v22  ;;  %v5484_v9 = vadd.f32 1.0, %v7929_v26  ;;  %7950 = vpow2.f32 %v6284_v3  ;;  %v9490_v16 = vadd.f32 %v7446_v47, %v9243_v51  ;;  %v7396_v6 = vpop.f32.mrb[40].mxu0 }
 0x297   : > { %v7933_v11 = vpop.eup %7932  ;;  %v5622_v8 = vmul.f32 %v7931_v35, %v9391_v62  ;;  %7952 = vrcp.f32 %v5481_v5  ;;  %v9494_v45 = vadd.f32 %v7447_v7, %v9243_v51  ;;  %v2979_v27 = vpop.f32.mrb[41].mxu1  ;;  %v7448_v31 = vadd.f32 %v7396_v6, %v7100_v25 }
 0x298   : > { %v7935_v4 = vpop.eup %7934  ;;  %v5621_v14 = vmul.f32 %v7933_v11, %v9396_v50  ;;  %7954 = vrcp.f32 %v5484_v9  ;;  %v6286_v37 = vmul.f32 -1.442695, %v9490_v16  ;;  %v5167_v38 = vpop.f32.mrb[41].mxu0 }
 0x299   : > { %v7937_v30 = vpop.eup %7936  ;;  %5670 = vst.msk [vmem:[%s9309_s29 + $0xc8] sm:$0xff] %vm355_vm0, %v5622_v8  ;;  %v5483_v49 = vadd.f32 1.0, %v7935_v4  ;;  %7956 = vpow2.f32 %v6283_v46  ;;  %v6285_v62 = vmul.f32 -1.442695, %v9494_v45  ;;  %v7449_v40 = vadd.f32 %v5167_v38, %v2979_v27  ;;  %v7103_v52 = vpop.f32.mrb[42].mxu1 }
 0x29a   : > { %v7939_v44 = vpop.eup %7938  ;;  %5669 = vst.msk [vmem:[%s9309_s29 + $0xc0] sm:$0xff] %vm355_vm0, %v5621_v14  ;;  %v5624_v0 = vmul.f32 %v7937_v30, %v9405_v42  ;;  %7958 = vpow2.f32 %v6286_v37  ;;  %v9505_v50 = vadd.f32 %v7448_v31, %v9243_v51  ;;  %v7399_v48 = vpop.f32.mrb[42].mxu0 }
 0x29b   : > { %v7941_v17 = vpop.eup %7940  ;;  %7960 = vrcp.f32 %v5483_v49  ;;  %v5486_v56 = vadd.f32 1.0, %v7939_v44  ;;  %v9508_v59 = vadd.f32 %v7449_v40, %v9243_v51  ;;  %v2989_v60 = vpop.f32.mrb[43].mxu1  ;;  %v7450_v23 = vadd.f32 %v7399_v48, %v7103_v52 }
 0x29c   : > { %v7943_v53 = vpop.eup %7942  ;;  %5672 = vst.msk [vmem:[%s9309_s29 + $0xd8] sm:$0xff] %vm355_vm0, %v5624_v0  ;;  %v5485_v34 = vadd.f32 1.0, %v7941_v17  ;;  %7962 = vpow2.f32 %v6285_v62  ;;  %v6288_v42 = vmul.f32 -1.442695, %v9505_v50  ;;  %v5177_v55 = vpop.f32.mrb[43].mxu0 }
 0x29d   : > { %v7945_v39 = vpop.eup %7944  ;;  %7964 = vrcp.f32 %v5486_v56  ;;  %v5488_v12 = vadd.f32 1.0, %v7943_v53  ;;  %v6287_v36 = vmul.f32 -1.442695, %v9508_v59  ;;  %v7451_v13 = vadd.f32 %v5177_v55, %v2989_v60  ;;  %v7106_v20 = vpop.f32.mrb[44].mxu1 }
 0x29e   : > { %v7947_v1 = vpop.eup %7946  ;;  %v5623_v41 = vmul.f32 %v7945_v39, %v9410_v15  ;;  %7966 = vrcp.f32 %v5485_v34  ;;  %v9516_v19 = vadd.f32 %v7450_v23, %v9243_v51  ;;  %v7402_v18 = vpop.f32.mrb[44].mxu0 }
 0x29f   : > { %v7949_v21 = vpop.eup %7948  ;;  %v5626_v43 = vmul.f32 %v7947_v1, %v9420_v57  ;;  %7968 = vrcp.f32 %v5488_v12  ;;  %v9520_v10 = vadd.f32 %v7451_v13, %v9243_v51  ;;  %v2999_v22 = vpop.f32.mrb[45].mxu1  ;;  %v7452_v33 = vadd.f32 %v7402_v18, %v7106_v20 }
 0x2a0   : > { %v7951_v3 = vpop.eup %7950  ;;  %5671 = vst.msk [vmem:[%s9309_s29 + $0xd0] sm:$0xff] %vm355_vm0, %v5623_v41  ;;  %v5487_v47 = vadd.f32 1.0, %v7949_v21  ;;  %7970 = vpow2.f32 %v6288_v42  ;;  %v6290_v15 = vmul.f32 -1.442695, %v9516_v19  ;;  %v5187_v26 = vpop.f32.mrb[45].mxu0 }
 0x2a1   : > { %v7953_v5 = vpop.eup %7952  ;;  %5674 = vst.msk [vmem:[%s9309_s29 + $0xe8] sm:$0xff] %vm355_vm0, %v5626_v43  ;;  %v5490_v46 = vadd.f32 1.0, %v7951_v3  ;;  %7972 = vpow2.f32 %v6287_v36  ;;  %v6289_v57 = vmul.f32 -1.442695, %v9520_v10  ;;  %v7453_v7 = vadd.f32 %v5187_v26, %v2999_v22  ;;  %v7109_v11 = vpop.f32.mrb[46].mxu1 }
 0x2a2   : > { %v7955_v35 = vpop.eup %7954  ;;  %v5625_v9 = vmul.f32 %v7953_v5, %v9423_v54  ;;  %7974 = vrcp.f32 %v5487_v47  ;;  %v9530_v25 = vadd.f32 %v7452_v33, %v9243_v51  ;;  %v7405_v4 = vpop.f32.mrb[46].mxu0 }
 0x2a3   : > { %v7957_v8 = vpop.eup %7956  ;;  %v5628_v6 = vmul.f32 %v7955_v35, %v9432_v2  ;;  %7976 = vrcp.f32 %v5490_v46  ;;  %v9534_v27 = vadd.f32 %v7453_v7, %v9243_v51  ;;  %v3009_v14 = vpop.f32.mrb[47].mxu1  ;;  %v7454_v38 = vadd.f32 %v7405_v4, %v7109_v11 }
 0x2a4   : > { %v7959_v37 = vpop.eup %7958  ;;  %5673 = vst.msk [vmem:[%s9309_s29 + $0xe0] sm:$0xff] %vm355_vm0, %v5625_v9  ;;  %v5489_v31 = vadd.f32 1.0, %v7957_v8  ;;  %7978 = vpow2.f32 %v6290_v15  ;;  %v6292_v54 = vmul.f32 -1.442695, %v9530_v25  ;;  %v5197_v30 = vpop.f32.mrb[47].mxu0 }
 0x2a5   : > { %v7961_v49 = vpop.eup %7960  ;;  %5676 = vst.msk [vmem:[%s9309_s29 + $0xf8] sm:$0xff] %vm355_vm0, %v5628_v6  ;;  %v5492_v2 = vadd.f32 1.0, %v7959_v37  ;;  %7980 = vpow2.f32 %v6289_v57  ;;  %v7455_v62 = vadd.f32 %v5197_v30, %v3009_v14  ;;  %v6291_v0 = vmul.f32 -1.442695, %v9534_v27 }
 0x2a6   : > { %v7963_v40 = vpop.eup %7962  ;;  %v5627_v44 = vmul.f32 %v7961_v49, %v9437_v29  ;;  %7982 = vrcp.f32 %v5489_v31  ;;  %v9544_v52 = vadd.f32 %v7454_v38, %v9243_v51 }
 0x2a7   : > { %v7965_v17 = vpop.eup %7964  ;;  %7984 = vrcp.f32 %v5492_v2  ;;  %v5491_v56 = vadd.f32 1.0, %v7963_v40  ;;  %v9547_v48 = vadd.f32 %v7455_v62, %v9243_v51 }
 0x2a8   : > { %v7967_v60 = vpop.eup %7966  ;;  %5675 = vst.msk [vmem:[%s9309_s29 + $0xf0] sm:$0xff] %vm355_vm0, %v5627_v44  ;;  %v5630_v53 = vmul.f32 %v7965_v17, %v9446_v58  ;;  %7986 = vpow2.f32 %v6292_v54  ;;  %v6294_v29 = vmul.f32 -1.442695, %v9544_v52 }
 0x2a9   : > { %v7969_v34 = vpop.eup %7968  ;;  %v5629_v42 = vmul.f32 %v7967_v60, %v9451_v63  ;;  %7988 = vrcp.f32 %v5491_v56  ;;  %v6293_v23 = vmul.f32 -1.442695, %v9547_v48 }
 0x2aa   : > { %v7971_v55 = vpop.eup %7970  ;;  %5678 = vst.msk [vmem:[%s9309_s29 + $0x108] sm:$0xff] %vm355_vm0, %v5630_v53  ;;  %v5632_v51 = vmul.f32 %v7969_v34, %v9460_v61  ;;  %7990 = vpow2.f32 %v6291_v0 }
 0x2ab   : > { %v7973_v39 = vpop.eup %7972  ;;  %5677 = vst.msk [vmem:[%s9309_s29 + $0x100] sm:$0xff] %vm355_vm0, %v5629_v42  ;;  %v5494_v58 = vadd.f32 1.0, %v7971_v55  ;;  %7992 = vpow2.f32 %v6294_v29 }
 0x2ac   : > { %v7975_v12 = vpop.eup %7974  ;;  %5680 = vst.msk [vmem:[%s9309_s29 + $0x118] sm:$0xff] %vm355_vm0, %v5632_v51  ;;  %v5493_v63 = vadd.f32 1.0, %v7973_v39  ;;  %7994 = vpow2.f32 %v6293_v23 }
 0x2ad   : > { %v7977_v36 = vpop.eup %7976  ;;  %v5631_v13 = vmul.f32 %v7975_v12, %v9464_v28  ;;  %7996 = vrcp.f32 %v5494_v58 }
 0x2ae   : > { %v7979_v1 = vpop.eup %7978  ;;  %v5634_v61 = vmul.f32 %v7977_v36, %v9476_v32  ;;  %7998 = vrcp.f32 %v5493_v63 }
 0x2af   : > { %v7981_v41 = vpop.eup %7980  ;;  %5679 = vst.msk [vmem:[%s9309_s29 + $0x110] sm:$0xff] %vm355_vm0, %v5631_v13  ;;  %v5496_v20 = vadd.f32 1.0, %v7979_v1 }
 0x2b0   : > { %v7983_v21 = vpop.eup %7982  ;;  %5682 = vst.msk [vmem:[%s9309_s29 + $0x128] sm:$0xff] %vm355_vm0, %v5634_v61  ;;  %v5495_v43 = vadd.f32 1.0, %v7981_v41 }
 0x2b1   : > { %v7985_v18 = vpop.eup %7984  ;;  %v5633_v22 = vmul.f32 %v7983_v21, %v9480_v24  ;;  %8000 = vrcp.f32 %v5496_v20 }
 0x2b2   : > { %v7987_v28 = vpop.eup %7986  ;;  %v5636_v3 = vmul.f32 %v7985_v18, %v9490_v16  ;;  %8002 = vrcp.f32 %v5495_v43 }
 0x2b3   : > { %v7989_v32 = vpop.eup %7988  ;;  %5681 = vst.msk [vmem:[%s9309_s29 + $0x120] sm:$0xff] %vm355_vm0, %v5633_v22  ;;  %v5498_v47 = vadd.f32 1.0, %v7987_v28 }
 0x2b4   : > { %v7991_v15 = vpop.eup %7990  ;;  %5684 = vst.msk [vmem:[%s9309_s29 + $0x138] sm:$0xff] %vm355_vm0, %v5636_v3  ;;  %v5635_v33 = vmul.f32 %v7989_v32, %v9494_v45 }
 0x2b5   : > { %v7993_v26 = vpop.eup %7992  ;;  %8004 = vrcp.f32 %v5498_v47  ;;  %v5497_v5 = vadd.f32 1.0, %v7991_v15 }
 0x2b6   : > { %v7995_v24 = vpop.eup %7994  ;;  %5683 = vst.msk [vmem:[%s9309_s29 + $0x130] sm:$0xff] %vm355_vm0, %v5635_v33  ;;  %v5500_v16 = vadd.f32 1.0, %v7993_v26 }
 0x2b7   : > { %v7997_v46 = vpop.eup %7996  ;;  %8006 = vrcp.f32 %v5497_v5  ;;  %v5499_v57 = vadd.f32 1.0, %v7995_v24 }
 0x2b8   : > { %v7999_v7 = vpop.eup %7998  ;;  %v5638_v35 = vmul.f32 %v7997_v46, %v9505_v50  ;;  %8008 = vrcp.f32 %v5500_v16 }
 0x2b9   : > { %v5637_v45 = vmul.f32 %v7999_v7, %v9508_v59  ;;  %8010 = vrcp.f32 %v5499_v57 }
 0x2ba   : > { %5686 = vst.msk [vmem:[%s9309_s29 + $0x148] sm:$0xff] %vm355_vm0, %v5638_v35 }
 0x2bb   : > { %v8001_v9 = vpop.eup %8000  ;;  %5685 = vst.msk [vmem:[%s9309_s29 + $0x140] sm:$0xff] %vm355_vm0, %v5637_v45 }
 0x2bc   : > { %v8003_v11 = vpop.eup %8002  ;;  %v5640_v8 = vmul.f32 %v8001_v9, %v9516_v19 }
 0x2bd   : > { %v5639_v6 = vmul.f32 %v8003_v11, %v9520_v10 }
 0x2be   : > { %5688 = vst.msk [vmem:[%s9309_s29 + $0x158] sm:$0xff] %vm355_vm0, %v5640_v8 }
 0x2bf   : > { %v8005_v50 = vpop.eup %8004  ;;  %5687 = vst.msk [vmem:[%s9309_s29 + $0x150] sm:$0xff] %vm355_vm0, %v5639_v6 }
 0x2c0   : > { %v5642_v59 = vmul.f32 %v8005_v50, %v9530_v25 }
 0x2c1   : > { %v8007_v4 = vpop.eup %8006 }
 0x2c2   : > { %v8009_v14 = vpop.eup %8008  ;;  %5690 = vst.msk [vmem:[%s9309_s29 + $0x168] sm:$0xff] %vm355_vm0, %v5642_v59  ;;  %v5641_v37 = vmul.f32 %v8007_v4, %v9534_v27 }
 0x2c3   : > { %v8011_v31 = vpop.eup %8010  ;;  %v5644_v54 = vmul.f32 %v8009_v14, %v9544_v52 }
 0x2c4   : > { %5689 = vst.msk [vmem:[%s9309_s29 + $0x160] sm:$0xff] %vm355_vm0, %v5641_v37  ;;  %v5643_v19 = vmul.f32 %v8011_v31, %v9547_v48 }
 0x2c5   : > { %5692 = vst.msk [vmem:[%s9309_s29 + $0x178] sm:$0xff] %vm355_vm0, %v5644_v54 }
 0x2c6   : > { %5691 = vst.msk [vmem:[%s9309_s29 + $0x170] sm:$0xff] %vm355_vm0, %v5643_v19 }
 0x2c7 PF: > { %s14_s17 = sadd.s32 1, %s8035_s17   ;;  %s9741_s15 = smov %s8031_s16 }
 0x2c8   : > { %p11_p5 = scmp.ge.s32.totalorder %s14_s17, 4   ;;  %s9742_s16 = smov %s9744_s18 }
 0x2ca   :  { %13 = sbr.rel (!%p11_p5) target bundleno = 2 (0x2), region = 77 }

</bundles_post_ra>
